<compile_context>
chip_gen: v5e
topology: v5e:2x2
jax: 0.10.0
libtpu: 0.0.40
codegen_flags: <defaults>
</compile_context>

<pallas_src>
import functools

import jax
import jax.numpy as jnp
from jax.experimental import pallas as pl
from jax.experimental.pallas import tpu as pltpu

HIDDEN = 256        # fixed by the module (hidden_size=256)
NUM_CLASSES = 3     # fixed by the module (Linear(256, 3))


def _w2v_lstm_kernel(x_ref, wih_ref, b_ref, whh_ref, wfc_ref, bfc_ref,
                     out_ref, gx_ref, *, seq_len, batch):
    """Fused input projection + sequential LSTM recurrence + FC + softmax.

    x_ref  : (T*B, D)  compute dtype, time-major rows (t major, b minor)
    wih_ref: (D, 4H)   compute dtype
    b_ref  : (1, 4H)   f32   (b_ih + b_hh)
    whh_ref: (H, 4H)   compute dtype
    wfc_ref: (H, 3)    compute dtype
    bfc_ref: (1, 3)    f32
    out_ref: (B, 3)    f32   softmax probabilities
    gx_ref : (T*B, 4H) f32   VMEM scratch holding the fused x-projection
    """
    cdtype = whh_ref.dtype          # MXU operand dtype; accumulation is f32
    H = HIDDEN

    # ---- Fused, time-parallel input projection: one big MXU dot, stays in VMEM.
    gx_ref[...] = jnp.dot(x_ref[...], wih_ref[...],
                          preferred_element_type=jnp.float32) + b_ref[...]

    # ---- Sequential recurrence, statically unrolled (seq_len is small/static).
    h = jnp.zeros((batch, H), jnp.float32)   # PyTorch default zero initial state
    c = jnp.zeros((batch, H), jnp.float32)

    # TODO(synk): if the bundle dump shows a per-step W_hh re-push into the MXU,
    # replace the per-gate jnp.dot with explicit pltpu.matmul_push_rhs (once,
    # before the loop) + matmul_acc_lhs / matmul_pop per step to keep the
    # (256, 4*256) recurrent weight resident across all serial steps.
    for t in range(seq_len):
        gx_t = gx_ref[pl.ds(t * batch, batch), :]          # (B, 4H) f32
        hc = h.astype(cdtype)
        # Per-gate column-block dots (PyTorch gate order i, f, g, o); each gate's
        # activation is issued as soon as its block's result is available so the
        # EUP sigmoid/tanh overlaps MXU work on the later gate blocks.
        i_g = jax.nn.sigmoid(
            gx_t[:, 0 * H:1 * H]
            + jnp.dot(hc, whh_ref[:, 0 * H:1 * H],
                      preferred_element_type=jnp.float32))
        f_g = jax.nn.sigmoid(
            gx_t[:, 1 * H:2 * H]
            + jnp.dot(hc, whh_ref[:, 1 * H:2 * H],
                      preferred_element_type=jnp.float32))
        g_g = jnp.tanh(
            gx_t[:, 2 * H:3 * H]
            + jnp.dot(hc, whh_ref[:, 2 * H:3 * H],
                      preferred_element_type=jnp.float32))
        c = f_g * c + i_g * g_g                            # before o-gate pop
        o_g = jax.nn.sigmoid(
            gx_t[:, 3 * H:4 * H]
            + jnp.dot(hc, whh_ref[:, 3 * H:4 * H],
                      preferred_element_type=jnp.float32))
        h = o_g * jnp.tanh(c)

    # ---- out = softmax(fc(h_T), dim=1), fused into the same program.
    logits = jnp.dot(h.astype(cdtype), wfc_ref[...],
                     preferred_element_type=jnp.float32) + bfc_ref[...]
    z = logits - jnp.max(logits, axis=1, keepdims=True)
    e = jnp.exp(z)
    out_ref[...] = e / jnp.sum(e, axis=1, keepdims=True)   # exact; off crit path


def w2v_lstm_forward(x, params, *, compute_dtype=jnp.float32):
    """x: (B, T, D) float32, batch_first — same convention as the PyTorch module.

    compute_dtype: dtype of the MXU operands (jnp.float32 or jnp.bfloat16);
    bf16 is the production choice on v5e/v6e/v7x (all accumulation and all
    sigmoid/tanh/softmax math stays in float32 either way).
    """
    wih, whh, b, wfc, bfc = params
    B, T, D = x.shape

    # Tiny time-major flatten of the input (2 KiB); everything else — including
    # the input projection — happens inside the single Pallas program.
    x_tm = jnp.transpose(x, (1, 0, 2)).reshape(T * B, D).astype(compute_dtype)

    kernel = functools.partial(_w2v_lstm_kernel, seq_len=T, batch=B)
    vmem = pltpu.MemorySpace.VMEM
    out = pl.pallas_call(
        kernel,
        out_shape=jax.ShapeDtypeStruct((B, NUM_CLASSES), jnp.float32),
        # Single program (no grid): every operand lives in VMEM exactly once —
        # no per-step pipeline bookkeeping, no double-buffered invariant weights.
        in_specs=[
            pl.BlockSpec(memory_space=vmem),   # x_tm (T*B, D)
            pl.BlockSpec(memory_space=vmem),   # W_ih (D, 4H)
            pl.BlockSpec(memory_space=vmem),   # b_ih + b_hh (1, 4H)
            pl.BlockSpec(memory_space=vmem),   # W_hh (H, 4H)   ~1 MiB f32
            pl.BlockSpec(memory_space=vmem),   # W_fc (H, 3)
            pl.BlockSpec(memory_space=vmem),   # b_fc (1, 3)
        ],
        out_specs=pl.BlockSpec(memory_space=vmem),
        scratch_shapes=[pltpu.VMEM((T * B, 4 * HIDDEN), jnp.float32)],
    )(x_tm,
      wih.astype(compute_dtype),
      b,
      whh.astype(compute_dtype),
      wfc.astype(compute_dtype),
      bfc)
    return out


def init_params(key, text_d):
    """Deterministic init mirroring PyTorch nn.LSTM / nn.Linear shapes.
    Weights stored pre-transposed for x @ W style matmuls; gate order i,f,g,o."""
    k_lstm = 1.0 / jnp.sqrt(jnp.float32(HIDDEN))
    k_fc = 1.0 / jnp.sqrt(jnp.float32(HIDDEN))
    ks = jax.random.split(key, 6)
    wih = jax.random.uniform(ks[0], (text_d, 4 * HIDDEN), jnp.float32, -k_lstm, k_lstm)
    whh = jax.random.uniform(ks[1], (HIDDEN, 4 * HIDDEN), jnp.float32, -k_lstm, k_lstm)
    b_ih = jax.random.uniform(ks[2], (4 * HIDDEN,), jnp.float32, -k_lstm, k_lstm)
    b_hh = jax.random.uniform(ks[3], (4 * HIDDEN,), jnp.float32, -k_lstm, k_lstm)
    b = (b_ih + b_hh).reshape(1, 4 * HIDDEN)
    wfc = jax.random.uniform(ks[4], (HIDDEN, NUM_CLASSES), jnp.float32, -k_fc, k_fc)
    bfc = jax.random.uniform(ks[5], (NUM_CLASSES,), jnp.float32, -k_fc, k_fc)
    return wih, whh, b, wfc, bfc.reshape(1, NUM_CLASSES)


def reference_forward(x, params):
    """Pure-JAX/XLA f32 reference of the PyTorch forward."""
    wih, whh, b, wfc, bfc = params
    B, T, D = x.shape

    def step(carry, x_t):
        h, c = carry
        gates = (jnp.dot(x_t, wih, preferred_element_type=jnp.float32)
                 + jnp.dot(h, whh, preferred_element_type=jnp.float32)
                 + b[0])
        i_g = jax.nn.sigmoid(gates[:, 0 * HIDDEN:1 * HIDDEN])
        f_g = jax.nn.sigmoid(gates[:, 1 * HIDDEN:2 * HIDDEN])
        g_g = jnp.tanh(gates[:, 2 * HIDDEN:3 * HIDDEN])
        o_g = jax.nn.sigmoid(gates[:, 3 * HIDDEN:4 * HIDDEN])
        c = f_g * c + i_g * g_g
        h = o_g * jnp.tanh(c)
        return (h, c), None

    h0 = jnp.zeros((B, HIDDEN), jnp.float32)
    c0 = jnp.zeros((B, HIDDEN), jnp.float32)
    (h, _), _ = jax.lax.scan(step, (h0, c0), jnp.transpose(x, (1, 0, 2)))
    logits = jnp.dot(h, wfc, preferred_element_type=jnp.float32) + bfc[0]
    return jax.nn.softmax(logits, axis=1)


if __name__ == "__main__":
    B, T, D = 2, 8, 32   # batch=2, seq=8, text_d=32
    key = jax.random.PRNGKey(0)
    kx, kp = jax.random.split(key)
    x = jax.random.normal(kx, (B, T, D), dtype=jnp.float32)
    params = init_params(kp, D)

    fwd = jax.jit(w2v_lstm_forward, static_argnames=("compute_dtype",))

    # f32 self-test (matches the PyTorch-style full-f32 reference).  bf16 MXU
    # operands (compute_dtype=jnp.bfloat16) are the production choice on real
    # TPU hardware but are not exercised here to keep the check backend-agnostic.
    out = jax.block_until_ready(fwd(x, params, compute_dtype=jnp.float32))
    assert out.shape == (B, NUM_CLASSES)
    ref = reference_forward(x, params)
    assert jnp.allclose(out, ref, atol=5e-3), "mismatch vs. reference"
    assert jnp.allclose(jnp.sum(out, axis=1), 1.0, atol=1e-5), "softmax not normalized"

    print("KERNEL_OK")
</pallas_src>

<mosaic_0001>
module attributes {stable_mosaic.version = 11 : i64} {
  func.func @_w2v_lstm_kernel(%arg0: memref<16x32xf32, #tpu.memory_space<vmem>>, %arg1: memref<32x1024xf32, #tpu.memory_space<vmem>>, %arg2: memref<1x1024xf32, #tpu.memory_space<vmem>>, %arg3: memref<256x1024xf32, #tpu.memory_space<vmem>>, %arg4: memref<256x3xf32, #tpu.memory_space<vmem>>, %arg5: memref<1x3xf32, #tpu.memory_space<vmem>>, %arg6: memref<2x3xf32, #tpu.memory_space<vmem>>, %arg7: memref<16x1024xf32, #tpu.memory_space<vmem>>) attributes {dimension_semantics = [], scalar_prefetch = 0 : i64, scratch_operands = 1 : i64, tpu.core_type = #tpu.core_type<tc>} {
    %c0 = arith.constant 0 : index
    %c0_0 = arith.constant 0 : index
    %0 = vector.load %arg0[%c0, %c0_0] : memref<16x32xf32, #tpu.memory_space<vmem>>, vector<16x32xf32>
    %c0_1 = arith.constant 0 : index
    %c0_2 = arith.constant 0 : index
    %1 = vector.load %arg1[%c0_1, %c0_2] : memref<32x1024xf32, #tpu.memory_space<vmem>>, vector<32x1024xf32>
    %cst = arith.constant dense<0.000000e+00> : vector<16x1024xf32>
    %2 = tpu.matmul %0, %1, %cst {dimension_numbers = #tpu.dot_dimension_numbers<[1], [0], [0], [1], [0, 0, 1, 1], [], []>} : vector<16x32xf32>, vector<32x1024xf32>, vector<16x1024xf32> -> vector<16x1024xf32>
    %c0_3 = arith.constant 0 : index
    %c0_4 = arith.constant 0 : index
    %3 = vector.load %arg2[%c0_3, %c0_4] : memref<1x1024xf32, #tpu.memory_space<vmem>>, vector<1x1024xf32>
    %4 = vector.broadcast %3 : vector<1x1024xf32> to vector<16x1024xf32>
    %5 = arith.addf %2, %4 : vector<16x1024xf32>
    %c0_5 = arith.constant 0 : index
    %c0_6 = arith.constant 0 : index
    %6 = vector.load %arg7[%c0_5, %c0_6] : memref<16x1024xf32, #tpu.memory_space<vmem>>, vector<16x1024xf32>
    tpu.vector_store %arg7[%c0_5, %c0_6], %5 {strides = array<i32>} : memref<16x1024xf32, #tpu.memory_space<vmem>>, vector<16x1024xf32>,
    %cst_7 = arith.constant 0.000000e+00 : f32
    %7 = vector.broadcast %cst_7 : f32 to vector<2x256xf32>
    %cst_8 = arith.constant 0.000000e+00 : f32
    %8 = vector.broadcast %cst_8 : f32 to vector<2x256xf32>
    %c0_9 = arith.constant 0 : index
    %c0_10 = arith.constant 0 : index
    %9 = vector.load %arg7[%c0_9, %c0_10] : memref<16x1024xf32, #tpu.memory_space<vmem>>, vector<2x1024xf32>
    %10 = vector.extract_strided_slice %9 {offsets = [0, 0], sizes = [2, 256], strides = [1, 1]} : vector<2x1024xf32> to vector<2x256xf32>
    %c0_11 = arith.constant 0 : index
    %c0_12 = arith.constant 0 : index
    %11 = vector.load %arg3[%c0_11, %c0_12] : memref<256x1024xf32, #tpu.memory_space<vmem>>, vector<256x256xf32>
    %cst_13 = arith.constant dense<0.000000e+00> : vector<2x256xf32>
    %12 = tpu.matmul %7, %11, %cst_13 {dimension_numbers = #tpu.dot_dimension_numbers<[1], [0], [0], [1], [0, 0, 1, 1], [], []>} : vector<2x256xf32>, vector<256x256xf32>, vector<2x256xf32> -> vector<2x256xf32>
    %13 = arith.addf %10, %12 : vector<2x256xf32>
    %14 = arith.negf %13 : vector<2x256xf32>
    %15 = math.exp %14 : vector<2x256xf32>
    %cst_14 = arith.constant 1.000000e+00 : f32
    %16 = vector.broadcast %cst_14 : f32 to vector<2x256xf32>
    %17 = arith.addf %16, %15 : vector<2x256xf32>
    %18 = arith.divf %16, %17 : vector<2x256xf32>
    %19 = vector.extract_strided_slice %9 {offsets = [0, 256], sizes = [2, 256], strides = [1, 1]} : vector<2x1024xf32> to vector<2x256xf32>
    %c0_15 = arith.constant 0 : index
    %c256 = arith.constant 256 : index
    %20 = vector.load %arg3[%c0_15, %c256] : memref<256x1024xf32, #tpu.memory_space<vmem>>, vector<256x256xf32>
    %cst_16 = arith.constant dense<0.000000e+00> : vector<2x256xf32>
    %21 = tpu.matmul %7, %20, %cst_16 {dimension_numbers = #tpu.dot_dimension_numbers<[1], [0], [0], [1], [0, 0, 1, 1], [], []>} : vector<2x256xf32>, vector<256x256xf32>, vector<2x256xf32> -> vector<2x256xf32>
    %22 = arith.addf %19, %21 : vector<2x256xf32>
    %23 = arith.negf %22 : vector<2x256xf32>
    %24 = math.exp %23 : vector<2x256xf32>
    %cst_17 = arith.constant 1.000000e+00 : f32
    %25 = vector.broadcast %cst_17 : f32 to vector<2x256xf32>
    %26 = arith.addf %25, %24 : vector<2x256xf32>
    %27 = arith.divf %25, %26 : vector<2x256xf32>
    %28 = vector.extract_strided_slice %9 {offsets = [0, 512], sizes = [2, 256], strides = [1, 1]} : vector<2x1024xf32> to vector<2x256xf32>
    %c0_18 = arith.constant 0 : index
    %c512 = arith.constant 512 : index
    %29 = vector.load %arg3[%c0_18, %c512] : memref<256x1024xf32, #tpu.memory_space<vmem>>, vector<256x256xf32>
    %cst_19 = arith.constant dense<0.000000e+00> : vector<2x256xf32>
    %30 = tpu.matmul %7, %29, %cst_19 {dimension_numbers = #tpu.dot_dimension_numbers<[1], [0], [0], [1], [0, 0, 1, 1], [], []>} : vector<2x256xf32>, vector<256x256xf32>, vector<2x256xf32> -> vector<2x256xf32>
    %31 = arith.addf %28, %30 : vector<2x256xf32>
    %32 = math.tanh %31 : vector<2x256xf32>
    %33 = arith.mulf %27, %8 : vector<2x256xf32>
    %34 = arith.mulf %18, %32 : vector<2x256xf32>
    %35 = arith.addf %33, %34 : vector<2x256xf32>
    %36 = vector.extract_strided_slice %9 {offsets = [0, 768], sizes = [2, 256], strides = [1, 1]} : vector<2x1024xf32> to vector<2x256xf32>
    %c0_20 = arith.constant 0 : index
    %c768 = arith.constant 768 : index
    %37 = vector.load %arg3[%c0_20, %c768] : memref<256x1024xf32, #tpu.memory_space<vmem>>, vector<256x256xf32>
    %cst_21 = arith.constant dense<0.000000e+00> : vector<2x256xf32>
    %38 = tpu.matmul %7, %37, %cst_21 {dimension_numbers = #tpu.dot_dimension_numbers<[1], [0], [0], [1], [0, 0, 1, 1], [], []>} : vector<2x256xf32>, vector<256x256xf32>, vector<2x256xf32> -> vector<2x256xf32>
    %39 = arith.addf %36, %38 : vector<2x256xf32>
    %40 = arith.negf %39 : vector<2x256xf32>
    %41 = math.exp %40 : vector<2x256xf32>
    %cst_22 = arith.constant 1.000000e+00 : f32
    %42 = vector.broadcast %cst_22 : f32 to vector<2x256xf32>
    %43 = arith.addf %42, %41 : vector<2x256xf32>
    %44 = arith.divf %42, %43 : vector<2x256xf32>
    %45 = math.tanh %35 : vector<2x256xf32>
    %46 = arith.mulf %44, %45 : vector<2x256xf32>
    %c2 = arith.constant 2 : index
    %c0_23 = arith.constant 0 : index
    %47 = vector.load %arg7[%c2, %c0_23] : memref<16x1024xf32, #tpu.memory_space<vmem>>, vector<2x1024xf32>
    %48 = vector.extract_strided_slice %47 {offsets = [0, 0], sizes = [2, 256], strides = [1, 1]} : vector<2x1024xf32> to vector<2x256xf32>
    %c0_24 = arith.constant 0 : index
    %c0_25 = arith.constant 0 : index
    %49 = vector.load %arg3[%c0_24, %c0_25] : memref<256x1024xf32, #tpu.memory_space<vmem>>, vector<256x256xf32>
    %cst_26 = arith.constant dense<0.000000e+00> : vector<2x256xf32>
    %50 = tpu.matmul %46, %49, %cst_26 {dimension_numbers = #tpu.dot_dimension_numbers<[1], [0], [0], [1], [0, 0, 1, 1], [], []>} : vector<2x256xf32>, vector<256x256xf32>, vector<2x256xf32> -> vector<2x256xf32>
    %51 = arith.addf %48, %50 : vector<2x256xf32>
    %52 = arith.negf %51 : vector<2x256xf32>
    %53 = math.exp %52 : vector<2x256xf32>
    %cst_27 = arith.constant 1.000000e+00 : f32
    %54 = vector.broadcast %cst_27 : f32 to vector<2x256xf32>
    %55 = arith.addf %54, %53 : vector<2x256xf32>
    %56 = arith.divf %54, %55 : vector<2x256xf32>
    %57 = vector.extract_strided_slice %47 {offsets = [0, 256], sizes = [2, 256], strides = [1, 1]} : vector<2x1024xf32> to vector<2x256xf32>
    %c0_28 = arith.constant 0 : index
    %c256_29 = arith.constant 256 : index
    %58 = vector.load %arg3[%c0_28, %c256_29] : memref<256x1024xf32, #tpu.memory_space<vmem>>, vector<256x256xf32>
    %cst_30 = arith.constant dense<0.000000e+00> : vector<2x256xf32>
    %59 = tpu.matmul %46, %58, %cst_30 {dimension_numbers = #tpu.dot_dimension_numbers<[1], [0], [0], [1], [0, 0, 1, 1], [], []>} : vector<2x256xf32>, vector<256x256xf32>, vector<2x256xf32> -> vector<2x256xf32>
    %60 = arith.addf %57, %59 : vector<2x256xf32>
    %61 = arith.negf %60 : vector<2x256xf32>
    %62 = math.exp %61 : vector<2x256xf32>
    %cst_31 = arith.constant 1.000000e+00 : f32
    %63 = vector.broadcast %cst_31 : f32 to vector<2x256xf32>
    %64 = arith.addf %63, %62 : vector<2x256xf32>
    %65 = arith.divf %63, %64 : vector<2x256xf32>
    %66 = vector.extract_strided_slice %47 {offsets = [0, 512], sizes = [2, 256], strides = [1, 1]} : vector<2x1024xf32> to vector<2x256xf32>
    %c0_32 = arith.constant 0 : index
    %c512_33 = arith.constant 512 : index
    %67 = vector.load %arg3[%c0_32, %c512_33] : memref<256x1024xf32, #tpu.memory_space<vmem>>, vector<256x256xf32>
    %cst_34 = arith.constant dense<0.000000e+00> : vector<2x256xf32>
    %68 = tpu.matmul %46, %67, %cst_34 {dimension_numbers = #tpu.dot_dimension_numbers<[1], [0], [0], [1], [0, 0, 1, 1], [], []>} : vector<2x256xf32>, vector<256x256xf32>, vector<2x256xf32> -> vector<2x256xf32>
    %69 = arith.addf %66, %68 : vector<2x256xf32>
    %70 = math.tanh %69 : vector<2x256xf32>
    %71 = arith.mulf %65, %35 : vector<2x256xf32>
    %72 = arith.mulf %56, %70 : vector<2x256xf32>
    %73 = arith.addf %71, %72 : vector<2x256xf32>
    %74 = vector.extract_strided_slice %47 {offsets = [0, 768], sizes = [2, 256], strides = [1, 1]} : vector<2x1024xf32> to vector<2x256xf32>
    %c0_35 = arith.constant 0 : index
    %c768_36 = arith.constant 768 : index
    %75 = vector.load %arg3[%c0_35, %c768_36] : memref<256x1024xf32, #tpu.memory_space<vmem>>, vector<256x256xf32>
    %cst_37 = arith.constant dense<0.000000e+00> : vector<2x256xf32>
    %76 = tpu.matmul %46, %75, %cst_37 {dimension_numbers = #tpu.dot_dimension_numbers<[1], [0], [0], [1], [0, 0, 1, 1], [], []>} : vector<2x256xf32>, vector<256x256xf32>, vector<2x256xf32> -> vector<2x256xf32>
    %77 = arith.addf %74, %76 : vector<2x256xf32>
    %78 = arith.negf %77 : vector<2x256xf32>
    %79 = math.exp %78 : vector<2x256xf32>
    %cst_38 = arith.constant 1.000000e+00 : f32
    %80 = vector.broadcast %cst_38 : f32 to vector<2x256xf32>
    %81 = arith.addf %80, %79 : vector<2x256xf32>
    %82 = arith.divf %80, %81 : vector<2x256xf32>
    %83 = math.tanh %73 : vector<2x256xf32>
    %84 = arith.mulf %82, %83 : vector<2x256xf32>
    %c4 = arith.constant 4 : index
    %c0_39 = arith.constant 0 : index
    %85 = vector.load %arg7[%c4, %c0_39] : memref<16x1024xf32, #tpu.memory_space<vmem>>, vector<2x1024xf32>
    %86 = vector.extract_strided_slice %85 {offsets = [0, 0], sizes = [2, 256], strides = [1, 1]} : vector<2x1024xf32> to vector<2x256xf32>
    %c0_40 = arith.constant 0 : index
    %c0_41 = arith.constant 0 : index
    %87 = vector.load %arg3[%c0_40, %c0_41] : memref<256x1024xf32, #tpu.memory_space<vmem>>, vector<256x256xf32>
    %cst_42 = arith.constant dense<0.000000e+00> : vector<2x256xf32>
    %88 = tpu.matmul %84, %87, %cst_42 {dimension_numbers = #tpu.dot_dimension_numbers<[1], [0], [0], [1], [0, 0, 1, 1], [], []>} : vector<2x256xf32>, vector<256x256xf32>, vector<2x256xf32> -> vector<2x256xf32>
    %89 = arith.addf %86, %88 : vector<2x256xf32>
    %90 = arith.negf %89 : vector<2x256xf32>
    %91 = math.exp %90 : vector<2x256xf32>
    %cst_43 = arith.constant 1.000000e+00 : f32
    %92 = vector.broadcast %cst_43 : f32 to vector<2x256xf32>
    %93 = arith.addf %92, %91 : vector<2x256xf32>
    %94 = arith.divf %92, %93 : vector<2x256xf32>
    %95 = vector.extract_strided_slice %85 {offsets = [0, 256], sizes = [2, 256], strides = [1, 1]} : vector<2x1024xf32> to vector<2x256xf32>
    %c0_44 = arith.constant 0 : index
    %c256_45 = arith.constant 256 : index
    %96 = vector.load %arg3[%c0_44, %c256_45] : memref<256x1024xf32, #tpu.memory_space<vmem>>, vector<256x256xf32>
    %cst_46 = arith.constant dense<0.000000e+00> : vector<2x256xf32>
    %97 = tpu.matmul %84, %96, %cst_46 {dimension_numbers = #tpu.dot_dimension_numbers<[1], [0], [0], [1], [0, 0, 1, 1], [], []>} : vector<2x256xf32>, vector<256x256xf32>, vector<2x256xf32> -> vector<2x256xf32>
    %98 = arith.addf %95, %97 : vector<2x256xf32>
    %99 = arith.negf %98 : vector<2x256xf32>
    %100 = math.exp %99 : vector<2x256xf32>
    %cst_47 = arith.constant 1.000000e+00 : f32
    %101 = vector.broadcast %cst_47 : f32 to vector<2x256xf32>
    %102 = arith.addf %101, %100 : vector<2x256xf32>
    %103 = arith.divf %101, %102 : vector<2x256xf32>
    %104 = vector.extract_strided_slice %85 {offsets = [0, 512], sizes = [2, 256], strides = [1, 1]} : vector<2x1024xf32> to vector<2x256xf32>
    %c0_48 = arith.constant 0 : index
    %c512_49 = arith.constant 512 : index
    %105 = vector.load %arg3[%c0_48, %c512_49] : memref<256x1024xf32, #tpu.memory_space<vmem>>, vector<256x256xf32>
    %cst_50 = arith.constant dense<0.000000e+00> : vector<2x256xf32>
    %106 = tpu.matmul %84, %105, %cst_50 {dimension_numbers = #tpu.dot_dimension_numbers<[1], [0], [0], [1], [0, 0, 1, 1], [], []>} : vector<2x256xf32>, vector<256x256xf32>, vector<2x256xf32> -> vector<2x256xf32>
    %107 = arith.addf %104, %106 : vector<2x256xf32>
    %108 = math.tanh %107 : vector<2x256xf32>
    %109 = arith.mulf %103, %73 : vector<2x256xf32>
    %110 = arith.mulf %94, %108 : vector<2x256xf32>
    %111 = arith.addf %109, %110 : vector<2x256xf32>
    %112 = vector.extract_strided_slice %85 {offsets = [0, 768], sizes = [2, 256], strides = [1, 1]} : vector<2x1024xf32> to vector<2x256xf32>
    %c0_51 = arith.constant 0 : index
    %c768_52 = arith.constant 768 : index
    %113 = vector.load %arg3[%c0_51, %c768_52] : memref<256x1024xf32, #tpu.memory_space<vmem>>, vector<256x256xf32>
    %cst_53 = arith.constant dense<0.000000e+00> : vector<2x256xf32>
    %114 = tpu.matmul %84, %113, %cst_53 {dimension_numbers = #tpu.dot_dimension_numbers<[1], [0], [0], [1], [0, 0, 1, 1], [], []>} : vector<2x256xf32>, vector<256x256xf32>, vector<2x256xf32> -> vector<2x256xf32>
    %115 = arith.addf %112, %114 : vector<2x256xf32>
    %116 = arith.negf %115 : vector<2x256xf32>
    %117 = math.exp %116 : vector<2x256xf32>
    %cst_54 = arith.constant 1.000000e+00 : f32
    %118 = vector.broadcast %cst_54 : f32 to vector<2x256xf32>
    %119 = arith.addf %118, %117 : vector<2x256xf32>
    %120 = arith.divf %118, %119 : vector<2x256xf32>
    %121 = math.tanh %111 : vector<2x256xf32>
    %122 = arith.mulf %120, %121 : vector<2x256xf32>
    %c6 = arith.constant 6 : index
    %c0_55 = arith.constant 0 : index
    %123 = vector.load %arg7[%c6, %c0_55] : memref<16x1024xf32, #tpu.memory_space<vmem>>, vector<2x1024xf32>
    %124 = vector.extract_strided_slice %123 {offsets = [0, 0], sizes = [2, 256], strides = [1, 1]} : vector<2x1024xf32> to vector<2x256xf32>
    %c0_56 = arith.constant 0 : index
    %c0_57 = arith.constant 0 : index
    %125 = vector.load %arg3[%c0_56, %c0_57] : memref<256x1024xf32, #tpu.memory_space<vmem>>, vector<256x256xf32>
    %cst_58 = arith.constant dense<0.000000e+00> : vector<2x256xf32>
    %126 = tpu.matmul %122, %125, %cst_58 {dimension_numbers = #tpu.dot_dimension_numbers<[1], [0], [0], [1], [0, 0, 1, 1], [], []>} : vector<2x256xf32>, vector<256x256xf32>, vector<2x256xf32> -> vector<2x256xf32>
    %127 = arith.addf %124, %126 : vector<2x256xf32>
    %128 = arith.negf %127 : vector<2x256xf32>
    %129 = math.exp %128 : vector<2x256xf32>
    %cst_59 = arith.constant 1.000000e+00 : f32
    %130 = vector.broadcast %cst_59 : f32 to vector<2x256xf32>
    %131 = arith.addf %130, %129 : vector<2x256xf32>
    %132 = arith.divf %130, %131 : vector<2x256xf32>
    %133 = vector.extract_strided_slice %123 {offsets = [0, 256], sizes = [2, 256], strides = [1, 1]} : vector<2x1024xf32> to vector<2x256xf32>
    %c0_60 = arith.constant 0 : index
    %c256_61 = arith.constant 256 : index
    %134 = vector.load %arg3[%c0_60, %c256_61] : memref<256x1024xf32, #tpu.memory_space<vmem>>, vector<256x256xf32>
    %cst_62 = arith.constant dense<0.000000e+00> : vector<2x256xf32>
    %135 = tpu.matmul %122, %134, %cst_62 {dimension_numbers = #tpu.dot_dimension_numbers<[1], [0], [0], [1], [0, 0, 1, 1], [], []>} : vector<2x256xf32>, vector<256x256xf32>, vector<2x256xf32> -> vector<2x256xf32>
    %136 = arith.addf %133, %135 : vector<2x256xf32>
    %137 = arith.negf %136 : vector<2x256xf32>
    %138 = math.exp %137 : vector<2x256xf32>
    %cst_63 = arith.constant 1.000000e+00 : f32
    %139 = vector.broadcast %cst_63 : f32 to vector<2x256xf32>
    %140 = arith.addf %139, %138 : vector<2x256xf32>
    %141 = arith.divf %139, %140 : vector<2x256xf32>
    %142 = vector.extract_strided_slice %123 {offsets = [0, 512], sizes = [2, 256], strides = [1, 1]} : vector<2x1024xf32> to vector<2x256xf32>
    %c0_64 = arith.constant 0 : index
    %c512_65 = arith.constant 512 : index
    %143 = vector.load %arg3[%c0_64, %c512_65] : memref<256x1024xf32, #tpu.memory_space<vmem>>, vector<256x256xf32>
    %cst_66 = arith.constant dense<0.000000e+00> : vector<2x256xf32>
    %144 = tpu.matmul %122, %143, %cst_66 {dimension_numbers = #tpu.dot_dimension_numbers<[1], [0], [0], [1], [0, 0, 1, 1], [], []>} : vector<2x256xf32>, vector<256x256xf32>, vector<2x256xf32> -> vector<2x256xf32>
    %145 = arith.addf %142, %144 : vector<2x256xf32>
    %146 = math.tanh %145 : vector<2x256xf32>
    %147 = arith.mulf %141, %111 : vector<2x256xf32>
    %148 = arith.mulf %132, %146 : vector<2x256xf32>
    %149 = arith.addf %147, %148 : vector<2x256xf32>
    %150 = vector.extract_strided_slice %123 {offsets = [0, 768], sizes = [2, 256], strides = [1, 1]} : vector<2x1024xf32> to vector<2x256xf32>
    %c0_67 = arith.constant 0 : index
    %c768_68 = arith.constant 768 : index
    %151 = vector.load %arg3[%c0_67, %c768_68] : memref<256x1024xf32, #tpu.memory_space<vmem>>, vector<256x256xf32>
    %cst_69 = arith.constant dense<0.000000e+00> : vector<2x256xf32>
    %152 = tpu.matmul %122, %151, %cst_69 {dimension_numbers = #tpu.dot_dimension_numbers<[1], [0], [0], [1], [0, 0, 1, 1], [], []>} : vector<2x256xf32>, vector<256x256xf32>, vector<2x256xf32> -> vector<2x256xf32>
    %153 = arith.addf %150, %152 : vector<2x256xf32>
    %154 = arith.negf %153 : vector<2x256xf32>
    %155 = math.exp %154 : vector<2x256xf32>
    %cst_70 = arith.constant 1.000000e+00 : f32
    %156 = vector.broadcast %cst_70 : f32 to vector<2x256xf32>
    %157 = arith.addf %156, %155 : vector<2x256xf32>
    %158 = arith.divf %156, %157 : vector<2x256xf32>
    %159 = math.tanh %149 : vector<2x256xf32>
    %160 = arith.mulf %158, %159 : vector<2x256xf32>
    %c8 = arith.constant 8 : index
    %c0_71 = arith.constant 0 : index
    %161 = vector.load %arg7[%c8, %c0_71] : memref<16x1024xf32, #tpu.memory_space<vmem>>, vector<2x1024xf32>
    %162 = vector.extract_strided_slice %161 {offsets = [0, 0], sizes = [2, 256], strides = [1, 1]} : vector<2x1024xf32> to vector<2x256xf32>
    %c0_72 = arith.constant 0 : index
    %c0_73 = arith.constant 0 : index
    %163 = vector.load %arg3[%c0_72, %c0_73] : memref<256x1024xf32, #tpu.memory_space<vmem>>, vector<256x256xf32>
    %cst_74 = arith.constant dense<0.000000e+00> : vector<2x256xf32>
    %164 = tpu.matmul %160, %163, %cst_74 {dimension_numbers = #tpu.dot_dimension_numbers<[1], [0], [0], [1], [0, 0, 1, 1], [], []>} : vector<2x256xf32>, vector<256x256xf32>, vector<2x256xf32> -> vector<2x256xf32>
    %165 = arith.addf %162, %164 : vector<2x256xf32>
    %166 = arith.negf %165 : vector<2x256xf32>
    %167 = math.exp %166 : vector<2x256xf32>
    %cst_75 = arith.constant 1.000000e+00 : f32
    %168 = vector.broadcast %cst_75 : f32 to vector<2x256xf32>
    %169 = arith.addf %168, %167 : vector<2x256xf32>
    %170 = arith.divf %168, %169 : vector<2x256xf32>
    %171 = vector.extract_strided_slice %161 {offsets = [0, 256], sizes = [2, 256], strides = [1, 1]} : vector<2x1024xf32> to vector<2x256xf32>
    %c0_76 = arith.constant 0 : index
    %c256_77 = arith.constant 256 : index
    %172 = vector.load %arg3[%c0_76, %c256_77] : memref<256x1024xf32, #tpu.memory_space<vmem>>, vector<256x256xf32>
    %cst_78 = arith.constant dense<0.000000e+00> : vector<2x256xf32>
    %173 = tpu.matmul %160, %172, %cst_78 {dimension_numbers = #tpu.dot_dimension_numbers<[1], [0], [0], [1], [0, 0, 1, 1], [], []>} : vector<2x256xf32>, vector<256x256xf32>, vector<2x256xf32> -> vector<2x256xf32>
    %174 = arith.addf %171, %173 : vector<2x256xf32>
    %175 = arith.negf %174 : vector<2x256xf32>
    %176 = math.exp %175 : vector<2x256xf32>
    %cst_79 = arith.constant 1.000000e+00 : f32
    %177 = vector.broadcast %cst_79 : f32 to vector<2x256xf32>
    %178 = arith.addf %177, %176 : vector<2x256xf32>
    %179 = arith.divf %177, %178 : vector<2x256xf32>
    %180 = vector.extract_strided_slice %161 {offsets = [0, 512], sizes = [2, 256], strides = [1, 1]} : vector<2x1024xf32> to vector<2x256xf32>
    %c0_80 = arith.constant 0 : index
    %c512_81 = arith.constant 512 : index
    %181 = vector.load %arg3[%c0_80, %c512_81] : memref<256x1024xf32, #tpu.memory_space<vmem>>, vector<256x256xf32>
    %cst_82 = arith.constant dense<0.000000e+00> : vector<2x256xf32>
    %182 = tpu.matmul %160, %181, %cst_82 {dimension_numbers = #tpu.dot_dimension_numbers<[1], [0], [0], [1], [0, 0, 1, 1], [], []>} : vector<2x256xf32>, vector<256x256xf32>, vector<2x256xf32> -> vector<2x256xf32>
    %183 = arith.addf %180, %182 : vector<2x256xf32>
    %184 = math.tanh %183 : vector<2x256xf32>
    %185 = arith.mulf %179, %149 : vector<2x256xf32>
    %186 = arith.mulf %170, %184 : vector<2x256xf32>
    %187 = arith.addf %185, %186 : vector<2x256xf32>
    %188 = vector.extract_strided_slice %161 {offsets = [0, 768], sizes = [2, 256], strides = [1, 1]} : vector<2x1024xf32> to vector<2x256xf32>
    %c0_83 = arith.constant 0 : index
    %c768_84 = arith.constant 768 : index
    %189 = vector.load %arg3[%c0_83, %c768_84] : memref<256x1024xf32, #tpu.memory_space<vmem>>, vector<256x256xf32>
    %cst_85 = arith.constant dense<0.000000e+00> : vector<2x256xf32>
    %190 = tpu.matmul %160, %189, %cst_85 {dimension_numbers = #tpu.dot_dimension_numbers<[1], [0], [0], [1], [0, 0, 1, 1], [], []>} : vector<2x256xf32>, vector<256x256xf32>, vector<2x256xf32> -> vector<2x256xf32>
    %191 = arith.addf %188, %190 : vector<2x256xf32>
    %192 = arith.negf %191 : vector<2x256xf32>
    %193 = math.exp %192 : vector<2x256xf32>
    %cst_86 = arith.constant 1.000000e+00 : f32
    %194 = vector.broadcast %cst_86 : f32 to vector<2x256xf32>
    %195 = arith.addf %194, %193 : vector<2x256xf32>
    %196 = arith.divf %194, %195 : vector<2x256xf32>
    %197 = math.tanh %187 : vector<2x256xf32>
    %198 = arith.mulf %196, %197 : vector<2x256xf32>
    %c10 = arith.constant 10 : index
    %c0_87 = arith.constant 0 : index
    %199 = vector.load %arg7[%c10, %c0_87] : memref<16x1024xf32, #tpu.memory_space<vmem>>, vector<2x1024xf32>
    %200 = vector.extract_strided_slice %199 {offsets = [0, 0], sizes = [2, 256], strides = [1, 1]} : vector<2x1024xf32> to vector<2x256xf32>
    %c0_88 = arith.constant 0 : index
    %c0_89 = arith.constant 0 : index
    %201 = vector.load %arg3[%c0_88, %c0_89] : memref<256x1024xf32, #tpu.memory_space<vmem>>, vector<256x256xf32>
    %cst_90 = arith.constant dense<0.000000e+00> : vector<2x256xf32>
    %202 = tpu.matmul %198, %201, %cst_90 {dimension_numbers = #tpu.dot_dimension_numbers<[1], [0], [0], [1], [0, 0, 1, 1], [], []>} : vector<2x256xf32>, vector<256x256xf32>, vector<2x256xf32> -> vector<2x256xf32>
    %203 = arith.addf %200, %202 : vector<2x256xf32>
    %204 = arith.negf %203 : vector<2x256xf32>
    %205 = math.exp %204 : vector<2x256xf32>
    %cst_91 = arith.constant 1.000000e+00 : f32
    %206 = vector.broadcast %cst_91 : f32 to vector<2x256xf32>
    %207 = arith.addf %206, %205 : vector<2x256xf32>
    %208 = arith.divf %206, %207 : vector<2x256xf32>
    %209 = vector.extract_strided_slice %199 {offsets = [0, 256], sizes = [2, 256], strides = [1, 1]} : vector<2x1024xf32> to vector<2x256xf32>
    %c0_92 = arith.constant 0 : index
    %c256_93 = arith.constant 256 : index
    %210 = vector.load %arg3[%c0_92, %c256_93] : memref<256x1024xf32, #tpu.memory_space<vmem>>, vector<256x256xf32>
    %cst_94 = arith.constant dense<0.000000e+00> : vector<2x256xf32>
    %211 = tpu.matmul %198, %210, %cst_94 {dimension_numbers = #tpu.dot_dimension_numbers<[1], [0], [0], [1], [0, 0, 1, 1], [], []>} : vector<2x256xf32>, vector<256x256xf32>, vector<2x256xf32> -> vector<2x256xf32>
    %212 = arith.addf %209, %211 : vector<2x256xf32>
    %213 = arith.negf %212 : vector<2x256xf32>
    %214 = math.exp %213 : vector<2x256xf32>
    %cst_95 = arith.constant 1.000000e+00 : f32
    %215 = vector.broadcast %cst_95 : f32 to vector<2x256xf32>
    %216 = arith.addf %215, %214 : vector<2x256xf32>
    %217 = arith.divf %215, %216 : vector<2x256xf32>
    %218 = vector.extract_strided_slice %199 {offsets = [0, 512], sizes = [2, 256], strides = [1, 1]} : vector<2x1024xf32> to vector<2x256xf32>
    %c0_96 = arith.constant 0 : index
    %c512_97 = arith.constant 512 : index
    %219 = vector.load %arg3[%c0_96, %c512_97] : memref<256x1024xf32, #tpu.memory_space<vmem>>, vector<256x256xf32>
    %cst_98 = arith.constant dense<0.000000e+00> : vector<2x256xf32>
    %220 = tpu.matmul %198, %219, %cst_98 {dimension_numbers = #tpu.dot_dimension_numbers<[1], [0], [0], [1], [0, 0, 1, 1], [], []>} : vector<2x256xf32>, vector<256x256xf32>, vector<2x256xf32> -> vector<2x256xf32>
    %221 = arith.addf %218, %220 : vector<2x256xf32>
    %222 = math.tanh %221 : vector<2x256xf32>
    %223 = arith.mulf %217, %187 : vector<2x256xf32>
    %224 = arith.mulf %208, %222 : vector<2x256xf32>
    %225 = arith.addf %223, %224 : vector<2x256xf32>
    %226 = vector.extract_strided_slice %199 {offsets = [0, 768], sizes = [2, 256], strides = [1, 1]} : vector<2x1024xf32> to vector<2x256xf32>
    %c0_99 = arith.constant 0 : index
    %c768_100 = arith.constant 768 : index
    %227 = vector.load %arg3[%c0_99, %c768_100] : memref<256x1024xf32, #tpu.memory_space<vmem>>, vector<256x256xf32>
    %cst_101 = arith.constant dense<0.000000e+00> : vector<2x256xf32>
    %228 = tpu.matmul %198, %227, %cst_101 {dimension_numbers = #tpu.dot_dimension_numbers<[1], [0], [0], [1], [0, 0, 1, 1], [], []>} : vector<2x256xf32>, vector<256x256xf32>, vector<2x256xf32> -> vector<2x256xf32>
    %229 = arith.addf %226, %228 : vector<2x256xf32>
    %230 = arith.negf %229 : vector<2x256xf32>
    %231 = math.exp %230 : vector<2x256xf32>
    %cst_102 = arith.constant 1.000000e+00 : f32
    %232 = vector.broadcast %cst_102 : f32 to vector<2x256xf32>
    %233 = arith.addf %232, %231 : vector<2x256xf32>
    %234 = arith.divf %232, %233 : vector<2x256xf32>
    %235 = math.tanh %225 : vector<2x256xf32>
    %236 = arith.mulf %234, %235 : vector<2x256xf32>
    %c12 = arith.constant 12 : index
    %c0_103 = arith.constant 0 : index
    %237 = vector.load %arg7[%c12, %c0_103] : memref<16x1024xf32, #tpu.memory_space<vmem>>, vector<2x1024xf32>
    %238 = vector.extract_strided_slice %237 {offsets = [0, 0], sizes = [2, 256], strides = [1, 1]} : vector<2x1024xf32> to vector<2x256xf32>
    %c0_104 = arith.constant 0 : index
    %c0_105 = arith.constant 0 : index
    %239 = vector.load %arg3[%c0_104, %c0_105] : memref<256x1024xf32, #tpu.memory_space<vmem>>, vector<256x256xf32>
    %cst_106 = arith.constant dense<0.000000e+00> : vector<2x256xf32>
    %240 = tpu.matmul %236, %239, %cst_106 {dimension_numbers = #tpu.dot_dimension_numbers<[1], [0], [0], [1], [0, 0, 1, 1], [], []>} : vector<2x256xf32>, vector<256x256xf32>, vector<2x256xf32> -> vector<2x256xf32>
    %241 = arith.addf %238, %240 : vector<2x256xf32>
    %242 = arith.negf %241 : vector<2x256xf32>
    %243 = math.exp %242 : vector<2x256xf32>
    %cst_107 = arith.constant 1.000000e+00 : f32
    %244 = vector.broadcast %cst_107 : f32 to vector<2x256xf32>
    %245 = arith.addf %244, %243 : vector<2x256xf32>
    %246 = arith.divf %244, %245 : vector<2x256xf32>
    %247 = vector.extract_strided_slice %237 {offsets = [0, 256], sizes = [2, 256], strides = [1, 1]} : vector<2x1024xf32> to vector<2x256xf32>
    %c0_108 = arith.constant 0 : index
    %c256_109 = arith.constant 256 : index
    %248 = vector.load %arg3[%c0_108, %c256_109] : memref<256x1024xf32, #tpu.memory_space<vmem>>, vector<256x256xf32>
    %cst_110 = arith.constant dense<0.000000e+00> : vector<2x256xf32>
    %249 = tpu.matmul %236, %248, %cst_110 {dimension_numbers = #tpu.dot_dimension_numbers<[1], [0], [0], [1], [0, 0, 1, 1], [], []>} : vector<2x256xf32>, vector<256x256xf32>, vector<2x256xf32> -> vector<2x256xf32>
    %250 = arith.addf %247, %249 : vector<2x256xf32>
    %251 = arith.negf %250 : vector<2x256xf32>
    %252 = math.exp %251 : vector<2x256xf32>
    %cst_111 = arith.constant 1.000000e+00 : f32
    %253 = vector.broadcast %cst_111 : f32 to vector<2x256xf32>
    %254 = arith.addf %253, %252 : vector<2x256xf32>
    %255 = arith.divf %253, %254 : vector<2x256xf32>
    %256 = vector.extract_strided_slice %237 {offsets = [0, 512], sizes = [2, 256], strides = [1, 1]} : vector<2x1024xf32> to vector<2x256xf32>
    %c0_112 = arith.constant 0 : index
    %c512_113 = arith.constant 512 : index
    %257 = vector.load %arg3[%c0_112, %c512_113] : memref<256x1024xf32, #tpu.memory_space<vmem>>, vector<256x256xf32>
    %cst_114 = arith.constant dense<0.000000e+00> : vector<2x256xf32>
    %258 = tpu.matmul %236, %257, %cst_114 {dimension_numbers = #tpu.dot_dimension_numbers<[1], [0], [0], [1], [0, 0, 1, 1], [], []>} : vector<2x256xf32>, vector<256x256xf32>, vector<2x256xf32> -> vector<2x256xf32>
    %259 = arith.addf %256, %258 : vector<2x256xf32>
    %260 = math.tanh %259 : vector<2x256xf32>
    %261 = arith.mulf %255, %225 : vector<2x256xf32>
    %262 = arith.mulf %246, %260 : vector<2x256xf32>
    %263 = arith.addf %261, %262 : vector<2x256xf32>
    %264 = vector.extract_strided_slice %237 {offsets = [0, 768], sizes = [2, 256], strides = [1, 1]} : vector<2x1024xf32> to vector<2x256xf32>
    %c0_115 = arith.constant 0 : index
    %c768_116 = arith.constant 768 : index
    %265 = vector.load %arg3[%c0_115, %c768_116] : memref<256x1024xf32, #tpu.memory_space<vmem>>, vector<256x256xf32>
    %cst_117 = arith.constant dense<0.000000e+00> : vector<2x256xf32>
    %266 = tpu.matmul %236, %265, %cst_117 {dimension_numbers = #tpu.dot_dimension_numbers<[1], [0], [0], [1], [0, 0, 1, 1], [], []>} : vector<2x256xf32>, vector<256x256xf32>, vector<2x256xf32> -> vector<2x256xf32>
    %267 = arith.addf %264, %266 : vector<2x256xf32>
    %268 = arith.negf %267 : vector<2x256xf32>
    %269 = math.exp %268 : vector<2x256xf32>
    %cst_118 = arith.constant 1.000000e+00 : f32
    %270 = vector.broadcast %cst_118 : f32 to vector<2x256xf32>
    %271 = arith.addf %270, %269 : vector<2x256xf32>
    %272 = arith.divf %270, %271 : vector<2x256xf32>
    %273 = math.tanh %263 : vector<2x256xf32>
    %274 = arith.mulf %272, %273 : vector<2x256xf32>
    %c14 = arith.constant 14 : index
    %c0_119 = arith.constant 0 : index
    %275 = vector.load %arg7[%c14, %c0_119] : memref<16x1024xf32, #tpu.memory_space<vmem>>, vector<2x1024xf32>
    %276 = vector.extract_strided_slice %275 {offsets = [0, 0], sizes = [2, 256], strides = [1, 1]} : vector<2x1024xf32> to vector<2x256xf32>
    %c0_120 = arith.constant 0 : index
    %c0_121 = arith.constant 0 : index
    %277 = vector.load %arg3[%c0_120, %c0_121] : memref<256x1024xf32, #tpu.memory_space<vmem>>, vector<256x256xf32>
    %cst_122 = arith.constant dense<0.000000e+00> : vector<2x256xf32>
    %278 = tpu.matmul %274, %277, %cst_122 {dimension_numbers = #tpu.dot_dimension_numbers<[1], [0], [0], [1], [0, 0, 1, 1], [], []>} : vector<2x256xf32>, vector<256x256xf32>, vector<2x256xf32> -> vector<2x256xf32>
    %279 = arith.addf %276, %278 : vector<2x256xf32>
    %280 = arith.negf %279 : vector<2x256xf32>
    %281 = math.exp %280 : vector<2x256xf32>
    %cst_123 = arith.constant 1.000000e+00 : f32
    %282 = vector.broadcast %cst_123 : f32 to vector<2x256xf32>
    %283 = arith.addf %282, %281 : vector<2x256xf32>
    %284 = arith.divf %282, %283 : vector<2x256xf32>
    %285 = vector.extract_strided_slice %275 {offsets = [0, 256], sizes = [2, 256], strides = [1, 1]} : vector<2x1024xf32> to vector<2x256xf32>
    %c0_124 = arith.constant 0 : index
    %c256_125 = arith.constant 256 : index
    %286 = vector.load %arg3[%c0_124, %c256_125] : memref<256x1024xf32, #tpu.memory_space<vmem>>, vector<256x256xf32>
    %cst_126 = arith.constant dense<0.000000e+00> : vector<2x256xf32>
    %287 = tpu.matmul %274, %286, %cst_126 {dimension_numbers = #tpu.dot_dimension_numbers<[1], [0], [0], [1], [0, 0, 1, 1], [], []>} : vector<2x256xf32>, vector<256x256xf32>, vector<2x256xf32> -> vector<2x256xf32>
    %288 = arith.addf %285, %287 : vector<2x256xf32>
    %289 = arith.negf %288 : vector<2x256xf32>
    %290 = math.exp %289 : vector<2x256xf32>
    %cst_127 = arith.constant 1.000000e+00 : f32
    %291 = vector.broadcast %cst_127 : f32 to vector<2x256xf32>
    %292 = arith.addf %291, %290 : vector<2x256xf32>
    %293 = arith.divf %291, %292 : vector<2x256xf32>
    %294 = vector.extract_strided_slice %275 {offsets = [0, 512], sizes = [2, 256], strides = [1, 1]} : vector<2x1024xf32> to vector<2x256xf32>
    %c0_128 = arith.constant 0 : index
    %c512_129 = arith.constant 512 : index
    %295 = vector.load %arg3[%c0_128, %c512_129] : memref<256x1024xf32, #tpu.memory_space<vmem>>, vector<256x256xf32>
    %cst_130 = arith.constant dense<0.000000e+00> : vector<2x256xf32>
    %296 = tpu.matmul %274, %295, %cst_130 {dimension_numbers = #tpu.dot_dimension_numbers<[1], [0], [0], [1], [0, 0, 1, 1], [], []>} : vector<2x256xf32>, vector<256x256xf32>, vector<2x256xf32> -> vector<2x256xf32>
    %297 = arith.addf %294, %296 : vector<2x256xf32>
    %298 = math.tanh %297 : vector<2x256xf32>
    %299 = arith.mulf %293, %263 : vector<2x256xf32>
    %300 = arith.mulf %284, %298 : vector<2x256xf32>
    %301 = arith.addf %299, %300 : vector<2x256xf32>
    %302 = vector.extract_strided_slice %275 {offsets = [0, 768], sizes = [2, 256], strides = [1, 1]} : vector<2x1024xf32> to vector<2x256xf32>
    %c0_131 = arith.constant 0 : index
    %c768_132 = arith.constant 768 : index
    %303 = vector.load %arg3[%c0_131, %c768_132] : memref<256x1024xf32, #tpu.memory_space<vmem>>, vector<256x256xf32>
    %cst_133 = arith.constant dense<0.000000e+00> : vector<2x256xf32>
    %304 = tpu.matmul %274, %303, %cst_133 {dimension_numbers = #tpu.dot_dimension_numbers<[1], [0], [0], [1], [0, 0, 1, 1], [], []>} : vector<2x256xf32>, vector<256x256xf32>, vector<2x256xf32> -> vector<2x256xf32>
    %305 = arith.addf %302, %304 : vector<2x256xf32>
    %306 = arith.negf %305 : vector<2x256xf32>
    %307 = math.exp %306 : vector<2x256xf32>
    %cst_134 = arith.constant 1.000000e+00 : f32
    %308 = vector.broadcast %cst_134 : f32 to vector<2x256xf32>
    %309 = arith.addf %308, %307 : vector<2x256xf32>
    %310 = arith.divf %308, %309 : vector<2x256xf32>
    %311 = math.tanh %301 : vector<2x256xf32>
    %312 = arith.mulf %310, %311 : vector<2x256xf32>
    %c0_135 = arith.constant 0 : index
    %c0_136 = arith.constant 0 : index
    %313 = vector.load %arg4[%c0_135, %c0_136] : memref<256x3xf32, #tpu.memory_space<vmem>>, vector<256x3xf32>
    %cst_137 = arith.constant dense<0.000000e+00> : vector<2x3xf32>
    %314 = tpu.matmul %312, %313, %cst_137 {dimension_numbers = #tpu.dot_dimension_numbers<[1], [0], [0], [1], [0, 0, 1, 1], [], []>} : vector<2x256xf32>, vector<256x3xf32>, vector<2x3xf32> -> vector<2x3xf32>
    %c0_138 = arith.constant 0 : index
    %c0_139 = arith.constant 0 : index
    %315 = vector.load %arg5[%c0_138, %c0_139] : memref<1x3xf32, #tpu.memory_space<vmem>>, vector<1x3xf32>
    %316 = vector.broadcast %315 : vector<1x3xf32> to vector<2x3xf32>
    %317 = arith.addf %314, %316 : vector<2x3xf32>
    %cst_140 = arith.constant dense<0xFF800000> : vector<2xf32>
    %318 = vector.multi_reduction <maximumf>, %317, %cst_140 [1] : vector<2x3xf32> to vector<2xf32>
    %319 = vector.shape_cast %318 : vector<2xf32> to vector<2x1xf32>
    %320 = vector.broadcast %319 : vector<2x1xf32> to vector<2x3xf32>
    %321 = arith.subf %317, %320 : vector<2x3xf32>
    %322 = math.exp %321 : vector<2x3xf32>
    %cst_141 = arith.constant dense<0.000000e+00> : vector<2xf32>
    %323 = vector.multi_reduction <add>, %322, %cst_141 [1] : vector<2x3xf32> to vector<2xf32>
    %324 = vector.shape_cast %323 : vector<2xf32> to vector<2x1xf32>
    %325 = vector.broadcast %324 : vector<2x1xf32> to vector<2x3xf32>
    %326 = arith.divf %322, %325 : vector<2x3xf32>
    %c0_142 = arith.constant 0 : index
    %c0_143 = arith.constant 0 : index
    %327 = vector.load %arg6[%c0_142, %c0_143] : memref<2x3xf32, #tpu.memory_space<vmem>>, vector<2x3xf32>
    tpu.vector_store %arg6[%c0_142, %c0_143], %326 {strides = array<i32>} : memref<2x3xf32, #tpu.memory_space<vmem>>, vector<2x3xf32>,
    return
  }
}

</mosaic_0001>

<bundles_post_ra>
// kernel: w2v_lstm_forward.1
= control target key start
LH: loop header
LB: loop body
LE: loop exit
PB: predicated region body
PF: predicated region fallthrough
CT: control target
= control target key end

     0   :  { %11 = vsyncpa [#allocation4], 0  ;;  %s10490_s0 = inlined_call_operand.vmem [shape: f32[16,32], index: 0, kind: input, shape index: {}]   ;;  %s10491_s1 = inlined_call_operand.vmem [shape: f32[32,1024], index: 1, kind: input, shape index: {}]   ;;  %s10492_s2 = inlined_call_operand.vmem [shape: f32[1,1024], index: 2, kind: input, shape index: {}]   ;;  %s10493_s3 = inlined_call_operand.hbm [shape: f32[256,1024], index: 3, kind: input, shape index: {}]   ;;  %s10494_s4 = inlined_call_operand.vmem [shape: f32[256,3], index: 4, kind: input, shape index: {}]   ;;  %s10495_s5 = inlined_call_operand.vmem [shape: f32[1,3], index: 5, kind: input, shape index: {}]   ;;  %s10496_s6 = inlined_call_operand.hbm [shape: f32[2,3], index: 6, kind: output, shape index: {}]  }
   0x1   :  { %12 = vsyncpa [#allocation5], 0  ;;  %s23_s23 = sshll.u32 %s10493_s3, 4  ;;  %s5923_s24 = smov [#allocation3]   ;;  %s24_s23 = int_to_ptr.hbm [resolvable:$true] %s23_s23 }
   0x2   :  { %s25_s25 = sshll.u32 %s5923_s24, 4  ;;  %s5924_s26 = smov 1024   ;;  %s26_s25 = int_to_ptr.vmem [resolvable:$true] %s25_s25 }
   0x3   :  { %s5925_s27 = smov 64  }
   0x4   :  { %31 = dma.hbm_to_vmem [thread:$0]  %s24_s23, 32768, %s26_s25, [#allocation4], %s5924_s26, %s5924_s26, %s5925_s27  }
   0x5   :  { %5919 = dma.done.wait [#allocation4], 32768  }
   0x6   :  { %5920 = vsyncadd [#allocation4], 4294934528  ;;  %v66_v0 = vld [vmem:[%s10491_s1 + $0xc0] sm:$0xff]  ;;  %v67_v1 = vld [vmem:[%s10491_s1 + $0xc8] sm:$0xff]  ;;  %vm92_vm0 = vcmask 261120   ;;  %s4582_s7 = sshll.u32 %s10496_s6, 4  ;;  %s4583_s7 = int_to_ptr.hbm [resolvable:$true] %s4582_s7 }
   0x7   :  { %v70_v2 = vld [vmem:[%s10491_s1 + $0xe0] sm:$0xff]  ;;  %111 = vmatpush.msra.mxu2 %v66_v0  ;;  %134 = vmatpush.msra.mxu3 %v67_v1  ;;  %v71_v3 = vld [vmem:[%s10491_s1 + $0xe8] sm:$0xff]  ;;  %v68_v19 = vld [vmem:[%s10491_s1 + $0xd0] sm:$0xff] }
   0x8   :  { %v58_v4 = vld [vmem:[%s10491_s1 + $0x80] sm:$0xff]  ;;  %v59_v5 = vld [vmem:[%s10491_s1 + $0x88] sm:$0xff]  ;;  %203 = vmatpush.msra.mxu0 %v70_v2  ;;  %226 = vmatpush.msra.mxu1 %v71_v3  ;;  %v69_v20 = vld [vmem:[%s10491_s1 + $0xd8] sm:$0xff] }
   0x9   :  { %v62_v6 = vld [vmem:[%s10491_s1 + $0xa0] sm:$0xff]  ;;  %v63_v7 = vld [vmem:[%s10491_s1 + $0xa8] sm:$0xff]  ;;  %112 = vmatpush.msra.mxu2 %v58_v4  ;;  %135 = vmatpush.msra.mxu3 %v59_v5  ;;  %v60_v23 = vld [vmem:[%s10491_s1 + $0x90] sm:$0xff] }
   0xa   :  { %v50_v8 = vld [vmem:[%s10491_s1 + $0x40] sm:$0xff]  ;;  %v51_v9 = vld [vmem:[%s10491_s1 + $0x48] sm:$0xff]  ;;  %204 = vmatpush.msra.mxu0 %v62_v6  ;;  %227 = vmatpush.msra.mxu1 %v63_v7  ;;  %v61_v24 = vld [vmem:[%s10491_s1 + $0x98] sm:$0xff] }
   0xb   :  { %v54_v10 = vld [vmem:[%s10491_s1 + $0x60] sm:$0xff]  ;;  %v55_v11 = vld [vmem:[%s10491_s1 + $0x68] sm:$0xff]  ;;  %113 = vmatpush.msra.mxu2 %v50_v8  ;;  %136 = vmatpush.msra.mxu3 %v51_v9  ;;  %v52_v27 = vld [vmem:[%s10491_s1 + $0x50] sm:$0xff] }
   0xc   :  { %v42_v12 = vld [vmem:[%s10491_s1] sm:$0xff]  ;;  %v43_v13 = vld [vmem:[%s10491_s1 + $0x8] sm:$0xff]  ;;  %205 = vmatpush.msra.mxu0 %v54_v10  ;;  %228 = vmatpush.msra.mxu1 %v55_v11  ;;  %v53_v28 = vld [vmem:[%s10491_s1 + $0x58] sm:$0xff] }
   0xd   :  { %v46_v14 = vld [vmem:[%s10491_s1 + $0x20] sm:$0xff]  ;;  %v47_v15 = vld [vmem:[%s10491_s1 + $0x28] sm:$0xff]  ;;  %114 = vmatpush.msra.mxu2 %v42_v12  ;;  %137 = vmatpush.msra.mxu3 %v43_v13  ;;  %v44_v32 = vld [vmem:[%s10491_s1 + $0x10] sm:$0xff] }
   0xe   :  { %v6017_v16 = vld [vmem:[%s10490_s0] sm:$0xff]  ;;  %206 = vmatpush.msra.mxu0 %v46_v14  ;;  %229 = vmatpush.msra.mxu1 %v47_v15  ;;  %v6044_v31 = vld [vmem:[%s10490_s0 + $0x8] sm:$0xff]  ;;  %v45_v33 = vld [vmem:[%s10491_s1 + $0x18] sm:$0xff] }
   0xf   :  { %v337_v17 = vld [vmem:[#allocation3 + $0x3c0] sm:$0xff]  ;;  %4592 = vmatmul.msk.f32.vlgmr.msra.gmra.mxu2 %vm92_vm0, %v6017_v16  ;;  %4594 = vmatmul.msk.f32.vlgmr.msra.gmra.mxu3 %vm92_vm0, %v6017_v16  ;;  %v72_v36 = vld [vmem:[%s10491_s1 + $0xf0] sm:$0xff]  ;;  %v73_v37 = vld [vmem:[%s10491_s1 + $0xf8] sm:$0xff] }
  0x10   :  { %v369_v18 = vld [vmem:[#allocation3 + $0x7c0] sm:$0xff]  ;;  %371 = vmatpush.msrb.mxu0 %v337_v17  ;;  %157 = vmatpush.msrb.mxu2 %v68_v19  ;;  %v64_v40 = vld [vmem:[%s10491_s1 + $0xb0] sm:$0xff]  ;;  %v65_v41 = vld [vmem:[%s10491_s1 + $0xb8] sm:$0xff] }
  0x11   :  { %v335_v21 = vld [vmem:[#allocation3 + $0x380] sm:$0xff]  ;;  %391 = vmatpush.msrb.mxu1 %v369_v18  ;;  %180 = vmatpush.msrb.mxu3 %v69_v20  ;;  %v56_v44 = vld [vmem:[%s10491_s1 + $0x70] sm:$0xff]  ;;  %v57_v45 = vld [vmem:[%s10491_s1 + $0x78] sm:$0xff] }
  0x12   :  { %v367_v22 = vld [vmem:[#allocation3 + $0x780] sm:$0xff]  ;;  %372 = vmatpush.msrb.mxu0 %v335_v21  ;;  %158 = vmatpush.msrb.mxu2 %v60_v23  ;;  %v48_v48 = vld [vmem:[%s10491_s1 + $0x30] sm:$0xff]  ;;  %v49_v49 = vld [vmem:[%s10491_s1 + $0x38] sm:$0xff]  ;;  %v10499_v21 = vmov 0.0  }
  0x13   :  { %v333_v25 = vld [vmem:[#allocation3 + $0x340] sm:$0xff]  ;;  %392 = vmatpush.msrb.mxu1 %v367_v22  ;;  %181 = vmatpush.msrb.mxu3 %v61_v24  ;;  %v338_v52 = vld [vmem:[#allocation3 + $0x3c8] sm:$0xff]  ;;  %v521_v19 = vld [vmem:[#allocation3 + $0x3d0] sm:$0xff] }
  0x14   :  { %v365_v26 = vld [vmem:[#allocation3 + $0x740] sm:$0xff]  ;;  %373 = vmatpush.msrb.mxu0 %v333_v25  ;;  %159 = vmatpush.msrb.mxu2 %v52_v27  ;;  %v370_v53 = vld [vmem:[#allocation3 + $0x7c8] sm:$0xff]  ;;  %v553_v20 = vld [vmem:[#allocation3 + $0x7d0] sm:$0xff] }
  0x15   :  { %v331_v29 = vld [vmem:[#allocation3 + $0x300] sm:$0xff]  ;;  %393 = vmatpush.msrb.mxu1 %v365_v26  ;;  %182 = vmatpush.msrb.mxu3 %v53_v28  ;;  %v336_v56 = vld [vmem:[#allocation3 + $0x388] sm:$0xff]  ;;  %v519_v24 = vld [vmem:[#allocation3 + $0x390] sm:$0xff] }
  0x16   :  { %v363_v30 = vld [vmem:[#allocation3 + $0x700] sm:$0xff]  ;;  %374 = vmatpush.msrb.mxu0 %v331_v29  ;;  %160 = vmatpush.msrb.mxu2 %v44_v32  ;;  %v368_v57 = vld [vmem:[#allocation3 + $0x788] sm:$0xff]  ;;  %v551_v25 = vld [vmem:[#allocation3 + $0x790] sm:$0xff] }
  0x17   :  { %394 = vmatpush.msrb.mxu1 %v363_v30  ;;  %v329_v34 = vld [vmem:[#allocation3 + $0x2c0] sm:$0xff]  ;;  %4593 = vmatmul.msk.f32.gmra.mxu2 %vm92_vm0, %v6044_v31  ;;  %v334_v60 = vld [vmem:[#allocation3 + $0x348] sm:$0xff]  ;;  %v517_v28 = vld [vmem:[#allocation3 + $0x350] sm:$0xff] }
  0x18   :  { %v361_v35 = vld [vmem:[#allocation3 + $0x6c0] sm:$0xff]  ;;  %4595 = vmatmul.msk.f32.gmra.mxu3 %vm92_vm0, %v6044_v31  ;;  %375 = vmatpush.msrb.mxu0 %v329_v34  ;;  %v366_v61 = vld [vmem:[#allocation3 + $0x748] sm:$0xff]  ;;  %v549_v29 = vld [vmem:[#allocation3 + $0x750] sm:$0xff] }
  0x19   :  { %183 = vmatpush.msrb.mxu3 %v45_v33  ;;  %v327_v38 = vld [vmem:[#allocation3 + $0x280] sm:$0xff]  ;;  %395 = vmatpush.msrb.mxu1 %v361_v35  ;;  %v332_v0 = vld [vmem:[#allocation3 + $0x308] sm:$0xff]  ;;  %v515_v33 = vld [vmem:[#allocation3 + $0x310] sm:$0xff] }
  0x1a   :  { %v359_v39 = vld [vmem:[#allocation3 + $0x680] sm:$0xff]  ;;  %249 = vmatpush.msra.mxu2 %v72_v36  ;;  %376 = vmatpush.msrb.mxu0 %v327_v38  ;;  %v364_v1 = vld [vmem:[#allocation3 + $0x708] sm:$0xff]  ;;  %v547_v34 = vld [vmem:[#allocation3 + $0x710] sm:$0xff] }
  0x1b   :  { %272 = vmatpush.msra.mxu3 %v73_v37  ;;  %v325_v42 = vld [vmem:[#allocation3 + $0x240] sm:$0xff]  ;;  %396 = vmatpush.msrb.mxu1 %v359_v39  ;;  %v330_v4 = vld [vmem:[#allocation3 + $0x2c8] sm:$0xff]  ;;  %v545_v37 = vld [vmem:[#allocation3 + $0x6d0] sm:$0xff] }
  0x1c   :  { %v357_v43 = vld [vmem:[#allocation3 + $0x640] sm:$0xff]  ;;  %250 = vmatpush.msra.mxu2 %v64_v40  ;;  %377 = vmatpush.msrb.mxu0 %v325_v42  ;;  %v362_v5 = vld [vmem:[#allocation3 + $0x6c8] sm:$0xff]  ;;  %v511_v40 = vld [vmem:[#allocation3 + $0x290] sm:$0xff] }
  0x1d   :  { %273 = vmatpush.msra.mxu3 %v65_v41  ;;  %v323_v46 = vld [vmem:[#allocation3 + $0x200] sm:$0xff]  ;;  %397 = vmatpush.msrb.mxu1 %v357_v43  ;;  %v328_v8 = vld [vmem:[#allocation3 + $0x288] sm:$0xff]  ;;  %v543_v41 = vld [vmem:[#allocation3 + $0x690] sm:$0xff] }
  0x1e   :  { %v355_v47 = vld [vmem:[#allocation3 + $0x600] sm:$0xff]  ;;  %251 = vmatpush.msra.mxu2 %v56_v44  ;;  %378 = vmatpush.msrb.mxu0 %v323_v46  ;;  %v360_v9 = vld [vmem:[#allocation3 + $0x688] sm:$0xff]  ;;  %v509_v44 = vld [vmem:[#allocation3 + $0x250] sm:$0xff] }
  0x1f   :  { %274 = vmatpush.msra.mxu3 %v57_v45  ;;  %398 = vmatpush.msrb.mxu1 %v355_v47  ;;  %v321_v50 = vld [vmem:[#allocation3 + $0x1c0] sm:$0xff]  ;;  %v326_v12 = vld [vmem:[#allocation3 + $0x248] sm:$0xff]  ;;  %v541_v45 = vld [vmem:[#allocation3 + $0x650] sm:$0xff] }
  0x20   :  { %4600 = vmatmul.msk.f32.vlgmr.msra.gmra.mxu0 %vm92_vm0, %v6017_v16  ;;  %4602 = vmatmul.msk.f32.vlgmr.msra.gmra.mxu1 %vm92_vm0, %v6017_v16  ;;  %v353_v51 = vld [vmem:[#allocation3 + $0x5c0] sm:$0xff]  ;;  %v358_v13 = vld [vmem:[#allocation3 + $0x648] sm:$0xff] }
  0x21   :  { %252 = vmatpush.msra.mxu2 %v48_v48  ;;  %275 = vmatpush.msra.mxu3 %v49_v49  ;;  %v319_v54 = vld [vmem:[#allocation3 + $0x180] sm:$0xff]  ;;  %v324_v17 = vld [vmem:[#allocation3 + $0x208] sm:$0xff]  ;;  %v507_v48 = vld [vmem:[#allocation3 + $0x210] sm:$0xff] }
  0x22   :  { %4596 = vmatmul.msk.f32.vlgmr.msrb.gmra.mxu2 %vm92_vm0, %v6017_v16  ;;  %4598 = vmatmul.msk.f32.vlgmr.msrb.gmra.mxu3 %vm92_vm0, %v6017_v16  ;;  %v351_v55 = vld [vmem:[#allocation3 + $0x580] sm:$0xff]  ;;  %v356_v18 = vld [vmem:[#allocation3 + $0x608] sm:$0xff]  ;;  %v539_v49 = vld [vmem:[#allocation3 + $0x610] sm:$0xff] }
  0x23   :  { %379 = vmatpush.msrb.mxu0 %v321_v50  ;;  %399 = vmatpush.msrb.mxu1 %v353_v51  ;;  %v317_v58 = vld [vmem:[#allocation3 + $0x140] sm:$0xff]  ;;  %v322_v22 = vld [vmem:[#allocation3 + $0x1c8] sm:$0xff]  ;;  %v6116_v51 = vld [vmem:[#allocation3 + $0x1d0] sm:$0xff] }
  0x24   :  { %411 = vmatpush.msrb.mxu2 %v338_v52  ;;  %431 = vmatpush.msrb.mxu3 %v370_v53  ;;  %v349_v59 = vld [vmem:[#allocation3 + $0x540] sm:$0xff]  ;;  %v354_v23 = vld [vmem:[#allocation3 + $0x5c8] sm:$0xff]  ;;  %v537_v52 = vld [vmem:[#allocation3 + $0x5d0] sm:$0xff] }
  0x25   :  { %380 = vmatpush.msrb.mxu0 %v319_v54  ;;  %400 = vmatpush.msrb.mxu1 %v351_v55  ;;  %v315_v62 = vld [vmem:[#allocation3 + $0x100] sm:$0xff]  ;;  %v320_v26 = vld [vmem:[#allocation3 + $0x188] sm:$0xff]  ;;  %v6118_v53 = vld [vmem:[#allocation3 + $0x3d8] sm:$0xff] }
  0x26   :  { %412 = vmatpush.msrb.mxu2 %v336_v56  ;;  %432 = vmatpush.msrb.mxu3 %v368_v57  ;;  %v347_v63 = vld [vmem:[#allocation3 + $0x500] sm:$0xff]  ;;  %v352_v27 = vld [vmem:[#allocation3 + $0x588] sm:$0xff]  ;;  %v6120_v54 = vld [vmem:[#allocation3 + $0x7d8] sm:$0xff] }
  0x27   :  { %381 = vmatpush.msrb.mxu0 %v317_v58  ;;  %401 = vmatpush.msrb.mxu1 %v349_v59  ;;  %v313_v2 = vld [vmem:[#allocation3 + $0xc0] sm:$0xff]  ;;  %v318_v30 = vld [vmem:[#allocation3 + $0x148] sm:$0xff]  ;;  %v6125_v55 = vld [vmem:[#allocation3 + $0x190] sm:$0xff] }
  0x28   :  { %413 = vmatpush.msrb.mxu2 %v334_v60  ;;  %433 = vmatpush.msrb.mxu3 %v366_v61  ;;  %v345_v3 = vld [vmem:[#allocation3 + $0x4c0] sm:$0xff]  ;;  %v350_v32 = vld [vmem:[#allocation3 + $0x548] sm:$0xff]  ;;  %v6127_v56 = vld [vmem:[#allocation3 + $0x590] sm:$0xff] }
  0x29   :  { %382 = vmatpush.msrb.mxu0 %v315_v62  ;;  %402 = vmatpush.msrb.mxu1 %v347_v63  ;;  %v311_v6 = vld [vmem:[#allocation3 + $0x80] sm:$0xff]  ;;  %v316_v35 = vld [vmem:[#allocation3 + $0x108] sm:$0xff]  ;;  %v6131_v57 = vld [vmem:[#allocation3 + $0x398] sm:$0xff] }
  0x2a   :  { %414 = vmatpush.msrb.mxu2 %v332_v0  ;;  %434 = vmatpush.msrb.mxu3 %v364_v1  ;;  %v343_v7 = vld [vmem:[#allocation3 + $0x480] sm:$0xff]  ;;  %v348_v36 = vld [vmem:[#allocation3 + $0x508] sm:$0xff]  ;;  %v6133_v58 = vld [vmem:[#allocation3 + $0x798] sm:$0xff] }
  0x2b   :  { %4601 = vmatmul.msk.f32.gmra.mxu0 %vm92_vm0, %v6044_v31  ;;  %4603 = vmatmul.msk.f32.gmra.mxu1 %vm92_vm0, %v6044_v31  ;;  %v309_v10 = vld [vmem:[#allocation3 + $0x40] sm:$0xff]  ;;  %v314_v38 = vld [vmem:[#allocation3 + $0xc8] sm:$0xff]  ;;  %v6137_v59 = vld [vmem:[#allocation3 + $0x150] sm:$0xff] }
  0x2c   :  { %4597 = vmatmul.msk.f32.gmra.mxu2 %vm92_vm0, %v6044_v31  ;;  %4599 = vmatmul.msk.f32.gmra.mxu3 %vm92_vm0, %v6044_v31  ;;  %v341_v11 = vld [vmem:[#allocation3 + $0x440] sm:$0xff]  ;;  %v346_v39 = vld [vmem:[#allocation3 + $0x4c8] sm:$0xff]  ;;  %v6139_v60 = vld [vmem:[#allocation3 + $0x550] sm:$0xff] }
  0x2d   :  { %383 = vmatpush.msrb.mxu0 %v313_v2  ;;  %403 = vmatpush.msrb.mxu1 %v345_v3  ;;  %v307_v14 = vld [vmem:[#allocation3] sm:$0xff]  ;;  %v312_v42 = vld [vmem:[#allocation3 + $0x88] sm:$0xff]  ;;  %v6143_v61 = vld [vmem:[#allocation3 + $0x358] sm:$0xff] }
  0x2e   :  { %415 = vmatpush.msrb.mxu2 %v330_v4  ;;  %435 = vmatpush.msrb.mxu3 %v362_v5  ;;  %v339_v15 = vld [vmem:[#allocation3 + $0x400] sm:$0xff]  ;;  %v344_v43 = vld [vmem:[#allocation3 + $0x488] sm:$0xff]  ;;  %v6145_v62 = vld [vmem:[#allocation3 + $0x758] sm:$0xff] }
  0x2f   :  { %384 = vmatpush.msrb.mxu0 %v311_v6  ;;  %404 = vmatpush.msrb.mxu1 %v343_v7  ;;  %v6106_v46 = vld [vmem:[#allocation3 + $0x48] sm:$0xff]  ;;  %v6149_v63 = vld [vmem:[#allocation3 + $0x110] sm:$0xff]  ;;  %v6155_v1 = vld [vmem:[#allocation3 + $0x318] sm:$0xff] }
  0x30   :  { %416 = vmatpush.msrb.mxu2 %v328_v8  ;;  %436 = vmatpush.msrb.mxu3 %v360_v9  ;;  %v6108_v47 = vld [vmem:[#allocation3 + $0x448] sm:$0xff]  ;;  %v6151_v0 = vld [vmem:[#allocation3 + $0x510] sm:$0xff]  ;;  %v6157_v2 = vld [vmem:[#allocation3 + $0x718] sm:$0xff] }
  0x31   :  { %385 = vmatpush.msrb.mxu0 %v309_v10  ;;  %405 = vmatpush.msrb.mxu1 %v341_v11  ;;  %v6110_v50 = vld [vmem:[#allocation3 + $0x8] sm:$0xff]  ;;  %v6161_v3 = vld [vmem:[#allocation3 + $0xd0] sm:$0xff]  ;;  %v6167_v5 = vld [vmem:[#allocation3 + $0x2d8] sm:$0xff] }
  0x32   :  { %417 = vmatpush.msrb.mxu2 %v326_v12  ;;  %437 = vmatpush.msrb.mxu3 %v358_v13  ;;  %v6163_v4 = vld [vmem:[#allocation3 + $0x4d0] sm:$0xff]  ;;  %v6169_v6 = vld [vmem:[#allocation3 + $0x6d8] sm:$0xff] }
  0x33   :  { %386 = vmatpush.msrb.mxu0 %v307_v14  ;;  %406 = vmatpush.msrb.mxu1 %v339_v15  ;;  %v6173_v7 = vld [vmem:[#allocation3 + $0x90] sm:$0xff]  ;;  %v6179_v9 = vld [vmem:[#allocation3 + $0x298] sm:$0xff] }
  0x34   :  { %418 = vmatpush.msrb.mxu2 %v324_v17  ;;  %438 = vmatpush.msrb.mxu3 %v356_v18  ;;  %v6175_v8 = vld [vmem:[#allocation3 + $0x490] sm:$0xff]  ;;  %v6181_v10 = vld [vmem:[#allocation3 + $0x698] sm:$0xff] }
  0x35   :  { %387 = vmatmul.f32.vlgmr.msrb.gmra.mxu0 %v10499_v21  ;;  %407 = vmatmul.f32.vlgmr.msrb.gmra.mxu1 %v10499_v21  ;;  %v6185_v11 = vld [vmem:[#allocation3 + $0x50] sm:$0xff]  ;;  %v6191_v13 = vld [vmem:[#allocation3 + $0x258] sm:$0xff] }
  0x36   :  { %555 = vmatpush.msra.mxu0 %v521_v19  ;;  %575 = vmatpush.msra.mxu1 %v553_v20  ;;  %v6187_v12 = vld [vmem:[#allocation3 + $0x450] sm:$0xff]  ;;  %v6193_v14 = vld [vmem:[#allocation3 + $0x658] sm:$0xff]  ;;  %v705_v20 = vld [vmem:[#allocation3 + $0x3e0] sm:$0xff] }
  0x37   :  { %4604 = vmatmul.msk.f32.vlgmr.msra.gmra.mxu2 %vm92_vm0, %v6017_v16  ;;  %4606 = vmatmul.msk.f32.vlgmr.msra.gmra.mxu3 %vm92_vm0, %v6017_v16  ;;  %v513_v16 = vld [vmem:[#allocation3 + $0x2d0] sm:$0xff]  ;;  %v6203_v18 = vld [vmem:[#allocation3 + $0x218] sm:$0xff] }
  0x38   :  { %419 = vmatpush.msrb.mxu2 %v322_v22  ;;  %439 = vmatpush.msrb.mxu3 %v354_v23  ;;  %v6197_v15 = vld [vmem:[#allocation3 + $0x10] sm:$0xff]  ;;  %v6205_v19 = vld [vmem:[#allocation3 + $0x618] sm:$0xff]  ;;  %v737_v22 = vld [vmem:[#allocation3 + $0x7e0] sm:$0xff] }
  0x39   :  { %556 = vmatpush.msra.mxu0 %v519_v24  ;;  %576 = vmatpush.msra.mxu1 %v551_v25  ;;  %v6199_v17 = vld [vmem:[#allocation3 + $0x410] sm:$0xff]  ;;  %v6213_v23 = vld [vmem:[#allocation3 + $0x1d8] sm:$0xff]  ;;  %v703_v25 = vld [vmem:[#allocation3 + $0x3a0] sm:$0xff] }
  0x3a   :  { %420 = vmatpush.msrb.mxu2 %v320_v26  ;;  %440 = vmatpush.msrb.mxu3 %v352_v27  ;;  %v6215_v24 = vld [vmem:[#allocation3 + $0x5d8] sm:$0xff]  ;;  %v735_v26 = vld [vmem:[#allocation3 + $0x7a0] sm:$0xff] }
  0x3b   :  { %557 = vmatpush.msra.mxu0 %v517_v28  ;;  %577 = vmatpush.msra.mxu1 %v549_v29  ;;  %v6219_v27 = vld [vmem:[#allocation3 + $0x198] sm:$0xff]  ;;  %v701_v29 = vld [vmem:[#allocation3 + $0x360] sm:$0xff] }
  0x3c   :  { %421 = vmatpush.msrb.mxu2 %v318_v30  ;;  %441 = vmatpush.msrb.mxu3 %v350_v32  ;;  %v6221_v28 = vld [vmem:[#allocation3 + $0x598] sm:$0xff]  ;;  %v733_v30 = vld [vmem:[#allocation3 + $0x760] sm:$0xff] }
  0x3d   :  { %558 = vmatpush.msra.mxu0 %v515_v33  ;;  %578 = vmatpush.msra.mxu1 %v547_v34  ;;  %v6225_v32 = vld [vmem:[#allocation3 + $0x158] sm:$0xff]  ;;  %v699_v34 = vld [vmem:[#allocation3 + $0x320] sm:$0xff] }
  0x3e   :  { %422 = vmatpush.msrb.mxu2 %v316_v35  ;;  %442 = vmatpush.msrb.mxu3 %v348_v36  ;;  %v6227_v33 = vld [vmem:[#allocation3 + $0x558] sm:$0xff]  ;;  %v731_v35 = vld [vmem:[#allocation3 + $0x720] sm:$0xff] }
  0x3f   :  { %559 = vmatpush.msra.mxu0 %v513_v16  ;;  %579 = vmatpush.msra.mxu1 %v545_v37  ;;  %v6231_v36 = vld [vmem:[#allocation3 + $0x118] sm:$0xff]  ;;  %v697_v37 = vld [vmem:[#allocation3 + $0x2e0] sm:$0xff] }
  0x40   :  { %4605 = vmatmul.msk.f32.gmra.mxu2 %vm92_vm0, %v6044_v31  ;;  %4607 = vmatmul.msk.f32.gmra.mxu3 %vm92_vm0, %v6044_v31  ;;  %v6112_v31 = vld [vmem:[#allocation3 + $0x408] sm:$0xff]  ;;  %v6233_v16 = vld [vmem:[#allocation3 + $0x518] sm:$0xff] }
  0x41   :  { %423 = vmatpush.msrb.mxu2 %v314_v38  ;;  %443 = vmatpush.msrb.mxu3 %v346_v39  ;;  %v729_v38 = vld [vmem:[#allocation3 + $0x6e0] sm:$0xff]  ;;  %v6237_v39 = vld [vmem:[#allocation3 + $0xd8] sm:$0xff] }
  0x42   :  { %560 = vmatpush.msra.mxu0 %v511_v40  ;;  %580 = vmatpush.msra.mxu1 %v543_v41  ;;  %v6239_v40 = vld [vmem:[#allocation3 + $0x4d8] sm:$0xff]  ;;  %v695_v41 = vld [vmem:[#allocation3 + $0x2a0] sm:$0xff] }
  0x43   :  { %424 = vmatpush.msrb.mxu2 %v312_v42  ;;  %444 = vmatpush.msrb.mxu3 %v344_v43  ;;  %11091 = vst [vmem:[#allocation9_spill] sm:$0xff] %v6239_v40  ;;  %v727_v42 = vld [vmem:[#allocation3 + $0x6a0] sm:$0xff]  ;;  %v6243_v43 = vld [vmem:[#allocation3 + $0x98] sm:$0xff] }
  0x44   :  { %561 = vmatpush.msra.mxu0 %v509_v44  ;;  %581 = vmatpush.msra.mxu1 %v541_v45  ;;  %11092 = vst [vmem:[#allocation10_spill] sm:$0xff] %v6243_v43  ;;  %v6245_v44 = vld [vmem:[#allocation3 + $0x498] sm:$0xff]  ;;  %v693_v45 = vld [vmem:[#allocation3 + $0x260] sm:$0xff] }
  0x45   :  { %425 = vmatpush.msrb.mxu2 %v6106_v46  ;;  %445 = vmatpush.msrb.mxu3 %v6108_v47  ;;  %11093 = vst [vmem:[#allocation11_spill] sm:$0xff] %v6245_v44 }
  0x46   :  { %562 = vmatpush.msra.mxu0 %v507_v48  ;;  %582 = vmatpush.msra.mxu1 %v539_v49  ;;  %v725_v48 = vld [vmem:[#allocation3 + $0x660] sm:$0xff]  ;;  %v6249_v49 = vld [vmem:[#allocation3 + $0x58] sm:$0xff] }
  0x47   :  { %426 = vmatpush.msrb.mxu2 %v6110_v50  ;;  %446 = vmatpush.msrb.mxu3 %v6112_v31  ;;  %11094 = vst [vmem:[#allocation12_spill] sm:$0xff] %v6249_v49 }
  0x48   :  { %563 = vmatpush.msra.mxu0 %v6116_v51  ;;  %583 = vmatpush.msra.mxu1 %v537_v52  ;;  %v6251_v52 = vld [vmem:[#allocation3 + $0x458] sm:$0xff] }
  0x49   :  { %595 = vmatpush.msra.mxu2 %v6118_v53  ;;  %615 = vmatpush.msra.mxu3 %v6120_v54  ;;  %11095 = vst [vmem:[#allocation13_spill] sm:$0xff] %v6251_v52 }
  0x4a   :  { %427 = vmatmul.f32.vlgmr.msrb.gmra.mxu2 %v10499_v21  ;;  %447 = vmatmul.f32.vlgmr.msrb.gmra.mxu3 %v10499_v21 }
  0x4b   :  { %564 = vmatpush.msra.mxu0 %v6125_v55  ;;  %584 = vmatpush.msra.mxu1 %v6127_v56 }
  0x4c   :  { %596 = vmatpush.msra.mxu2 %v6131_v57  ;;  %616 = vmatpush.msra.mxu3 %v6133_v58 }
  0x4d   :  { %565 = vmatpush.msra.mxu0 %v6137_v59  ;;  %585 = vmatpush.msra.mxu1 %v6139_v60 }
  0x4e   :  { %597 = vmatpush.msra.mxu2 %v6143_v61  ;;  %617 = vmatpush.msra.mxu3 %v6145_v62 }
  0x4f   :  { %566 = vmatpush.msra.mxu0 %v6149_v63  ;;  %586 = vmatpush.msra.mxu1 %v6151_v0 }
  0x50   :  { %598 = vmatpush.msra.mxu2 %v6155_v1  ;;  %618 = vmatpush.msra.mxu3 %v6157_v2 }
  0x51   :  { %567 = vmatpush.msra.mxu0 %v6161_v3  ;;  %587 = vmatpush.msra.mxu1 %v6163_v4 }
  0x52   :  { %599 = vmatpush.msra.mxu2 %v6167_v5  ;;  %619 = vmatpush.msra.mxu3 %v6169_v6 }
  0x53   :  { %568 = vmatpush.msra.mxu0 %v6173_v7  ;;  %588 = vmatpush.msra.mxu1 %v6175_v8 }
  0x54   :  { %600 = vmatpush.msra.mxu2 %v6179_v9  ;;  %620 = vmatpush.msra.mxu3 %v6181_v10 }
  0x55   :  { %569 = vmatpush.msra.mxu0 %v6185_v11  ;;  %589 = vmatpush.msra.mxu1 %v6187_v12 }
  0x56   :  { %601 = vmatpush.msra.mxu2 %v6191_v13  ;;  %621 = vmatpush.msra.mxu3 %v6193_v14 }
  0x57   :  { %570 = vmatpush.msra.mxu0 %v6197_v15  ;;  %590 = vmatpush.msra.mxu1 %v6199_v17 }
  0x58   :  { %602 = vmatpush.msra.mxu2 %v6203_v18  ;;  %622 = vmatpush.msra.mxu3 %v6205_v19 }
  0x59   :  { %571 = vmatmul.f32.vlgmr.msra.gmra.mxu0 %v10499_v21  ;;  %591 = vmatmul.f32.vlgmr.msra.gmra.mxu1 %v10499_v21 }
  0x5a   :  { %739 = vmatpush.msrb.mxu0 %v705_v20  ;;  %759 = vmatpush.msrb.mxu1 %v737_v22  ;;  %v691_v20 = vld [vmem:[#allocation3 + $0x220] sm:$0xff] }
  0x5b   :  { %603 = vmatpush.msra.mxu2 %v6213_v23  ;;  %623 = vmatpush.msra.mxu3 %v6215_v24  ;;  %v723_v22 = vld [vmem:[#allocation3 + $0x620] sm:$0xff] }
  0x5c   :  { %740 = vmatpush.msrb.mxu0 %v703_v25  ;;  %760 = vmatpush.msrb.mxu1 %v735_v26  ;;  %v6255_v25 = vld [vmem:[#allocation3 + $0x18] sm:$0xff] }
  0x5d   :  { %604 = vmatpush.msra.mxu2 %v6219_v27  ;;  %624 = vmatpush.msra.mxu3 %v6221_v28  ;;  %11096 = vst [vmem:[#allocation14_spill] sm:$0xff] %v6255_v25  ;;  %v6257_v26 = vld [vmem:[#allocation3 + $0x418] sm:$0xff] }
  0x5e   :  { %741 = vmatpush.msrb.mxu0 %v701_v29  ;;  %761 = vmatpush.msrb.mxu1 %v733_v30  ;;  %11097 = vst [vmem:[#allocation15_spill] sm:$0xff] %v6257_v26  ;;  %v689_v29 = vld [vmem:[#allocation3 + $0x1e0] sm:$0xff] }
  0x5f   :  { %605 = vmatpush.msra.mxu2 %v6225_v32  ;;  %625 = vmatpush.msra.mxu3 %v6227_v33  ;;  %v721_v30 = vld [vmem:[#allocation3 + $0x5e0] sm:$0xff] }
  0x60   :  { %742 = vmatpush.msrb.mxu0 %v699_v34  ;;  %762 = vmatpush.msrb.mxu1 %v731_v35  ;;  %v706_v34 = vld [vmem:[#allocation3 + $0x3e8] sm:$0xff] }
  0x61   :  { %606 = vmatpush.msra.mxu2 %v6231_v36  ;;  %626 = vmatpush.msra.mxu3 %v6233_v16  ;;  %v738_v35 = vld [vmem:[#allocation3 + $0x7e8] sm:$0xff] }
  0x62   :  { %743 = vmatpush.msrb.mxu0 %v697_v37  ;;  %763 = vmatpush.msrb.mxu1 %v729_v38  ;;  %v687_v37 = vld [vmem:[#allocation3 + $0x1a0] sm:$0xff] }
  0x63   :  { %607 = vmatpush.msra.mxu2 %v6237_v39  ;;  %627 = vmatpush.msra.mxu3 %v6239_v40  ;;  %v719_v38 = vld [vmem:[#allocation3 + $0x5a0] sm:$0xff]  ;;  %v6287_v40 = vld [vmem:[#allocation3 + $0x2f8] sm:$0xff] }
  0x64   :  { %744 = vmatpush.msrb.mxu0 %v695_v41  ;;  %764 = vmatpush.msrb.mxu1 %v727_v42  ;;  %v704_v41 = vld [vmem:[#allocation3 + $0x3a8] sm:$0xff] }
  0x65   :  { %608 = vmatpush.msra.mxu2 %v6243_v43  ;;  %628 = vmatpush.msra.mxu3 %v6245_v44  ;;  %v736_v42 = vld [vmem:[#allocation3 + $0x7a8] sm:$0xff] }
  0x66   :  { %745 = vmatpush.msrb.mxu0 %v693_v45  ;;  %765 = vmatpush.msrb.mxu1 %v725_v48  ;;  %v685_v45 = vld [vmem:[#allocation3 + $0x160] sm:$0xff]  ;;  %v716_v44 = vld [vmem:[#allocation3 + $0x528] sm:$0xff] }
  0x67   :  { %609 = vmatpush.msra.mxu2 %v6249_v49  ;;  %629 = vmatpush.msra.mxu3 %v6251_v52  ;;  %v717_v48 = vld [vmem:[#allocation3 + $0x560] sm:$0xff] }
  0x68   :  { %746 = vmatpush.msrb.mxu0 %v691_v20  ;;  %766 = vmatpush.msrb.mxu1 %v723_v22  ;;  %v702_v20 = vld [vmem:[#allocation3 + $0x368] sm:$0xff]  ;;  %v715_v52 = vld [vmem:[#allocation3 + $0x520] sm:$0xff] }
  0x69   :  { %610 = vmatpush.msra.mxu2 %v6255_v25  ;;  %630 = vmatpush.msra.mxu3 %v6257_v26  ;;  %v734_v22 = vld [vmem:[#allocation3 + $0x768] sm:$0xff]  ;;  %v683_v26 = vld [vmem:[#allocation3 + $0x120] sm:$0xff] }
  0x6a   :  { %611 = vmatmul.f32.vlgmr.msra.gmra.mxu2 %v10499_v21  ;;  %631 = vmatmul.f32.vlgmr.msra.gmra.mxu3 %v10499_v21  ;;  %v700_v21 = vld [vmem:[#allocation3 + $0x328] sm:$0xff] }
  0x6b   :  { %747 = vmatpush.msrb.mxu0 %v689_v29  ;;  %767 = vmatpush.msrb.mxu1 %v721_v30  ;;  %v732_v25 = vld [vmem:[#allocation3 + $0x728] sm:$0xff]  ;;  %v681_v29 = vld [vmem:[#allocation3 + $0xe0] sm:$0xff] }
  0x6c   :  { %779 = vmatpush.msrb.mxu2 %v706_v34  ;;  %799 = vmatpush.msrb.mxu3 %v738_v35  ;;  %v713_v30 = vld [vmem:[#allocation3 + $0x4e0] sm:$0xff]  ;;  %v698_v34 = vld [vmem:[#allocation3 + $0x2e8] sm:$0xff] }
  0x6d   :  { %748 = vmatpush.msrb.mxu0 %v687_v37  ;;  %768 = vmatpush.msrb.mxu1 %v719_v38  ;;  %v730_v35 = vld [vmem:[#allocation3 + $0x6e8] sm:$0xff]  ;;  %v679_v37 = vld [vmem:[#allocation3 + $0xa0] sm:$0xff] }
  0x6e   :  { %780 = vmatpush.msrb.mxu2 %v704_v41  ;;  %800 = vmatpush.msrb.mxu3 %v736_v42  ;;  %v711_v38 = vld [vmem:[#allocation3 + $0x4a0] sm:$0xff]  ;;  %v696_v41 = vld [vmem:[#allocation3 + $0x2a8] sm:$0xff] }
  0x6f   :  { %749 = vmatpush.msrb.mxu0 %v685_v45  ;;  %769 = vmatpush.msrb.mxu1 %v717_v48  ;;  %v728_v42 = vld [vmem:[#allocation3 + $0x6a8] sm:$0xff]  ;;  %v677_v45 = vld [vmem:[#allocation3 + $0x60] sm:$0xff] }
  0x70   :  { %781 = vmatpush.msrb.mxu2 %v702_v20  ;;  %801 = vmatpush.msrb.mxu3 %v734_v22  ;;  %v709_v48 = vld [vmem:[#allocation3 + $0x460] sm:$0xff]  ;;  %v694_v20 = vld [vmem:[#allocation3 + $0x268] sm:$0xff] }
  0x71   :  { %750 = vmatpush.msrb.mxu0 %v683_v26  ;;  %770 = vmatpush.msrb.mxu1 %v715_v52  ;;  %v726_v22 = vld [vmem:[#allocation3 + $0x668] sm:$0xff]  ;;  %v675_v52 = vld [vmem:[#allocation3 + $0x20] sm:$0xff] }
  0x72   :  { %782 = vmatpush.msrb.mxu2 %v700_v21  ;;  %802 = vmatpush.msrb.mxu3 %v732_v25  ;;  %v707_v26 = vld [vmem:[#allocation3 + $0x420] sm:$0xff]  ;;  %v692_v21 = vld [vmem:[#allocation3 + $0x228] sm:$0xff] }
  0x73   :  { %751 = vmatpush.msrb.mxu0 %v681_v29  ;;  %771 = vmatpush.msrb.mxu1 %v713_v30  ;;  %v724_v25 = vld [vmem:[#allocation3 + $0x628] sm:$0xff]  ;;  %v859_v29 = vld [vmem:[#allocation3 + $0x3f0] sm:$0xff] }
  0x74   :  { %783 = vmatpush.msrb.mxu2 %v698_v34  ;;  %803 = vmatpush.msrb.mxu3 %v730_v35  ;;  %v891_v30 = vld [vmem:[#allocation3 + $0x7f0] sm:$0xff]  ;;  %v690_v34 = vld [vmem:[#allocation3 + $0x1e8] sm:$0xff] }
  0x75   :  { %752 = vmatpush.msrb.mxu0 %v679_v37  ;;  %772 = vmatpush.msrb.mxu1 %v711_v38  ;;  %v722_v35 = vld [vmem:[#allocation3 + $0x5e8] sm:$0xff]  ;;  %v11098_v37 = vmov 0.0   ;;  %v857_v38 = vld [vmem:[#allocation3 + $0x3b0] sm:$0xff] }
  0x76   :  { %784 = vmatpush.msrb.mxu2 %v696_v41  ;;  %804 = vmatpush.msrb.mxu3 %v728_v42  ;;  %v889_v41 = vld [vmem:[#allocation3 + $0x7b0] sm:$0xff]  ;;  %v688_v42 = vld [vmem:[#allocation3 + $0x1a8] sm:$0xff] }
  0x77   :  { %753 = vmatpush.msrb.mxu0 %v677_v45  ;;  %773 = vmatpush.msrb.mxu1 %v709_v48  ;;  %v720_v45 = vld [vmem:[#allocation3 + $0x5a8] sm:$0xff]  ;;  %v855_v48 = vld [vmem:[#allocation3 + $0x370] sm:$0xff] }
  0x78   :  { %785 = vmatpush.msrb.mxu2 %v694_v20  ;;  %805 = vmatpush.msrb.mxu3 %v726_v22  ;;  %v887_v20 = vld [vmem:[#allocation3 + $0x770] sm:$0xff]  ;;  %v686_v22 = vld [vmem:[#allocation3 + $0x168] sm:$0xff] }
  0x79   :  { %754 = vmatpush.msrb.mxu0 %v675_v52  ;;  %774 = vmatpush.msrb.mxu1 %v707_v26  ;;  %v718_v52 = vld [vmem:[#allocation3 + $0x568] sm:$0xff]  ;;  %v853_v26 = vld [vmem:[#allocation3 + $0x330] sm:$0xff] }
  0x7a   :  { %786 = vmatpush.msrb.mxu2 %v692_v21  ;;  %806 = vmatpush.msrb.mxu3 %v724_v25  ;;  %v885_v21 = vld [vmem:[#allocation3 + $0x730] sm:$0xff]  ;;  %v684_v25 = vld [vmem:[#allocation3 + $0x128] sm:$0xff] }
  0x7b   :  { %755 = vmatmul.f32.vlgmr.msrb.gmra.mxu0 %v11098_v37  ;;  %775 = vmatmul.f32.vlgmr.msrb.gmra.mxu1 %v11098_v37 }
  0x7c   :  { %893 = vmatpush.msra.mxu0 %v859_v29  ;;  %913 = vmatpush.msra.mxu1 %v891_v30  ;;  %v851_v29 = vld [vmem:[#allocation3 + $0x2f0] sm:$0xff] }
  0x7d   :  { %787 = vmatpush.msrb.mxu2 %v690_v34  ;;  %807 = vmatpush.msrb.mxu3 %v722_v35  ;;  %v883_v30 = vld [vmem:[#allocation3 + $0x6f0] sm:$0xff]  ;;  %v682_v34 = vld [vmem:[#allocation3 + $0xe8] sm:$0xff] }
  0x7e   :  { %894 = vmatpush.msra.mxu0 %v857_v38  ;;  %914 = vmatpush.msra.mxu1 %v889_v41  ;;  %v714_v35 = vld [vmem:[#allocation3 + $0x4e8] sm:$0xff]  ;;  %v849_v38 = vld [vmem:[#allocation3 + $0x2b0] sm:$0xff] }
  0x7f   :  { %788 = vmatpush.msrb.mxu2 %v688_v42  ;;  %808 = vmatpush.msrb.mxu3 %v720_v45  ;;  %v881_v41 = vld [vmem:[#allocation3 + $0x6b0] sm:$0xff]  ;;  %v680_v42 = vld [vmem:[#allocation3 + $0xa8] sm:$0xff] }
  0x80   :  { %895 = vmatpush.msra.mxu0 %v855_v48  ;;  %915 = vmatpush.msra.mxu1 %v887_v20  ;;  %v712_v45 = vld [vmem:[#allocation3 + $0x4a8] sm:$0xff]  ;;  %v847_v48 = vld [vmem:[#allocation3 + $0x270] sm:$0xff] }
  0x81   :  { %789 = vmatpush.msrb.mxu2 %v686_v22  ;;  %809 = vmatpush.msrb.mxu3 %v718_v52  ;;  %v879_v20 = vld [vmem:[#allocation3 + $0x670] sm:$0xff]  ;;  %v678_v22 = vld [vmem:[#allocation3 + $0x68] sm:$0xff] }
  0x82   :  { %896 = vmatpush.msra.mxu0 %v853_v26  ;;  %916 = vmatpush.msra.mxu1 %v885_v21  ;;  %v710_v52 = vld [vmem:[#allocation3 + $0x468] sm:$0xff]  ;;  %v845_v26 = vld [vmem:[#allocation3 + $0x230] sm:$0xff] }
  0x83   :  { %790 = vmatpush.msrb.mxu2 %v684_v25  ;;  %810 = vmatpush.msrb.mxu3 %v716_v44  ;;  %v877_v21 = vld [vmem:[#allocation3 + $0x630] sm:$0xff]  ;;  %v676_v44 = vld [vmem:[#allocation3 + $0x28] sm:$0xff] }
  0x84   :  { %897 = vmatpush.msra.mxu0 %v851_v29  ;;  %917 = vmatpush.msra.mxu1 %v883_v30  ;;  %v708_v25 = vld [vmem:[#allocation3 + $0x428] sm:$0xff]  ;;  %v843_v29 = vld [vmem:[#allocation3 + $0x1f0] sm:$0xff] }
  0x85   :  { %791 = vmatpush.msrb.mxu2 %v682_v34  ;;  %811 = vmatpush.msrb.mxu3 %v714_v35  ;;  %v875_v30 = vld [vmem:[#allocation3 + $0x5f0] sm:$0xff]  ;;  %v6267_v34 = vld [vmem:[#allocation3 + $0x3f8] sm:$0xff] }
  0x86   :  { %898 = vmatpush.msra.mxu0 %v849_v38  ;;  %918 = vmatpush.msra.mxu1 %v881_v41  ;;  %11099 = vst [vmem:[#allocation16_spill] sm:$0xff] %v6267_v34  ;;  %v892_v35 = vld [vmem:[#allocation3 + $0x7f8] sm:$0xff]  ;;  %v841_v38 = vld [vmem:[#allocation3 + $0x1b0] sm:$0xff] }
  0x87   :  { %792 = vmatpush.msrb.mxu2 %v680_v42  ;;  %812 = vmatpush.msrb.mxu3 %v712_v45  ;;  %v873_v41 = vld [vmem:[#allocation3 + $0x5b0] sm:$0xff]  ;;  %v6274_v42 = vld [vmem:[%s10492_s2] sm:$0xff]  ;;  %v6276_v45 = vld [vmem:[#allocation3 + $0x3b8] sm:$0xff] }
  0x88   :  { %899 = vmatpush.msra.mxu0 %v847_v48  ;;  %919 = vmatpush.msra.mxu1 %v879_v20  ;;  %11100 = vst [vmem:[#allocation17_spill] sm:$0xff] %v6276_v45  ;;  %v890_v48 = vld [vmem:[#allocation3 + $0x7b8] sm:$0xff]  ;;  %v839_v20 = vld [vmem:[#allocation3 + $0x170] sm:$0xff] }
  0x89   :  { %793 = vmatpush.msrb.mxu2 %v678_v22  ;;  %813 = vmatpush.msrb.mxu3 %v710_v52  ;;  %v871_v22 = vld [vmem:[#allocation3 + $0x570] sm:$0xff]  ;;  %v6279_v52 = vld [vmem:[#allocation3 + $0x378] sm:$0xff] }
  0x8a   :  { %900 = vmatpush.msra.mxu0 %v845_v26  ;;  %920 = vmatpush.msra.mxu1 %v877_v21  ;;  %11101 = vst [vmem:[#allocation18_spill] sm:$0xff] %v6279_v52  ;;  %v888_v26 = vld [vmem:[#allocation3 + $0x778] sm:$0xff]  ;;  %v76_v21 = vperm.slane %v6274_v42, 0 }
  0x8b   :  { %794 = vmatpush.msrb.mxu2 %v676_v44  ;;  %814 = vmatpush.msrb.mxu3 %v708_v25  ;;  %v77_v44 = vperm.slane %v6274_v42, 1  ;;  %v837_v25 = vld [vmem:[#allocation3 + $0x130] sm:$0xff] }
  0x8c   :  { %795 = vmatmul.f32.vlgmr.msrb.gmra.mxu2 %v11098_v37  ;;  %815 = vmatmul.f32.vlgmr.msrb.gmra.mxu3 %v11098_v37 }
  0x8d   :  { %901 = vmatpush.msra.mxu0 %v843_v29  ;;  %921 = vmatpush.msra.mxu1 %v875_v30  ;;  %v869_v29 = vld [vmem:[#allocation3 + $0x530] sm:$0xff]  ;;  %v6284_v30 = vld [vmem:[#allocation3 + $0x338] sm:$0xff] }
  0x8e   :  { %933 = vmatpush.msra.mxu2 %v6267_v34  ;;  %953 = vmatpush.msra.mxu3 %v892_v35  ;;  %v886_v35 = vld [vmem:[#allocation3 + $0x738] sm:$0xff] }
  0x8f   :  { %902 = vmatpush.msra.mxu0 %v841_v38  ;;  %922 = vmatpush.msra.mxu1 %v873_v41  ;;  %v835_v38 = vld [vmem:[#allocation3 + $0xf0] sm:$0xff] }
  0x90   :  { %934 = vmatpush.msra.mxu2 %v6276_v45  ;;  %954 = vmatpush.msra.mxu3 %v890_v48  ;;  %v867_v41 = vld [vmem:[#allocation3 + $0x4f0] sm:$0xff]  ;;  %v884_v45 = vld [vmem:[#allocation3 + $0x6f8] sm:$0xff] }
  0x91   :  { %903 = vmatpush.msra.mxu0 %v839_v20  ;;  %923 = vmatpush.msra.mxu1 %v871_v22  ;;  %v833_v20 = vld [vmem:[#allocation3 + $0xb0] sm:$0xff] }
  0x92   :  { %935 = vmatpush.msra.mxu2 %v6279_v52  ;;  %955 = vmatpush.msra.mxu3 %v888_v26  ;;  %v116_v34 = vpop.f32.mrf.mxu2  ;;  %v139_v49 = vpop.f32.mrf.mxu3  ;;  %v865_v22 = vld [vmem:[#allocation3 + $0x4b0] sm:$0xff]  ;;  %v6290_v52 = vld [vmem:[#allocation3 + $0x2b8] sm:$0xff] }
  0x93   :  { %904 = vmatpush.msra.mxu0 %v837_v25  ;;  %924 = vmatpush.msra.mxu1 %v869_v29  ;;  %v117_v48 = vadd.f32 %v116_v34, %v76_v21  ;;  %v140_v43 = vadd.f32 %v139_v49, %v77_v44  ;;  %11102 = vst [vmem:[#allocation19_spill] sm:$0xff] %v6290_v52  ;;  %v882_v26 = vld [vmem:[#allocation3 + $0x6b8] sm:$0xff]  ;;  %v831_v25 = vld [vmem:[#allocation3 + $0x70] sm:$0xff] }
  0x94   :  { %936 = vmatpush.msra.mxu2 %v6284_v30  ;;  %956 = vmatpush.msra.mxu3 %v886_v35  ;;  %v863_v29 = vld [vmem:[#allocation3 + $0x470] sm:$0xff]  ;;  %v6293_v49 = vld [vmem:[#allocation3 + $0x278] sm:$0xff] }
  0x95   :  { %905 = vmatpush.msra.mxu0 %v835_v38  ;;  %925 = vmatpush.msra.mxu1 %v867_v41  ;;  %283 = vst [vmem:[#allocation2 + $0x30] sm:$0xff] %v117_v48  ;;  %v880_v34 = vld [vmem:[#allocation3 + $0x678] sm:$0xff]  ;;  %v6296_v35 = vld [vmem:[#allocation3 + $0x30] sm:$0xff] }
  0x96   :  { %937 = vmatpush.msra.mxu2 %v6287_v40  ;;  %957 = vmatpush.msra.mxu3 %v884_v45  ;;  %284 = vst [vmem:[#allocation2] sm:$0xff] %v140_v43  ;;  %v861_v38 = vld [vmem:[#allocation3 + $0x430] sm:$0xff]  ;;  %v6298_v41 = vld [vmem:[#allocation3 + $0x238] sm:$0xff] }
  0x97   :  { %906 = vmatpush.msra.mxu0 %v833_v20  ;;  %926 = vmatpush.msra.mxu1 %v865_v22  ;;  %11103 = vst [vmem:[#allocation20_spill] sm:$0xff] %v6293_v49  ;;  %v878_v48 = vld [vmem:[#allocation3 + $0x638] sm:$0xff] }
  0x98   :  { %938 = vmatpush.msra.mxu2 %v6290_v52  ;;  %958 = vmatpush.msra.mxu3 %v882_v26  ;;  %11104 = vst [vmem:[#allocation21_spill] sm:$0xff] %v6296_v35  ;;  %v6304_v26 = vld [vmem:[#allocation3 + $0x1f8] sm:$0xff] }
  0x99   :  { %907 = vmatpush.msra.mxu0 %v831_v25  ;;  %927 = vmatpush.msra.mxu1 %v863_v29  ;;  %11105 = vst [vmem:[#allocation22_spill] sm:$0xff] %v6298_v41  ;;  %v876_v52 = vld [vmem:[#allocation3 + $0x5f8] sm:$0xff] }
  0x9a   :  { %939 = vmatpush.msra.mxu2 %v6293_v49  ;;  %959 = vmatpush.msra.mxu3 %v880_v34  ;;  %v119_v43 = vpop.f32.mrf.mxu2  ;;  %11106 = vst [vmem:[#allocation23_spill] sm:$0xff] %v6304_v26  ;;  %v6309_v34 = vld [vmem:[#allocation3 + $0x1b8] sm:$0xff]  ;;  %v6383_v49 = vld [vmem:[#allocation3 + $0x280] sm:$0xff] }
  0x9b   :  { %v142_v45 = vpop.f32.mrf.mxu3  ;;  %908 = vmatpush.msra.mxu0 %v6296_v35  ;;  %928 = vmatpush.msra.mxu1 %v861_v38  ;;  %v120_v25 = vadd.f32 %v119_v43, %v76_v21  ;;  %11107 = vst [vmem:[#allocation24_spill] sm:$0xff] %v6309_v34  ;;  %v6311_v20 = vld [vmem:[#allocation3 + $0x5b8] sm:$0xff]  ;;  %v11109_v21 = vperm.slane %v6274_v42, 4  ;;  %v11110_v38 = vperm.slane %v6274_v42, 5 }
  0x9c   :  { %v143_v29 = vadd.f32 %v142_v45, %v77_v44  ;;  %940 = vmatpush.msra.mxu2 %v6298_v41  ;;  %960 = vmatpush.msra.mxu3 %v878_v48  ;;  %11108 = vst [vmem:[#allocation25_spill] sm:$0xff] %v6311_v20  ;;  %v6318_v43 = vld [vmem:[#allocation3 + $0x178] sm:$0xff]  ;;  %v6322_v41 = vld [vmem:[#allocation3 + $0x3c0] sm:$0xff] }
  0x9d   :  { %909 = vmatmul.f32.vlgmr.msra.gmra.mxu0 %v11098_v37  ;;  %929 = vmatmul.f32.vlgmr.msra.gmra.mxu1 %v11098_v37  ;;  %291 = vst [vmem:[#allocation2 + $0x40] sm:$0xff] %v120_v25  ;;  %v208_v22 = vpop.f32.mrf.mxu0  ;;  %v231_v35 = vpop.f32.mrf.mxu1  ;;  %v6320_v45 = vld [vmem:[#allocation3 + $0x578] sm:$0xff]  ;;  %v4923_v25 = vld [vmem:[#allocation3 + $0x7c0] sm:$0xff] }
  0x9e   :  { %941 = vmatpush.msra.mxu2 %v6304_v26  ;;  %961 = vmatpush.msra.mxu3 %v876_v52  ;;  %292 = vst [vmem:[#allocation2 + $0x20] sm:$0xff] %v143_v29  ;;  %v209_v44 = vadd.f32 %v208_v22, %v11109_v21  ;;  %v232_v48 = vadd.f32 %v231_v35, %v11110_v38  ;;  %v6327_v52 = vld [vmem:[#allocation3 + $0x138] sm:$0xff]  ;;  %v6331_v35 = vld [vmem:[#allocation3 + $0x380] sm:$0xff] }
  0x9f   :  { %11111 = vst [vmem:[#allocation26_spill] sm:$0xff] %v6318_v43  ;;  %1025 = vmatpush.msrb.mxu0 %v6322_v41  ;;  %1045 = vmatpush.msrb.mxu1 %v4923_v25  ;;  %v6329_v22 = vld [vmem:[#allocation3 + $0x538] sm:$0xff]  ;;  %v4925_v29 = vld [vmem:[#allocation3 + $0x780] sm:$0xff] }
  0xa0   :  { %11112 = vst [vmem:[#allocation27_spill] sm:$0xff] %v6320_v45  ;;  %942 = vmatpush.msra.mxu2 %v6309_v34  ;;  %962 = vmatpush.msra.mxu3 %v6311_v20  ;;  %v6340_v25 = vld [vmem:[#allocation3 + $0x4f8] sm:$0xff]  ;;  %v6342_v20 = vld [vmem:[#allocation3 + $0x340] sm:$0xff] }
  0xa1   :  { %11113 = vst [vmem:[#allocation28_spill] sm:$0xff] %v6322_v41  ;;  %1026 = vmatpush.msrb.mxu0 %v6331_v35  ;;  %1046 = vmatpush.msrb.mxu1 %v4925_v29  ;;  %v6347_v29 = vld [vmem:[#allocation3 + $0xb8] sm:$0xff]  ;;  %v6354_v41 = vld [vmem:[#allocation3 + $0x700] sm:$0xff] }
  0xa2   :  { %287 = vst [vmem:[#allocation2 + $0x50] sm:$0xff] %v209_v44  ;;  %943 = vmatpush.msra.mxu2 %v6318_v43  ;;  %963 = vmatpush.msra.mxu3 %v6320_v45  ;;  %v6338_v44 = vld [vmem:[#allocation3 + $0xf8] sm:$0xff]  ;;  %v6367_v26 = vld [vmem:[#allocation3 + $0x2c0] sm:$0xff] }
  0xa3   :  { %11114 = vst [vmem:[#allocation29_spill] sm:$0xff] %v6327_v52  ;;  %1027 = vmatpush.msrb.mxu0 %v6342_v20  ;;  %v6349_v45 = vld [vmem:[#allocation3 + $0x4b8] sm:$0xff] }
  0xa4   :  { %11115 = vst [vmem:[#allocation30_spill] sm:$0xff] %v6329_v22  ;;  %944 = vmatpush.msra.mxu2 %v6327_v52  ;;  %964 = vmatpush.msra.mxu3 %v6329_v22  ;;  %v6363_v43 = vld [vmem:[#allocation3 + $0x78] sm:$0xff] }
  0xa5   :  { %288 = vst [vmem:[#allocation2 + $0x68] sm:$0xff] %v232_v48  ;;  %v4927_v48 = vld [vmem:[#allocation3 + $0x740] sm:$0xff]  ;;  %v162_v21 = vpop.f32.mrf.mxu2  ;;  %v185_v38 = vpop.f32.mrf.mxu3  ;;  %v6365_v34 = vld [vmem:[#allocation3 + $0x478] sm:$0xff] }
  0xa6   :  { %11116 = vst [vmem:[#allocation31_spill] sm:$0xff] %v6331_v35  ;;  %1047 = vmatpush.msrb.mxu1 %v4927_v48  ;;  %v6351_v35 = vld [vmem:[#allocation3 + $0x300] sm:$0xff]  ;;  %945 = vmatpush.msra.mxu2 %v6338_v44  ;;  %v11123_v48 = vperm.slane %v6274_v42, 2 }
  0xa7   :  { %11117 = vst [vmem:[#allocation32_spill] sm:$0xff] %v6338_v44  ;;  %1028 = vmatpush.msrb.mxu0 %v6351_v35  ;;  %965 = vmatpush.msra.mxu3 %v6340_v25 }
  0xa8   :  { %11118 = vst [vmem:[#allocation33_spill] sm:$0xff] %v6340_v25  ;;  %1048 = vmatpush.msrb.mxu1 %v6354_v41  ;;  %v163_v22 = vadd.f32 %v162_v21, %v11123_v48  ;;  %946 = vmatpush.msra.mxu2 %v6347_v29  ;;  %v211_v21 = vpop.f32.mrf.mxu0  ;;  %v234_v48 = vpop.f32.mrf.mxu1 }
  0xa9   :  { %11119 = vst [vmem:[#allocation34_spill] sm:$0xff] %v6342_v20  ;;  %v11124_v20 = vperm.slane %v6274_v42, 3  ;;  %1029 = vmatpush.msrb.mxu0 %v6367_v26  ;;  %966 = vmatpush.msra.mxu3 %v6349_v45 }
  0xaa   :  { %11120 = vst [vmem:[#allocation35_spill] sm:$0xff] %v6349_v45  ;;  %947 = vmatpush.msra.mxu2 %v6363_v43  ;;  %v6420_v45 = vld [vmem:[#allocation3 + $0x1c0] sm:$0xff] }
  0xab   :  { %11121 = vst [vmem:[#allocation36_spill] sm:$0xff] %v6351_v35  ;;  %v186_v52 = vadd.f32 %v185_v38, %v11124_v20  ;;  %v6370_v35 = vld [vmem:[#allocation3 + $0x6c0] sm:$0xff]  ;;  %v6375_v20 = vld [vmem:[#allocation3 + $0x38] sm:$0xff]  ;;  %1030 = vmatpush.msrb.mxu0 %v6383_v49  ;;  %967 = vmatpush.msra.mxu3 %v6365_v34 }
  0xac   :  { %11122 = vst [vmem:[#allocation37_spill] sm:$0xff] %v6354_v41  ;;  %1049 = vmatpush.msrb.mxu1 %v6370_v35  ;;  %v6377_v38 = vld [vmem:[#allocation3 + $0x438] sm:$0xff]  ;;  %v11129_v41 = vperm.slane %v6274_v42, 4  ;;  %948 = vmatpush.msra.mxu2 %v6375_v20 }
  0xad   :  { %11125 = vst [vmem:[#allocation38_spill] sm:$0xff] %v6365_v34  ;;  %968 = vmatpush.msra.mxu3 %v6377_v38  ;;  %949 = vmatmul.f32.vlgmr.msra.gmra.mxu2 %v11098_v37  ;;  %v6417_v34 = vld [vmem:[#allocation3 + $0x388] sm:$0xff] }
  0xae   :  { %11126 = vst [vmem:[#allocation39_spill] sm:$0xff] %v6367_v26  ;;  %v212_v25 = vadd.f32 %v211_v21, %v11129_v41  ;;  %v11130_v26 = vperm.slane %v6274_v42, 5  ;;  %v6394_v41 = vld [vmem:[#allocation3 + $0x640] sm:$0xff]  ;;  %969 = vmatmul.f32.vlgmr.msra.gmra.mxu3 %v11098_v37  ;;  %v11138_v37 = vperm.slane %v6274_v42, 2 }
  0xaf   :  { %11127 = vst [vmem:[#allocation40_spill] sm:$0xff] %v6370_v35  ;;  %v6386_v35 = vld [vmem:[#allocation3 + $0x680] sm:$0xff]  ;;  %v188_v21 = vpop.f32.mrf.mxu3 }
  0xb0   :  { %285 = vst [vmem:[#allocation2 + $0x58] sm:$0xff] %v163_v22  ;;  %v235_v44 = vadd.f32 %v234_v48, %v11130_v26  ;;  %1050 = vmatpush.msrb.mxu1 %v6386_v35  ;;  %v6401_v26 = vld [vmem:[#allocation3 + $0x3c8] sm:$0xff]  ;;  %v6404_v22 = vld [vmem:[#allocation3 + $0x200] sm:$0xff] }
  0xb1   :  { %11128 = vst [vmem:[#allocation41_spill] sm:$0xff] %v6377_v38  ;;  %1065 = vmatpush.msrb.mxu2 %v6401_v26  ;;  %v6407_v48 = vld [vmem:[#allocation3 + $0x7c8] sm:$0xff] }
  0xb2   :  { %286 = vst [vmem:[#allocation2 + $0x18] sm:$0xff] %v186_v52  ;;  %v6391_v52 = vld [vmem:[#allocation3 + $0x240] sm:$0xff]  ;;  %1051 = vmatpush.msrb.mxu1 %v6394_v41  ;;  %1085 = vmatpush.msrb.mxu3 %v6407_v48 }
  0xb3   :  { %11131 = vst [vmem:[#allocation42_spill] sm:$0xff] %v6383_v49  ;;  %1031 = vmatpush.msrb.mxu0 %v6391_v52  ;;  %1066 = vmatpush.msrb.mxu2 %v6417_v34  ;;  %v6479_v49 = vld [vmem:[#allocation3 + $0x248] sm:$0xff] }
  0xb4   :  { %11132 = vst [vmem:[#allocation43_spill] sm:$0xff] %v6386_v35  ;;  %v11139_v35 = vperm.slane %v6274_v42, 3 }
  0xb5   :  { %295 = vst [vmem:[#allocation2 + $0x60] sm:$0xff] %v212_v25  ;;  %1032 = vmatpush.msrb.mxu0 %v6404_v22  ;;  %v165_v25 = vpop.f32.mrf.mxu2 }
  0xb6   :  { %11133 = vst [vmem:[#allocation44_spill] sm:$0xff] %v6391_v52  ;;  %v189_v38 = vadd.f32 %v188_v21, %v11139_v35  ;;  %v6432_v35 = vld [vmem:[#allocation3 + $0x180] sm:$0xff]  ;;  %v6435_v21 = vld [vmem:[#allocation3 + $0x748] sm:$0xff] }
  0xb7   :  { %11134 = vst [vmem:[#allocation45_spill] sm:$0xff] %v6394_v41  ;;  %v6410_v41 = vld [vmem:[#allocation3 + $0x600] sm:$0xff]  ;;  %1033 = vmatpush.msrb.mxu0 %v6420_v45 }
  0xb8   :  { %296 = vst [vmem:[#allocation2 + $0x70] sm:$0xff] %v235_v44  ;;  %1052 = vmatpush.msrb.mxu1 %v6410_v41  ;;  %v166_v44 = vadd.f32 %v165_v25, %v11138_v37  ;;  %v6429_v25 = vld [vmem:[#allocation3 + $0x348] sm:$0xff]  ;;  %v6438_v37 = vld [vmem:[#allocation3 + $0x580] sm:$0xff] }
  0xb9   :  { %11135 = vst [vmem:[#allocation46_spill] sm:$0xff] %v6404_v22  ;;  %v6423_v22 = vld [vmem:[#allocation3 + $0x788] sm:$0xff]  ;;  %1067 = vmatpush.msrb.mxu2 %v6429_v25  ;;  %1034 = vmatpush.msrb.mxu0 %v6432_v35 }
  0xba   :  { %11136 = vst [vmem:[#allocation47_spill] sm:$0xff] %v6407_v48  ;;  %1086 = vmatpush.msrb.mxu3 %v6423_v22  ;;  %v6426_v48 = vld [vmem:[#allocation3 + $0x5c0] sm:$0xff]  ;;  %v277_v52 = vpop.f32.mrf.mxu3 }
  0xbb   :  { %11137 = vst [vmem:[#allocation48_spill] sm:$0xff] %v6410_v41  ;;  %1053 = vmatpush.msrb.mxu1 %v6426_v48  ;;  %v6441_v41 = vld [vmem:[#allocation3 + $0x308] sm:$0xff] }
  0xbc   :  { %11140 = vst [vmem:[#allocation49_spill] sm:$0xff] %v6420_v45  ;;  %1087 = vmatpush.msrb.mxu3 %v6435_v21  ;;  %1068 = vmatpush.msrb.mxu2 %v6441_v41  ;;  %v6470_v45 = vld [vmem:[#allocation3 + $0xc0] sm:$0xff] }
  0xbd   :  { %11141 = vst [vmem:[#allocation50_spill] sm:$0xff] %v6423_v22  ;;  %1054 = vmatpush.msrb.mxu1 %v6438_v37  ;;  %v82_v22 = vperm.slane %v6274_v42, 6 }
  0xbe   :  { %11142 = vst [vmem:[#allocation51_spill] sm:$0xff] %v6426_v48  ;;  %v6447_v48 = vld [vmem:[#allocation3 + $0x708] sm:$0xff] }
  0xbf   :  { %293 = vst [vmem:[#allocation2 + $0x10] sm:$0xff] %v166_v44  ;;  %v6444_v44 = vld [vmem:[#allocation3 + $0x140] sm:$0xff]  ;;  %1088 = vmatpush.msrb.mxu3 %v6447_v48 }
  0xc0   :  { %11143 = vst [vmem:[#allocation52_spill] sm:$0xff] %v6432_v35  ;;  %1035 = vmatpush.msrb.mxu0 %v6444_v44  ;;  %v6461_v35 = vld [vmem:[#allocation3 + $0x6c8] sm:$0xff] }
  0xc1   :  { %294 = vst [vmem:[#allocation2 + $0x38] sm:$0xff] %v189_v38  ;;  %v6450_v38 = vld [vmem:[#allocation3 + $0x540] sm:$0xff]  ;;  %1089 = vmatpush.msrb.mxu3 %v6461_v35 }
  0xc2   :  { %11144 = vst [vmem:[#allocation53_spill] sm:$0xff] %v6435_v21  ;;  %1055 = vmatpush.msrb.mxu1 %v6450_v38  ;;  %v6453_v21 = vld [vmem:[#allocation3 + $0x2c8] sm:$0xff] }
  0xc3   :  { %11145 = vst [vmem:[#allocation54_spill] sm:$0xff] %v6438_v37  ;;  %1069 = vmatpush.msrb.mxu2 %v6453_v21  ;;  %v6456_v37 = vld [vmem:[#allocation3 + $0x100] sm:$0xff] }
  0xc4   :  { %11146 = vst [vmem:[#allocation55_spill] sm:$0xff] %v6441_v41  ;;  %1036 = vmatpush.msrb.mxu0 %v6456_v37  ;;  %v6494_v41 = vld [vmem:[#allocation3 + $0x40] sm:$0xff] }
  0xc5   :  { %11147 = vst [vmem:[#allocation56_spill] sm:$0xff] %v6444_v44  ;;  %v83_v44 = vperm.slane %v6274_v42, 7  ;;  %v6476_v42 = vld [vmem:[#allocation3 + $0x4c0] sm:$0xff] }
  0xc6   :  { %11148 = vst [vmem:[#allocation57_spill] sm:$0xff] %v6447_v48  ;;  %v6464_v48 = vld [vmem:[#allocation3 + $0x500] sm:$0xff]  ;;  %1037 = vmatpush.msrb.mxu0 %v6470_v45 }
  0xc7   :  { %11149 = vst [vmem:[#allocation58_spill] sm:$0xff] %v6450_v38  ;;  %1056 = vmatpush.msrb.mxu1 %v6464_v48  ;;  %v6467_v38 = vld [vmem:[#allocation3 + $0x288] sm:$0xff] }
  0xc8   :  { %11150 = vst [vmem:[#allocation59_spill] sm:$0xff] %v6453_v21  ;;  %1070 = vmatpush.msrb.mxu2 %v6467_v38  ;;  %v6485_v21 = vld [vmem:[#allocation3 + $0x648] sm:$0xff] }
  0xc9   :  { %11151 = vst [vmem:[#allocation60_spill] sm:$0xff] %v6456_v37  ;;  %v6473_v37 = vld [vmem:[#allocation3 + $0x688] sm:$0xff]  ;;  %1057 = vmatpush.msrb.mxu1 %v6476_v42 }
  0xca   :  { %11152 = vst [vmem:[#allocation61_spill] sm:$0xff] %v6461_v35  ;;  %1090 = vmatpush.msrb.mxu3 %v6473_v37  ;;  %v254_v35 = vpop.f32.mrf.mxu2  ;;  %1071 = vmatpush.msrb.mxu2 %v6479_v49 }
  0xcb   :  { %11153 = vst [vmem:[#allocation62_spill] sm:$0xff] %v6464_v48  ;;  %v6482_v48 = vld [vmem:[#allocation3 + $0x80] sm:$0xff] }
  0xcc   :  { %11154 = vst [vmem:[#allocation63_spill] sm:$0xff] %v6467_v38  ;;  %1038 = vmatpush.msrb.mxu0 %v6482_v48  ;;  %v255_v38 = vadd.f32 %v254_v35, %v82_v22  ;;  %1091 = vmatpush.msrb.mxu3 %v6485_v21  ;;  %v6503_v35 = vld [vmem:[#allocation3 + $0x1c8] sm:$0xff] }
  0xcd   :  { %11155 = vst [vmem:[#allocation64_spill] sm:$0xff] %v6470_v45  ;;  %v278_v45 = vadd.f32 %v277_v52, %v83_v44  ;;  %v6500_v52 = vld [vmem:[#allocation3 + $0x440] sm:$0xff] }
  0xce   :  { %11156 = vst [vmem:[#allocation65_spill] sm:$0xff] %v6473_v37  ;;  %v6488_v37 = vld [vmem:[#allocation3 + $0x480] sm:$0xff]  ;;  %1039 = vmatpush.msrb.mxu0 %v6494_v41 }
  0xcf   :  { %11157 = vst [vmem:[#allocation66_spill] sm:$0xff] %v6476_v42  ;;  %1058 = vmatpush.msrb.mxu1 %v6488_v37  ;;  %v6491_v42 = vld [vmem:[#allocation3 + $0x208] sm:$0xff] }
  0xd0   :  { %11158 = vst [vmem:[#allocation67_spill] sm:$0xff] %v6479_v49  ;;  %1072 = vmatpush.msrb.mxu2 %v6491_v42  ;;  %v6548_v49 = vld [vmem:[#allocation3 + $0x508] sm:$0xff] }
  0xd1   :  { %11159 = vst [vmem:[#allocation68_spill] sm:$0xff] %v6482_v48  ;;  %v6497_v48 = vld [vmem:[#allocation3 + $0x608] sm:$0xff]  ;;  %1059 = vmatpush.msrb.mxu1 %v6500_v52 }
  0xd2   :  { %11160 = vst [vmem:[#allocation69_spill] sm:$0xff] %v6485_v21  ;;  %1092 = vmatpush.msrb.mxu3 %v6497_v48  ;;  %1073 = vmatpush.msrb.mxu2 %v6503_v35  ;;  %v6509_v21 = vld [vmem:[#allocation3 + $0x3d0] sm:$0xff] }
  0xd3   :  { %11161 = vst [vmem:[#allocation70_spill] sm:$0xff] %v6488_v37  ;;  %v6506_v37 = vld [vmem:[#allocation3] sm:$0xff] }
  0xd4   :  { %11162 = vst [vmem:[#allocation71_spill] sm:$0xff] %v6491_v42  ;;  %1040 = vmatpush.msrb.mxu0 %v6506_v37  ;;  %v6539_v42 = vld [vmem:[#allocation3 + $0x108] sm:$0xff] }
  0xd5   :  { %11163 = vst [vmem:[#allocation72_spill] sm:$0xff] %v6494_v41  ;;  %v257_v41 = vpop.f32.mrf.mxu2 }
  0xd6   :  { %289 = vst [vmem:[#allocation2 + $0x8] sm:$0xff] %v255_v38  ;;  %1151 = vmatpush.msra.mxu0 %v6509_v21  ;;  %v6512_v38 = vld [vmem:[#allocation3 + $0x5c8] sm:$0xff] }
  0xd7   :  { %11164 = vst [vmem:[#allocation73_spill] sm:$0xff] %v6497_v48  ;;  %1093 = vmatpush.msrb.mxu3 %v6512_v38  ;;  %v6515_v48 = vld [vmem:[#allocation3 + $0x188] sm:$0xff] }
  0xd8   :  { %11165 = vst [vmem:[#allocation74_spill] sm:$0xff] %v6500_v52  ;;  %1074 = vmatpush.msrb.mxu2 %v6515_v48  ;;  %v6521_v52 = vld [vmem:[#allocation3 + $0x390] sm:$0xff] }
  0xd9   :  { %290 = vst [vmem:[#allocation2 + $0x48] sm:$0xff] %v278_v45  ;;  %v6518_v45 = vld [vmem:[#allocation3 + $0x400] sm:$0xff]  ;;  %1152 = vmatpush.msra.mxu0 %v6521_v52 }
  0xda   :  { %11166 = vst [vmem:[#allocation75_spill] sm:$0xff] %v6503_v35  ;;  %1060 = vmatpush.msrb.mxu1 %v6518_v45  ;;  %v6533_v35 = vld [vmem:[#allocation3 + $0x350] sm:$0xff] }
  0xdb   :  { %11167 = vst [vmem:[#allocation76_spill] sm:$0xff] %v6506_v37  ;;  %v6524_v37 = vld [vmem:[#allocation3 + $0x588] sm:$0xff]  ;;  %1153 = vmatpush.msra.mxu0 %v6533_v35 }
  0xdc   :  { %11168 = vst [vmem:[#allocation77_spill] sm:$0xff] %v6509_v21  ;;  %1094 = vmatpush.msrb.mxu3 %v6524_v37  ;;  %v6527_v21 = vld [vmem:[#allocation3 + $0x148] sm:$0xff] }
  0xdd   :  { %11169 = vst [vmem:[#allocation78_spill] sm:$0xff] %v6512_v38  ;;  %1075 = vmatpush.msrb.mxu2 %v6527_v21  ;;  %v6530_v38 = vld [vmem:[#allocation3 + $0x7d0] sm:$0xff] }
  0xde   :  { %11170 = vst [vmem:[#allocation79_spill] sm:$0xff] %v6515_v48  ;;  %1171 = vmatpush.msra.mxu1 %v6530_v38  ;;  %v280_v48 = vpop.f32.mrf.mxu3 }
  0xdf   :  { %11171 = vst [vmem:[#allocation80_spill] sm:$0xff] %v6518_v45  ;;  %v6536_v45 = vld [vmem:[#allocation3 + $0x548] sm:$0xff]  ;;  %1076 = vmatpush.msrb.mxu2 %v6539_v42 }
  0xe0   :  { %11172 = vst [vmem:[#allocation81_spill] sm:$0xff] %v6521_v52  ;;  %1095 = vmatpush.msrb.mxu3 %v6536_v45  ;;  %v258_v52 = vadd.f32 %v257_v41, %v82_v22  ;;  %v6554_v41 = vld [vmem:[#allocation3 + $0x750] sm:$0xff] }
  0xe1   :  { %11173 = vst [vmem:[#allocation82_spill] sm:$0xff] %v6524_v37  ;;  %v281_v37 = vadd.f32 %v280_v48, %v83_v44  ;;  %v6557_v22 = vld [vmem:[#allocation3 + $0x2d0] sm:$0xff]  ;;  %v6560_v48 = vld [vmem:[#allocation3 + $0x4c8] sm:$0xff] }
  0xe2   :  { %11174 = vst [vmem:[#allocation83_spill] sm:$0xff] %v6527_v21  ;;  %v6542_v21 = vld [vmem:[#allocation3 + $0x790] sm:$0xff]  ;;  %1096 = vmatpush.msrb.mxu3 %v6548_v49  ;;  %v6563_v44 = vld [vmem:[#allocation3 + $0x88] sm:$0xff] }
  0xe3   :  { %11175 = vst [vmem:[#allocation84_spill] sm:$0xff] %v6530_v38  ;;  %1172 = vmatpush.msra.mxu1 %v6542_v21  ;;  %v6545_v38 = vld [vmem:[#allocation3 + $0x310] sm:$0xff] }
  0xe4   :  { %11176 = vst [vmem:[#allocation85_spill] sm:$0xff] %v6536_v45  ;;  %1154 = vmatpush.msra.mxu0 %v6545_v38  ;;  %v6551_v45 = vld [vmem:[#allocation3 + $0xc8] sm:$0xff]  ;;  %1097 = vmatpush.msrb.mxu3 %v6560_v48 }
  0xe5   :  { %11177 = vst [vmem:[#allocation86_spill] sm:$0xff] %v6542_v21  ;;  %1077 = vmatpush.msrb.mxu2 %v6551_v45  ;;  %1173 = vmatpush.msra.mxu1 %v6554_v41  ;;  %v6569_v21 = vld [vmem:[#allocation3 + $0x290] sm:$0xff] }
  0xe6   :  { %297 = vst [vmem:[#allocation2 + $0x78] sm:$0xff] %v258_v52  ;;  %1155 = vmatpush.msra.mxu0 %v6557_v22  ;;  %v6566_v52 = vld [vmem:[#allocation3 + $0x710] sm:$0xff] }
  0xe7   :  { %11178 = vst [vmem:[#allocation87_spill] sm:$0xff] %v6554_v41  ;;  %1078 = vmatpush.msrb.mxu2 %v6563_v44  ;;  %1174 = vmatpush.msra.mxu1 %v6566_v52  ;;  %v6576_v41 = vld [vmem:[#allocation3 + $0x6d0] sm:$0xff] }
  0xe8   :  { %298 = vst [vmem:[#allocation2 + $0x28] sm:$0xff] %v281_v37  ;;  %1156 = vmatpush.msra.mxu0 %v6569_v21  ;;  %v6572_v37 = vld [vmem:[#allocation3 + $0x488] sm:$0xff] }
  0xe9   :  { %11179 = vst [vmem:[#allocation88_spill] sm:$0xff] %v6560_v48  ;;  %1098 = vmatpush.msrb.mxu3 %v6572_v37  ;;  %1079 = vmatpush.msrb.mxu2 %v6106_v46  ;;  %v6579_v48 = vld [vmem:[#allocation3 + $0x250] sm:$0xff] }
  0xea   :  { %11180 = vst [vmem:[#allocation89_spill] sm:$0xff] %v6566_v52  ;;  %1175 = vmatpush.msra.mxu1 %v6576_v41  ;;  %1157 = vmatpush.msra.mxu0 %v6579_v48  ;;  %v6584_v52 = vld [vmem:[#allocation3 + $0x690] sm:$0xff] }
  0xeb   :  { %11181 = vst [vmem:[#allocation90_spill] sm:$0xff] %v6572_v37  ;;  %1099 = vmatpush.msrb.mxu3 %v6108_v47  ;;  %1080 = vmatpush.msrb.mxu2 %v6110_v50  ;;  %v6588_v37 = vld [vmem:[#allocation3 + $0x210] sm:$0xff] }
  0xec   :  { %1176 = vmatpush.msra.mxu1 %v6584_v52  ;;  %1158 = vmatpush.msra.mxu0 %v6588_v37  ;;  %v6592_v46 = vld [vmem:[#allocation3 + $0x650] sm:$0xff] }
  0xed   :  { %1191 = vmatpush.msra.mxu2 %v6118_v53  ;;  %1100 = vmatpush.msrb.mxu3 %v6112_v31  ;;  %v6598_v47 = vld [vmem:[#allocation3 + $0x610] sm:$0xff]  ;;  %v11184_v53 = vld [vmem:[#allocation12_spill] sm:$0xff] }
  0xee   :  { %1177 = vmatpush.msra.mxu1 %v6592_v46  ;;  %1159 = vmatpush.msra.mxu0 %v6116_v51  ;;  %v6604_v50 = vld [vmem:[#allocation3 + $0x5d0] sm:$0xff]  ;;  %v11183_v51 = vld [vmem:[#allocation9_spill] sm:$0xff] }
  0xef   :  { %1192 = vmatpush.msra.mxu2 %v6131_v57  ;;  %1211 = vmatpush.msra.mxu3 %v6120_v54  ;;  %v11182_v31 = vld [vmem:[#allocation10_spill] sm:$0xff]  ;;  %v11185_v54 = vld [vmem:[#allocation11_spill] sm:$0xff] }
  0xf0   :  { %1178 = vmatpush.msra.mxu1 %v6598_v47  ;;  %1160 = vmatpush.msra.mxu0 %v6125_v55  ;;  %v388_v55 = vpop.f32.mrf.mxu0  ;;  %v11186_v57 = vld [vmem:[#allocation14_spill] sm:$0xff] }
  0xf1   :  { %1193 = vmatpush.msra.mxu2 %v6143_v61  ;;  %1212 = vmatpush.msra.mxu3 %v6133_v58  ;;  %v11187_v58 = vld [vmem:[#allocation13_spill] sm:$0xff] }
  0xf2   :  { %1179 = vmatpush.msra.mxu1 %v6604_v50  ;;  %1161 = vmatpush.msra.mxu0 %v6137_v59  ;;  %v11188_v59 = vld [vmem:[#allocation15_spill] sm:$0xff] }
  0xf3   :  { %1194 = vmatpush.msra.mxu2 %v6155_v1  ;;  %1213 = vmatpush.msra.mxu3 %v6145_v62 }
  0xf4   :  { %1180 = vmatpush.msra.mxu1 %v6127_v56  ;;  %1162 = vmatpush.msra.mxu0 %v6149_v63  ;;  %v408_v56 = vpop.f32.mrf.mxu1 }
  0xf5   :  { %1195 = vmatpush.msra.mxu2 %v6167_v5  ;;  %1214 = vmatpush.msra.mxu3 %v6157_v2  ;;  %v409_v62 = vadd.f32 %v408_v56, %v388_v55  ;;  %v301_v2 = vld [vmem:[#allocation2 + $0x58] sm:$0x3] }
  0xf6   :  { %1181 = vmatpush.msra.mxu1 %v6139_v60  ;;  %1163 = vmatpush.msra.mxu0 %v6161_v3 }
  0xf7   :  { %1196 = vmatpush.msra.mxu2 %v6179_v9  ;;  %1215 = vmatpush.msra.mxu3 %v6169_v6  ;;  %v428_v6 = vpop.f32.mrf.mxu2 }
  0xf8   :  { %1182 = vmatpush.msra.mxu1 %v6151_v0  ;;  %1164 = vmatpush.msra.mxu0 %v6173_v7  ;;  %v572_v60 = vpop.f32.mrf.mxu0  ;;  %v299_v0 = vld [vmem:[#allocation2 + $0x30] sm:$0x3]  ;;  %v448_v7 = vpop.f32.mrf.mxu3 }
  0xf9   :  { %1197 = vmatpush.msra.mxu2 %v6191_v13  ;;  %1216 = vmatpush.msra.mxu3 %v6181_v10  ;;  %v451_v1 = vadd.f32 %v409_v62, %v299_v0  ;;  %v449_v13 = vadd.f32 %v448_v7, %v428_v6 }
  0xfa   :  { %1183 = vmatpush.msra.mxu1 %v6163_v4  ;;  %1165 = vmatpush.msra.mxu0 %v6185_v11 }
  0xfb   :  { %1198 = vmatpush.msra.mxu2 %v6203_v18  ;;  %1217 = vmatpush.msra.mxu3 %v6193_v14  ;;  %v4608_v4 = vmul.f32 -1.442695, %v451_v1 }
  0xfc   :  { %1184 = vmatpush.msra.mxu1 %v6175_v8  ;;  %1166 = vmatpush.msra.mxu0 %v6197_v15  ;;  %v592_v61 = vpop.f32.mrf.mxu1 }
  0xfd   :  { %1199 = vmatpush.msra.mxu2 %v6213_v23  ;;  %1218 = vmatpush.msra.mxu3 %v6205_v19  ;;  %v593_v63 = vadd.f32 %v592_v61, %v572_v60  ;;  %4662 = vpow2.f32 %v4608_v4  ;;  %v302_v19 = vld [vmem:[#allocation2 + $0x18] sm:$0x3]  ;;  %v303_v61 = vld [vmem:[#allocation2 + $0x50] sm:$0x3] }
  0xfe   :  { %1185 = vmatpush.msra.mxu1 %v6187_v12 }
  0xff   :  { %1200 = vmatpush.msra.mxu2 %v6219_v27  ;;  %1219 = vmatpush.msra.mxu3 %v6215_v24  ;;  %v635_v3 = vadd.f32 %v593_v63, %v301_v2  ;;  %v612_v10 = vpop.f32.mrf.mxu2 }
 0x100   :  { %1186 = vmatpush.msra.mxu1 %v6199_v17  ;;  %v632_v11 = vpop.f32.mrf.mxu3  ;;  %v300_v17 = vld [vmem:[#allocation2] sm:$0x3]  ;;  %v756_v24 = vpop.f32.mrf.mxu0 }
 0x101   :  { %1201 = vmatpush.msra.mxu2 %v6225_v32  ;;  %1220 = vmatpush.msra.mxu3 %v6221_v28  ;;  %v4610_v5 = vmul.f32 -1.442695, %v635_v3  ;;  %v633_v15 = vadd.f32 %v632_v11, %v612_v10  ;;  %v452_v18 = vadd.f32 %v449_v13, %v300_v17 }
 0x103   :  { %1202 = vmatpush.msra.mxu2 %v6231_v36  ;;  %1221 = vmatpush.msra.mxu3 %v6227_v33  ;;  %4664 = vpow2.f32 %v4610_v5  ;;  %v4663_v8 = vpop.eup %4662  ;;  %v636_v23 = vadd.f32 %v633_v15, %v302_v19  ;;  %v4609_v28 = vmul.f32 -1.442695, %v452_v18 }
 0x104   :  { %v6647_v12 = vadd.f32 1.0, %v4663_v8  ;;  %v776_v27 = vpop.f32.mrf.mxu1 }
 0x105   :  { %1203 = vmatpush.msra.mxu2 %v6237_v39  ;;  %1222 = vmatpush.msra.mxu3 %v6233_v16  ;;  %v4611_v33 = vmul.f32 -1.442695, %v636_v23 }
 0x106   :  { %4666 = vrcp.f32 %v6647_v12  ;;  %vm466_vm3 = vweird.f32 %v6647_v12  ;;  %v472_v7 = vand.u32 2147483648, %v6647_v12 }
 0x107   :  { %1204 = vmatpush.msra.mxu2 %v11182_v31  ;;  %1223 = vmatpush.msra.mxu3 %v11183_v51 }
 0x109   :  { %1205 = vmatpush.msra.mxu2 %v11184_v53  ;;  %1224 = vmatpush.msra.mxu3 %v11185_v54  ;;  %v4665_v9 = vpop.eup %4664  ;;  %v777_v53 = vadd.f32 %v776_v27, %v756_v24 }
 0x10a   :  { %v643_v14 = vadd.f32 1.0, %v4665_v9  ;;  %v470_v9 = vand.u32 2147483647, %v6647_v12 }
 0x10b   :  { %1206 = vmatpush.msra.mxu2 %v11186_v57  ;;  %1225 = vmatpush.msra.mxu3 %v11187_v58  ;;  %v305_v57 = vld [vmem:[#allocation2 + $0x8] sm:$0x3]  ;;  %v819_v62 = vadd.f32 %v777_v53, %v303_v61 }
 0x10c   :  { %4668 = vrcp.f32 %v643_v14  ;;  %v4667_v32 = vpop.eup %4666  ;;  %v656_v6 = vand.u32 2147483648, %v643_v14  ;;  %vm650_vm4 = vweird.f32 %v643_v14  ;;  %v654_v10 = vand.u32 2147483647, %v643_v14  ;;  %v306_v61 = vld [vmem:[#allocation2 + $0x48] sm:$0x3] }
 0x10d   :  { %1226 = vmatpush.msra.mxu3 %v11188_v59  ;;  %4670 = vpow2.f32 %v4609_v28  ;;  %v462_v16 = vmul.f32 %v4667_v32, %v6647_v12  ;;  %vm467_vm1 = vweird.f32 %v4667_v32  ;;  %v473_v28 = vor.u32 1.1754944e-38, %v472_v7 }
 0x10e   :  { %4672 = vpow2.f32 %v4611_v33  ;;  %vm6659_vm5 = vmor %vm466_vm3, %vm467_vm1  ;;  %v657_v27 = vor.u32 1.1754944e-38, %v656_v6  ;;  %vm471_vm7 = vcmp.eq.f32.partialorder %v470_v9, 8.507059e+37  ;;  %vm655_vm8 = vcmp.eq.f32.partialorder %v654_v10, 8.507059e+37 }
 0x10f   :  { %v463_v55 = vsub.f32 1.0, %v462_v16  ;;  %v796_v18 = vpop.f32.mrf.mxu2  ;;  %v816_v19 = vpop.f32.mrf.mxu3 }
 0x111   :  { %v464_v2 = vmul.f32 %v4667_v32, %v463_v55 }
 0x112   :  { %v4669_v36 = vpop.eup %4668 }
 0x113   :  { %v646_v39 = vmul.f32 %v4669_v36, %v643_v14  ;;  %v4671_v58 = vpop.eup %4670  ;;  %v465_v4 = vadd.f32 %v4667_v32, %v464_v2  ;;  %vm651_vm2 = vweird.f32 %v4669_v36 }
 0x114   :  { %v4673_v60 = vpop.eup %4672  ;;  %v6651_v0 = vadd.f32 1.0, %v4671_v58  ;;  %vm6664_vm6 = vmor %vm650_vm4, %vm651_vm2 }
 0x115   :  { %v647_v56 = vsub.f32 1.0, %v646_v39  ;;  %v6653_v3 = vadd.f32 1.0, %v4673_v60  ;;  %v469_v15 = vsel %vm6659_vm5, %v4667_v32, %v465_v4 }
 0x116   :  { %v474_v14 = vsel %vm471_vm7, %v473_v28, %v469_v15  ;;  %vm481_vm15 = vweird.f32 %v6651_v0 }
 0x117   :  { %v648_v1 = vmul.f32 %v4669_v36, %v647_v56  ;;  %vm665_vm0 = vweird.f32 %v6653_v3 }
 0x119   :  { %v649_v5 = vadd.f32 %v4669_v36, %v648_v1 }
 0x11a   :  { %v910_v31 = vpop.f32.mrf.mxu0  ;;  %v930_v51 = vpop.f32.mrf.mxu1 }
 0x11b   :  { %v931_v54 = vadd.f32 %v930_v51, %v910_v31  ;;  %v653_v17 = vsel %vm6664_vm6, %v4669_v36, %v649_v5 }
 0x11c   :  { %v658_v16 = vsel %vm655_vm8, %v657_v27, %v653_v17 }
 0x11d   :  { %v973_v59 = vadd.f32 %v931_v54, %v305_v57  ;;  %v823_v31 = vmul.f32 0.0, %v658_v16  ;;  %v817_v54 = vadd.f32 %v816_v19, %v796_v18  ;;  %v669_v16 = vand.u32 2147483647, %v6653_v3 }
 0x11f   :  { %v4612_v63 = vmul.f32 -1.442695, %v973_v59  ;;  %vm670_vm4 = vcmp.eq.f32.partialorder %v669_v16, 8.507059e+37  ;;  %v6776_v16 = vld [vmem:[#allocation3 + $0x1e8] sm:$0xff] }
 0x121   :  { %4674 = vpow2.f32 %v4612_v63 }
 0x122   :  { %4676 = vtanh.f32 %v819_v62  ;;  %v304_v62 = vld [vmem:[#allocation2 + $0x68] sm:$0x3] }
 0x123   :  { %4678 = vrcp.f32 %v6651_v0  ;;  %v820_v2 = vadd.f32 %v817_v54, %v304_v62 }
 0x124   :  { %4680 = vrcp.f32 %v6653_v3 }
 0x127   :  { %v4675_v11 = vpop.eup %4674 }
 0x128   :  { %v981_v23 = vadd.f32 1.0, %v4675_v11  ;;  %v4677_v24 = vpop.eup %4676 }
 0x129   :  { %v6672_v33 = vpop.eup %4678  ;;  %v825_v39 = vmul.f32 %v4677_v24, %v474_v14  ;;  %v671_v24 = vand.u32 2147483648, %v6653_v3  ;;  %v485_v14 = vand.u32 2147483647, %v6651_v0 }
 0x12a   :  { %4682 = vrcp.f32 %v981_v23  ;;  %v6674_v12 = vpop.eup %4680  ;;  %v477_v32 = vmul.f32 %v6672_v33, %v6651_v0  ;;  %v994_v4 = vand.u32 2147483648, %v981_v23  ;;  %v992_v6 = vand.u32 2147483647, %v981_v23 }
 0x12b   :  { %v661_v36 = vmul.f32 %v6674_v12, %v6653_v3  ;;  %v6680_v53 = vadd.f32 %v825_v39, %v823_v31  ;;  %vm988_vm10 = vweird.f32 %v981_v23  ;;  %vm482_vm12 = vweird.f32 %v6672_v33  ;;  %v6715_v3 = vld [vmem:[#allocation3 + $0x3e0] sm:$0xff] }
 0x12c   :  { %v478_v59 = vsub.f32 1.0, %v477_v32  ;;  %v995_v11 = vor.u32 1.1754944e-38, %v994_v4  ;;  %vm993_vm13 = vcmp.eq.f32.partialorder %v992_v6, 8.507059e+37  ;;  %vm666_vm14 = vweird.f32 %v6674_v12  ;;  %vm6695_vm1 = vmor %vm481_vm15, %vm482_vm12  ;;  %v6747_v6 = vld [vmem:[#allocation3 + $0x2e8] sm:$0xff] }
 0x12d   :  { %v662_v60 = vsub.f32 1.0, %v661_v36  ;;  %4684 = vtanh.f32 %v6680_v53  ;;  %vm6701_vm2 = vmor %vm665_vm0, %vm666_vm14  ;;  %vm486_vm3 = vcmp.eq.f32.partialorder %v485_v14, 8.507059e+37  ;;  %v6773_v14 = vld [vmem:[#allocation3 + $0x1e0] sm:$0xff] }
 0x12e   :  { %v479_v9 = vmul.f32 %v6672_v33, %v478_v59 }
 0x12f   :  { %v663_v8 = vmul.f32 %v6674_v12, %v662_v60  ;;  %v6728_v60 = vld [vmem:[#allocation3 + $0x360] sm:$0xff] }
 0x130   :  { %v4683_v51 = vpop.eup %4682  ;;  %v950_v55 = vpop.f32.mrf.mxu2  ;;  %v480_v17 = vadd.f32 %v6672_v33, %v479_v9  ;;  %v6754_v9 = vld [vmem:[#allocation3 + $0x2a8] sm:$0xff] }
 0x131   :  { %v970_v56 = vpop.f32.mrf.mxu3  ;;  %v984_v57 = vmul.f32 %v4683_v51, %v981_v23  ;;  %vm989_vm9 = vweird.f32 %v4683_v51  ;;  %v664_v18 = vadd.f32 %v6674_v12, %v663_v8  ;;  %v487_v23 = vand.u32 2147483648, %v6651_v0  ;;  %v6751_v8 = vld [vmem:[#allocation3 + $0x2a0] sm:$0xff] }
 0x132   :  { %v971_v58 = vadd.f32 %v970_v56, %v950_v55  ;;  %vm990_vm11 = vmor %vm988_vm10, %vm989_vm9  ;;  %v484_v36 = vsel %vm6695_vm1, %v6672_v33, %v480_v17  ;;  %v672_v55 = vor.u32 1.1754944e-38, %v671_v24  ;;  %v6722_v33 = vld [vmem:[#allocation3 + $0x3a0] sm:$0xff]  ;;  %v6769_v24 = vld [vmem:[#allocation3 + $0x228] sm:$0xff] }
 0x133   :  { %v985_v63 = vsub.f32 1.0, %v984_v57  ;;  %v4685_v15 = vpop.eup %4684  ;;  %v668_v31 = vsel %vm6701_vm2, %v6674_v12, %v664_v18  ;;  %v488_v56 = vor.u32 1.1754944e-38, %v487_v23  ;;  %v6725_v12 = vld [vmem:[#allocation3 + $0x3a8] sm:$0xff] }
 0x134   :  { %v974_v1 = vadd.f32 %v971_v58, %v306_v61  ;;  %v673_v58 = vsel %vm670_vm4, %v672_v55, %v668_v31  ;;  %v6731_v61 = vld [vmem:[#allocation3 + $0x368] sm:$0xff]  ;;  %v6779_v31 = vld [vmem:[#allocation3 + $0x1a0] sm:$0xff] }
 0x135   :  { %v986_v5 = vmul.f32 %v4683_v51, %v985_v63  ;;  %v489_v57 = vsel %vm486_vm3, %v488_v56, %v484_v36  ;;  %v824_v62 = vmul.f32 0.0, %v673_v58  ;;  %v6734_v63 = vld [vmem:[#allocation3 + $0x320] sm:$0xff]  ;;  %11197 = vst [vmem:[#allocation10_spill] sm:$0xff] %v6779_v31  ;;  %v6790_v56 = vld [vmem:[#allocation3 + $0x168] sm:$0xff] }
 0x136   :  { %v4613_v7 = vmul.f32 -1.442695, %v974_v1  ;;  %v6737_v1 = vld [vmem:[#allocation3 + $0x328] sm:$0xff]  ;;  %v6787_v55 = vld [vmem:[#allocation3 + $0x160] sm:$0xff]  ;;  %11200 = vst [vmem:[#allocation11_spill] sm:$0xff] %v6790_v56 }
 0x137   :  { %v987_v10 = vadd.f32 %v4683_v51, %v986_v5  ;;  %v6744_v5 = vld [vmem:[#allocation3 + $0x2e0] sm:$0xff]  ;;  %11199 = vst [vmem:[#allocation12_spill] sm:$0xff] %v6787_v55 }
 0x138   :  { %4686 = vpow2.f32 %v4613_v7  ;;  %v6798_v58 = vld [vmem:[#allocation3 + $0x7e0] sm:$0xff] }
 0x139   :  { %4688 = vtanh.f32 %v820_v2  ;;  %v991_v13 = vsel %vm990_vm11, %v4683_v51, %v987_v10  ;;  %v6718_v51 = vld [vmem:[#allocation3 + $0x3e8] sm:$0xff] }
 0x13a   :  { %v996_v19 = vsel %vm993_vm13, %v995_v11, %v991_v13  ;;  %v6759_v13 = vld [vmem:[#allocation3 + $0x260] sm:$0xff] }
 0x13b   :  { %v6692_v27 = vmul.f32 %v4685_v15, %v996_v19  ;;  %v6762_v15 = vld [vmem:[#allocation3 + $0x268] sm:$0xff]  ;;  %v6766_v19 = vld [vmem:[#allocation3 + $0x220] sm:$0xff] }
 0x13d   :  { %1041 = vmatmul.f32.vlgmr.msrb.gmra.mxu0 %v6692_v27  ;;  %1081 = vmatmul.f32.vlgmr.msrb.gmra.mxu2 %v6692_v27 }
 0x13e   :  { %v4687_v39 = vpop.eup %4686  ;;  %1277 = vmatpush.msrb.mxu0 %v6715_v3  ;;  %1317 = vmatpush.msrb.mxu2 %v6718_v51 }
 0x13f   :  { %v6713_v0 = vadd.f32 1.0, %v4687_v39  ;;  %v4689_v54 = vpop.eup %4688 }
 0x140   :  { %1278 = vmatpush.msrb.mxu0 %v6722_v33  ;;  %1318 = vmatpush.msrb.mxu2 %v6725_v12  ;;  %v826_v59 = vmul.f32 %v4689_v54, %v489_v57  ;;  %v6782_v54 = vld [vmem:[#allocation3 + $0x1a8] sm:$0xff]  ;;  %v6795_v57 = vld [vmem:[#allocation3 + $0x120] sm:$0xff] }
 0x141   :  { %4690 = vrcp.f32 %v6713_v0  ;;  %v1009_v11 = vand.u32 2147483648, %v6713_v0  ;;  %v1007_v18 = vand.u32 2147483647, %v6713_v0  ;;  %vm1003_vm6 = vweird.f32 %v6713_v0  ;;  %11198 = vst [vmem:[#allocation9_spill] sm:$0xff] %v6782_v54 }
 0x142   :  { %1279 = vmatpush.msrb.mxu0 %v6728_v60  ;;  %1319 = vmatpush.msrb.mxu2 %v6731_v61  ;;  %v6742_v4 = vadd.f32 %v826_v59, %v824_v62  ;;  %11201 = vst [vmem:[#allocation14_spill] sm:$0xff] %v6795_v57  ;;  %v6801_v59 = vld [vmem:[#allocation3 + $0x128] sm:$0xff] }
 0x143   :  { %v1010_v28 = vor.u32 1.1754944e-38, %v1009_v11  ;;  %vm1008_vm8 = vcmp.eq.f32.partialorder %v1007_v18, 8.507059e+37  ;;  %11202 = vst [vmem:[#allocation13_spill] sm:$0xff] %v6801_v59  ;;  %v6804_v62 = vld [vmem:[#allocation3 + $0x7e8] sm:$0xff]  ;;  %v6822_v18 = vld [vmem:[#allocation3 + $0x760] sm:$0xff] }
 0x144   :  { %1280 = vmatpush.msrb.mxu0 %v6734_v63  ;;  %1320 = vmatpush.msrb.mxu2 %v6737_v1  ;;  %4692 = vtanh.f32 %v6742_v4  ;;  %v6816_v11 = vld [vmem:[#allocation3 + $0x7a8] sm:$0xff] }
 0x145   :  { %1167 = vmatmul.f32.vlgmr.msra.gmra.mxu0 %v6692_v27  ;;  %1207 = vmatmul.f32.vlgmr.msra.gmra.mxu2 %v6692_v27 }
 0x146   :  { %1281 = vmatpush.msrb.mxu0 %v6744_v5  ;;  %1321 = vmatpush.msrb.mxu2 %v6747_v6 }
 0x147   :  { %v4691_v2 = vpop.eup %4690 }
 0x148   :  { %v999_v7 = vmul.f32 %v4691_v2, %v6713_v0  ;;  %1282 = vmatpush.msrb.mxu0 %v6751_v8  ;;  %1322 = vmatpush.msrb.mxu2 %v6754_v9  ;;  %vm1004_vm5 = vweird.f32 %v4691_v2 }
 0x149   :  { %vm1005_vm7 = vmor %vm1003_vm6, %vm1004_vm5 }
 0x14a   :  { %v1000_v10 = vsub.f32 1.0, %v999_v7  ;;  %1283 = vmatpush.msrb.mxu0 %v6759_v13  ;;  %1323 = vmatpush.msrb.mxu2 %v6762_v15  ;;  %v4693_v32 = vpop.eup %4692  ;;  %v6810_v7 = vld [vmem:[#allocation3 + $0x7a0] sm:$0xff] }
 0x14c   :  { %v1001_v17 = vmul.f32 %v4691_v2, %v1000_v10  ;;  %1284 = vmatpush.msrb.mxu0 %v6766_v19  ;;  %1324 = vmatpush.msrb.mxu2 %v6769_v24  ;;  %v6813_v10 = vld [vmem:[#allocation3 + $0xe8] sm:$0xff] }
 0x14d   :  { %11204 = vst [vmem:[#allocation91_spill] sm:$0xff] %v6813_v10 }
 0x14e   :  { %v1002_v23 = vadd.f32 %v4691_v2, %v1001_v17  ;;  %1285 = vmatpush.msrb.mxu0 %v6773_v14  ;;  %1325 = vmatpush.msrb.mxu2 %v6776_v16  ;;  %v6819_v17 = vld [vmem:[#allocation3 + $0xa0] sm:$0xff] }
 0x14f   :  { %11205 = vst [vmem:[#allocation92_spill] sm:$0xff] %v6819_v17 }
 0x150   :  { %v1006_v39 = vsel %vm1005_vm7, %v4691_v2, %v1002_v23  ;;  %1286 = vmatpush.msrb.mxu0 %v6779_v31  ;;  %1326 = vmatpush.msrb.mxu2 %v6782_v54  ;;  %v6807_v2 = vld [vmem:[#allocation3 + $0xe0] sm:$0xff]  ;;  %v6825_v23 = vld [vmem:[#allocation3 + $0xa8] sm:$0xff] }
 0x151   :  { %v1011_v36 = vsel %vm1008_vm8, %v1010_v28, %v1006_v39  ;;  %11203 = vst [vmem:[#allocation15_spill] sm:$0xff] %v6807_v2  ;;  %v6828_v28 = vld [vmem:[#allocation3 + $0x768] sm:$0xff]  ;;  %v6831_v39 = vld [vmem:[#allocation3 + $0x60] sm:$0xff] }
 0x152   :  { %v6785_v0 = vmul.f32 %v4693_v32, %v1011_v36  ;;  %1287 = vmatpush.msrb.mxu0 %v6787_v55  ;;  %1327 = vmatpush.msrb.mxu2 %v6790_v56  ;;  %11206 = vst [vmem:[#allocation93_spill] sm:$0xff] %v6825_v23  ;;  %v6834_v32 = vld [vmem:[#allocation3 + $0x720] sm:$0xff]  ;;  %v6837_v36 = vld [vmem:[#allocation3 + $0x68] sm:$0xff] }
 0x153   :  { %11207 = vst [vmem:[#allocation94_spill] sm:$0xff] %v6831_v39  ;;  %v11214_v56 = vld [vmem:[#allocation17_spill] sm:$0xff]  ;;  %v11217_v54 = vld [vmem:[#allocation18_spill] sm:$0xff] }
 0x154   :  { %1061 = vmatmul.f32.vlgmr.msrb.gmra.mxu1 %v6785_v0  ;;  %1101 = vmatmul.f32.vlgmr.msrb.gmra.mxu3 %v6785_v0  ;;  %11208 = vst [vmem:[#allocation95_spill] sm:$0xff] %v6837_v36  ;;  %v6873_v55 = vld [vmem:[#allocation3 + $0x660] sm:$0xff] }
 0x155   :  { %1288 = vmatpush.msrb.mxu0 %v6795_v57  ;;  %1297 = vmatpush.msrb.mxu1 %v6798_v58  ;;  %v6866_v57 = vld [vmem:[#allocation3 + $0x6a8] sm:$0xff]  ;;  %v6883_v31 = vld [vmem:[#allocation3 + $0x620] sm:$0xff] }
 0x156   :  { %1328 = vmatpush.msrb.mxu2 %v6801_v59  ;;  %1337 = vmatpush.msrb.mxu3 %v6804_v62  ;;  %v6863_v59 = vld [vmem:[#allocation3 + $0x6a0] sm:$0xff] }
 0x157   :  { %1289 = vmatpush.msrb.mxu0 %v6807_v2  ;;  %1298 = vmatpush.msrb.mxu1 %v6810_v7  ;;  %v6859_v2 = vld [vmem:[#allocation3 + $0x3f0] sm:$0xff] }
 0x158   :  { %1329 = vmatpush.msrb.mxu2 %v6813_v10  ;;  %1338 = vmatpush.msrb.mxu3 %v6816_v11  ;;  %v6851_v10 = vld [vmem:[#allocation3 + $0x28] sm:$0xff]  ;;  %11211 = vst [vmem:[#allocation98_spill] sm:$0xff] %v6859_v2 }
 0x159   :  { %1290 = vmatpush.msrb.mxu0 %v6819_v17  ;;  %1299 = vmatpush.msrb.mxu1 %v6822_v18  ;;  %v6840_v17 = vld [vmem:[#allocation3 + $0x728] sm:$0xff]  ;;  %11210 = vst [vmem:[#allocation97_spill] sm:$0xff] %v6851_v10 }
 0x15a   :  { %1330 = vmatpush.msrb.mxu2 %v6825_v23  ;;  %1339 = vmatpush.msrb.mxu3 %v6828_v28  ;;  %v6845_v23 = vld [vmem:[#allocation3 + $0x20] sm:$0xff] }
 0x15b   :  { %1291 = vmatpush.msrb.mxu0 %v6831_v39  ;;  %1300 = vmatpush.msrb.mxu1 %v6834_v32  ;;  %11209 = vst [vmem:[#allocation96_spill] sm:$0xff] %v6845_v23  ;;  %v6848_v39 = vld [vmem:[#allocation3 + $0x6e0] sm:$0xff] }
 0x15c   :  { %1331 = vmatpush.msrb.mxu2 %v6837_v36  ;;  %1340 = vmatpush.msrb.mxu3 %v6840_v17  ;;  %v6854_v36 = vld [vmem:[#allocation3 + $0x6e8] sm:$0xff] }
 0x15d   :  { %1187 = vmatmul.f32.vlgmr.msra.gmra.mxu1 %v6785_v0  ;;  %1227 = vmatmul.f32.vlgmr.msra.gmra.mxu3 %v6785_v0 }
 0x15e   :  { %1292 = vmatpush.msrb.mxu0 %v6845_v23  ;;  %1301 = vmatpush.msrb.mxu1 %v6848_v39  ;;  %v11212_v23 = vld [vmem:[#allocation16_spill] sm:$0xff] }
 0x15f   :  { %1332 = vmatpush.msrb.mxu2 %v6851_v10  ;;  %1341 = vmatpush.msrb.mxu3 %v6854_v36  ;;  %v6869_v10 = vld [vmem:[#allocation3 + $0x3b0] sm:$0xff] }
 0x160   :  { %1293 = vmatmul.f32.vlgmr.msrb.gmra.mxu0 %v6692_v27  ;;  %1333 = vmatmul.f32.vlgmr.msrb.gmra.mxu2 %v6692_v27  ;;  %11213 = vst [vmem:[#allocation16_spill] sm:$0xff] %v6869_v10 }
 0x161   :  { %1379 = vmatpush.msra.mxu0 %v6859_v2  ;;  %1419 = vmatpush.msra.mxu2 %v11212_v23  ;;  %v6876_v2 = vld [vmem:[#allocation3 + $0x668] sm:$0xff]  ;;  %v6879_v23 = vld [vmem:[#allocation3 + $0x370] sm:$0xff] }
 0x162   :  { %1302 = vmatpush.msrb.mxu1 %v6863_v59  ;;  %1342 = vmatpush.msrb.mxu3 %v6866_v57  ;;  %11215 = vst [vmem:[#allocation17_spill] sm:$0xff] %v6876_v2 }
 0x163   :  { %1380 = vmatpush.msra.mxu0 %v6869_v10  ;;  %1420 = vmatpush.msra.mxu2 %v11214_v56  ;;  %11216 = vst [vmem:[#allocation99_spill] sm:$0xff] %v6879_v23  ;;  %v6886_v10 = vld [vmem:[#allocation3 + $0x628] sm:$0xff]  ;;  %v6889_v56 = vld [vmem:[#allocation3 + $0x330] sm:$0xff] }
 0x164   :  { %1303 = vmatpush.msrb.mxu1 %v6873_v55  ;;  %1343 = vmatpush.msrb.mxu3 %v6876_v2  ;;  %11218 = vst [vmem:[#allocation18_spill] sm:$0xff] %v6886_v10  ;;  %v6893_v2 = vld [vmem:[#allocation3 + $0x5e0] sm:$0xff] }
 0x165   :  { %1381 = vmatpush.msra.mxu0 %v6879_v23  ;;  %1421 = vmatpush.msra.mxu2 %v11217_v54  ;;  %11219 = vst [vmem:[#allocation100_spill] sm:$0xff] %v6889_v56  ;;  %v6896_v23 = vld [vmem:[#allocation3 + $0x5e8] sm:$0xff]  ;;  %v6899_v54 = vld [vmem:[#allocation3 + $0x2f0] sm:$0xff] }
 0x166   :  { %1304 = vmatpush.msrb.mxu1 %v6883_v31  ;;  %1344 = vmatpush.msrb.mxu3 %v6886_v10  ;;  %11220 = vst [vmem:[#allocation101_spill] sm:$0xff] %v6893_v2  ;;  %v6903_v10 = vld [vmem:[#allocation3 + $0x5a0] sm:$0xff] }
 0x167   :  { %1382 = vmatpush.msra.mxu0 %v6889_v56  ;;  %1422 = vmatpush.msra.mxu2 %v6284_v30  ;;  %11221 = vst [vmem:[#allocation102_spill] sm:$0xff] %v6896_v23  ;;  %v6906_v56 = vld [vmem:[#allocation3 + $0x5a8] sm:$0xff]  ;;  %v6909_v30 = vld [vmem:[#allocation3 + $0x2b0] sm:$0xff] }
 0x168   :  { %1305 = vmatpush.msrb.mxu1 %v6893_v2  ;;  %1345 = vmatpush.msrb.mxu3 %v6896_v23  ;;  %11222 = vst [vmem:[#allocation103_spill] sm:$0xff] %v6899_v54  ;;  %v11226_v2 = vld [vmem:[#allocation19_spill] sm:$0xff]  ;;  %v6913_v23 = vld [vmem:[#allocation3 + $0x560] sm:$0xff] }
 0x169   :  { %1383 = vmatpush.msra.mxu0 %v6899_v54  ;;  %1423 = vmatpush.msra.mxu2 %v6287_v40  ;;  %11223 = vst [vmem:[#allocation104_spill] sm:$0xff] %v6903_v10  ;;  %v6916_v54 = vld [vmem:[#allocation3 + $0x568] sm:$0xff]  ;;  %v6919_v40 = vld [vmem:[#allocation3 + $0x270] sm:$0xff] }
 0x16a   :  { %1306 = vmatpush.msrb.mxu1 %v6903_v10  ;;  %11224 = vst [vmem:[#allocation105_spill] sm:$0xff] %v6906_v56  ;;  %1346 = vmatpush.msrb.mxu3 %v6906_v56  ;;  %v11230_v10 = vld [vmem:[#allocation20_spill] sm:$0xff] }
 0x16b   :  { %11225 = vst [vmem:[#allocation106_spill] sm:$0xff] %v6909_v30  ;;  %1384 = vmatpush.msra.mxu0 %v6909_v30  ;;  %1424 = vmatpush.msra.mxu2 %v11226_v2  ;;  %v6923_v56 = vld [vmem:[#allocation3 + $0x520] sm:$0xff]  ;;  %v6926_v30 = vld [vmem:[#allocation3 + $0x528] sm:$0xff]  ;;  %v6929_v2 = vld [vmem:[#allocation3 + $0x230] sm:$0xff] }
 0x16c   :  { %11227 = vst [vmem:[#allocation19_spill] sm:$0xff] %v6913_v23  ;;  %1307 = vmatpush.msrb.mxu1 %v6913_v23  ;;  %1347 = vmatpush.msrb.mxu3 %v6916_v54  ;;  %v11234_v23 = vld [vmem:[#allocation22_spill] sm:$0xff] }
 0x16d   :  { %11228 = vst [vmem:[#allocation107_spill] sm:$0xff] %v6916_v54  ;;  %1385 = vmatpush.msra.mxu0 %v6919_v40  ;;  %1425 = vmatpush.msra.mxu2 %v11230_v10  ;;  %v6933_v54 = vld [vmem:[#allocation3 + $0x4e0] sm:$0xff]  ;;  %v6939_v10 = vld [vmem:[#allocation3 + $0x1f0] sm:$0xff] }
 0x16e   :  { %11229 = vst [vmem:[#allocation108_spill] sm:$0xff] %v6919_v40  ;;  %1308 = vmatpush.msrb.mxu1 %v6923_v56  ;;  %1348 = vmatpush.msrb.mxu3 %v6926_v30  ;;  %v6936_v40 = vld [vmem:[#allocation3 + $0x4e8] sm:$0xff] }
 0x16f   :  { %11231 = vst [vmem:[#allocation20_spill] sm:$0xff] %v6923_v56  ;;  %1386 = vmatpush.msra.mxu0 %v6929_v2  ;;  %1426 = vmatpush.msra.mxu2 %v11234_v23  ;;  %v11238_v56 = vld [vmem:[#allocation23_spill] sm:$0xff] }
 0x170   :  { %11232 = vst [vmem:[#allocation109_spill] sm:$0xff] %v6926_v30  ;;  %1309 = vmatpush.msrb.mxu1 %v6933_v54  ;;  %1349 = vmatpush.msrb.mxu3 %v6936_v40  ;;  %v6943_v30 = vld [vmem:[#allocation3 + $0x4a0] sm:$0xff]  ;;  %v6949_v23 = vld [vmem:[#allocation3 + $0x1b0] sm:$0xff] }
 0x171   :  { %11233 = vst [vmem:[#allocation110_spill] sm:$0xff] %v6929_v2  ;;  %1387 = vmatpush.msra.mxu0 %v6939_v10  ;;  %1427 = vmatpush.msra.mxu2 %v11238_v56  ;;  %v6946_v2 = vld [vmem:[#allocation3 + $0x4a8] sm:$0xff]  ;;  %v6959_v56 = vld [vmem:[#allocation3 + $0x170] sm:$0xff] }
 0x172   :  { %11235 = vst [vmem:[#allocation22_spill] sm:$0xff] %v6933_v54  ;;  %1310 = vmatpush.msrb.mxu1 %v6943_v30  ;;  %1350 = vmatpush.msrb.mxu3 %v6946_v2  ;;  %v11242_v54 = vld [vmem:[#allocation24_spill] sm:$0xff] }
 0x173   :  { %11236 = vst [vmem:[#allocation111_spill] sm:$0xff] %v6936_v40  ;;  %1388 = vmatpush.msra.mxu0 %v6949_v23  ;;  %1428 = vmatpush.msra.mxu2 %v11242_v54  ;;  %v6953_v40 = vld [vmem:[#allocation3 + $0x460] sm:$0xff]  ;;  %v6971_v54 = vld [vmem:[#allocation3 + $0x130] sm:$0xff] }
 0x174   :  { %11237 = vst [vmem:[#allocation112_spill] sm:$0xff] %v6939_v10  ;;  %1311 = vmatpush.msrb.mxu1 %v6953_v40  ;;  %v6956_v10 = vld [vmem:[#allocation3 + $0x468] sm:$0xff] }
 0x175   :  { %11239 = vst [vmem:[#allocation23_spill] sm:$0xff] %v6943_v30  ;;  %1351 = vmatpush.msrb.mxu3 %v6956_v10  ;;  %1389 = vmatpush.msra.mxu0 %v6959_v56  ;;  %v11246_v30 = vld [vmem:[#allocation26_spill] sm:$0xff] }
 0x176   :  { %11240 = vst [vmem:[#allocation113_spill] sm:$0xff] %v6946_v2  ;;  %1429 = vmatpush.msra.mxu2 %v11246_v30  ;;  %v6963_v2 = vld [vmem:[#allocation3 + $0x420] sm:$0xff] }
 0x177   :  { %11241 = vst [vmem:[#allocation114_spill] sm:$0xff] %v6949_v23  ;;  %1312 = vmatpush.msrb.mxu1 %v6963_v2  ;;  %v6966_v23 = vld [vmem:[#allocation3 + $0x428] sm:$0xff]  ;;  %1390 = vmatpush.msra.mxu0 %v6971_v54 }
 0x178   :  { %11243 = vst [vmem:[#allocation24_spill] sm:$0xff] %v6953_v40  ;;  %1352 = vmatpush.msrb.mxu3 %v6966_v23  ;;  %1313 = vmatmul.f32.vlgmr.msrb.gmra.mxu1 %v6785_v0  ;;  %v11251_v30 = vld [vmem:[#allocation29_spill] sm:$0xff]  ;;  %v11255_v40 = vld [vmem:[#allocation32_spill] sm:$0xff] }
 0x179   :  { %11244 = vst [vmem:[#allocation115_spill] sm:$0xff] %v6956_v10  ;;  %1353 = vmatmul.f32.vlgmr.msrb.gmra.mxu3 %v6785_v0  ;;  %v6974_v10 = vld [vmem:[#allocation3 + $0x7f0] sm:$0xff]  ;;  %1430 = vmatpush.msra.mxu2 %v11251_v30 }
 0x17a   :  { %11245 = vst [vmem:[#allocation116_spill] sm:$0xff] %v6959_v56  ;;  %1399 = vmatpush.msra.mxu1 %v6974_v10  ;;  %v6978_v56 = vld [vmem:[#allocation3 + $0x7f8] sm:$0xff]  ;;  %v6994_v30 = vld [vmem:[#allocation3 + $0x770] sm:$0xff] }
 0x17b   :  { %11247 = vst [vmem:[#allocation26_spill] sm:$0xff] %v6963_v2  ;;  %1439 = vmatpush.msra.mxu3 %v6978_v56  ;;  %v6981_v2 = vld [vmem:[#allocation3 + $0xf0] sm:$0xff]  ;;  %1431 = vmatpush.msra.mxu2 %v11255_v40 }
 0x17c   :  { %11248 = vst [vmem:[#allocation117_spill] sm:$0xff] %v6966_v23  ;;  %1391 = vmatpush.msra.mxu0 %v6981_v2  ;;  %v6984_v23 = vld [vmem:[#allocation3 + $0x7b0] sm:$0xff] }
 0x17d   :  { %11249 = vst [vmem:[#allocation118_spill] sm:$0xff] %v6971_v54  ;;  %1400 = vmatpush.msra.mxu1 %v6984_v23  ;;  %v6988_v54 = vld [vmem:[#allocation3 + $0x7b8] sm:$0xff]  ;;  %1432 = vmatpush.msra.mxu2 %v6347_v29  ;;  %v7004_v40 = vld [vmem:[#allocation3 + $0x730] sm:$0xff] }
 0x17e   :  { %11250 = vst [vmem:[#allocation119_spill] sm:$0xff] %v6974_v10  ;;  %1440 = vmatpush.msra.mxu3 %v6988_v54  ;;  %v6991_v10 = vld [vmem:[#allocation3 + $0xb0] sm:$0xff] }
 0x17f   :  { %11252 = vst [vmem:[#allocation29_spill] sm:$0xff] %v6978_v56  ;;  %1392 = vmatpush.msra.mxu0 %v6991_v10  ;;  %1401 = vmatpush.msra.mxu1 %v6994_v30  ;;  %v7012_v29 = vld [vmem:[#allocation3 + $0x6f0] sm:$0xff] }
 0x180   :  { %11253 = vst [vmem:[#allocation120_spill] sm:$0xff] %v6981_v2  ;;  %v6998_v2 = vld [vmem:[#allocation3 + $0x778] sm:$0xff]  ;;  %1433 = vmatpush.msra.mxu2 %v6363_v43  ;;  %v7021_v43 = vld [vmem:[#allocation3 + $0x6b0] sm:$0xff] }
 0x181   :  { %11254 = vst [vmem:[#allocation121_spill] sm:$0xff] %v6984_v23  ;;  %1441 = vmatpush.msra.mxu3 %v6998_v2  ;;  %v7001_v23 = vld [vmem:[#allocation3 + $0x70] sm:$0xff]  ;;  %1402 = vmatpush.msra.mxu1 %v7004_v40 }
 0x182   :  { %11256 = vst [vmem:[#allocation32_spill] sm:$0xff] %v6988_v54  ;;  %1393 = vmatpush.msra.mxu0 %v7001_v23  ;;  %1434 = vmatpush.msra.mxu2 %v6375_v20  ;;  %v7029_v20 = vld [vmem:[#allocation3 + $0x670] sm:$0xff] }
 0x183   :  { %11257 = vst [vmem:[#allocation122_spill] sm:$0xff] %v6991_v10  ;;  %v7008_v10 = vld [vmem:[#allocation3 + $0x738] sm:$0xff]  ;;  %1403 = vmatpush.msra.mxu1 %v7012_v29  ;;  %1435 = vmatmul.f32.vlgmr.msra.gmra.mxu2 %v6692_v27 }
 0x184   :  { %11258 = vst [vmem:[#allocation123_spill] sm:$0xff] %v6994_v30  ;;  %1442 = vmatpush.msra.mxu3 %v7008_v10  ;;  %v11263_v30 = vld [vmem:[#allocation21_spill] sm:$0xff]  ;;  %1563 = vmatpush.msrb.mxu2 %v6401_v26  ;;  %v11274_v26 = vld [vmem:[#allocation34_spill] sm:$0xff] }
 0x185   :  { %11259 = vst [vmem:[#allocation124_spill] sm:$0xff] %v6998_v2  ;;  %1394 = vmatpush.msra.mxu0 %v11263_v30  ;;  %v7016_v2 = vld [vmem:[#allocation3 + $0x6f8] sm:$0xff]  ;;  %1404 = vmatpush.msra.mxu1 %v7021_v43 }
 0x186   :  { %11260 = vst [vmem:[#allocation125_spill] sm:$0xff] %v7001_v23  ;;  %1443 = vmatpush.msra.mxu3 %v7016_v2  ;;  %1395 = vmatmul.f32.vlgmr.msra.gmra.mxu0 %v6692_v27  ;;  %v7024_v23 = vld [vmem:[#allocation3 + $0x6b8] sm:$0xff] }
 0x187   :  { %11261 = vst [vmem:[#allocation126_spill] sm:$0xff] %v7004_v40  ;;  %v11268_v30 = vld [vmem:[#allocation28_spill] sm:$0xff]  ;;  %1405 = vmatpush.msra.mxu1 %v7029_v20  ;;  %v11271_v27 = vld [vmem:[#allocation31_spill] sm:$0xff]  ;;  %1564 = vmatpush.msrb.mxu2 %v6417_v34 }
 0x188   :  { %11262 = vst [vmem:[#allocation127_spill] sm:$0xff] %v7008_v10  ;;  %1444 = vmatpush.msra.mxu3 %v7024_v23  ;;  %1523 = vmatpush.msrb.mxu0 %v11268_v30  ;;  %v7045_v30 = vld [vmem:[#allocation3 + $0x5f0] sm:$0xff]  ;;  %v11277_v34 = vld [vmem:[#allocation36_spill] sm:$0xff] }
 0x189   :  { %11264 = vst [vmem:[#allocation21_spill] sm:$0xff] %v7012_v29  ;;  %1565 = vmatpush.msrb.mxu2 %v6429_v25  ;;  %v11282_v25 = vld [vmem:[#allocation59_spill] sm:$0xff] }
 0x18a   :  { %11265 = vst [vmem:[#allocation128_spill] sm:$0xff] %v7016_v2  ;;  %v7032_v2 = vld [vmem:[#allocation3 + $0x678] sm:$0xff]  ;;  %1524 = vmatpush.msrb.mxu0 %v11271_v27 }
 0x18b   :  { %11266 = vst [vmem:[#allocation129_spill] sm:$0xff] %v7021_v43  ;;  %1445 = vmatpush.msra.mxu3 %v7032_v2  ;;  %v7037_v43 = vld [vmem:[#allocation3 + $0x630] sm:$0xff] }
 0x18c   :  { %11267 = vst [vmem:[#allocation130_spill] sm:$0xff] %v7024_v23  ;;  %1406 = vmatpush.msra.mxu1 %v7037_v43  ;;  %v7040_v23 = vld [vmem:[#allocation3 + $0x638] sm:$0xff]  ;;  %1525 = vmatpush.msrb.mxu0 %v11274_v26 }
 0x18d   :  { %11269 = vst [vmem:[#allocation28_spill] sm:$0xff] %v7029_v20  ;;  %1446 = vmatpush.msra.mxu3 %v7040_v23  ;;  %v11278_v27 = vld [vmem:[#allocation55_spill] sm:$0xff] }
 0x18e   :  { %11270 = vst [vmem:[#allocation131_spill] sm:$0xff] %v7032_v2  ;;  %1407 = vmatpush.msra.mxu1 %v7045_v30  ;;  %v7048_v2 = vld [vmem:[#allocation3 + $0x5f8] sm:$0xff]  ;;  %1526 = vmatpush.msrb.mxu0 %v11277_v34  ;;  %v7059_v20 = vld [vmem:[#allocation3 + $0x570] sm:$0xff] }
 0x18f   :  { %11272 = vst [vmem:[#allocation31_spill] sm:$0xff] %v7037_v43  ;;  %1447 = vmatpush.msra.mxu3 %v7048_v2  ;;  %1566 = vmatpush.msrb.mxu2 %v11278_v27  ;;  %v7053_v43 = vld [vmem:[#allocation3 + $0x5b0] sm:$0xff] }
 0x190   :  { %11273 = vst [vmem:[#allocation132_spill] sm:$0xff] %v7040_v23  ;;  %1408 = vmatpush.msra.mxu1 %v7053_v43  ;;  %v11280_v23 = vld [vmem:[#allocation25_spill] sm:$0xff]  ;;  %v11281_v26 = vld [vmem:[#allocation39_spill] sm:$0xff] }
 0x191   :  { %11275 = vst [vmem:[#allocation34_spill] sm:$0xff] %v7045_v30  ;;  %1448 = vmatpush.msra.mxu3 %v11280_v23  ;;  %1527 = vmatpush.msrb.mxu0 %v11281_v26  ;;  %v11284_v30 = vld [vmem:[#allocation27_spill] sm:$0xff]  ;;  %v11289_v23 = vld [vmem:[#allocation44_spill] sm:$0xff] }
 0x192   :  { %11276 = vst [vmem:[#allocation133_spill] sm:$0xff] %v7048_v2  ;;  %1567 = vmatpush.msrb.mxu2 %v11282_v25  ;;  %1409 = vmatpush.msra.mxu1 %v7059_v20  ;;  %v11285_v2 = vld [vmem:[#allocation42_spill] sm:$0xff]  ;;  %v11286_v34 = vld [vmem:[#allocation63_spill] sm:$0xff] }
 0x193   :  { %11279 = vst [vmem:[#allocation36_spill] sm:$0xff] %v7053_v43  ;;  %1449 = vmatpush.msra.mxu3 %v11284_v30  ;;  %1528 = vmatpush.msrb.mxu0 %v11285_v2  ;;  %v7065_v27 = vld [vmem:[#allocation3 + $0x530] sm:$0xff] }
 0x194   :  { %11283 = vst [vmem:[#allocation55_spill] sm:$0xff] %v7059_v20  ;;  %1568 = vmatpush.msrb.mxu2 %v11286_v34  ;;  %1410 = vmatpush.msra.mxu1 %v7065_v27  ;;  %v11288_v43 = vld [vmem:[#allocation30_spill] sm:$0xff]  ;;  %v11290_v26 = vld [vmem:[#allocation67_spill] sm:$0xff]  ;;  %v11292_v20 = vld [vmem:[#allocation33_spill] sm:$0xff] }
 0x195   :  { %11287 = vst [vmem:[#allocation25_spill] sm:$0xff] %v7065_v27  ;;  %1450 = vmatpush.msra.mxu3 %v11288_v43  ;;  %1529 = vmatpush.msrb.mxu0 %v11289_v23  ;;  %v7071_v25 = vld [vmem:[#allocation3 + $0x4f0] sm:$0xff]  ;;  %v11297_v43 = vld [vmem:[#allocation49_spill] sm:$0xff] }
 0x196   :  { %1569 = vmatpush.msrb.mxu2 %v11290_v26  ;;  %11291 = vst [vmem:[#allocation39_spill] sm:$0xff] %v7071_v25  ;;  %1411 = vmatpush.msra.mxu1 %v7071_v25  ;;  %v11293_v30 = vld [vmem:[#allocation46_spill] sm:$0xff]  ;;  %v11294_v2 = vld [vmem:[#allocation71_spill] sm:$0xff] }
 0x197   :  { %1451 = vmatpush.msra.mxu3 %v11292_v20  ;;  %1530 = vmatpush.msrb.mxu0 %v11293_v30  ;;  %v7077_v34 = vld [vmem:[#allocation3 + $0x4b0] sm:$0xff]  ;;  %v11301_v20 = vld [vmem:[#allocation52_spill] sm:$0xff] }
 0x198   :  { %1570 = vmatpush.msrb.mxu2 %v11294_v2  ;;  %11295 = vst [vmem:[#allocation59_spill] sm:$0xff] %v7077_v34  ;;  %1412 = vmatpush.msra.mxu1 %v7077_v34  ;;  %v11296_v27 = vld [vmem:[#allocation35_spill] sm:$0xff]  ;;  %v11300_v25 = vld [vmem:[#allocation38_spill] sm:$0xff]  ;;  %v11304_v34 = vld [vmem:[#allocation41_spill] sm:$0xff] }
 0x199   :  { %1452 = vmatpush.msra.mxu3 %v11296_v27  ;;  %1531 = vmatpush.msrb.mxu0 %v11297_v43  ;;  %v11298_v23 = vld [vmem:[#allocation75_spill] sm:$0xff]  ;;  %v7095_v27 = vld [vmem:[#allocation3 + $0x7c0] sm:$0xff] }
 0x19a   :  { %1571 = vmatpush.msrb.mxu2 %v11298_v23  ;;  %v7083_v26 = vld [vmem:[#allocation3 + $0x470] sm:$0xff]  ;;  %11305 = vst [vmem:[#allocation63_spill] sm:$0xff] %v7095_v27 }
 0x19b   :  { %11299 = vst [vmem:[#allocation27_spill] sm:$0xff] %v7083_v26  ;;  %1413 = vmatpush.msra.mxu1 %v7083_v26  ;;  %1453 = vmatpush.msra.mxu3 %v11300_v25  ;;  %v11302_v30 = vld [vmem:[#allocation79_spill] sm:$0xff]  ;;  %v11307_v25 = vld [vmem:[#allocation56_spill] sm:$0xff] }
 0x19c   :  { %1532 = vmatpush.msrb.mxu0 %v11301_v20  ;;  %1572 = vmatpush.msrb.mxu2 %v11302_v30  ;;  %v7089_v2 = vld [vmem:[#allocation3 + $0x430] sm:$0xff]  ;;  %v7101_v20 = vld [vmem:[#allocation3 + $0x780] sm:$0xff]  ;;  %v1020_v26 = vld [vmem:[#allocation2 + $0x18] sm:$0xc] }
 0x19d   :  { %11303 = vst [vmem:[#allocation42_spill] sm:$0xff] %v7089_v2  ;;  %1414 = vmatpush.msra.mxu1 %v7089_v2  ;;  %1454 = vmatpush.msra.mxu3 %v11304_v34  ;;  %v11306_v43 = vld [vmem:[#allocation47_spill] sm:$0xff]  ;;  %v11310_v30 = vld [vmem:[#allocation50_spill] sm:$0xff]  ;;  %v11311_v34 = vld [vmem:[#allocation60_spill] sm:$0xff] }
 0x19e   :  { %1415 = vmatmul.f32.vlgmr.msra.gmra.mxu1 %v6785_v0  ;;  %1455 = vmatmul.f32.vlgmr.msra.gmra.mxu3 %v6785_v0  ;;  %v11308_v23 = vld [vmem:[#allocation83_spill] sm:$0xff]  ;;  %11309 = vst [vmem:[#allocation30_spill] sm:$0xff] %v7101_v20  ;;  %v7107_v0 = vld [vmem:[#allocation3 + $0x740] sm:$0xff] }
 0x19f   :  { %1543 = vmatpush.msrb.mxu1 %v7095_v27  ;;  %1583 = vmatpush.msrb.mxu3 %v11306_v43  ;;  %11312 = vst [vmem:[#allocation44_spill] sm:$0xff] %v7107_v0  ;;  %v11313_v27 = vld [vmem:[#allocation53_spill] sm:$0xff]  ;;  %v11314_v43 = vld [vmem:[#allocation64_spill] sm:$0xff] }
 0x1a0   :  { %1533 = vmatpush.msrb.mxu0 %v11307_v25  ;;  %1573 = vmatpush.msrb.mxu2 %v11308_v23  ;;  %v11315_v25 = vld [vmem:[#allocation37_spill] sm:$0xff] }
 0x1a1   :  { %1544 = vmatpush.msrb.mxu1 %v7101_v20  ;;  %1584 = vmatpush.msrb.mxu3 %v11310_v30  ;;  %v11316_v23 = vld [vmem:[#allocation57_spill] sm:$0xff]  ;;  %v11317_v20 = vld [vmem:[#allocation68_spill] sm:$0xff] }
 0x1a2   :  { %1534 = vmatpush.msrb.mxu0 %v11311_v34  ;;  %1574 = vmatpush.msrb.mxu2 %v6539_v42  ;;  %v11318_v30 = vld [vmem:[#allocation40_spill] sm:$0xff]  ;;  %v11319_v42 = vld [vmem:[#allocation61_spill] sm:$0xff] }
 0x1a3   :  { %1545 = vmatpush.msrb.mxu1 %v7107_v0  ;;  %1585 = vmatpush.msrb.mxu3 %v11313_v27  ;;  %v11320_v34 = vld [vmem:[#allocation72_spill] sm:$0xff]  ;;  %v7120_v0 = vld [vmem:[#allocation3 + $0x48] sm:$0xff]  ;;  %v11322_v27 = vld [vmem:[#allocation43_spill] sm:$0xff] }
 0x1a4   :  { %1535 = vmatpush.msrb.mxu0 %v11314_v43  ;;  %1575 = vmatpush.msrb.mxu2 %v6551_v45  ;;  %11321 = vst [vmem:[#allocation67_spill] sm:$0xff] %v7120_v0  ;;  %v11323_v45 = vld [vmem:[#allocation65_spill] sm:$0xff]  ;;  %v11324_v43 = vld [vmem:[#allocation76_spill] sm:$0xff] }
 0x1a5   :  { %1546 = vmatpush.msrb.mxu1 %v11315_v25  ;;  %1586 = vmatpush.msrb.mxu3 %v11316_v23  ;;  %v7126_v25 = vld [vmem:[#allocation3 + $0x8] sm:$0xff] }
 0x1a6   :  { %1536 = vmatpush.msrb.mxu0 %v11317_v20  ;;  %1576 = vmatpush.msrb.mxu2 %v6563_v44  ;;  %11325 = vst [vmem:[#allocation33_spill] sm:$0xff] %v7126_v25  ;;  %v11326_v44 = vld [vmem:[#allocation45_spill] sm:$0xff] }
 0x1a7   :  { %1547 = vmatpush.msrb.mxu1 %v11318_v30  ;;  %1587 = vmatpush.msrb.mxu3 %v11319_v42  ;;  %v11327_v20 = vld [vmem:[#allocation69_spill] sm:$0xff]  ;;  %v7132_v30 = vld [vmem:[#allocation3 + $0x3d8] sm:$0xff] }
 0x1a8   :  { %1537 = vmatpush.msrb.mxu0 %v11320_v34  ;;  %1577 = vmatpush.msrb.mxu2 %v7120_v0  ;;  %v11328_v23 = vld [vmem:[#allocation77_spill] sm:$0xff]  ;;  %11329 = vst [vmem:[#allocation46_spill] sm:$0xff] %v7132_v30  ;;  %v11330_v42 = vld [vmem:[#allocation48_spill] sm:$0xff] }
 0x1a9   :  { %1548 = vmatpush.msrb.mxu1 %v11322_v27  ;;  %1588 = vmatpush.msrb.mxu3 %v11323_v45  ;;  %v11331_v34 = vld [vmem:[#allocation73_spill] sm:$0xff]  ;;  %v7138_v45 = vld [vmem:[#allocation3 + $0x398] sm:$0xff] }
 0x1aa   :  { %1538 = vmatpush.msrb.mxu0 %v11324_v43  ;;  %1578 = vmatpush.msrb.mxu2 %v7126_v25  ;;  %v11332_v27 = vld [vmem:[#allocation81_spill] sm:$0xff]  ;;  %11333 = vst [vmem:[#allocation71_spill] sm:$0xff] %v7138_v45  ;;  %v11334_v43 = vld [vmem:[#allocation51_spill] sm:$0xff] }
 0x1ab   :  { %1549 = vmatpush.msrb.mxu1 %v11326_v44  ;;  %1589 = vmatpush.msrb.mxu3 %v11327_v20  ;;  %v11335_v44 = vld [vmem:[#allocation78_spill] sm:$0xff]  ;;  %v7144_v20 = vld [vmem:[#allocation3 + $0x358] sm:$0xff]  ;;  %v1018_v25 = vld [vmem:[#allocation2] sm:$0xc] }
 0x1ac   :  { %1649 = vmatpush.msra.mxu0 %v11328_v23  ;;  %1689 = vmatpush.msra.mxu2 %v7132_v30  ;;  %11336 = vst [vmem:[#allocation35_spill] sm:$0xff] %v7144_v20  ;;  %v11337_v23 = vld [vmem:[#allocation54_spill] sm:$0xff] }
 0x1ad   :  { %1550 = vmatpush.msrb.mxu1 %v11330_v42  ;;  %1590 = vmatpush.msrb.mxu3 %v11331_v34  ;;  %v11338_v42 = vld [vmem:[#allocation82_spill] sm:$0xff]  ;;  %v7150_v34 = vld [vmem:[#allocation3 + $0x318] sm:$0xff] }
 0x1ae   :  { %1650 = vmatpush.msra.mxu0 %v11332_v27  ;;  %1690 = vmatpush.msra.mxu2 %v7138_v45  ;;  %11339 = vst [vmem:[#allocation49_spill] sm:$0xff] %v7150_v34  ;;  %v11340_v27 = vld [vmem:[#allocation58_spill] sm:$0xff] }
 0x1af   :  { %1551 = vmatpush.msrb.mxu1 %v11334_v43  ;;  %1591 = vmatpush.msrb.mxu3 %v11335_v44  ;;  %v11341_v43 = vld [vmem:[#allocation85_spill] sm:$0xff]  ;;  %v11343_v44 = vld [vmem:[#allocation62_spill] sm:$0xff] }
 0x1b0   :  { %1651 = vmatpush.msra.mxu0 %v6533_v35  ;;  %1691 = vmatpush.msra.mxu2 %v7144_v20  ;;  %v7156_v35 = vld [vmem:[#allocation3 + $0x2d8] sm:$0xff] }
 0x1b1   :  { %1552 = vmatpush.msrb.mxu1 %v11337_v23  ;;  %1592 = vmatpush.msrb.mxu3 %v11338_v42  ;;  %11342 = vst [vmem:[#allocation75_spill] sm:$0xff] %v7156_v35  ;;  %v11345_v23 = vld [vmem:[#allocation66_spill] sm:$0xff]  ;;  %v11346_v42 = vld [vmem:[#allocation88_spill] sm:$0xff] }
 0x1b2   :  { %1652 = vmatpush.msra.mxu0 %v6545_v38  ;;  %1692 = vmatpush.msra.mxu2 %v7150_v34  ;;  %v7162_v38 = vld [vmem:[#allocation3 + $0x298] sm:$0xff]  ;;  %v1017_v34 = vld [vmem:[#allocation2 + $0x30] sm:$0xc] }
 0x1b3   :  { %1553 = vmatpush.msrb.mxu1 %v11340_v27  ;;  %1593 = vmatpush.msrb.mxu3 %v11341_v43  ;;  %11344 = vst [vmem:[#allocation38_spill] sm:$0xff] %v7162_v38  ;;  %v11348_v27 = vld [vmem:[#allocation70_spill] sm:$0xff]  ;;  %v1019_v20 = vld [vmem:[#allocation2 + $0x58] sm:$0xc] }
 0x1b4   :  { %1653 = vmatpush.msra.mxu0 %v6557_v22  ;;  %1693 = vmatpush.msra.mxu2 %v7156_v35  ;;  %v7168_v22 = vld [vmem:[#allocation3 + $0x258] sm:$0xff]  ;;  %v11349_v43 = vld [vmem:[#allocation90_spill] sm:$0xff] }
 0x1b5   :  { %1554 = vmatpush.msrb.mxu1 %v11343_v44  ;;  %1594 = vmatpush.msrb.mxu3 %v6548_v49  ;;  %11347 = vst [vmem:[#allocation52_spill] sm:$0xff] %v7168_v22  ;;  %v7174_v49 = vld [vmem:[#allocation3 + $0x218] sm:$0xff]  ;;  %v7178_v44 = vld [vmem:[#allocation3 + $0x448] sm:$0xff] }
 0x1b6   :  { %1654 = vmatpush.msra.mxu0 %v6569_v21  ;;  %1694 = vmatpush.msra.mxu2 %v7162_v38  ;;  %11350 = vst [vmem:[#allocation79_spill] sm:$0xff] %v7174_v49  ;;  %v11351_v21 = vld [vmem:[#allocation74_spill] sm:$0xff]  ;;  %v11369_v38 = vld [vmem:[#allocation89_spill] sm:$0xff] }
 0x1b7   :  { %1555 = vmatpush.msrb.mxu1 %v11345_v23  ;;  %1595 = vmatpush.msrb.mxu3 %v11346_v42  ;;  %11352 = vst [vmem:[#allocation41_spill] sm:$0xff] %v7178_v44  ;;  %v7184_v23 = vld [vmem:[#allocation3 + $0x1d8] sm:$0xff] }
 0x1b8   :  { %1655 = vmatpush.msra.mxu0 %v6579_v48  ;;  %1695 = vmatpush.msra.mxu2 %v7168_v22  ;;  %v7181_v48 = vld [vmem:[#allocation3 + $0x1d0] sm:$0xff]  ;;  %11354 = vst [vmem:[#allocation56_spill] sm:$0xff] %v7184_v23  ;;  %v11355_v42 = vld [vmem:[#allocation80_spill] sm:$0xff] }
 0x1b9   :  { %1556 = vmatpush.msrb.mxu1 %v11348_v27  ;;  %1596 = vmatpush.msrb.mxu3 %v11349_v43  ;;  %11353 = vst [vmem:[#allocation47_spill] sm:$0xff] %v7181_v48  ;;  %v11357_v27 = vld [vmem:[#allocation84_spill] sm:$0xff]  ;;  %v11365_v22 = vld [vmem:[#allocation87_spill] sm:$0xff] }
 0x1ba   :  { %1656 = vmatpush.msra.mxu0 %v6588_v37  ;;  %1696 = vmatpush.msra.mxu2 %v7174_v49  ;;  %v7188_v37 = vld [vmem:[#allocation3 + $0x408] sm:$0xff]  ;;  %v7192_v43 = vld [vmem:[#allocation3 + $0x7d8] sm:$0xff]  ;;  %v7205_v49 = vld [vmem:[#allocation3 + $0x150] sm:$0xff] }
 0x1bb   :  { %1557 = vmatpush.msrb.mxu1 %v11351_v21  ;;  %1597 = vmatpush.msrb.mxu3 %v7178_v44  ;;  %11356 = vst [vmem:[#allocation83_spill] sm:$0xff] %v7188_v37  ;;  %v7195_v21 = vld [vmem:[#allocation3 + $0x190] sm:$0xff] }
 0x1bc   :  { %1657 = vmatpush.msra.mxu0 %v7181_v48  ;;  %1697 = vmatpush.msra.mxu2 %v7184_v23  ;;  %11358 = vst [vmem:[#allocation50_spill] sm:$0xff] %v7192_v43  ;;  %v7198_v48 = vld [vmem:[#allocation3 + $0x198] sm:$0xff]  ;;  %v11361_v23 = vld [vmem:[#allocation86_spill] sm:$0xff] }
 0x1bd   :  { %1558 = vmatpush.msrb.mxu1 %v11355_v42  ;;  %1598 = vmatpush.msrb.mxu3 %v7188_v37  ;;  %11359 = vst [vmem:[#allocation60_spill] sm:$0xff] %v7195_v21  ;;  %v7202_v42 = vld [vmem:[#allocation3 + $0x798] sm:$0xff] }
 0x1be   :  { %1658 = vmatpush.msra.mxu0 %v7195_v21  ;;  %11360 = vst [vmem:[#allocation53_spill] sm:$0xff] %v7198_v48  ;;  %1698 = vmatpush.msra.mxu2 %v7198_v48  ;;  %v7212_v21 = vld [vmem:[#allocation3 + $0x758] sm:$0xff]  ;;  %v7215_v48 = vld [vmem:[#allocation3 + $0x110] sm:$0xff] }
 0x1bf   :  { %1669 = vmatpush.msra.mxu1 %v11357_v27  ;;  %1709 = vmatpush.msra.mxu3 %v7192_v43  ;;  %11362 = vst [vmem:[#allocation64_spill] sm:$0xff] %v7202_v42  ;;  %v7208_v27 = vld [vmem:[#allocation3 + $0x158] sm:$0xff] }
 0x1c0   :  { %11363 = vst [vmem:[#allocation37_spill] sm:$0xff] %v7205_v49  ;;  %1659 = vmatpush.msra.mxu0 %v7205_v49  ;;  %1699 = vmatpush.msra.mxu2 %v7208_v27  ;;  %v7222_v49 = vld [vmem:[#allocation3 + $0x718] sm:$0xff] }
 0x1c1   :  { %1670 = vmatpush.msra.mxu1 %v11361_v23  ;;  %1710 = vmatpush.msra.mxu3 %v7202_v42  ;;  %11364 = vst [vmem:[#allocation57_spill] sm:$0xff] %v7208_v27  ;;  %v7218_v23 = vld [vmem:[#allocation3 + $0x118] sm:$0xff]  ;;  %v7225_v27 = vld [vmem:[#allocation3 + $0xd0] sm:$0xff] }
 0x1c2   :  { %11366 = vst [vmem:[#allocation68_spill] sm:$0xff] %v7212_v21  ;;  %1660 = vmatpush.msra.mxu0 %v7215_v48  ;;  %1700 = vmatpush.msra.mxu2 %v7218_v23 }
 0x1c3   :  { %1671 = vmatpush.msra.mxu1 %v11365_v22  ;;  %1711 = vmatpush.msra.mxu3 %v7212_v21  ;;  %11367 = vst [vmem:[#allocation40_spill] sm:$0xff] %v7215_v48  ;;  %v7228_v22 = vld [vmem:[#allocation3 + $0xd8] sm:$0xff] }
 0x1c4   :  { %11368 = vst [vmem:[#allocation61_spill] sm:$0xff] %v7218_v23  ;;  %1661 = vmatpush.msra.mxu0 %v7225_v27  ;;  %1701 = vmatpush.msra.mxu2 %v7228_v22  ;;  %v7232_v48 = vld [vmem:[#allocation3 + $0x6d8] sm:$0xff]  ;;  %v7235_v23 = vld [vmem:[#allocation3 + $0x90] sm:$0xff] }
 0x1c5   :  { %1672 = vmatpush.msra.mxu1 %v11369_v38  ;;  %11370 = vst [vmem:[#allocation72_spill] sm:$0xff] %v7222_v49  ;;  %1712 = vmatpush.msra.mxu3 %v7222_v49  ;;  %v7238_v38 = vld [vmem:[#allocation3 + $0x98] sm:$0xff] }
 0x1c6   :  { %11371 = vst [vmem:[#allocation43_spill] sm:$0xff] %v7225_v27  ;;  %1662 = vmatpush.msra.mxu0 %v7235_v23  ;;  %1702 = vmatpush.msra.mxu2 %v7238_v38  ;;  %v7242_v27 = vld [vmem:[#allocation3 + $0x698] sm:$0xff] }
 0x1c7   :  { %11372 = vst [vmem:[#allocation65_spill] sm:$0xff] %v7228_v22  ;;  %1673 = vmatpush.msra.mxu1 %v6576_v41  ;;  %1713 = vmatpush.msra.mxu3 %v7232_v48  ;;  %v7245_v22 = vld [vmem:[#allocation3 + $0x50] sm:$0xff]  ;;  %v7248_v41 = vld [vmem:[#allocation3 + $0x58] sm:$0xff] }
 0x1c8   :  { %11373 = vst [vmem:[#allocation76_spill] sm:$0xff] %v7232_v48  ;;  %1663 = vmatpush.msra.mxu0 %v7245_v22  ;;  %1703 = vmatpush.msra.mxu2 %v7248_v41 }
 0x1c9   :  { %11374 = vst [vmem:[#allocation45_spill] sm:$0xff] %v7235_v23  ;;  %1674 = vmatpush.msra.mxu1 %v6584_v52  ;;  %1714 = vmatpush.msra.mxu3 %v7242_v27  ;;  %v7252_v23 = vld [vmem:[#allocation3 + $0x658] sm:$0xff] }
 0x1ca   :  { %11375 = vst [vmem:[#allocation69_spill] sm:$0xff] %v7238_v38  ;;  %v7255_v38 = vld [vmem:[#allocation3 + $0x10] sm:$0xff]  ;;  %v7258_v52 = vld [vmem:[#allocation3 + $0x18] sm:$0xff] }
 0x1cb   :  { %11376 = vst [vmem:[#allocation77_spill] sm:$0xff] %v7242_v27  ;;  %1675 = vmatpush.msra.mxu1 %v6592_v46  ;;  %1715 = vmatpush.msra.mxu3 %v7252_v23  ;;  %v7266_v46 = vld [vmem:[#allocation3 + $0x5d8] sm:$0xff] }
 0x1cc   :  { %11377 = vst [vmem:[#allocation48_spill] sm:$0xff] %v7245_v22  ;;  %1664 = vmatpush.msra.mxu0 %v7255_v38  ;;  %1704 = vmatpush.msra.mxu2 %v7258_v52  ;;  %v7262_v22 = vld [vmem:[#allocation3 + $0x618] sm:$0xff] }
 0x1cd   :  { %11378 = vst [vmem:[#allocation73_spill] sm:$0xff] %v7248_v41  ;;  %1676 = vmatpush.msra.mxu1 %v6598_v47  ;;  %1716 = vmatpush.msra.mxu3 %v7262_v22  ;;  %v7269_v41 = vld [vmem:[#allocation3 + $0x590] sm:$0xff]  ;;  %v7278_v47 = vld [vmem:[#allocation3 + $0x558] sm:$0xff] }
 0x1ce   :  { %11379 = vst [vmem:[#allocation81_spill] sm:$0xff] %v7252_v23 }
 0x1cf   :  { %11380 = vst [vmem:[#allocation51_spill] sm:$0xff] %v7255_v38  ;;  %1677 = vmatpush.msra.mxu1 %v6604_v50  ;;  %1717 = vmatpush.msra.mxu3 %v7266_v46  ;;  %v7272_v38 = vld [vmem:[#allocation3 + $0x598] sm:$0xff]  ;;  %v7281_v50 = vld [vmem:[#allocation3 + $0x510] sm:$0xff] }
 0x1d0   :  { %11381 = vst [vmem:[#allocation78_spill] sm:$0xff] %v7258_v52  ;;  %v7275_v52 = vld [vmem:[#allocation3 + $0x550] sm:$0xff] }
 0x1d1   :  { %11382 = vst [vmem:[#allocation54_spill] sm:$0xff] %v7262_v22  ;;  %1678 = vmatpush.msra.mxu1 %v7269_v41  ;;  %1718 = vmatpush.msra.mxu3 %v7272_v38  ;;  %v1042_v22 = vpop.f32.mrf.mxu0 }
 0x1d2   :  { %11383 = vst [vmem:[#allocation82_spill] sm:$0xff] %v7266_v46  ;;  %v7284_v46 = vld [vmem:[#allocation3 + $0x518] sm:$0xff] }
 0x1d3   :  { %11384 = vst [vmem:[#allocation58_spill] sm:$0xff] %v7269_v41  ;;  %1679 = vmatpush.msra.mxu1 %v7275_v52  ;;  %1719 = vmatpush.msra.mxu3 %v7278_v47  ;;  %v7287_v41 = vld [vmem:[#allocation3 + $0x4d0] sm:$0xff] }
 0x1d4   :  { %11385 = vst [vmem:[#allocation85_spill] sm:$0xff] %v7272_v38  ;;  %v7290_v38 = vld [vmem:[#allocation3 + $0x4d8] sm:$0xff] }
 0x1d5   :  { %11386 = vst [vmem:[#allocation62_spill] sm:$0xff] %v7275_v52  ;;  %1680 = vmatpush.msra.mxu1 %v7281_v50  ;;  %1720 = vmatpush.msra.mxu3 %v7284_v46  ;;  %v7293_v52 = vld [vmem:[#allocation3 + $0x490] sm:$0xff] }
 0x1d6   :  { %11387 = vst [vmem:[#allocation66_spill] sm:$0xff] %v7278_v47  ;;  %v7296_v47 = vld [vmem:[#allocation3 + $0x498] sm:$0xff] }
 0x1d7   :  { %11388 = vst [vmem:[#allocation88_spill] sm:$0xff] %v7281_v50  ;;  %1681 = vmatpush.msra.mxu1 %v7287_v41  ;;  %1721 = vmatpush.msra.mxu3 %v7290_v38  ;;  %v7299_v50 = vld [vmem:[#allocation3 + $0x450] sm:$0xff]  ;;  %v1102_v23 = vpop.f32.mrf.mxu3 }
 0x1d8   :  { %11389 = vst [vmem:[#allocation70_spill] sm:$0xff] %v7284_v46  ;;  %v7302_v46 = vld [vmem:[#allocation3 + $0x458] sm:$0xff] }
 0x1d9   :  { %11390 = vst [vmem:[#allocation90_spill] sm:$0xff] %v7287_v41  ;;  %1682 = vmatpush.msra.mxu1 %v7293_v52  ;;  %1722 = vmatpush.msra.mxu3 %v7296_v47  ;;  %v7305_v41 = vld [vmem:[#allocation3 + $0x410] sm:$0xff]  ;;  %v1168_v48 = vpop.f32.mrf.mxu0 }
 0x1da   :  { %11391 = vst [vmem:[#allocation74_spill] sm:$0xff] %v7290_v38  ;;  %v7308_v38 = vld [vmem:[#allocation3 + $0x418] sm:$0xff] }
 0x1db   :  { %11392 = vst [vmem:[#allocation80_spill] sm:$0xff] %v7293_v52  ;;  %1683 = vmatpush.msra.mxu1 %v7299_v50  ;;  %1723 = vmatpush.msra.mxu3 %v7302_v46  ;;  %v1062_v52 = vpop.f32.mrf.mxu1 }
 0x1dc   :  { %11393 = vst [vmem:[#allocation84_spill] sm:$0xff] %v7296_v47  ;;  %v1082_v47 = vpop.f32.mrf.mxu2  ;;  %v1063_v49 = vadd.f32 %v1062_v52, %v1042_v22 }
 0x1dd   :  { %11394 = vst [vmem:[#allocation86_spill] sm:$0xff] %v7299_v50  ;;  %1684 = vmatpush.msra.mxu1 %v7305_v41  ;;  %1724 = vmatpush.msra.mxu3 %v7308_v38  ;;  %v1103_v43 = vadd.f32 %v1102_v23, %v1082_v47 }
 0x1de   :  { %11395 = vst [vmem:[#allocation87_spill] sm:$0xff] %v7302_v46  ;;  %v1107_v21 = vrot.slane %v1063_v49, 6 }
 0x1df   :  { %11396 = vst [vmem:[#allocation89_spill] sm:$0xff] %v7305_v41  ;;  %v1108_v45 = vrot.slane %v1103_v43, 6 }
 0x1e0   :  { %11397 = vst [vmem:[#allocation134_spill] sm:$0xff] %v7308_v38  ;;  %v1228_v42 = vpop.f32.mrf.mxu3  ;;  %v1111_v41 = vadd.f32 %v1107_v21, %v1017_v34 }
 0x1e1   :  { %v1112_v2 = vadd.f32 %v1108_v45, %v1018_v25 }
 0x1e2   :  { %v4614_v30 = vmul.f32 -1.442695, %v1111_v41 }
 0x1e3   :  { %v1188_v27 = vpop.f32.mrf.mxu1  ;;  %v4615_v49 = vmul.f32 -1.442695, %v1112_v2 }
 0x1e4   :  { %v1189_v50 = vadd.f32 %v1188_v27, %v1168_v48  ;;  %v1208_v46 = vpop.f32.mrf.mxu2  ;;  %4694 = vpow2.f32 %v4614_v30 }
 0x1e5   :  { %v1229_v37 = vadd.f32 %v1228_v42, %v1208_v46 }
 0x1e6   :  { %v1233_v35 = vrot.slane %v1189_v50, 6 }
 0x1e7   :  { %v1234_v38 = vrot.slane %v1229_v37, 6 }
 0x1e8   :  { %v1237_v44 = vadd.f32 %v1233_v35, %v1019_v20 }
 0x1e9   :  { %v1238_v29 = vadd.f32 %v1234_v38, %v1020_v26  ;;  %v1294_v26 = vpop.f32.mrf.mxu0 }
 0x1ea   :  { %v4616_v0 = vmul.f32 -1.442695, %v1237_v44  ;;  %v4695_v27 = vpop.eup %4694 }
 0x1eb   :  { %v4617_v48 = vmul.f32 -1.442695, %v1238_v29  ;;  %v7311_v42 = vadd.f32 1.0, %v4695_v27  ;;  %v1023_v27 = vld [vmem:[#allocation2 + $0x8] sm:$0xc] }
 0x1ec   :  { %4696 = vpow2.f32 %v4616_v0  ;;  %v1334_v45 = vpop.f32.mrf.mxu2 }
 0x1ed   :  { %4698 = vpow2.f32 %v4615_v49  ;;  %v1132_v56 = vand.u32 2147483648, %v7311_v42  ;;  %vm1126_vm11 = vweird.f32 %v7311_v42 }
 0x1ee   :  { %4700 = vpow2.f32 %v4617_v48 }
 0x1ef   :  { %4702 = vrcp.f32 %v7311_v42 }
 0x1f2   :  { %v4697_v23 = vpop.eup %4696 }
 0x1f3   :  { %v7313_v34 = vadd.f32 1.0, %v4697_v23  ;;  %v4699_v20 = vpop.eup %4698 }
 0x1f4   :  { %v4701_v35 = vpop.eup %4700  ;;  %v7317_v25 = vadd.f32 1.0, %v4699_v20 }
 0x1f5   :  { %4704 = vrcp.f32 %v7313_v34  ;;  %v1314_v0 = vpop.f32.mrf.mxu1  ;;  %v7319_v2 = vadd.f32 1.0, %v4701_v35  ;;  %v7321_v29 = vpop.eup %4702  ;;  %vm1252_vm12 = vweird.f32 %v7313_v34 }
 0x1f6   :  { %4706 = vrcp.f32 %v7317_v25  ;;  %v1315_v37 = vadd.f32 %v1314_v0, %v1294_v26  ;;  %v1122_v43 = vmul.f32 %v7321_v29, %v7311_v42  ;;  %v1021_v0 = vld [vmem:[#allocation2 + $0x50] sm:$0xc]  ;;  %vm1127_vm9 = vweird.f32 %v7321_v29 }
 0x1f7   :  { %4708 = vrcp.f32 %v7319_v2  ;;  %vm7354_vm13 = vmor %vm1126_vm11, %vm1127_vm9  ;;  %vm1141_vm0 = vweird.f32 %v7317_v25  ;;  %vm1267_vm4 = vweird.f32 %v7319_v2 }
 0x1f8   :  { %v1359_v47 = vrot.slane %v1315_v37, 6  ;;  %v1123_v49 = vsub.f32 1.0, %v1122_v43 }
 0x1fa   :  { %v1124_v43 = vmul.f32 %v7321_v29, %v1123_v49  ;;  %v1258_v49 = vand.u32 2147483648, %v7313_v34 }
 0x1fb   :  { %v7324_v30 = vpop.eup %4704 }
 0x1fc   :  { %v1354_v44 = vpop.f32.mrf.mxu3  ;;  %v1248_v21 = vmul.f32 %v7324_v30, %v7313_v34  ;;  %v7331_v52 = vpop.eup %4706  ;;  %vm1253_vm10 = vweird.f32 %v7324_v30 }
 0x1fd   :  { %v7333_v46 = vpop.eup %4708  ;;  %v1355_v23 = vadd.f32 %v1354_v44, %v1334_v45  ;;  %v1137_v35 = vmul.f32 %v7331_v52, %v7317_v25  ;;  %vm7362_vm14 = vmor %vm1252_vm12, %vm1253_vm10  ;;  %vm1142_vm2 = vweird.f32 %v7331_v52 }
 0x1fe   :  { %v1249_v48 = vsub.f32 1.0, %v1248_v21  ;;  %v1263_v26 = vmul.f32 %v7333_v46, %v7319_v2  ;;  %vm1268_vm3 = vweird.f32 %v7333_v46  ;;  %vm7388_vm5 = vmor %vm1141_vm0, %vm1142_vm2 }
 0x1ff   :  { %v1360_v21 = vrot.slane %v1355_v23, 6  ;;  %v1138_v44 = vsub.f32 1.0, %v1137_v35  ;;  %vm1269_vm6 = vmor %vm1267_vm4, %vm1268_vm3 }
 0x200   :  { %v1250_v37 = vmul.f32 %v7324_v30, %v1249_v48  ;;  %v1256_v48 = vand.u32 2147483647, %v7313_v34 }
 0x202   :  { %vm1257_vm1 = vcmp.eq.f32.partialorder %v1256_v48, 8.507059e+37 }
 0x203   :  { %v1396_v22 = vpop.f32.mrf.mxu0 }
 0x206   :  { %v1436_v10 = vpop.f32.mrf.mxu2 }
 0x21b   :  { %v1416_v38 = vpop.f32.mrf.mxu1 }
 0x21c   :  { %v1417_v41 = vadd.f32 %v1416_v38, %v1396_v22  ;;  %v1363_v38 = vadd.f32 %v1359_v47, %v1021_v0 }
 0x21e   :  { %v1461_v50 = vrot.slane %v1417_v41, 6  ;;  %v1264_v41 = vsub.f32 1.0, %v1263_v26 }
 0x220   :  { %v1465_v20 = vadd.f32 %v1461_v50, %v1023_v27  ;;  %v1130_v50 = vand.u32 2147483647, %v7311_v42  ;;  %v1024_v27 = vld [vmem:[#allocation2 + $0x48] sm:$0xc]  ;;  %v1265_v35 = vmul.f32 %v7333_v46, %v1264_v41  ;;  %v1139_v42 = vmul.f32 %v7331_v52, %v1138_v44 }
 0x221   :  { %v1456_v22 = vpop.f32.mrf.mxu3  ;;  %v1259_v44 = vor.u32 1.1754944e-38, %v1258_v49 }
 0x222   :  { %v4618_v40 = vmul.f32 -1.442695, %v1465_v20  ;;  %v1457_v54 = vadd.f32 %v1456_v22, %v1436_v10  ;;  %v1125_v10 = vadd.f32 %v7321_v29, %v1124_v43  ;;  %v1369_v22 = vrot.slane %v6680_v53, 6 }
 0x223   :  { %vm7366_vm15 = vcmp.eq.f32.partialorder %v1130_v50, 8.507059e+37  ;;  %v1266_v41 = vadd.f32 %v7333_v46, %v1265_v35 }
 0x224   :  { %4710 = vpow2.f32 %v4618_v40  ;;  %v1462_v45 = vrot.slane %v1457_v54, 6  ;;  %v1251_v40 = vadd.f32 %v7324_v30, %v1250_v37  ;;  %v1022_v54 = vld [vmem:[#allocation2 + $0x68] sm:$0xc]  ;;  %v1133_v37 = vor.u32 1.1754944e-38, %v1132_v56 }
 0x225   :  { %4712 = vtanh.f32 %v1363_v38  ;;  %v1364_v23 = vadd.f32 %v1360_v21, %v1022_v54  ;;  %v1129_v43 = vsel %vm7354_vm13, %v7321_v29, %v1125_v10  ;;  %v1140_v56 = vadd.f32 %v7331_v52, %v1139_v42 }
 0x226   :  { %v1466_v47 = vadd.f32 %v1462_v45, %v1024_v27  ;;  %v1255_v53 = vsel %vm7362_vm14, %v7324_v30, %v1251_v40  ;;  %v1273_v29 = vand.u32 2147483648, %v7319_v2  ;;  %v1134_v30 = vsel %vm7366_vm15, %v1133_v37, %v1129_v43 }
 0x227   :  { %v1260_v50 = vsel %vm1257_vm1, %v1259_v44, %v1255_v53  ;;  %v1147_v27 = vand.u32 2147483648, %v7317_v25  ;;  %v1145_v40 = vand.u32 2147483647, %v7317_v25  ;;  %v1271_v54 = vand.u32 2147483647, %v7319_v2 }
 0x228   :  { %v4619_v20 = vmul.f32 -1.442695, %v1466_v47  ;;  %v1373_v48 = vmul.f32 %v1369_v22, %v1260_v50  ;;  %v1274_v42 = vor.u32 1.1754944e-38, %v1273_v29  ;;  %v1370_v22 = vrot.slane %v6742_v4, 6 }
 0x229   :  { %vm1146_vm7 = vcmp.eq.f32.partialorder %v1145_v40, 8.507059e+37  ;;  %vm1272_vm8 = vcmp.eq.f32.partialorder %v1271_v54, 8.507059e+37 }
 0x22a   :  { %v4711_v0 = vpop.eup %4710  ;;  %4714 = vpow2.f32 %v4619_v20  ;;  %v1270_v20 = vsel %vm1269_vm6, %v7333_v46, %v1266_v41 }
 0x22b   :  { %v1473_v21 = vadd.f32 1.0, %v4711_v0  ;;  %v4713_v45 = vpop.eup %4712  ;;  %4716 = vtanh.f32 %v1364_v23  ;;  %v1144_v23 = vsel %vm7388_vm5, %v7331_v52, %v1140_v56  ;;  %v1148_v0 = vor.u32 1.1754944e-38, %v1147_v27 }
 0x22c   :  { %v1375_v47 = vmul.f32 %v4713_v45, %v1134_v30  ;;  %v1275_v2 = vsel %vm1272_vm8, %v1274_v42, %v1270_v20 }
 0x22d   :  { %4718 = vrcp.f32 %v1473_v21  ;;  %v1149_v25 = vsel %vm1146_vm7, %v1148_v0, %v1144_v23  ;;  %v1374_v52 = vmul.f32 %v1370_v22, %v1275_v2  ;;  %v1486_v46 = vand.u32 2147483648, %v1473_v21  ;;  %v11437_v2 = vld [vmem:[#allocation115_spill] sm:$0xff] }
 0x22e   :  { %v7398_v34 = vadd.f32 %v1375_v47, %v1373_v48  ;;  %v1484_v44 = vand.u32 2147483647, %v1473_v21  ;;  %vm1480_vm10 = vweird.f32 %v1473_v21  ;;  %v7490_v22 = vld [vmem:[#allocation3 + $0x378] sm:$0xff] }
 0x22f   :  { %v1487_v50 = vor.u32 1.1754944e-38, %v1486_v46  ;;  %v11442_v46 = vld [vmem:[#allocation119_spill] sm:$0xff] }
 0x230   :  { %v4715_v49 = vpop.eup %4714  ;;  %vm1485_vm12 = vcmp.eq.f32.partialorder %v1484_v44, 8.507059e+37  ;;  %v11443_v44 = vld [vmem:[#allocation29_spill] sm:$0xff] }
 0x231   :  { %v1474_v35 = vadd.f32 1.0, %v4715_v49  ;;  %v4717_v26 = vpop.eup %4716 }
 0x232   :  { %v1376_v43 = vmul.f32 %v4717_v26, %v1149_v25  ;;  %v11436_v25 = vld [vmem:[#allocation24_spill] sm:$0xff] }
 0x233   :  { %v4719_v38 = vpop.eup %4718  ;;  %4720 = vrcp.f32 %v1474_v35  ;;  %v1501_v40 = vand.u32 2147483648, %v1474_v35  ;;  %v1499_v48 = vand.u32 2147483647, %v1474_v35  ;;  %vm1495_vm14 = vweird.f32 %v1474_v35 }
 0x234   :  { %v1476_v37 = vmul.f32 %v4719_v38, %v1473_v21  ;;  %4722 = vtanh.f32 %v7398_v34  ;;  %vm1481_vm9 = vweird.f32 %v4719_v38  ;;  %v7402_v41 = vadd.f32 %v1376_v43, %v1374_v52  ;;  %v11439_v43 = vld [vmem:[#allocation26_spill] sm:$0xff]  ;;  %v11441_v52 = vld [vmem:[#allocation100_spill] sm:$0xff] }
 0x235   :  { %vm1482_vm11 = vmor %vm1480_vm10, %vm1481_vm9  ;;  %v1502_v21 = vor.u32 1.1754944e-38, %v1501_v40  ;;  %vm1500_vm0 = vcmp.eq.f32.partialorder %v1499_v48, 8.507059e+37  ;;  %v11450_v40 = vld [vmem:[#allocation108_spill] sm:$0xff]  ;;  %v11452_v48 = vld [vmem:[#allocation127_spill] sm:$0xff] }
 0x236   :  { %v1477_v53 = vsub.f32 1.0, %v1476_v37  ;;  %4724 = vtanh.f32 %v7402_v41  ;;  %v11438_v37 = vld [vmem:[#allocation99_spill] sm:$0xff] }
 0x238   :  { %v1478_v45 = vmul.f32 %v4719_v38, %v1477_v53  ;;  %v11440_v53 = vld [vmem:[#allocation117_spill] sm:$0xff] }
 0x239   :  { %v4721_v56 = vpop.eup %4720 }
 0x23a   :  { %v1479_v29 = vadd.f32 %v4719_v38, %v1478_v45  ;;  %v1491_v30 = vmul.f32 %v4721_v56, %v1474_v35  ;;  %v4723_v47 = vpop.eup %4722  ;;  %vm1496_vm13 = vweird.f32 %v4721_v56  ;;  %v7499_v45 = vld [vmem:[#allocation3 + $0x338] sm:$0xff] }
 0x23b   :  { %vm1497_vm15 = vmor %vm1495_vm14, %vm1496_vm13 }
 0x23c   :  { %v1483_v27 = vsel %vm1482_vm11, %v4719_v38, %v1479_v29  ;;  %v1492_v4 = vsub.f32 1.0, %v1491_v30  ;;  %v4725_v42 = vpop.eup %4724  ;;  %v11445_v29 = vld [vmem:[#allocation121_spill] sm:$0xff]  ;;  %v7505_v30 = vld [vmem:[#allocation3 + $0x2f8] sm:$0xff] }
 0x23d   :  { %v1488_v10 = vsel %vm1485_vm12, %v1487_v50, %v1483_v27  ;;  %v11446_v50 = vld [vmem:[#allocation32_spill] sm:$0xff]  ;;  %v11447_v27 = vld [vmem:[#allocation106_spill] sm:$0xff] }
 0x23e   :  { %v1507_v54 = vmul.f32 %v4723_v47, %v1488_v10  ;;  %v1493_v49 = vmul.f32 %v4721_v56, %v1492_v4  ;;  %v11448_v4 = vld [vmem:[#allocation123_spill] sm:$0xff]  ;;  %v11449_v10 = vld [vmem:[#allocation124_spill] sm:$0xff] }
 0x23f   :  { %v7511_v47 = vld [vmem:[#allocation3 + $0x2b8] sm:$0xff] }
 0x240   :  { %v7405_v23 = vrot.slane %v1507_v54, 2  ;;  %v1494_v20 = vadd.f32 %v4721_v56, %v1493_v49  ;;  %v11451_v54 = vld [vmem:[#allocation126_spill] sm:$0xff]  ;;  %v7517_v49 = vld [vmem:[#allocation3 + $0x278] sm:$0xff] }
 0x242   :  { %v1498_v26 = vsel %vm1497_vm15, %v4721_v56, %v1494_v20  ;;  %1539 = vmatmul.f32.vlgmr.msrb.gmra.mxu0 %v7405_v23  ;;  %1579 = vmatmul.f32.vlgmr.msrb.gmra.mxu2 %v7405_v23  ;;  %v11444_v56 = vld [vmem:[#allocation103_spill] sm:$0xff]  ;;  %v11453_v20 = vld [vmem:[#allocation110_spill] sm:$0xff] }
 0x243   :  { %v1503_v0 = vsel %vm1500_vm0, %v1502_v21, %v1498_v26  ;;  %1775 = vmatpush.msrb.mxu0 %v6715_v3  ;;  %1815 = vmatpush.msrb.mxu2 %v6718_v51  ;;  %v11406_v3 = vld [vmem:[#allocation10_spill] sm:$0xff]  ;;  %v11407_v51 = vld [vmem:[#allocation9_spill] sm:$0xff]  ;;  %v7523_v26 = vld [vmem:[#allocation3 + $0x238] sm:$0xff] }
 0x244   :  { %v1508_v38 = vmul.f32 %v4725_v42, %v1503_v0  ;;  %v11454_v21 = vld [vmem:[#allocation21_spill] sm:$0xff]  ;;  %v11455_v42 = vld [vmem:[#allocation128_spill] sm:$0xff] }
 0x245   :  { %1776 = vmatpush.msrb.mxu0 %v6722_v33  ;;  %1816 = vmatpush.msrb.mxu2 %v6725_v12  ;;  %v11408_v33 = vld [vmem:[#allocation17_spill] sm:$0xff]  ;;  %v11409_v12 = vld [vmem:[#allocation12_spill] sm:$0xff] }
 0x246   :  { %v7413_v35 = vrot.slane %v1508_v38, 2  ;;  %v11456_v0 = vld [vmem:[#allocation112_spill] sm:$0xff]  ;;  %v11457_v38 = vld [vmem:[#allocation129_spill] sm:$0xff] }
 0x247   :  { %1777 = vmatpush.msrb.mxu0 %v6728_v60  ;;  %1817 = vmatpush.msrb.mxu2 %v6731_v61  ;;  %v11410_v60 = vld [vmem:[#allocation11_spill] sm:$0xff]  ;;  %v11411_v61 = vld [vmem:[#allocation18_spill] sm:$0xff] }
 0x248   :  { %1559 = vmatmul.f32.vlgmr.msrb.gmra.mxu1 %v7413_v35  ;;  %1599 = vmatmul.f32.vlgmr.msrb.gmra.mxu3 %v7413_v35 }
 0x249   :  { %1778 = vmatpush.msrb.mxu0 %v6734_v63  ;;  %1795 = vmatpush.msrb.mxu1 %v6798_v58  ;;  %v11412_v63 = vld [vmem:[#allocation14_spill] sm:$0xff]  ;;  %v11427_v58 = vld [vmem:[#allocation109_spill] sm:$0xff] }
 0x24a   :  { %1818 = vmatpush.msrb.mxu2 %v6737_v1  ;;  %1835 = vmatpush.msrb.mxu3 %v6804_v62  ;;  %v11413_v1 = vld [vmem:[#allocation101_spill] sm:$0xff]  ;;  %v11429_v62 = vld [vmem:[#allocation22_spill] sm:$0xff] }
 0x24b   :  { %1665 = vmatmul.f32.vlgmr.msra.gmra.mxu0 %v7405_v23  ;;  %1705 = vmatmul.f32.vlgmr.msra.gmra.mxu2 %v7405_v23 }
 0x24c   :  { %1779 = vmatpush.msrb.mxu0 %v6744_v5  ;;  %1796 = vmatpush.msrb.mxu1 %v6810_v7  ;;  %v11414_v5 = vld [vmem:[#allocation13_spill] sm:$0xff] }
 0x24d   :  { %1819 = vmatpush.msrb.mxu2 %v6747_v6  ;;  %1836 = vmatpush.msrb.mxu3 %v6816_v11  ;;  %v11415_v6 = vld [vmem:[#allocation102_spill] sm:$0xff]  ;;  %v11430_v7 = vld [vmem:[#allocation97_spill] sm:$0xff]  ;;  %v11431_v11 = vld [vmem:[#allocation111_spill] sm:$0xff] }
 0x24e   :  { %1780 = vmatpush.msrb.mxu0 %v6751_v8  ;;  %1797 = vmatpush.msrb.mxu1 %v6822_v18  ;;  %v11416_v8 = vld [vmem:[#allocation15_spill] sm:$0xff] }
 0x24f   :  { %1820 = vmatpush.msrb.mxu2 %v6754_v9  ;;  %1837 = vmatpush.msrb.mxu3 %v6828_v28  ;;  %v11417_v9 = vld [vmem:[#allocation104_spill] sm:$0xff]  ;;  %v11433_v28 = vld [vmem:[#allocation23_spill] sm:$0xff] }
 0x250   :  { %1781 = vmatpush.msrb.mxu0 %v6759_v13  ;;  %1798 = vmatpush.msrb.mxu1 %v6834_v32  ;;  %v11418_v13 = vld [vmem:[#allocation91_spill] sm:$0xff]  ;;  %v11435_v32 = vld [vmem:[#allocation16_spill] sm:$0xff] }
 0x251   :  { %1821 = vmatpush.msrb.mxu2 %v6762_v15  ;;  %1838 = vmatpush.msrb.mxu3 %v6840_v17  ;;  %v11419_v15 = vld [vmem:[#allocation105_spill] sm:$0xff]  ;;  %v11432_v17 = vld [vmem:[#allocation98_spill] sm:$0xff]  ;;  %v7478_v18 = vld [vmem:[#allocation3 + $0x3f8] sm:$0xff] }
 0x252   :  { %1685 = vmatmul.f32.vlgmr.msra.gmra.mxu1 %v7413_v35  ;;  %1725 = vmatmul.f32.vlgmr.msra.gmra.mxu3 %v7413_v35 }
 0x253   :  { %1782 = vmatpush.msrb.mxu0 %v6766_v19  ;;  %1799 = vmatpush.msrb.mxu1 %v6848_v39  ;;  %v11420_v19 = vld [vmem:[#allocation92_spill] sm:$0xff]  ;;  %v11434_v39 = vld [vmem:[#allocation113_spill] sm:$0xff] }
 0x254   :  { %1822 = vmatpush.msrb.mxu2 %v6769_v24  ;;  %1839 = vmatpush.msrb.mxu3 %v6854_v36  ;;  %v11421_v24 = vld [vmem:[#allocation19_spill] sm:$0xff] }
 0x255   :  { %1783 = vmatpush.msrb.mxu0 %v6773_v14  ;;  %1800 = vmatpush.msrb.mxu1 %v6863_v59  ;;  %v11422_v14 = vld [vmem:[#allocation93_spill] sm:$0xff]  ;;  %v11428_v59 = vld [vmem:[#allocation96_spill] sm:$0xff] }
 0x256   :  { %1823 = vmatpush.msrb.mxu2 %v6776_v16  ;;  %1840 = vmatpush.msrb.mxu3 %v6866_v57  ;;  %v11423_v16 = vld [vmem:[#allocation107_spill] sm:$0xff] }
 0x257   :  { %1784 = vmatpush.msrb.mxu0 %v11406_v3  ;;  %1801 = vmatpush.msrb.mxu1 %v6873_v55  ;;  %v11425_v55 = vld [vmem:[#allocation20_spill] sm:$0xff]  ;;  %v11426_v57 = vld [vmem:[#allocation95_spill] sm:$0xff] }
 0x258   :  { %1824 = vmatpush.msrb.mxu2 %v11407_v51  ;;  %1841 = vmatpush.msrb.mxu3 %v11408_v33  ;;  %v7484_v36 = vld [vmem:[#allocation3 + $0x3b8] sm:$0xff]  ;;  %v11458_v51 = vld [vmem:[#allocation130_spill] sm:$0xff] }
 0x259   :  { %1785 = vmatpush.msrb.mxu0 %v11409_v12  ;;  %1802 = vmatpush.msrb.mxu1 %v6883_v31  ;;  %v11424_v31 = vld [vmem:[#allocation94_spill] sm:$0xff]  ;;  %v7529_v3 = vld [vmem:[#allocation3 + $0x1f8] sm:$0xff] }
 0x25a   :  { %1825 = vmatpush.msrb.mxu2 %v11410_v60  ;;  %1842 = vmatpush.msrb.mxu3 %v11411_v61  ;;  %v11459_v33 = vld [vmem:[#allocation114_spill] sm:$0xff]  ;;  %v11460_v12 = vld [vmem:[#allocation28_spill] sm:$0xff]  ;;  %v11461_v61 = vld [vmem:[#allocation131_spill] sm:$0xff] }
 0x25b   :  { %1786 = vmatpush.msrb.mxu0 %v11412_v63  ;;  %1803 = vmatpush.msrb.mxu1 %v11413_v1  ;;  %v7535_v60 = vld [vmem:[#allocation3 + $0x1b8] sm:$0xff] }
 0x25c   :  { %1826 = vmatpush.msrb.mxu2 %v11414_v5  ;;  %1843 = vmatpush.msrb.mxu3 %v11415_v6  ;;  %v11462_v63 = vld [vmem:[#allocation116_spill] sm:$0xff]  ;;  %v11463_v1 = vld [vmem:[#allocation31_spill] sm:$0xff] }
 0x25d   :  { %1787 = vmatpush.msrb.mxu0 %v11416_v8  ;;  %1804 = vmatpush.msrb.mxu1 %v11417_v9  ;;  %v7541_v5 = vld [vmem:[#allocation3 + $0x178] sm:$0xff]  ;;  %v11465_v8 = vld [vmem:[#allocation118_spill] sm:$0xff] }
 0x25e   :  { %1827 = vmatpush.msrb.mxu2 %v11418_v13  ;;  %1844 = vmatpush.msrb.mxu3 %v11419_v15  ;;  %v11464_v6 = vld [vmem:[#allocation132_spill] sm:$0xff]  ;;  %v11466_v9 = vld [vmem:[#allocation34_spill] sm:$0xff]  ;;  %v11467_v15 = vld [vmem:[#allocation133_spill] sm:$0xff] }
 0x25f   :  { %1788 = vmatpush.msrb.mxu0 %v11420_v19  ;;  %1805 = vmatpush.msrb.mxu1 %v11421_v24  ;;  %v7547_v13 = vld [vmem:[#allocation3 + $0x138] sm:$0xff] }
 0x260   :  { %1828 = vmatpush.msrb.mxu2 %v11422_v14  ;;  %1845 = vmatpush.msrb.mxu3 %v11423_v16  ;;  %v11468_v19 = vld [vmem:[#allocation120_spill] sm:$0xff] }
 0x261   :  { %1789 = vmatpush.msrb.mxu0 %v11424_v31  ;;  %1806 = vmatpush.msrb.mxu1 %v11425_v55  ;;  %v11469_v24 = vld [vmem:[#allocation36_spill] sm:$0xff]  ;;  %v11470_v31 = vld [vmem:[#allocation122_spill] sm:$0xff]  ;;  %v11471_v55 = vld [vmem:[#allocation55_spill] sm:$0xff] }
 0x262   :  { %1829 = vmatpush.msrb.mxu2 %v11426_v57  ;;  %1846 = vmatpush.msrb.mxu3 %v11427_v58  ;;  %v7553_v14 = vld [vmem:[#allocation3 + $0xf8] sm:$0xff] }
 0x263   :  { %1790 = vmatpush.msrb.mxu0 %v11428_v59  ;;  %1807 = vmatpush.msrb.mxu1 %v11429_v62  ;;  %v7556_v16 = vld [vmem:[#allocation3 + $0x5b8] sm:$0xff]  ;;  %v11472_v59 = vld [vmem:[#allocation125_spill] sm:$0xff] }
 0x264   :  { %1830 = vmatpush.msrb.mxu2 %v11430_v7  ;;  %1847 = vmatpush.msrb.mxu3 %v11431_v11  ;;  %v7561_v57 = vld [vmem:[#allocation3 + $0xb8] sm:$0xff]  ;;  %v11473_v62 = vld [vmem:[#allocation25_spill] sm:$0xff] }
 0x265   :  { %1791 = vmatmul.f32.vlgmr.msrb.gmra.mxu0 %v7405_v23  ;;  %1831 = vmatmul.f32.vlgmr.msrb.gmra.mxu2 %v7405_v23  ;;  %v7564_v58 = vld [vmem:[#allocation3 + $0x578] sm:$0xff] }
 0x266   :  { %1877 = vmatpush.msra.mxu0 %v11432_v17  ;;  %1917 = vmatpush.msra.mxu2 %v7478_v18  ;;  %v7569_v7 = vld [vmem:[#allocation3 + $0x78] sm:$0xff]  ;;  %v7575_v17 = vld [vmem:[#allocation3 + $0x30] sm:$0xff] }
 0x267   :  { %1808 = vmatpush.msrb.mxu1 %v11433_v28  ;;  %1848 = vmatpush.msrb.mxu3 %v11434_v39  ;;  %v7572_v11 = vld [vmem:[#allocation3 + $0x538] sm:$0xff] }
 0x268   :  { %1878 = vmatpush.msra.mxu0 %v11435_v32  ;;  %1918 = vmatpush.msra.mxu2 %v7484_v36  ;;  %v11474_v28 = vld [vmem:[#allocation39_spill] sm:$0xff] }
 0x269   :  { %1809 = vmatpush.msrb.mxu1 %v11436_v25  ;;  %1849 = vmatpush.msrb.mxu3 %v11437_v2  ;;  %v7579_v39 = vld [vmem:[#allocation3 + $0x38] sm:$0xff] }
 0x26a   :  { %1879 = vmatpush.msra.mxu0 %v11438_v37  ;;  %1919 = vmatpush.msra.mxu2 %v7490_v22  ;;  %v7582_v32 = vld [vmem:[#allocation3 + $0x4f8] sm:$0xff]  ;;  %v7591_v37 = vld [vmem:[#allocation3 + $0x3c0] sm:$0xff] }
 0x26b   :  { %1810 = vmatpush.msrb.mxu1 %v11439_v43  ;;  %1850 = vmatpush.msrb.mxu3 %v11440_v53  ;;  %v11475_v25 = vld [vmem:[#allocation59_spill] sm:$0xff]  ;;  %v7594_v43 = vld [vmem:[#allocation3 + $0x3c8] sm:$0xff] }
 0x26c   :  { %1811 = vmatmul.f32.vlgmr.msrb.gmra.mxu1 %v7413_v35  ;;  %1851 = vmatmul.f32.vlgmr.msrb.gmra.mxu3 %v7413_v35  ;;  %v7588_v2 = vld [vmem:[#allocation3 + $0x4b8] sm:$0xff] }
 0x26d   :  { %1880 = vmatpush.msra.mxu0 %v11441_v52  ;;  %1897 = vmatpush.msra.mxu1 %v11442_v46  ;;  %v11476_v53 = vld [vmem:[#allocation27_spill] sm:$0xff]  ;;  %v7604_v46 = vld [vmem:[#allocation3 + $0x388] sm:$0xff] }
 0x26e   :  { %1920 = vmatpush.msra.mxu2 %v7499_v45  ;;  %1937 = vmatpush.msra.mxu3 %v11443_v44  ;;  %v7598_v52 = vld [vmem:[#allocation3 + $0x478] sm:$0xff]  ;;  %v11477_v44 = vld [vmem:[#allocation42_spill] sm:$0xff] }
 0x26f   :  { %1881 = vmatpush.msra.mxu0 %v11444_v56  ;;  %1898 = vmatpush.msra.mxu1 %v11445_v29  ;;  %v7608_v56 = vld [vmem:[#allocation3 + $0x438] sm:$0xff]  ;;  %v7613_v29 = vld [vmem:[#allocation3 + $0x340] sm:$0xff] }
 0x270   :  { %1921 = vmatpush.msra.mxu2 %v7505_v30  ;;  %1938 = vmatpush.msra.mxu3 %v11446_v50  ;;  %v7616_v50 = vld [vmem:[#allocation3 + $0x348] sm:$0xff] }
 0x271   :  { %1882 = vmatpush.msra.mxu0 %v11447_v27  ;;  %1899 = vmatpush.msra.mxu1 %v11448_v4  ;;  %v11478_v27 = vld [vmem:[#allocation63_spill] sm:$0xff]  ;;  %v7620_v4 = vld [vmem:[#allocation3 + $0x7c8] sm:$0xff] }
 0x272   :  { %1922 = vmatpush.msra.mxu2 %v7511_v47  ;;  %1939 = vmatpush.msra.mxu3 %v11449_v10  ;;  %v7623_v10 = vld [vmem:[#allocation3 + $0x300] sm:$0xff] }
 0x273   :  { %1883 = vmatpush.msra.mxu0 %v11450_v40  ;;  %1900 = vmatpush.msra.mxu1 %v11451_v54  ;;  %v7626_v40 = vld [vmem:[#allocation3 + $0x308] sm:$0xff] }
 0x274   :  { %1923 = vmatpush.msra.mxu2 %v7517_v49  ;;  %1940 = vmatpush.msra.mxu3 %v11452_v48  ;;  %11479 = vst [vmem:[#allocation10_spill] sm:$0xff] %v7626_v40  ;;  %v7630_v54 = vld [vmem:[#allocation3 + $0x788] sm:$0xff]  ;;  %v7633_v48 = vld [vmem:[#allocation3 + $0x2c0] sm:$0xff] }
 0x275   :  { %1884 = vmatpush.msra.mxu0 %v11453_v20  ;;  %1901 = vmatpush.msra.mxu1 %v11454_v21  ;;  %11481 = vst [vmem:[#allocation9_spill] sm:$0xff] %v7630_v54  ;;  %v7636_v20 = vld [vmem:[#allocation3 + $0x2c8] sm:$0xff]  ;;  %v11484_v21 = vld [vmem:[#allocation44_spill] sm:$0xff] }
 0x276   :  { %1924 = vmatpush.msra.mxu2 %v7523_v26  ;;  %1941 = vmatpush.msra.mxu3 %v11455_v42  ;;  %11482 = vst [vmem:[#allocation17_spill] sm:$0xff] %v7633_v48  ;;  %v7640_v42 = vld [vmem:[#allocation3 + $0x748] sm:$0xff] }
 0x277   :  { %1885 = vmatpush.msra.mxu0 %v11456_v0  ;;  %1902 = vmatpush.msra.mxu1 %v11457_v38  ;;  %11483 = vst [vmem:[#allocation12_spill] sm:$0xff] %v7636_v20  ;;  %v7643_v0 = vld [vmem:[#allocation3 + $0x280] sm:$0xff]  ;;  %v7646_v38 = vld [vmem:[#allocation3 + $0x288] sm:$0xff] }
 0x278   :  { %1925 = vmatpush.msra.mxu2 %v7529_v3  ;;  %1942 = vmatpush.msra.mxu3 %v11458_v51  ;;  %11485 = vst [vmem:[#allocation11_spill] sm:$0xff] %v7640_v42  ;;  %v7649_v51 = vld [vmem:[#allocation3 + $0x700] sm:$0xff] }
 0x279   :  { %1886 = vmatpush.msra.mxu0 %v11459_v33  ;;  %1903 = vmatpush.msra.mxu1 %v11460_v12  ;;  %11486 = vst [vmem:[#allocation18_spill] sm:$0xff] %v7643_v0  ;;  %v7652_v33 = vld [vmem:[#allocation3 + $0x708] sm:$0xff]  ;;  %v7655_v12 = vld [vmem:[#allocation3 + $0x240] sm:$0xff] }
 0x27a   :  { %1926 = vmatpush.msra.mxu2 %v7535_v60  ;;  %1943 = vmatpush.msra.mxu3 %v11461_v61  ;;  %11487 = vst [vmem:[#allocation14_spill] sm:$0xff] %v7646_v38  ;;  %v7658_v61 = vld [vmem:[#allocation3 + $0x248] sm:$0xff] }
 0x27b   :  { %1887 = vmatpush.msra.mxu0 %v11462_v63  ;;  %1904 = vmatpush.msra.mxu1 %v11463_v1  ;;  %11488 = vst [vmem:[#allocation101_spill] sm:$0xff] %v7649_v51  ;;  %v7661_v63 = vld [vmem:[#allocation3 + $0x6c0] sm:$0xff]  ;;  %v7664_v1 = vld [vmem:[#allocation3 + $0x6c8] sm:$0xff] }
 0x27c   :  { %1927 = vmatpush.msra.mxu2 %v7541_v5  ;;  %1944 = vmatpush.msra.mxu3 %v11464_v6  ;;  %11489 = vst [vmem:[#allocation13_spill] sm:$0xff] %v7652_v33  ;;  %v7667_v6 = vld [vmem:[#allocation3 + $0x200] sm:$0xff] }
 0x27d   :  { %1888 = vmatpush.msra.mxu0 %v11465_v8  ;;  %1905 = vmatpush.msra.mxu1 %v11466_v9  ;;  %11490 = vst [vmem:[#allocation102_spill] sm:$0xff] %v7655_v12  ;;  %v7670_v8 = vld [vmem:[#allocation3 + $0x208] sm:$0xff]  ;;  %v7673_v9 = vld [vmem:[#allocation3 + $0x680] sm:$0xff] }
 0x27e   :  { %1928 = vmatpush.msra.mxu2 %v7547_v13  ;;  %1945 = vmatpush.msra.mxu3 %v11467_v15  ;;  %11491 = vst [vmem:[#allocation15_spill] sm:$0xff] %v7658_v61  ;;  %v7676_v15 = vld [vmem:[#allocation3 + $0x688] sm:$0xff] }
 0x27f   :  { %1889 = vmatpush.msra.mxu0 %v11468_v19  ;;  %1906 = vmatpush.msra.mxu1 %v11469_v24  ;;  %11492 = vst [vmem:[#allocation104_spill] sm:$0xff] %v7661_v63  ;;  %v7679_v19 = vld [vmem:[#allocation3 + $0x1c0] sm:$0xff]  ;;  %v7682_v24 = vld [vmem:[#allocation3 + $0x1c8] sm:$0xff] }
 0x280   :  { %1929 = vmatpush.msra.mxu2 %v7553_v14  ;;  %1946 = vmatpush.msra.mxu3 %v7556_v16  ;;  %11493 = vst [vmem:[#allocation91_spill] sm:$0xff] %v7664_v1 }
 0x281   :  { %1890 = vmatpush.msra.mxu0 %v11470_v31  ;;  %1907 = vmatpush.msra.mxu1 %v11471_v55  ;;  %11494 = vst [vmem:[#allocation105_spill] sm:$0xff] %v7667_v6  ;;  %v7685_v31 = vld [vmem:[#allocation3 + $0x640] sm:$0xff]  ;;  %v7688_v55 = vld [vmem:[#allocation3 + $0x648] sm:$0xff] }
 0x282   :  { %1930 = vmatpush.msra.mxu2 %v7561_v57  ;;  %1947 = vmatpush.msra.mxu3 %v7564_v58  ;;  %11495 = vst [vmem:[#allocation92_spill] sm:$0xff] %v7670_v8 }
 0x283   :  { %1891 = vmatpush.msra.mxu0 %v11472_v59  ;;  %1908 = vmatpush.msra.mxu1 %v11473_v62  ;;  %11496 = vst [vmem:[#allocation19_spill] sm:$0xff] %v7673_v9  ;;  %v7691_v59 = vld [vmem:[#allocation3 + $0x180] sm:$0xff]  ;;  %v7694_v62 = vld [vmem:[#allocation3 + $0x188] sm:$0xff] }
 0x284   :  { %1931 = vmatpush.msra.mxu2 %v7569_v7  ;;  %1948 = vmatpush.msra.mxu3 %v7572_v11  ;;  %11497 = vst [vmem:[#allocation93_spill] sm:$0xff] %v7676_v15 }
 0x285   :  { %1892 = vmatpush.msra.mxu0 %v7575_v17  ;;  %1909 = vmatpush.msra.mxu1 %v11474_v28  ;;  %11498 = vst [vmem:[#allocation107_spill] sm:$0xff] %v7679_v19  ;;  %v7697_v28 = vld [vmem:[#allocation3 + $0x600] sm:$0xff] }
 0x286   :  { %1932 = vmatpush.msra.mxu2 %v7579_v39  ;;  %1949 = vmatpush.msra.mxu3 %v7582_v32  ;;  %11499 = vst [vmem:[#allocation94_spill] sm:$0xff] %v7682_v24 }
 0x287   :  { %1893 = vmatmul.f32.vlgmr.msra.gmra.mxu0 %v7405_v23  ;;  %1933 = vmatmul.f32.vlgmr.msra.gmra.mxu2 %v7405_v23  ;;  %v7601_v23 = vld [vmem:[#allocation3 + $0x380] sm:$0xff]  ;;  %11500 = vst [vmem:[#allocation20_spill] sm:$0xff] %v7685_v31 }
 0x288   :  { %1910 = vmatpush.msra.mxu1 %v11475_v25  ;;  %1950 = vmatpush.msra.mxu3 %v7588_v2  ;;  %11501 = vst [vmem:[#allocation95_spill] sm:$0xff] %v7688_v55  ;;  %v7700_v25 = vld [vmem:[#allocation3 + $0x608] sm:$0xff] }
 0x289   :  { %2021 = vmatpush.msrb.mxu0 %v7591_v37  ;;  %2061 = vmatpush.msrb.mxu2 %v7594_v43  ;;  %11502 = vst [vmem:[#allocation109_spill] sm:$0xff] %v7691_v59 }
 0x28a   :  { %1911 = vmatpush.msra.mxu1 %v11476_v53  ;;  %1951 = vmatpush.msra.mxu3 %v7598_v52  ;;  %11503 = vst [vmem:[#allocation96_spill] sm:$0xff] %v7694_v62  ;;  %v7703_v53 = vld [vmem:[#allocation3 + $0x140] sm:$0xff] }
 0x28b   :  { %2022 = vmatpush.msrb.mxu0 %v7601_v23  ;;  %2062 = vmatpush.msrb.mxu2 %v7604_v46  ;;  %11504 = vst [vmem:[#allocation22_spill] sm:$0xff] %v7697_v28 }
 0x28c   :  { %1912 = vmatpush.msra.mxu1 %v11477_v44  ;;  %1952 = vmatpush.msra.mxu3 %v7608_v56  ;;  %11505 = vst [vmem:[#allocation97_spill] sm:$0xff] %v7700_v25  ;;  %v7706_v44 = vld [vmem:[#allocation3 + $0x148] sm:$0xff] }
 0x28d   :  { %1913 = vmatmul.f32.vlgmr.msra.gmra.mxu1 %v7413_v35  ;;  %1953 = vmatmul.f32.vlgmr.msra.gmra.mxu3 %v7413_v35  ;;  %v11480_v35 = vld [vmem:[#allocation30_spill] sm:$0xff]  ;;  %11506 = vst [vmem:[#allocation111_spill] sm:$0xff] %v7703_v53 }
 0x28e   :  { %2023 = vmatpush.msrb.mxu0 %v7613_v29  ;;  %2063 = vmatpush.msrb.mxu2 %v7616_v50  ;;  %11507 = vst [vmem:[#allocation98_spill] sm:$0xff] %v7706_v44 }
 0x28f   :  { %2041 = vmatpush.msrb.mxu1 %v11478_v27  ;;  %2081 = vmatpush.msrb.mxu3 %v7620_v4  ;;  %v7709_v27 = vld [vmem:[#allocation3 + $0x5c0] sm:$0xff] }
 0x290   :  { %2024 = vmatpush.msrb.mxu0 %v7623_v10  ;;  %2064 = vmatpush.msrb.mxu2 %v7626_v40  ;;  %11508 = vst [vmem:[#allocation23_spill] sm:$0xff] %v7709_v27 }
 0x291   :  { %2042 = vmatpush.msrb.mxu1 %v11480_v35  ;;  %2082 = vmatpush.msrb.mxu3 %v7630_v54  ;;  %v7712_v35 = vld [vmem:[#allocation3 + $0x5c8] sm:$0xff] }
 0x292   :  { %2025 = vmatpush.msrb.mxu0 %v7633_v48  ;;  %2065 = vmatpush.msrb.mxu2 %v7636_v20  ;;  %11509 = vst [vmem:[#allocation113_spill] sm:$0xff] %v7712_v35 }
 0x293   :  { %2043 = vmatpush.msrb.mxu1 %v11484_v21  ;;  %2083 = vmatpush.msrb.mxu3 %v7640_v42  ;;  %v7715_v21 = vld [vmem:[#allocation3 + $0x100] sm:$0xff]  ;;  %v1513_v42 = vld [vmem:[#allocation2 + $0x50] sm:$0x30] }
 0x294   :  { %2026 = vmatpush.msrb.mxu0 %v7643_v0  ;;  %2066 = vmatpush.msrb.mxu2 %v7646_v38  ;;  %11510 = vst [vmem:[#allocation16_spill] sm:$0xff] %v7715_v21  ;;  %v1512_v0 = vld [vmem:[#allocation2 + $0x18] sm:$0x30] }
 0x295   :  { %2044 = vmatpush.msrb.mxu1 %v7649_v51  ;;  %2084 = vmatpush.msrb.mxu3 %v7652_v33  ;;  %v1510_v33 = vld [vmem:[#allocation2] sm:$0x30] }
 0x296   :  { %2027 = vmatpush.msrb.mxu0 %v7655_v12  ;;  %2067 = vmatpush.msrb.mxu2 %v7658_v61 }
 0x297   :  { %2045 = vmatpush.msrb.mxu1 %v7661_v63  ;;  %2085 = vmatpush.msrb.mxu3 %v7664_v1  ;;  %v1511_v63 = vld [vmem:[#allocation2 + $0x58] sm:$0x30] }
 0x298   :  { %2028 = vmatpush.msrb.mxu0 %v7667_v6  ;;  %2068 = vmatpush.msrb.mxu2 %v7670_v8 }
 0x299   :  { %2046 = vmatpush.msrb.mxu1 %v7673_v9  ;;  %2086 = vmatpush.msrb.mxu3 %v7676_v15 }
 0x29a   :  { %2029 = vmatpush.msrb.mxu0 %v7679_v19  ;;  %2069 = vmatpush.msrb.mxu2 %v7682_v24 }
 0x29b   :  { %2047 = vmatpush.msrb.mxu1 %v7685_v31  ;;  %2087 = vmatpush.msrb.mxu3 %v7688_v55  ;;  %v11578_v55 = vld [vmem:[#allocation65_spill] sm:$0xff]  ;;  %v11583_v31 = vld [vmem:[#allocation66_spill] sm:$0xff] }
 0x29c   :  { %2030 = vmatpush.msrb.mxu0 %v7691_v59  ;;  %2070 = vmatpush.msrb.mxu2 %v7694_v62  ;;  %v7787_v62 = vld [vmem:[#allocation3 + $0x400] sm:$0xff]  ;;  %v7832_v59 = vld [vmem:[#allocation3 + $0x690] sm:$0xff] }
 0x29d   :  { %2048 = vmatpush.msrb.mxu1 %v7697_v28  ;;  %2088 = vmatpush.msrb.mxu3 %v7700_v25  ;;  %v7718_v25 = vld [vmem:[#allocation3 + $0x108] sm:$0xff]  ;;  %v7755_v28 = vld [vmem:[#allocation3 + $0x4c0] sm:$0xff]  ;;  %11538 = vst [vmem:[#allocation129_spill] sm:$0xff] %v7787_v62 }
 0x29e   :  { %2031 = vmatpush.msrb.mxu0 %v7703_v53  ;;  %2071 = vmatpush.msrb.mxu2 %v7706_v44  ;;  %11511 = vst [vmem:[#allocation24_spill] sm:$0xff] %v7718_v25  ;;  %v7721_v53 = vld [vmem:[#allocation3 + $0x580] sm:$0xff]  ;;  %v7724_v44 = vld [vmem:[#allocation3 + $0x588] sm:$0xff] }
 0x29f   :  { %2049 = vmatpush.msrb.mxu1 %v7709_v27  ;;  %2089 = vmatpush.msrb.mxu3 %v7712_v35  ;;  %11512 = vst [vmem:[#allocation115_spill] sm:$0xff] %v7721_v53  ;;  %v7727_v27 = vld [vmem:[#allocation3 + $0xc0] sm:$0xff]  ;;  %v7730_v35 = vld [vmem:[#allocation3 + $0xc8] sm:$0xff] }
 0x2a0   :  { %2032 = vmatpush.msrb.mxu0 %v7715_v21  ;;  %2072 = vmatpush.msrb.mxu2 %v7718_v25  ;;  %11513 = vst [vmem:[#allocation99_spill] sm:$0xff] %v7724_v44  ;;  %v7733_v21 = vld [vmem:[#allocation3 + $0x540] sm:$0xff]  ;;  %v7736_v25 = vld [vmem:[#allocation3 + $0x548] sm:$0xff] }
 0x2a1   :  { %2050 = vmatpush.msrb.mxu1 %v7721_v53  ;;  %2090 = vmatpush.msrb.mxu3 %v7724_v44  ;;  %11514 = vst [vmem:[#allocation26_spill] sm:$0xff] %v7727_v27  ;;  %v7739_v53 = vld [vmem:[#allocation3 + $0x80] sm:$0xff]  ;;  %v7742_v44 = vld [vmem:[#allocation3 + $0x88] sm:$0xff] }
 0x2a2   :  { %2033 = vmatpush.msrb.mxu0 %v7727_v27  ;;  %11515 = vst [vmem:[#allocation117_spill] sm:$0xff] %v7730_v35  ;;  %2073 = vmatpush.msrb.mxu2 %v7730_v35  ;;  %v7745_v27 = vld [vmem:[#allocation3 + $0x500] sm:$0xff]  ;;  %v7748_v35 = vld [vmem:[#allocation3 + $0x508] sm:$0xff] }
 0x2a3   :  { %11516 = vst [vmem:[#allocation100_spill] sm:$0xff] %v7733_v21  ;;  %2051 = vmatpush.msrb.mxu1 %v7733_v21  ;;  %2091 = vmatpush.msrb.mxu3 %v7736_v25  ;;  %v7751_v21 = vld [vmem:[#allocation3 + $0x40] sm:$0xff] }
 0x2a4   :  { %11517 = vst [vmem:[#allocation119_spill] sm:$0xff] %v7736_v25  ;;  %2034 = vmatpush.msrb.mxu0 %v7739_v53  ;;  %2074 = vmatpush.msrb.mxu2 %v7742_v44  ;;  %v11523_v25 = vld [vmem:[#allocation67_spill] sm:$0xff] }
 0x2a5   :  { %11518 = vst [vmem:[#allocation29_spill] sm:$0xff] %v7739_v53  ;;  %2052 = vmatpush.msrb.mxu1 %v7745_v27  ;;  %2092 = vmatpush.msrb.mxu3 %v7748_v35  ;;  %v7758_v53 = vld [vmem:[#allocation3 + $0x4c8] sm:$0xff] }
 0x2a6   :  { %11519 = vst [vmem:[#allocation103_spill] sm:$0xff] %v7742_v44  ;;  %2035 = vmatpush.msrb.mxu0 %v7751_v21  ;;  %2075 = vmatpush.msrb.mxu2 %v11523_v25  ;;  %v7761_v44 = vld [vmem:[#allocation3] sm:$0xff] }
 0x2a7   :  { %11520 = vst [vmem:[#allocation121_spill] sm:$0xff] %v7745_v27  ;;  %2053 = vmatpush.msrb.mxu1 %v7755_v28  ;;  %2093 = vmatpush.msrb.mxu3 %v7758_v53  ;;  %v11527_v27 = vld [vmem:[#allocation33_spill] sm:$0xff] }
 0x2a8   :  { %11521 = vst [vmem:[#allocation32_spill] sm:$0xff] %v7748_v35  ;;  %2036 = vmatpush.msrb.mxu0 %v7761_v44  ;;  %2076 = vmatpush.msrb.mxu2 %v11527_v27  ;;  %v7765_v35 = vld [vmem:[#allocation3 + $0x3d0] sm:$0xff]  ;;  %v7769_v25 = vld [vmem:[#allocation3 + $0x480] sm:$0xff] }
 0x2a9   :  { %11522 = vst [vmem:[#allocation106_spill] sm:$0xff] %v7751_v21  ;;  %v11529_v21 = vld [vmem:[#allocation46_spill] sm:$0xff]  ;;  %2054 = vmatpush.msrb.mxu1 %v7769_v25  ;;  %v7779_v27 = vld [vmem:[#allocation3 + $0x440] sm:$0xff] }
 0x2aa   :  { %11524 = vst [vmem:[#allocation123_spill] sm:$0xff] %v7755_v28  ;;  %2147 = vmatpush.msra.mxu0 %v7765_v35  ;;  %2187 = vmatpush.msra.mxu2 %v11529_v21  ;;  %v7772_v28 = vld [vmem:[#allocation3 + $0x488] sm:$0xff]  ;;  %v7783_v21 = vld [vmem:[#allocation3 + $0x350] sm:$0xff] }
 0x2ab   :  { %11525 = vst [vmem:[#allocation124_spill] sm:$0xff] %v7758_v53  ;;  %2094 = vmatpush.msrb.mxu3 %v7772_v28  ;;  %v7775_v53 = vld [vmem:[#allocation3 + $0x390] sm:$0xff]  ;;  %2055 = vmatpush.msrb.mxu1 %v7779_v27 }
 0x2ac   :  { %11526 = vst [vmem:[#allocation108_spill] sm:$0xff] %v7761_v44  ;;  %2148 = vmatpush.msra.mxu0 %v7775_v53  ;;  %v11533_v44 = vld [vmem:[#allocation71_spill] sm:$0xff] }
 0x2ad   :  { %11528 = vst [vmem:[#allocation126_spill] sm:$0xff] %v7765_v35  ;;  %2188 = vmatpush.msra.mxu2 %v11533_v44  ;;  %v11535_v35 = vld [vmem:[#allocation41_spill] sm:$0xff]  ;;  %2056 = vmatpush.msrb.mxu1 %v7787_v62  ;;  %v7794_v44 = vld [vmem:[#allocation3 + $0x7d0] sm:$0xff]  ;;  %v11547_v62 = vld [vmem:[#allocation64_spill] sm:$0xff] }
 0x2ae   :  { %11530 = vst [vmem:[#allocation127_spill] sm:$0xff] %v7769_v25  ;;  %2095 = vmatpush.msrb.mxu3 %v11535_v35  ;;  %2149 = vmatpush.msra.mxu0 %v7783_v21  ;;  %v11537_v25 = vld [vmem:[#allocation35_spill] sm:$0xff]  ;;  %v11542_v35 = vld [vmem:[#allocation49_spill] sm:$0xff] }
 0x2af   :  { %11531 = vst [vmem:[#allocation110_spill] sm:$0xff] %v7772_v28  ;;  %2189 = vmatpush.msra.mxu2 %v11537_v25  ;;  %v11539_v28 = vld [vmem:[#allocation83_spill] sm:$0xff]  ;;  %2167 = vmatpush.msra.mxu1 %v7794_v44 }
 0x2b0   :  { %11532 = vst [vmem:[#allocation21_spill] sm:$0xff] %v7775_v53  ;;  %2096 = vmatpush.msrb.mxu3 %v11539_v28  ;;  %v7791_v53 = vld [vmem:[#allocation3 + $0x310] sm:$0xff] }
 0x2b1   :  { %11534 = vst [vmem:[#allocation128_spill] sm:$0xff] %v7779_v27  ;;  %2150 = vmatpush.msra.mxu0 %v7791_v53  ;;  %2190 = vmatpush.msra.mxu2 %v11542_v35  ;;  %v11543_v27 = vld [vmem:[#allocation50_spill] sm:$0xff]  ;;  %v11546_v28 = vld [vmem:[#allocation75_spill] sm:$0xff]  ;;  %v11551_v35 = vld [vmem:[#allocation68_spill] sm:$0xff] }
 0x2b2   :  { %11536 = vst [vmem:[#allocation112_spill] sm:$0xff] %v7783_v21  ;;  %2207 = vmatpush.msra.mxu3 %v11543_v27  ;;  %v7799_v21 = vld [vmem:[#allocation3 + $0x2d0] sm:$0xff] }
 0x2b3   :  { %11540 = vst [vmem:[#allocation130_spill] sm:$0xff] %v7791_v53  ;;  %2151 = vmatpush.msra.mxu0 %v7799_v21  ;;  %v7802_v25 = vld [vmem:[#allocation3 + $0x790] sm:$0xff]  ;;  %2191 = vmatpush.msra.mxu2 %v11546_v28  ;;  %v11555_v28 = vld [vmem:[#allocation72_spill] sm:$0xff] }
 0x2b4   :  { %11541 = vst [vmem:[#allocation114_spill] sm:$0xff] %v7794_v44  ;;  %2168 = vmatpush.msra.mxu1 %v7802_v25  ;;  %2208 = vmatpush.msra.mxu3 %v11547_v62  ;;  %v7807_v53 = vld [vmem:[#allocation3 + $0x290] sm:$0xff]  ;;  %v11554_v62 = vld [vmem:[#allocation52_spill] sm:$0xff] }
 0x2b5   :  { %11544 = vst [vmem:[#allocation28_spill] sm:$0xff] %v7799_v21  ;;  %2152 = vmatpush.msra.mxu0 %v7807_v53  ;;  %v7810_v44 = vld [vmem:[#allocation3 + $0x750] sm:$0xff] }
 0x2b6   :  { %11545 = vst [vmem:[#allocation131_spill] sm:$0xff] %v7802_v25  ;;  %2169 = vmatpush.msra.mxu1 %v7810_v44  ;;  %v11550_v27 = vld [vmem:[#allocation38_spill] sm:$0xff]  ;;  %2209 = vmatpush.msra.mxu3 %v11551_v35  ;;  %v11559_v35 = vld [vmem:[#allocation76_spill] sm:$0xff] }
 0x2b7   :  { %11548 = vst [vmem:[#allocation116_spill] sm:$0xff] %v7807_v53  ;;  %2192 = vmatpush.msra.mxu2 %v11550_v27  ;;  %v7815_v21 = vld [vmem:[#allocation3 + $0x250] sm:$0xff] }
 0x2b8   :  { %11549 = vst [vmem:[#allocation31_spill] sm:$0xff] %v7810_v44  ;;  %2153 = vmatpush.msra.mxu0 %v7815_v21  ;;  %v7818_v25 = vld [vmem:[#allocation3 + $0x710] sm:$0xff]  ;;  %2210 = vmatpush.msra.mxu3 %v11555_v28  ;;  %v11563_v28 = vld [vmem:[#allocation77_spill] sm:$0xff] }
 0x2b9   :  { %11552 = vst [vmem:[#allocation132_spill] sm:$0xff] %v7815_v21  ;;  %2170 = vmatpush.msra.mxu1 %v7818_v25  ;;  %2193 = vmatpush.msra.mxu2 %v11554_v62  ;;  %v7823_v53 = vld [vmem:[#allocation3 + $0x210] sm:$0xff]  ;;  %v11562_v62 = vld [vmem:[#allocation56_spill] sm:$0xff] }
 0x2ba   :  { %11553 = vst [vmem:[#allocation118_spill] sm:$0xff] %v7818_v25  ;;  %2154 = vmatpush.msra.mxu0 %v7823_v53  ;;  %v7826_v44 = vld [vmem:[#allocation3 + $0x6d0] sm:$0xff]  ;;  %2211 = vmatpush.msra.mxu3 %v11559_v35  ;;  %v11564_v25 = vld [vmem:[#allocation60_spill] sm:$0xff]  ;;  %v11568_v35 = vld [vmem:[#allocation37_spill] sm:$0xff] }
 0x2bb   :  { %11556 = vst [vmem:[#allocation34_spill] sm:$0xff] %v7823_v53  ;;  %2171 = vmatpush.msra.mxu1 %v7826_v44  ;;  %v11558_v27 = vld [vmem:[#allocation79_spill] sm:$0xff] }
 0x2bc   :  { %11557 = vst [vmem:[#allocation133_spill] sm:$0xff] %v7826_v44  ;;  %2194 = vmatpush.msra.mxu2 %v11558_v27  ;;  %v11560_v21 = vld [vmem:[#allocation47_spill] sm:$0xff]  ;;  %2212 = vmatpush.msra.mxu3 %v11563_v28  ;;  %v11566_v44 = vld [vmem:[#allocation53_spill] sm:$0xff]  ;;  %v11572_v28 = vld [vmem:[#allocation40_spill] sm:$0xff] }
 0x2bd   :  { %2155 = vmatpush.msra.mxu0 %v11560_v21  ;;  %11561 = vst [vmem:[#allocation120_spill] sm:$0xff] %v7832_v59  ;;  %2172 = vmatpush.msra.mxu1 %v7832_v59  ;;  %v7838_v53 = vld [vmem:[#allocation3 + $0x650] sm:$0xff]  ;;  %v11567_v27 = vld [vmem:[#allocation81_spill] sm:$0xff] }
 0x2be   :  { %2195 = vmatpush.msra.mxu2 %v11562_v62  ;;  %11565 = vst [vmem:[#allocation36_spill] sm:$0xff] %v7838_v53  ;;  %2213 = vmatpush.msra.mxu3 %v11567_v27  ;;  %v7844_v21 = vld [vmem:[#allocation3 + $0x610] sm:$0xff]  ;;  %v11570_v59 = vld [vmem:[#allocation57_spill] sm:$0xff] }
 0x2bf   :  { %2156 = vmatpush.msra.mxu0 %v11564_v25  ;;  %2173 = vmatpush.msra.mxu1 %v7838_v53  ;;  %11569 = vst [vmem:[#allocation122_spill] sm:$0xff] %v7844_v21  ;;  %v11571_v62 = vld [vmem:[#allocation54_spill] sm:$0xff]  ;;  %v11574_v53 = vld [vmem:[#allocation61_spill] sm:$0xff]  ;;  %v11576_v27 = vld [vmem:[#allocation43_spill] sm:$0xff] }
 0x2c0   :  { %2196 = vmatpush.msra.mxu2 %v11566_v44  ;;  %2214 = vmatpush.msra.mxu3 %v11571_v62  ;;  %v7850_v25 = vld [vmem:[#allocation3 + $0x5d0] sm:$0xff] }
 0x2c1   :  { %2157 = vmatpush.msra.mxu0 %v11568_v35  ;;  %2174 = vmatpush.msra.mxu1 %v7844_v21  ;;  %11573 = vst [vmem:[#allocation55_spill] sm:$0xff] %v7850_v25  ;;  %v11575_v44 = vld [vmem:[#allocation82_spill] sm:$0xff]  ;;  %v11579_v21 = vld [vmem:[#allocation85_spill] sm:$0xff] }
 0x2c2   :  { %2197 = vmatpush.msra.mxu2 %v11570_v59  ;;  %2215 = vmatpush.msra.mxu3 %v11575_v44  ;;  %v11577_v35 = vld [vmem:[#allocation58_spill] sm:$0xff]  ;;  %v11580_v59 = vld [vmem:[#allocation45_spill] sm:$0xff] }
 0x2c3   :  { %2158 = vmatpush.msra.mxu0 %v11572_v28  ;;  %2175 = vmatpush.msra.mxu1 %v7850_v25  ;;  %v11581_v62 = vld [vmem:[#allocation62_spill] sm:$0xff]  ;;  %v11582_v28 = vld [vmem:[#allocation69_spill] sm:$0xff]  ;;  %v11584_v25 = vld [vmem:[#allocation48_spill] sm:$0xff] }
 0x2c4   :  { %2198 = vmatpush.msra.mxu2 %v11574_v53  ;;  %2216 = vmatpush.msra.mxu3 %v11579_v21  ;;  %v11585_v53 = vld [vmem:[#allocation88_spill] sm:$0xff]  ;;  %v11586_v44 = vld [vmem:[#allocation73_spill] sm:$0xff]  ;;  %v11590_v21 = vld [vmem:[#allocation78_spill] sm:$0xff] }
 0x2c5   :  { %2159 = vmatpush.msra.mxu0 %v11576_v27  ;;  %2176 = vmatpush.msra.mxu1 %v11577_v35  ;;  %v11587_v27 = vld [vmem:[#allocation70_spill] sm:$0xff]  ;;  %v11588_v35 = vld [vmem:[#allocation51_spill] sm:$0xff] }
 0x2c6   :  { %2199 = vmatpush.msra.mxu2 %v11578_v55  ;;  %2217 = vmatpush.msra.mxu3 %v11583_v31  ;;  %v11589_v55 = vld [vmem:[#allocation90_spill] sm:$0xff] }
 0x2c7   :  { %2160 = vmatpush.msra.mxu0 %v11580_v59  ;;  %2177 = vmatpush.msra.mxu1 %v11581_v62  ;;  %v11591_v59 = vld [vmem:[#allocation74_spill] sm:$0xff]  ;;  %v11592_v62 = vld [vmem:[#allocation80_spill] sm:$0xff] }
 0x2c8   :  { %2200 = vmatpush.msra.mxu2 %v11582_v28  ;;  %2218 = vmatpush.msra.mxu3 %v11587_v27  ;;  %v11593_v28 = vld [vmem:[#allocation84_spill] sm:$0xff]  ;;  %v11594_v31 = vld [vmem:[#allocation86_spill] sm:$0xff]  ;;  %v1560_v27 = vpop.f32.mrf.mxu1 }
 0x2c9   :  { %2161 = vmatpush.msra.mxu0 %v11584_v25  ;;  %2178 = vmatpush.msra.mxu1 %v11585_v53  ;;  %v11595_v25 = vld [vmem:[#allocation87_spill] sm:$0xff]  ;;  %v11596_v53 = vld [vmem:[#allocation89_spill] sm:$0xff] }
 0x2ca   :  { %2201 = vmatpush.msra.mxu2 %v11586_v44  ;;  %2219 = vmatpush.msra.mxu3 %v11591_v59  ;;  %v11597_v44 = vld [vmem:[#allocation134_spill] sm:$0xff] }
 0x2cb   :  { %2162 = vmatpush.msra.mxu0 %v11588_v35  ;;  %2179 = vmatpush.msra.mxu1 %v11589_v55  ;;  %v1540_v35 = vpop.f32.mrf.mxu0  ;;  %v1600_v24 = vpop.f32.mrf.mxu3 }
 0x2cc   :  { %2202 = vmatpush.msra.mxu2 %v11590_v21  ;;  %2220 = vmatpush.msra.mxu3 %v11593_v28  ;;  %v1580_v55 = vpop.f32.mrf.mxu2  ;;  %v1561_v21 = vadd.f32 %v1560_v27, %v1540_v35 }
 0x2cd   :  { %2180 = vmatpush.msra.mxu1 %v11592_v62  ;;  %v1601_v28 = vadd.f32 %v1600_v24, %v1580_v55 }
 0x2ce   :  { %2221 = vmatpush.msra.mxu3 %v11595_v25  ;;  %v1605_v9 = vrot.slane %v1561_v21, 4 }
 0x2cf   :  { %2181 = vmatpush.msra.mxu1 %v11594_v31  ;;  %v1509_v31 = vld [vmem:[#allocation2 + $0x30] sm:$0x30]  ;;  %v1606_v61 = vrot.slane %v1601_v28, 4 }
 0x2d0   :  { %2222 = vmatpush.msra.mxu3 %v11597_v44  ;;  %v1686_v19 = vpop.f32.mrf.mxu1  ;;  %v1609_v25 = vadd.f32 %v1605_v9, %v1509_v31 }
 0x2d1   :  { %2182 = vmatpush.msra.mxu1 %v11596_v53  ;;  %v1610_v38 = vadd.f32 %v1606_v61, %v1510_v33 }
 0x2d2   :  { %v4620_v12 = vmul.f32 -1.442695, %v1609_v25 }
 0x2d3   :  { %v1666_v15 = vpop.f32.mrf.mxu0 }
 0x2d4   :  { %v1687_v59 = vadd.f32 %v1686_v19, %v1666_v15  ;;  %v1706_v6 = vpop.f32.mrf.mxu2  ;;  %4726 = vpow2.f32 %v4620_v12  ;;  %v4621_v15 = vmul.f32 -1.442695, %v1610_v38 }
 0x2d5   :  { %v1726_v62 = vpop.f32.mrf.mxu3 }
 0x2d6   :  { %v1731_v8 = vrot.slane %v1687_v59, 4  ;;  %v1727_v1 = vadd.f32 %v1726_v62, %v1706_v6 }
 0x2d8   :  { %v1735_v53 = vadd.f32 %v1731_v8, %v1511_v63  ;;  %v1732_v44 = vrot.slane %v1727_v1, 4 }
 0x2da   :  { %v4622_v51 = vmul.f32 -1.442695, %v1735_v53  ;;  %v1736_v27 = vadd.f32 %v1732_v44, %v1512_v0  ;;  %v4727_v35 = vpop.eup %4726 }
 0x2db   :  { %v7877_v6 = vadd.f32 1.0, %v4727_v35 }
 0x2dc   :  { %4728 = vpow2.f32 %v4622_v51  ;;  %v4623_v19 = vmul.f32 -1.442695, %v1736_v27 }
 0x2dd   :  { %4730 = vpow2.f32 %v4621_v15  ;;  %v1630_v40 = vand.u32 2147483648, %v7877_v6  ;;  %vm1624_vm3 = vweird.f32 %v7877_v6 }
 0x2de   :  { %4732 = vpow2.f32 %v4623_v19 }
 0x2df   :  { %4734 = vrcp.f32 %v7877_v6 }
 0x2e2   :  { %v4729_v24 = vpop.eup %4728  ;;  %v1792_v0 = vpop.f32.mrf.mxu0 }
 0x2e3   :  { %v7879_v9 = vadd.f32 1.0, %v4729_v24  ;;  %v4731_v63 = vpop.eup %4730  ;;  %v1515_v24 = vld [vmem:[#allocation2 + $0x8] sm:$0x30] }
 0x2e4   :  { %v4733_v1 = vpop.eup %4732  ;;  %v7883_v33 = vadd.f32 1.0, %v4731_v63 }
 0x2e5   :  { %4736 = vrcp.f32 %v7879_v9  ;;  %v7885_v38 = vadd.f32 1.0, %v4733_v1  ;;  %v7887_v12 = vpop.eup %4734  ;;  %vm1750_vm4 = vweird.f32 %v7879_v9 }
 0x2e6   :  { %4738 = vrcp.f32 %v7883_v33  ;;  %v1620_v59 = vmul.f32 %v7887_v12, %v7877_v6  ;;  %vm1625_vm1 = vweird.f32 %v7887_v12  ;;  %vm1639_vm8 = vweird.f32 %v7883_v33 }
 0x2e7   :  { %4740 = vrcp.f32 %v7885_v38  ;;  %vm7920_vm5 = vmor %vm1624_vm3, %vm1625_vm1  ;;  %vm1765_vm12 = vweird.f32 %v7885_v38 }
 0x2e8   :  { %v1832_v8 = vpop.f32.mrf.mxu2  ;;  %v1621_v19 = vsub.f32 1.0, %v1620_v59 }
 0x2e9   :  { %v1812_v51 = vpop.f32.mrf.mxu1 }
 0x2ea   :  { %v1813_v21 = vadd.f32 %v1812_v51, %v1792_v0  ;;  %v1622_v59 = vmul.f32 %v7887_v12, %v1621_v19  ;;  %v1754_v19 = vand.u32 2147483647, %v7879_v9 }
 0x2eb   :  { %v7890_v61 = vpop.eup %4736 }
 0x2ec   :  { %v1746_v62 = vmul.f32 %v7890_v61, %v7879_v9  ;;  %v7897_v53 = vpop.eup %4738  ;;  %v1857_v27 = vrot.slane %v1813_v21, 4  ;;  %vm1751_vm2 = vweird.f32 %v7890_v61  ;;  %vm1755_vm9 = vcmp.eq.f32.partialorder %v1754_v19, 8.507059e+37 }
 0x2ed   :  { %v7899_v44 = vpop.eup %4740  ;;  %v1635_v0 = vmul.f32 %v7897_v53, %v7883_v33  ;;  %vm7928_vm6 = vmor %vm1750_vm4, %vm1751_vm2  ;;  %vm1640_vm10 = vweird.f32 %v7897_v53 }
 0x2ee   :  { %v1747_v35 = vsub.f32 1.0, %v1746_v62  ;;  %v1761_v51 = vmul.f32 %v7899_v44, %v7885_v38  ;;  %vm1766_vm11 = vweird.f32 %v7899_v44  ;;  %vm7954_vm13 = vmor %vm1639_vm8, %vm1640_vm10 }
 0x2ef   :  { %v1852_v55 = vpop.f32.mrf.mxu3  ;;  %vm1767_vm14 = vmor %vm1765_vm12, %vm1766_vm11 }
 0x2f0   :  { %v1853_v63 = vadd.f32 %v1852_v55, %v1832_v8  ;;  %v1748_v21 = vmul.f32 %v7890_v61, %v1747_v35  ;;  %v1636_v55 = vsub.f32 1.0, %v1635_v0 }
 0x2f2   :  { %v1858_v62 = vrot.slane %v1853_v63, 4 }
 0x304   :  { %v1894_v28 = vpop.f32.mrf.mxu0 }
 0x30a   :  { %v1914_v31 = vpop.f32.mrf.mxu1  ;;  %v1934_v20 = vpop.f32.mrf.mxu2 }
 0x30b   :  { %v1915_v25 = vadd.f32 %v1914_v31, %v1894_v28  ;;  %v1861_v31 = vadd.f32 %v1857_v27, %v1513_v42  ;;  %v1756_v27 = vand.u32 2147483648, %v7879_v9 }
 0x30d   :  { %v1959_v15 = vrot.slane %v1915_v25, 4  ;;  %v1762_v25 = vsub.f32 1.0, %v1761_v51 }
 0x30f   :  { %v1963_v1 = vadd.f32 %v1959_v15, %v1515_v24  ;;  %v1628_v15 = vand.u32 2147483647, %v7877_v6  ;;  %v1516_v24 = vld [vmem:[#allocation2 + $0x48] sm:$0x30]  ;;  %v1637_v6 = vmul.f32 %v7897_v53, %v1636_v55  ;;  %v1757_v55 = vor.u32 1.1754944e-38, %v1756_v27 }
 0x310   :  { %v1954_v28 = vpop.f32.mrf.mxu3 }
 0x311   :  { %v4624_v48 = vmul.f32 -1.442695, %v1963_v1  ;;  %v1955_v54 = vadd.f32 %v1954_v28, %v1934_v20  ;;  %v1623_v20 = vadd.f32 %v7887_v12, %v1622_v59  ;;  %v1763_v1 = vmul.f32 %v7899_v44, %v1762_v25 }
 0x312   :  { %v1867_v28 = vrot.slane %v7398_v34, 6  ;;  %vm7932_vm7 = vcmp.eq.f32.partialorder %v1628_v15, 8.507059e+37 }
 0x313   :  { %4742 = vpow2.f32 %v4624_v48  ;;  %v1960_v8 = vrot.slane %v1955_v54, 4  ;;  %v1749_v48 = vadd.f32 %v7890_v61, %v1748_v21  ;;  %v1514_v54 = vld [vmem:[#allocation2 + $0x68] sm:$0x30]  ;;  %v1631_v21 = vor.u32 1.1754944e-38, %v1630_v40 }
 0x314   :  { %4744 = vtanh.f32 %v1861_v31  ;;  %v1862_v35 = vadd.f32 %v1858_v62, %v1514_v54  ;;  %v1627_v59 = vsel %vm7920_vm5, %v7887_v12, %v1623_v20  ;;  %v1638_v40 = vadd.f32 %v7897_v53, %v1637_v6 }
 0x315   :  { %v1964_v42 = vadd.f32 %v1960_v8, %v1516_v24  ;;  %v1753_v34 = vsel %vm7928_vm6, %v7890_v61, %v1749_v48  ;;  %v1764_v25 = vadd.f32 %v7899_v44, %v1763_v1  ;;  %v1771_v12 = vand.u32 2147483648, %v7885_v38 }
 0x316   :  { %v1632_v61 = vsel %vm7932_vm7, %v1631_v21, %v1627_v59  ;;  %v1758_v15 = vsel %vm1755_vm9, %v1757_v55, %v1753_v34  ;;  %v1645_v24 = vand.u32 2147483648, %v7883_v33  ;;  %v1643_v48 = vand.u32 2147483647, %v7883_v33 }
 0x317   :  { %v4625_v63 = vmul.f32 -1.442695, %v1964_v42  ;;  %v1769_v54 = vand.u32 2147483647, %v7885_v38  ;;  %v1871_v19 = vmul.f32 %v1867_v28, %v1758_v15  ;;  %v1772_v6 = vor.u32 1.1754944e-38, %v1771_v12 }
 0x318   :  { %vm1644_vm15 = vcmp.eq.f32.partialorder %v1643_v48, 8.507059e+37  ;;  %v1868_v28 = vrot.slane %v7402_v41, 6 }
 0x319   :  { %v4743_v51 = vpop.eup %4742  ;;  %4746 = vpow2.f32 %v4625_v63  ;;  %v1768_v63 = vsel %vm1767_vm14, %v7899_v44, %v1764_v25  ;;  %vm1770_vm0 = vcmp.eq.f32.partialorder %v1769_v54, 8.507059e+37 }
 0x31a   :  { %v1971_v62 = vadd.f32 1.0, %v4743_v51  ;;  %v4745_v8 = vpop.eup %4744  ;;  %4748 = vtanh.f32 %v1862_v35  ;;  %v1642_v35 = vsel %vm7954_vm13, %v7897_v53, %v1638_v40  ;;  %v1646_v51 = vor.u32 1.1754944e-38, %v1645_v24 }
 0x31b   :  { %v1873_v42 = vmul.f32 %v4745_v8, %v1632_v61  ;;  %v1773_v38 = vsel %vm1770_vm0, %v1772_v6, %v1768_v63 }
 0x31c   :  { %4750 = vrcp.f32 %v1971_v62  ;;  %v1647_v33 = vsel %vm1644_vm15, %v1646_v51, %v1642_v35  ;;  %v1872_v53 = vmul.f32 %v1868_v28, %v1773_v38  ;;  %v1984_v44 = vand.u32 2147483648, %v1971_v62 }
 0x31d   :  { %v7964_v9 = vadd.f32 %v1873_v42, %v1871_v19  ;;  %v1982_v55 = vand.u32 2147483647, %v1971_v62  ;;  %vm1978_vm2 = vweird.f32 %v1971_v62 }
 0x31e   :  { %v1985_v15 = vor.u32 1.1754944e-38, %v1984_v44  ;;  %v8000_v44 = vld [vmem:[#allocation3 + $0x7e0] sm:$0xff] }
 0x31f   :  { %v4747_v27 = vpop.eup %4746  ;;  %vm1983_vm4 = vcmp.eq.f32.partialorder %v1982_v55, 8.507059e+37  ;;  %v8006_v55 = vld [vmem:[#allocation3 + $0x7e8] sm:$0xff] }
 0x320   :  { %v1972_v1 = vadd.f32 1.0, %v4747_v27  ;;  %v4749_v0 = vpop.eup %4748 }
 0x321   :  { %v1874_v59 = vmul.f32 %v4749_v0, %v1647_v33  ;;  %v7978_v33 = vld [vmem:[#allocation3 + $0x3e8] sm:$0xff] }
 0x322   :  { %v4751_v31 = vpop.eup %4750  ;;  %4752 = vrcp.f32 %v1972_v1  ;;  %v1999_v48 = vand.u32 2147483648, %v1972_v1  ;;  %v1997_v19 = vand.u32 2147483647, %v1972_v1  ;;  %vm1993_vm6 = vweird.f32 %v1972_v1 }
 0x323   :  { %v1974_v21 = vmul.f32 %v4751_v31, %v1971_v62  ;;  %4754 = vtanh.f32 %v7964_v9  ;;  %vm1979_vm1 = vweird.f32 %v4751_v31  ;;  %v7968_v25 = vadd.f32 %v1874_v59, %v1872_v53  ;;  %v7989_v59 = vld [vmem:[#allocation3 + $0x360] sm:$0xff] }
 0x324   :  { %vm1980_vm3 = vmor %vm1978_vm2, %vm1979_vm1  ;;  %v2000_v62 = vor.u32 1.1754944e-38, %v1999_v48  ;;  %vm1998_vm8 = vcmp.eq.f32.partialorder %v1997_v19, 8.507059e+37  ;;  %v7997_v53 = vld [vmem:[#allocation3 + $0x320] sm:$0xff]  ;;  %v8044_v19 = vld [vmem:[#allocation3 + $0x728] sm:$0xff] }
 0x325   :  { %v1975_v34 = vsub.f32 1.0, %v1974_v21  ;;  %4756 = vtanh.f32 %v7968_v25  ;;  %v7984_v21 = vld [vmem:[#allocation3 + $0x3a8] sm:$0xff]  ;;  %v8035_v48 = vld [vmem:[#allocation3 + $0x260] sm:$0xff] }
 0x327   :  { %v1976_v8 = vmul.f32 %v4751_v31, %v1975_v34  ;;  %v7992_v34 = vld [vmem:[#allocation3 + $0x368] sm:$0xff] }
 0x328   :  { %v4753_v40 = vpop.eup %4752 }
 0x329   :  { %v1977_v12 = vadd.f32 %v4751_v31, %v1976_v8  ;;  %v1989_v61 = vmul.f32 %v4753_v40, %v1972_v1  ;;  %v4755_v42 = vpop.eup %4754  ;;  %vm1994_vm5 = vweird.f32 %v4753_v40  ;;  %v7981_v1 = vld [vmem:[#allocation3 + $0x3a0] sm:$0xff]  ;;  %v8003_v8 = vld [vmem:[#allocation3 + $0x328] sm:$0xff] }
 0x32a   :  { %vm1995_vm7 = vmor %vm1993_vm6, %vm1994_vm5 }
 0x32b   :  { %v1981_v24 = vsel %vm1980_vm3, %v4751_v31, %v1977_v12  ;;  %v1990_v41 = vsub.f32 1.0, %v1989_v61  ;;  %v4757_v6 = vpop.eup %4756  ;;  %v7975_v31 = vld [vmem:[#allocation3 + $0x3e0] sm:$0xff]  ;;  %v8017_v61 = vld [vmem:[#allocation3 + $0x2e8] sm:$0xff] }
 0x32c   :  { %v1986_v20 = vsel %vm1983_vm4, %v1985_v15, %v1981_v24  ;;  %v8014_v12 = vld [vmem:[#allocation3 + $0x7a0] sm:$0xff]  ;;  %v8020_v15 = vld [vmem:[#allocation3 + $0x7a8] sm:$0xff] }
 0x32d   :  { %v2005_v54 = vmul.f32 %v4755_v42, %v1986_v20  ;;  %v1991_v27 = vmul.f32 %v4753_v40, %v1990_v41  ;;  %v8023_v24 = vld [vmem:[#allocation3 + $0x2a0] sm:$0xff]  ;;  %v8029_v42 = vld [vmem:[#allocation3 + $0x2a8] sm:$0xff] }
 0x32e   :  { %v8026_v41 = vld [vmem:[#allocation3 + $0x760] sm:$0xff]  ;;  %v8032_v20 = vld [vmem:[#allocation3 + $0x768] sm:$0xff] }
 0x32f   :  { %v7971_v35 = vrot.slane %v2005_v54, 4  ;;  %v1992_v63 = vadd.f32 %v4753_v40, %v1991_v27  ;;  %v8038_v54 = vld [vmem:[#allocation3 + $0x720] sm:$0xff]  ;;  %v8041_v27 = vld [vmem:[#allocation3 + $0x268] sm:$0xff] }
 0x331   :  { %v1996_v0 = vsel %vm1995_vm7, %v4753_v40, %v1992_v63  ;;  %2037 = vmatmul.f32.vlgmr.msrb.gmra.mxu0 %v7971_v35  ;;  %2077 = vmatmul.f32.vlgmr.msrb.gmra.mxu2 %v7971_v35  ;;  %v8011_v40 = vld [vmem:[#allocation3 + $0x2e0] sm:$0xff] }
 0x332   :  { %v2001_v51 = vsel %vm1998_vm8, %v2000_v62, %v1996_v0  ;;  %2273 = vmatpush.msrb.mxu0 %v7975_v31  ;;  %2313 = vmatpush.msrb.mxu2 %v7978_v33  ;;  %v8049_v63 = vld [vmem:[#allocation3 + $0x220] sm:$0xff]  ;;  %v8055_v0 = vld [vmem:[#allocation3 + $0x228] sm:$0xff] }
 0x333   :  { %v2006_v38 = vmul.f32 %v4757_v6, %v2001_v51  ;;  %11606 = vst [vmem:[#allocation125_spill] sm:$0xff] %v8049_v63  ;;  %v8052_v62 = vld [vmem:[#allocation3 + $0x6e0] sm:$0xff]  ;;  %v8058_v6 = vld [vmem:[#allocation3 + $0x6e8] sm:$0xff] }
 0x334   :  { %2274 = vmatpush.msrb.mxu0 %v7981_v1  ;;  %2314 = vmatpush.msrb.mxu2 %v7984_v21  ;;  %11607 = vst [vmem:[#allocation25_spill] sm:$0xff] %v8052_v62  ;;  %v8061_v51 = vld [vmem:[#allocation3 + $0x1e0] sm:$0xff] }
 0x335   :  { %v7987_v28 = vrot.slane %v2006_v38, 4  ;;  %11608 = vst [vmem:[#allocation39_spill] sm:$0xff] %v8055_v0  ;;  %v8064_v38 = vld [vmem:[#allocation3 + $0x6a0] sm:$0xff] }
 0x336   :  { %2275 = vmatpush.msrb.mxu0 %v7989_v59  ;;  %2315 = vmatpush.msrb.mxu2 %v7992_v34  ;;  %11609 = vst [vmem:[#allocation59_spill] sm:$0xff] %v8058_v6 }
 0x337   :  { %2057 = vmatmul.f32.vlgmr.msrb.gmra.mxu1 %v7987_v28  ;;  %2097 = vmatmul.f32.vlgmr.msrb.gmra.mxu3 %v7987_v28  ;;  %11610 = vst [vmem:[#allocation27_spill] sm:$0xff] %v8061_v51 }
 0x338   :  { %2276 = vmatpush.msrb.mxu0 %v7997_v53  ;;  %2293 = vmatpush.msrb.mxu1 %v8000_v44  ;;  %11611 = vst [vmem:[#allocation42_spill] sm:$0xff] %v8064_v38 }
 0x339   :  { %2316 = vmatpush.msrb.mxu2 %v8003_v8  ;;  %2333 = vmatpush.msrb.mxu3 %v8006_v55 }
 0x33a   :  { %2163 = vmatmul.f32.vlgmr.msra.gmra.mxu0 %v7971_v35  ;;  %2203 = vmatmul.f32.vlgmr.msra.gmra.mxu2 %v7971_v35 }
 0x33b   :  { %2277 = vmatpush.msrb.mxu0 %v8011_v40  ;;  %2294 = vmatpush.msrb.mxu1 %v8014_v12 }
 0x33c   :  { %2317 = vmatpush.msrb.mxu2 %v8017_v61  ;;  %2334 = vmatpush.msrb.mxu3 %v8020_v15 }
 0x33d   :  { %2278 = vmatpush.msrb.mxu0 %v8023_v24  ;;  %2295 = vmatpush.msrb.mxu1 %v8026_v41 }
 0x33e   :  { %2318 = vmatpush.msrb.mxu2 %v8029_v42  ;;  %2335 = vmatpush.msrb.mxu3 %v8032_v20 }
 0x33f   :  { %2279 = vmatpush.msrb.mxu0 %v8035_v48  ;;  %2296 = vmatpush.msrb.mxu1 %v8038_v54 }
 0x340   :  { %2319 = vmatpush.msrb.mxu2 %v8041_v27  ;;  %2336 = vmatpush.msrb.mxu3 %v8044_v19 }
 0x341   :  { %2183 = vmatmul.f32.vlgmr.msra.gmra.mxu1 %v7987_v28  ;;  %2223 = vmatmul.f32.vlgmr.msra.gmra.mxu3 %v7987_v28 }
 0x342   :  { %2280 = vmatpush.msrb.mxu0 %v8049_v63  ;;  %2297 = vmatpush.msrb.mxu1 %v8052_v62  ;;  %v8067_v63 = vld [vmem:[#allocation3 + $0x1e8] sm:$0xff] }
 0x343   :  { %2320 = vmatpush.msrb.mxu2 %v8055_v0  ;;  %2337 = vmatpush.msrb.mxu3 %v8058_v6  ;;  %11612 = vst [vmem:[#allocation63_spill] sm:$0xff] %v8067_v63  ;;  %v8070_v62 = vld [vmem:[#allocation3 + $0x6a8] sm:$0xff]  ;;  %v8073_v0 = vld [vmem:[#allocation3 + $0x1a0] sm:$0xff] }
 0x344   :  { %2281 = vmatpush.msrb.mxu0 %v8061_v51  ;;  %2298 = vmatpush.msrb.mxu1 %v8064_v38  ;;  %11613 = vst [vmem:[#allocation30_spill] sm:$0xff] %v8070_v62  ;;  %v8076_v6 = vld [vmem:[#allocation3 + $0x660] sm:$0xff]  ;;  %v8079_v51 = vld [vmem:[#allocation3 + $0x1a8] sm:$0xff] }
 0x345   :  { %2321 = vmatpush.msrb.mxu2 %v8067_v63  ;;  %2338 = vmatpush.msrb.mxu3 %v8070_v62  ;;  %11614 = vst [vmem:[#allocation44_spill] sm:$0xff] %v8073_v0  ;;  %v8082_v38 = vld [vmem:[#allocation3 + $0x668] sm:$0xff]  ;;  %v8085_v63 = vld [vmem:[#allocation3 + $0x160] sm:$0xff] }
 0x346   :  { %2282 = vmatpush.msrb.mxu0 %v8073_v0  ;;  %11615 = vst [vmem:[#allocation67_spill] sm:$0xff] %v8076_v6  ;;  %2299 = vmatpush.msrb.mxu1 %v8076_v6  ;;  %v8088_v62 = vld [vmem:[#allocation3 + $0x620] sm:$0xff]  ;;  %v8091_v0 = vld [vmem:[#allocation3 + $0x168] sm:$0xff] }
 0x347   :  { %11616 = vst [vmem:[#allocation33_spill] sm:$0xff] %v8079_v51  ;;  %2322 = vmatpush.msrb.mxu2 %v8079_v51  ;;  %2339 = vmatpush.msrb.mxu3 %v8082_v38  ;;  %v8094_v6 = vld [vmem:[#allocation3 + $0x628] sm:$0xff]  ;;  %v8097_v51 = vld [vmem:[#allocation3 + $0x120] sm:$0xff] }
 0x348   :  { %11617 = vst [vmem:[#allocation46_spill] sm:$0xff] %v8082_v38  ;;  %2283 = vmatpush.msrb.mxu0 %v8085_v63  ;;  %2300 = vmatpush.msrb.mxu1 %v8088_v62  ;;  %v8100_v38 = vld [vmem:[#allocation3 + $0x5e0] sm:$0xff] }
 0x349   :  { %11618 = vst [vmem:[#allocation71_spill] sm:$0xff] %v8085_v63  ;;  %2323 = vmatpush.msrb.mxu2 %v8091_v0  ;;  %2340 = vmatpush.msrb.mxu3 %v8094_v6  ;;  %v8103_v63 = vld [vmem:[#allocation3 + $0x128] sm:$0xff] }
 0x34a   :  { %11619 = vst [vmem:[#allocation41_spill] sm:$0xff] %v8088_v62  ;;  %2284 = vmatpush.msrb.mxu0 %v8097_v51  ;;  %2301 = vmatpush.msrb.mxu1 %v8100_v38  ;;  %v8106_v62 = vld [vmem:[#allocation3 + $0x5e8] sm:$0xff] }
 0x34b   :  { %11620 = vst [vmem:[#allocation35_spill] sm:$0xff] %v8091_v0  ;;  %2324 = vmatpush.msrb.mxu2 %v8103_v63  ;;  %2341 = vmatpush.msrb.mxu3 %v8106_v62  ;;  %v8109_v0 = vld [vmem:[#allocation3 + $0xe0] sm:$0xff] }
 0x34c   :  { %11621 = vst [vmem:[#allocation83_spill] sm:$0xff] %v8094_v6  ;;  %2285 = vmatpush.msrb.mxu0 %v8109_v0  ;;  %v8112_v6 = vld [vmem:[#allocation3 + $0x5a0] sm:$0xff] }
 0x34d   :  { %11622 = vst [vmem:[#allocation49_spill] sm:$0xff] %v8097_v51  ;;  %2302 = vmatpush.msrb.mxu1 %v8112_v6  ;;  %v8115_v51 = vld [vmem:[#allocation3 + $0xe8] sm:$0xff] }
 0x34e   :  { %11623 = vst [vmem:[#allocation50_spill] sm:$0xff] %v8100_v38  ;;  %2325 = vmatpush.msrb.mxu2 %v8115_v51  ;;  %v8118_v38 = vld [vmem:[#allocation3 + $0x5a8] sm:$0xff] }
 0x34f   :  { %11624 = vst [vmem:[#allocation75_spill] sm:$0xff] %v8103_v63  ;;  %2342 = vmatpush.msrb.mxu3 %v8118_v38  ;;  %v8121_v63 = vld [vmem:[#allocation3 + $0xa0] sm:$0xff] }
 0x350   :  { %11625 = vst [vmem:[#allocation64_spill] sm:$0xff] %v8106_v62  ;;  %2286 = vmatpush.msrb.mxu0 %v8121_v63  ;;  %v8124_v62 = vld [vmem:[#allocation3 + $0x560] sm:$0xff] }
 0x351   :  { %11626 = vst [vmem:[#allocation38_spill] sm:$0xff] %v8109_v0  ;;  %2303 = vmatpush.msrb.mxu1 %v8124_v62  ;;  %v8127_v0 = vld [vmem:[#allocation3 + $0xa8] sm:$0xff] }
 0x352   :  { %11627 = vst [vmem:[#allocation68_spill] sm:$0xff] %v8112_v6  ;;  %2326 = vmatpush.msrb.mxu2 %v8127_v0  ;;  %v8130_v6 = vld [vmem:[#allocation3 + $0x568] sm:$0xff] }
 0x353   :  { %11628 = vst [vmem:[#allocation52_spill] sm:$0xff] %v8115_v51  ;;  %2343 = vmatpush.msrb.mxu3 %v8130_v6  ;;  %v8133_v51 = vld [vmem:[#allocation3 + $0x60] sm:$0xff] }
 0x354   :  { %11629 = vst [vmem:[#allocation72_spill] sm:$0xff] %v8118_v38  ;;  %2287 = vmatpush.msrb.mxu0 %v8133_v51  ;;  %v8136_v38 = vld [vmem:[#allocation3 + $0x520] sm:$0xff] }
 0x355   :  { %11630 = vst [vmem:[#allocation79_spill] sm:$0xff] %v8121_v63  ;;  %2304 = vmatpush.msrb.mxu1 %v8136_v38  ;;  %v8139_v63 = vld [vmem:[#allocation3 + $0x68] sm:$0xff] }
 0x356   :  { %11631 = vst [vmem:[#allocation76_spill] sm:$0xff] %v8124_v62  ;;  %2327 = vmatpush.msrb.mxu2 %v8139_v63  ;;  %v8142_v62 = vld [vmem:[#allocation3 + $0x528] sm:$0xff] }
 0x357   :  { %11632 = vst [vmem:[#allocation47_spill] sm:$0xff] %v8127_v0  ;;  %2344 = vmatpush.msrb.mxu3 %v8142_v62  ;;  %v8145_v0 = vld [vmem:[#allocation3 + $0x20] sm:$0xff] }
 0x358   :  { %11633 = vst [vmem:[#allocation56_spill] sm:$0xff] %v8130_v6  ;;  %2288 = vmatpush.msrb.mxu0 %v8145_v0  ;;  %v8148_v6 = vld [vmem:[#allocation3 + $0x4e0] sm:$0xff] }
 0x359   :  { %11634 = vst [vmem:[#allocation77_spill] sm:$0xff] %v8133_v51  ;;  %2305 = vmatpush.msrb.mxu1 %v8148_v6  ;;  %v8151_v51 = vld [vmem:[#allocation3 + $0x28] sm:$0xff]  ;;  %2289 = vmatmul.f32.vlgmr.msrb.gmra.mxu0 %v7971_v35 }
 0x35a   :  { %11635 = vst [vmem:[#allocation60_spill] sm:$0xff] %v8136_v38  ;;  %2328 = vmatpush.msrb.mxu2 %v8151_v51  ;;  %v8154_v38 = vld [vmem:[#allocation3 + $0x4e8] sm:$0xff] }
 0x35b   :  { %11636 = vst [vmem:[#allocation53_spill] sm:$0xff] %v8142_v62  ;;  %2345 = vmatpush.msrb.mxu3 %v8154_v38  ;;  %2329 = vmatmul.f32.vlgmr.msrb.gmra.mxu2 %v7971_v35  ;;  %v8159_v62 = vld [vmem:[#allocation3 + $0x3f0] sm:$0xff] }
 0x35c   :  { %11637 = vst [vmem:[#allocation81_spill] sm:$0xff] %v8145_v0  ;;  %2375 = vmatpush.msra.mxu0 %v8159_v62  ;;  %2415 = vmatpush.msra.mxu2 %v7478_v18  ;;  %v8163_v0 = vld [vmem:[#allocation3 + $0x4a0] sm:$0xff]  ;;  %v8179_v18 = vld [vmem:[#allocation3 + $0x370] sm:$0xff] }
 0x35d   :  { %11638 = vst [vmem:[#allocation37_spill] sm:$0xff] %v8148_v6  ;;  %2306 = vmatpush.msrb.mxu1 %v8163_v0  ;;  %v8166_v6 = vld [vmem:[#allocation3 + $0x4a8] sm:$0xff] }
 0x35e   :  { %11639 = vst [vmem:[#allocation57_spill] sm:$0xff] %v8151_v51  ;;  %2346 = vmatpush.msrb.mxu3 %v8166_v6  ;;  %v8169_v51 = vld [vmem:[#allocation3 + $0x3b0] sm:$0xff]  ;;  %2416 = vmatpush.msra.mxu2 %v7484_v36 }
 0x35f   :  { %11640 = vst [vmem:[#allocation54_spill] sm:$0xff] %v8154_v38  ;;  %2376 = vmatpush.msra.mxu0 %v8169_v51  ;;  %v8173_v38 = vld [vmem:[#allocation3 + $0x460] sm:$0xff]  ;;  %v8191_v36 = vld [vmem:[#allocation3 + $0x330] sm:$0xff] }
 0x360   :  { %11641 = vst [vmem:[#allocation40_spill] sm:$0xff] %v8159_v62  ;;  %2307 = vmatpush.msrb.mxu1 %v8173_v38  ;;  %v8176_v62 = vld [vmem:[#allocation3 + $0x468] sm:$0xff]  ;;  %2417 = vmatpush.msra.mxu2 %v7490_v22  ;;  %v8198_v22 = vld [vmem:[#allocation3 + $0x7f8] sm:$0xff] }
 0x361   :  { %11642 = vst [vmem:[#allocation61_spill] sm:$0xff] %v8166_v6  ;;  %2347 = vmatpush.msrb.mxu3 %v8176_v62  ;;  %2377 = vmatpush.msra.mxu0 %v8179_v18  ;;  %v8183_v6 = vld [vmem:[#allocation3 + $0x420] sm:$0xff] }
 0x362   :  { %11643 = vst [vmem:[#allocation82_spill] sm:$0xff] %v8169_v51  ;;  %2308 = vmatpush.msrb.mxu1 %v8183_v6  ;;  %v8186_v51 = vld [vmem:[#allocation3 + $0x428] sm:$0xff]  ;;  %2418 = vmatpush.msra.mxu2 %v7499_v45  ;;  %v8214_v45 = vld [vmem:[#allocation3 + $0x770] sm:$0xff] }
 0x363   :  { %11644 = vst [vmem:[#allocation43_spill] sm:$0xff] %v8176_v62  ;;  %2348 = vmatpush.msrb.mxu3 %v8186_v51  ;;  %2309 = vmatmul.f32.vlgmr.msrb.gmra.mxu1 %v7987_v28  ;;  %v8194_v62 = vld [vmem:[#allocation3 + $0x7f0] sm:$0xff] }
 0x364   :  { %11645 = vst [vmem:[#allocation58_spill] sm:$0xff] %v8183_v6  ;;  %2349 = vmatmul.f32.vlgmr.msrb.gmra.mxu3 %v7987_v28  ;;  %2378 = vmatpush.msra.mxu0 %v8191_v36  ;;  %v8201_v6 = vld [vmem:[#allocation3 + $0x2f0] sm:$0xff] }
 0x365   :  { %11646 = vst [vmem:[#allocation65_spill] sm:$0xff] %v8186_v51  ;;  %2395 = vmatpush.msra.mxu1 %v8194_v62  ;;  %2435 = vmatpush.msra.mxu3 %v8198_v22  ;;  %v8204_v51 = vld [vmem:[#allocation3 + $0x7b0] sm:$0xff] }
 0x366   :  { %11647 = vst [vmem:[#allocation85_spill] sm:$0xff] %v8191_v36  ;;  %2379 = vmatpush.msra.mxu0 %v8201_v6  ;;  %2419 = vmatpush.msra.mxu2 %v7505_v30  ;;  %v8208_v36 = vld [vmem:[#allocation3 + $0x7b8] sm:$0xff]  ;;  %v8224_v30 = vld [vmem:[#allocation3 + $0x730] sm:$0xff] }
 0x367   :  { %11648 = vst [vmem:[#allocation45_spill] sm:$0xff] %v8194_v62  ;;  %2396 = vmatpush.msra.mxu1 %v8204_v51  ;;  %2436 = vmatpush.msra.mxu3 %v8208_v36  ;;  %v8211_v62 = vld [vmem:[#allocation3 + $0x2b0] sm:$0xff] }
 0x368   :  { %11649 = vst [vmem:[#allocation62_spill] sm:$0xff] %v8201_v6  ;;  %2380 = vmatpush.msra.mxu0 %v8211_v62  ;;  %2420 = vmatpush.msra.mxu2 %v7511_v47  ;;  %v8218_v6 = vld [vmem:[#allocation3 + $0x778] sm:$0xff]  ;;  %v8234_v47 = vld [vmem:[#allocation3 + $0x6f0] sm:$0xff] }
 0x369   :  { %11650 = vst [vmem:[#allocation69_spill] sm:$0xff] %v8204_v51  ;;  %2397 = vmatpush.msra.mxu1 %v8214_v45  ;;  %2437 = vmatpush.msra.mxu3 %v8218_v6  ;;  %v8221_v51 = vld [vmem:[#allocation3 + $0x270] sm:$0xff] }
 0x36a   :  { %11651 = vst [vmem:[#allocation66_spill] sm:$0xff] %v8211_v62  ;;  %2381 = vmatpush.msra.mxu0 %v8221_v51  ;;  %2421 = vmatpush.msra.mxu2 %v7517_v49  ;;  %v8228_v62 = vld [vmem:[#allocation3 + $0x738] sm:$0xff]  ;;  %v8244_v49 = vld [vmem:[#allocation3 + $0x6b0] sm:$0xff] }
 0x36b   :  { %11652 = vst [vmem:[#allocation48_spill] sm:$0xff] %v8214_v45  ;;  %2398 = vmatpush.msra.mxu1 %v8224_v30  ;;  %2438 = vmatpush.msra.mxu3 %v8228_v62  ;;  %v8231_v45 = vld [vmem:[#allocation3 + $0x230] sm:$0xff] }
 0x36c   :  { %11653 = vst [vmem:[#allocation88_spill] sm:$0xff] %v8221_v51  ;;  %2382 = vmatpush.msra.mxu0 %v8231_v45  ;;  %2422 = vmatpush.msra.mxu2 %v7523_v26  ;;  %v8238_v51 = vld [vmem:[#allocation3 + $0x6f8] sm:$0xff]  ;;  %v8254_v26 = vld [vmem:[#allocation3 + $0x670] sm:$0xff] }
 0x36d   :  { %11654 = vst [vmem:[#allocation73_spill] sm:$0xff] %v8224_v30  ;;  %2399 = vmatpush.msra.mxu1 %v8234_v47  ;;  %2439 = vmatpush.msra.mxu3 %v8238_v51  ;;  %v8241_v30 = vld [vmem:[#allocation3 + $0x1f0] sm:$0xff] }
 0x36e   :  { %11655 = vst [vmem:[#allocation70_spill] sm:$0xff] %v8231_v45  ;;  %2383 = vmatpush.msra.mxu0 %v8241_v30  ;;  %2423 = vmatpush.msra.mxu2 %v7529_v3  ;;  %v8248_v45 = vld [vmem:[#allocation3 + $0x6b8] sm:$0xff]  ;;  %v8264_v3 = vld [vmem:[#allocation3 + $0x630] sm:$0xff] }
 0x36f   :  { %11656 = vst [vmem:[#allocation51_spill] sm:$0xff] %v8234_v47  ;;  %2400 = vmatpush.msra.mxu1 %v8244_v49  ;;  %2440 = vmatpush.msra.mxu3 %v8248_v45  ;;  %v8251_v47 = vld [vmem:[#allocation3 + $0x1b0] sm:$0xff] }
 0x370   :  { %11657 = vst [vmem:[#allocation90_spill] sm:$0xff] %v8241_v30  ;;  %2384 = vmatpush.msra.mxu0 %v8251_v47  ;;  %2424 = vmatpush.msra.mxu2 %v7535_v60  ;;  %v8258_v30 = vld [vmem:[#allocation3 + $0x678] sm:$0xff]  ;;  %v8274_v60 = vld [vmem:[#allocation3 + $0x5f0] sm:$0xff] }
 0x371   :  { %11658 = vst [vmem:[#allocation78_spill] sm:$0xff] %v8244_v49  ;;  %2401 = vmatpush.msra.mxu1 %v8254_v26  ;;  %2441 = vmatpush.msra.mxu3 %v8258_v30  ;;  %v8261_v49 = vld [vmem:[#allocation3 + $0x170] sm:$0xff] }
 0x372   :  { %11659 = vst [vmem:[#allocation74_spill] sm:$0xff] %v8251_v47  ;;  %2385 = vmatpush.msra.mxu0 %v8261_v49  ;;  %2425 = vmatpush.msra.mxu2 %v7541_v5  ;;  %v8268_v47 = vld [vmem:[#allocation3 + $0x638] sm:$0xff]  ;;  %v8284_v5 = vld [vmem:[#allocation3 + $0x5b0] sm:$0xff] }
 0x373   :  { %11660 = vst [vmem:[#allocation80_spill] sm:$0xff] %v8254_v26  ;;  %2402 = vmatpush.msra.mxu1 %v8264_v3  ;;  %2442 = vmatpush.msra.mxu3 %v8268_v47  ;;  %v8271_v26 = vld [vmem:[#allocation3 + $0x130] sm:$0xff] }
 0x374   :  { %11661 = vst [vmem:[#allocation84_spill] sm:$0xff] %v8258_v30  ;;  %2386 = vmatpush.msra.mxu0 %v8271_v26  ;;  %2426 = vmatpush.msra.mxu2 %v7547_v13  ;;  %v8292_v13 = vld [vmem:[#allocation3 + $0x570] sm:$0xff] }
 0x375   :  { %11662 = vst [vmem:[#allocation86_spill] sm:$0xff] %v8261_v49  ;;  %2403 = vmatpush.msra.mxu1 %v8274_v60  ;;  %v8278_v49 = vld [vmem:[#allocation3 + $0x5f8] sm:$0xff] }
 0x376   :  { %11663 = vst [vmem:[#allocation87_spill] sm:$0xff] %v8264_v3  ;;  %2443 = vmatpush.msra.mxu3 %v8278_v49  ;;  %v8281_v3 = vld [vmem:[#allocation3 + $0xf0] sm:$0xff]  ;;  %2427 = vmatpush.msra.mxu2 %v7553_v14 }
 0x377   :  { %11664 = vst [vmem:[#allocation89_spill] sm:$0xff] %v8268_v47  ;;  %2387 = vmatpush.msra.mxu0 %v8281_v3  ;;  %2404 = vmatpush.msra.mxu1 %v8284_v5  ;;  %v8306_v14 = vld [vmem:[#allocation3 + $0x4f0] sm:$0xff] }
 0x378   :  { %11665 = vst [vmem:[#allocation134_spill] sm:$0xff] %v8271_v26  ;;  %2444 = vmatpush.msra.mxu3 %v7556_v16  ;;  %v8289_v26 = vld [vmem:[#allocation3 + $0xb0] sm:$0xff]  ;;  %2428 = vmatpush.msra.mxu2 %v7561_v57 }
 0x379   :  { %11666 = vst [vmem:[#allocation135_spill] sm:$0xff] %v8274_v60  ;;  %2388 = vmatpush.msra.mxu0 %v8289_v26  ;;  %2405 = vmatpush.msra.mxu1 %v8292_v13  ;;  %v8313_v16 = vld [vmem:[#allocation3 + $0x4b0] sm:$0xff] }
 0x37a   :  { %11667 = vst [vmem:[#allocation136_spill] sm:$0xff] %v8278_v49  ;;  %2445 = vmatpush.msra.mxu3 %v7564_v58  ;;  %2429 = vmatpush.msra.mxu2 %v7569_v7  ;;  %v8319_v57 = vld [vmem:[#allocation3 + $0x470] sm:$0xff]  ;;  %v8333_v7 = vld [vmem:[#allocation3 + $0x7c0] sm:$0xff] }
 0x37b   :  { %11668 = vst [vmem:[#allocation137_spill] sm:$0xff] %v8281_v3  ;;  %v8297_v3 = vld [vmem:[#allocation3 + $0x70] sm:$0xff] }
 0x37c   :  { %11669 = vst [vmem:[#allocation138_spill] sm:$0xff] %v8284_v5  ;;  %2389 = vmatpush.msra.mxu0 %v8297_v3  ;;  %v8300_v5 = vld [vmem:[#allocation3 + $0x530] sm:$0xff]  ;;  %2446 = vmatpush.msra.mxu3 %v7572_v11 }
 0x37d   :  { %11670 = vst [vmem:[#allocation139_spill] sm:$0xff] %v8289_v26  ;;  %2406 = vmatpush.msra.mxu1 %v8300_v5  ;;  %2430 = vmatpush.msra.mxu2 %v7579_v39  ;;  %v8325_v58 = vld [vmem:[#allocation3 + $0x430] sm:$0xff]  ;;  %v11681_v39 = vld [vmem:[#allocation9_spill] sm:$0xff] }
 0x37e   :  { %11671 = vst [vmem:[#allocation140_spill] sm:$0xff] %v8292_v13  ;;  %2390 = vmatpush.msra.mxu0 %v7575_v17  ;;  %2447 = vmatpush.msra.mxu3 %v7582_v32  ;;  %v11679_v11 = vld [vmem:[#allocation10_spill] sm:$0xff]  ;;  %v8339_v17 = vld [vmem:[#allocation3 + $0x780] sm:$0xff]  ;;  %v2010_v13 = vld [vmem:[#allocation2 + $0x18] sm:$0xc0] }
 0x37f   :  { %11672 = vst [vmem:[#allocation141_spill] sm:$0xff] %v8297_v3  ;;  %2407 = vmatpush.msra.mxu1 %v8306_v14  ;;  %2391 = vmatmul.f32.vlgmr.msra.gmra.mxu0 %v7971_v35  ;;  %v11682_v32 = vld [vmem:[#allocation17_spill] sm:$0xff]  ;;  %v2011_v26 = vld [vmem:[#allocation2 + $0x50] sm:$0xc0] }
 0x380   :  { %11673 = vst [vmem:[#allocation142_spill] sm:$0xff] %v8300_v5  ;;  %2431 = vmatmul.f32.vlgmr.msra.gmra.mxu2 %v7971_v35  ;;  %2448 = vmatpush.msra.mxu3 %v7588_v2  ;;  %v11683_v2 = vld [vmem:[#allocation12_spill] sm:$0xff]  ;;  %v11694_v35 = vld [vmem:[#allocation105_spill] sm:$0xff] }
 0x381   :  { %11674 = vst [vmem:[#allocation143_spill] sm:$0xff] %v8306_v14  ;;  %2408 = vmatpush.msra.mxu1 %v8313_v16  ;;  %2519 = vmatpush.msrb.mxu0 %v7591_v37  ;;  %v8345_v37 = vld [vmem:[#allocation3 + $0x740] sm:$0xff] }
 0x382   :  { %11675 = vst [vmem:[#allocation144_spill] sm:$0xff] %v8313_v16  ;;  %2559 = vmatpush.msrb.mxu2 %v7594_v43  ;;  %2449 = vmatpush.msra.mxu3 %v7598_v52  ;;  %v11685_v43 = vld [vmem:[#allocation11_spill] sm:$0xff]  ;;  %v11686_v52 = vld [vmem:[#allocation18_spill] sm:$0xff]  ;;  %v2008_v14 = vld [vmem:[#allocation2] sm:$0xc0] }
 0x383   :  { %11676 = vst [vmem:[#allocation145_spill] sm:$0xff] %v8319_v57  ;;  %2409 = vmatpush.msra.mxu1 %v8319_v57  ;;  %2520 = vmatpush.msrb.mxu0 %v7601_v23  ;;  %v11687_v23 = vld [vmem:[#allocation14_spill] sm:$0xff] }
 0x384   :  { %2560 = vmatpush.msrb.mxu2 %v7604_v46  ;;  %11677 = vst [vmem:[#allocation146_spill] sm:$0xff] %v8325_v58  ;;  %2450 = vmatpush.msra.mxu3 %v7608_v56  ;;  %v11688_v46 = vld [vmem:[#allocation101_spill] sm:$0xff] }
 0x385   :  { %2410 = vmatpush.msra.mxu1 %v8325_v58  ;;  %2451 = vmatmul.f32.vlgmr.msra.gmra.mxu3 %v7987_v28  ;;  %11678 = vst [vmem:[#allocation147_spill] sm:$0xff] %v8333_v7  ;;  %v11689_v56 = vld [vmem:[#allocation13_spill] sm:$0xff] }
 0x386   :  { %2411 = vmatmul.f32.vlgmr.msra.gmra.mxu1 %v7987_v28  ;;  %2521 = vmatpush.msrb.mxu0 %v7613_v29  ;;  %11680 = vst [vmem:[#allocation10_spill] sm:$0xff] %v8339_v17  ;;  %v11690_v29 = vld [vmem:[#allocation102_spill] sm:$0xff]  ;;  %v11695_v28 = vld [vmem:[#allocation92_spill] sm:$0xff] }
 0x387   :  { %2561 = vmatpush.msrb.mxu2 %v7616_v50  ;;  %2539 = vmatpush.msrb.mxu1 %v8333_v7  ;;  %11684 = vst [vmem:[#allocation9_spill] sm:$0xff] %v8345_v37  ;;  %v11691_v50 = vld [vmem:[#allocation15_spill] sm:$0xff]  ;;  %v2009_v7 = vld [vmem:[#allocation2 + $0x58] sm:$0xc0] }
 0x388   :  { %2579 = vmatpush.msrb.mxu3 %v7620_v4  ;;  %2522 = vmatpush.msrb.mxu0 %v7623_v10  ;;  %v11692_v4 = vld [vmem:[#allocation104_spill] sm:$0xff]  ;;  %v11693_v10 = vld [vmem:[#allocation91_spill] sm:$0xff] }
 0x389   :  { %2562 = vmatpush.msrb.mxu2 %v11679_v11  ;;  %2540 = vmatpush.msrb.mxu1 %v8339_v17  ;;  %v11696_v11 = vld [vmem:[#allocation19_spill] sm:$0xff] }
 0x38a   :  { %2580 = vmatpush.msrb.mxu3 %v11681_v39  ;;  %2523 = vmatpush.msrb.mxu0 %v11682_v32  ;;  %v11697_v39 = vld [vmem:[#allocation93_spill] sm:$0xff]  ;;  %v11698_v32 = vld [vmem:[#allocation107_spill] sm:$0xff] }
 0x38b   :  { %2563 = vmatpush.msrb.mxu2 %v11683_v2  ;;  %2541 = vmatpush.msrb.mxu1 %v8345_v37  ;;  %v11699_v2 = vld [vmem:[#allocation94_spill] sm:$0xff]  ;;  %v2007_v37 = vld [vmem:[#allocation2 + $0x30] sm:$0xc0] }
 0x38c   :  { %2581 = vmatpush.msrb.mxu3 %v11685_v43  ;;  %2524 = vmatpush.msrb.mxu0 %v11686_v52  ;;  %v11700_v43 = vld [vmem:[#allocation20_spill] sm:$0xff]  ;;  %v11701_v52 = vld [vmem:[#allocation95_spill] sm:$0xff] }
 0x38d   :  { %2564 = vmatpush.msrb.mxu2 %v11687_v23  ;;  %2542 = vmatpush.msrb.mxu1 %v11688_v46  ;;  %v11702_v23 = vld [vmem:[#allocation109_spill] sm:$0xff]  ;;  %v11703_v46 = vld [vmem:[#allocation96_spill] sm:$0xff] }
 0x38e   :  { %2582 = vmatpush.msrb.mxu3 %v11689_v56  ;;  %2525 = vmatpush.msrb.mxu0 %v11690_v29  ;;  %v11704_v56 = vld [vmem:[#allocation22_spill] sm:$0xff]  ;;  %v11705_v29 = vld [vmem:[#allocation97_spill] sm:$0xff] }
 0x38f   :  { %2565 = vmatpush.msrb.mxu2 %v11691_v50  ;;  %2543 = vmatpush.msrb.mxu1 %v11692_v4  ;;  %v11706_v50 = vld [vmem:[#allocation111_spill] sm:$0xff]  ;;  %v11707_v4 = vld [vmem:[#allocation98_spill] sm:$0xff] }
 0x390   :  { %2583 = vmatpush.msrb.mxu3 %v11693_v10  ;;  %2526 = vmatpush.msrb.mxu0 %v11694_v35  ;;  %v11708_v10 = vld [vmem:[#allocation23_spill] sm:$0xff]  ;;  %v11709_v35 = vld [vmem:[#allocation113_spill] sm:$0xff] }
 0x391   :  { %2566 = vmatpush.msrb.mxu2 %v11695_v28  ;;  %2544 = vmatpush.msrb.mxu1 %v11696_v11  ;;  %v11710_v28 = vld [vmem:[#allocation16_spill] sm:$0xff] }
 0x392   :  { %2584 = vmatpush.msrb.mxu3 %v11697_v39  ;;  %2527 = vmatpush.msrb.mxu0 %v11698_v32  ;;  %v11711_v11 = vld [vmem:[#allocation24_spill] sm:$0xff]  ;;  %v11712_v39 = vld [vmem:[#allocation115_spill] sm:$0xff] }
 0x393   :  { %2567 = vmatpush.msrb.mxu2 %v11699_v2  ;;  %2545 = vmatpush.msrb.mxu1 %v11700_v43  ;;  %v11713_v32 = vld [vmem:[#allocation99_spill] sm:$0xff]  ;;  %v11714_v2 = vld [vmem:[#allocation26_spill] sm:$0xff]  ;;  %v11715_v43 = vld [vmem:[#allocation117_spill] sm:$0xff] }
 0x394   :  { %2585 = vmatpush.msrb.mxu3 %v11701_v52  ;;  %2528 = vmatpush.msrb.mxu0 %v11702_v23  ;;  %v11716_v52 = vld [vmem:[#allocation100_spill] sm:$0xff]  ;;  %v11717_v23 = vld [vmem:[#allocation119_spill] sm:$0xff] }
 0x395   :  { %2568 = vmatpush.msrb.mxu2 %v11703_v46  ;;  %2546 = vmatpush.msrb.mxu1 %v11704_v56  ;;  %v11718_v46 = vld [vmem:[#allocation29_spill] sm:$0xff]  ;;  %v11719_v56 = vld [vmem:[#allocation103_spill] sm:$0xff] }
 0x396   :  { %2586 = vmatpush.msrb.mxu3 %v11705_v29  ;;  %2529 = vmatpush.msrb.mxu0 %v11706_v50  ;;  %v11720_v29 = vld [vmem:[#allocation121_spill] sm:$0xff]  ;;  %v11721_v50 = vld [vmem:[#allocation32_spill] sm:$0xff] }
 0x397   :  { %2569 = vmatpush.msrb.mxu2 %v11707_v4  ;;  %2547 = vmatpush.msrb.mxu1 %v11708_v10  ;;  %v11722_v4 = vld [vmem:[#allocation106_spill] sm:$0xff] }
 0x398   :  { %2587 = vmatpush.msrb.mxu3 %v11709_v35  ;;  %2530 = vmatpush.msrb.mxu0 %v11710_v28  ;;  %v8386_v10 = vld [vmem:[#allocation3 + $0x48] sm:$0xff]  ;;  %v11724_v35 = vld [vmem:[#allocation123_spill] sm:$0xff]  ;;  %v11725_v28 = vld [vmem:[#allocation124_spill] sm:$0xff] }
 0x399   :  { %2570 = vmatpush.msrb.mxu2 %v11711_v11  ;;  %2548 = vmatpush.msrb.mxu1 %v11712_v39  ;;  %11723 = vst [vmem:[#allocation17_spill] sm:$0xff] %v8386_v10  ;;  %v11726_v11 = vld [vmem:[#allocation108_spill] sm:$0xff]  ;;  %v8392_v39 = vld [vmem:[#allocation3 + $0x8] sm:$0xff] }
 0x39a   :  { %2588 = vmatpush.msrb.mxu3 %v11713_v32  ;;  %2531 = vmatpush.msrb.mxu0 %v11714_v2  ;;  %11727 = vst [vmem:[#allocation12_spill] sm:$0xff] %v8392_v39  ;;  %v11728_v32 = vld [vmem:[#allocation126_spill] sm:$0xff]  ;;  %v8396_v2 = vld [vmem:[#allocation3 + $0x3d8] sm:$0xff] }
 0x39b   :  { %2571 = vmatpush.msrb.mxu2 %v11715_v43  ;;  %2549 = vmatpush.msrb.mxu1 %v11716_v52  ;;  %11729 = vst [vmem:[#allocation11_spill] sm:$0xff] %v8396_v2  ;;  %v11730_v43 = vld [vmem:[#allocation127_spill] sm:$0xff]  ;;  %v11731_v52 = vld [vmem:[#allocation110_spill] sm:$0xff] }
 0x39c   :  { %2589 = vmatpush.msrb.mxu3 %v11717_v23  ;;  %2532 = vmatpush.msrb.mxu0 %v11718_v46  ;;  %v11732_v23 = vld [vmem:[#allocation21_spill] sm:$0xff]  ;;  %v8402_v46 = vld [vmem:[#allocation3 + $0x398] sm:$0xff] }
 0x39d   :  { %2572 = vmatpush.msrb.mxu2 %v11719_v56  ;;  %2550 = vmatpush.msrb.mxu1 %v11720_v29  ;;  %11733 = vst [vmem:[#allocation18_spill] sm:$0xff] %v8402_v46  ;;  %v11734_v56 = vld [vmem:[#allocation128_spill] sm:$0xff]  ;;  %v8406_v29 = vld [vmem:[#allocation3 + $0x448] sm:$0xff] }
 0x39e   :  { %2590 = vmatpush.msrb.mxu3 %v11721_v50  ;;  %2533 = vmatpush.msrb.mxu0 %v11722_v4  ;;  %11735 = vst [vmem:[#allocation14_spill] sm:$0xff] %v8406_v29  ;;  %v11736_v50 = vld [vmem:[#allocation112_spill] sm:$0xff] }
 0x39f   :  { %2573 = vmatpush.msrb.mxu2 %v8386_v10  ;;  %2551 = vmatpush.msrb.mxu1 %v11724_v35  ;;  %v8410_v4 = vld [vmem:[#allocation3 + $0x358] sm:$0xff]  ;;  %v11738_v35 = vld [vmem:[#allocation129_spill] sm:$0xff] }
 0x3a0   :  { %2591 = vmatpush.msrb.mxu3 %v11725_v28  ;;  %2534 = vmatpush.msrb.mxu0 %v11726_v11  ;;  %11737 = vst [vmem:[#allocation101_spill] sm:$0xff] %v8410_v4  ;;  %v8414_v28 = vld [vmem:[#allocation3 + $0x408] sm:$0xff] }
 0x3a1   :  { %2574 = vmatpush.msrb.mxu2 %v8392_v39  ;;  %2552 = vmatpush.msrb.mxu1 %v11730_v43  ;;  %11739 = vst [vmem:[#allocation13_spill] sm:$0xff] %v8414_v28  ;;  %v11740_v11 = vld [vmem:[#allocation130_spill] sm:$0xff]  ;;  %v8419_v43 = vld [vmem:[#allocation3 + $0x318] sm:$0xff] }
 0x3a2   :  { %2639 = vmatpush.msra.mxu0 %v11728_v32  ;;  %2592 = vmatpush.msrb.mxu3 %v11731_v52  ;;  %v11741_v32 = vld [vmem:[#allocation114_spill] sm:$0xff]  ;;  %11742 = vst [vmem:[#allocation102_spill] sm:$0xff] %v8419_v43  ;;  %v8422_v52 = vld [vmem:[#allocation3 + $0x7d8] sm:$0xff] }
 0x3a3   :  { %2679 = vmatpush.msra.mxu2 %v8396_v2  ;;  %2553 = vmatpush.msrb.mxu1 %v11734_v56  ;;  %11743 = vst [vmem:[#allocation15_spill] sm:$0xff] %v8422_v52  ;;  %v11745_v56 = vld [vmem:[#allocation131_spill] sm:$0xff] }
 0x3a4   :  { %2640 = vmatpush.msra.mxu0 %v11732_v23  ;;  %2593 = vmatpush.msrb.mxu3 %v8406_v29  ;;  %v11744_v23 = vld [vmem:[#allocation28_spill] sm:$0xff] }
 0x3a5   :  { %2680 = vmatpush.msra.mxu2 %v8402_v46  ;;  %2554 = vmatpush.msrb.mxu1 %v11738_v35  ;;  %v8430_v35 = vld [vmem:[#allocation3 + $0x798] sm:$0xff] }
 0x3a6   :  { %2641 = vmatpush.msra.mxu0 %v11736_v50  ;;  %2594 = vmatpush.msrb.mxu3 %v8414_v28  ;;  %v8427_v50 = vld [vmem:[#allocation3 + $0x2d8] sm:$0xff]  ;;  %11747 = vst [vmem:[#allocation91_spill] sm:$0xff] %v8430_v35 }
 0x3a7   :  { %2681 = vmatpush.msra.mxu2 %v8410_v4  ;;  %2659 = vmatpush.msra.mxu1 %v11741_v32  ;;  %11746 = vst [vmem:[#allocation104_spill] sm:$0xff] %v8427_v50  ;;  %v11749_v32 = vld [vmem:[#allocation31_spill] sm:$0xff] }
 0x3a8   :  { %2642 = vmatpush.msra.mxu0 %v11740_v11  ;;  %2699 = vmatpush.msra.mxu3 %v8422_v52  ;;  %v11748_v11 = vld [vmem:[#allocation116_spill] sm:$0xff] }
 0x3a9   :  { %2682 = vmatpush.msra.mxu2 %v8419_v43  ;;  %2660 = vmatpush.msra.mxu1 %v11745_v56  ;;  %v8435_v43 = vld [vmem:[#allocation3 + $0x298] sm:$0xff]  ;;  %v11753_v56 = vld [vmem:[#allocation118_spill] sm:$0xff] }
 0x3aa   :  { %2643 = vmatpush.msra.mxu0 %v11744_v23  ;;  %2700 = vmatpush.msra.mxu3 %v8430_v35  ;;  %11750 = vst [vmem:[#allocation105_spill] sm:$0xff] %v8435_v43  ;;  %v8438_v52 = vld [vmem:[#allocation3 + $0x758] sm:$0xff] }
 0x3ab   :  { %2683 = vmatpush.msra.mxu2 %v8427_v50  ;;  %2661 = vmatpush.msra.mxu1 %v11749_v32  ;;  %11751 = vst [vmem:[#allocation92_spill] sm:$0xff] %v8438_v52  ;;  %v11752_v23 = vld [vmem:[#allocation132_spill] sm:$0xff]  ;;  %v11757_v32 = vld [vmem:[#allocation133_spill] sm:$0xff] }
 0x3ac   :  { %2644 = vmatpush.msra.mxu0 %v11748_v11  ;;  %2701 = vmatpush.msra.mxu3 %v8438_v52  ;;  %v8443_v50 = vld [vmem:[#allocation3 + $0x258] sm:$0xff]  ;;  %v11756_v11 = vld [vmem:[#allocation34_spill] sm:$0xff] }
 0x3ad   :  { %2684 = vmatpush.msra.mxu2 %v8435_v43  ;;  %2662 = vmatpush.msra.mxu1 %v11753_v56  ;;  %11754 = vst [vmem:[#allocation19_spill] sm:$0xff] %v8443_v50  ;;  %v8446_v35 = vld [vmem:[#allocation3 + $0x718] sm:$0xff] }
 0x3ae   :  { %2645 = vmatpush.msra.mxu0 %v11752_v23  ;;  %11755 = vst [vmem:[#allocation93_spill] sm:$0xff] %v8446_v35  ;;  %2702 = vmatpush.msra.mxu3 %v8446_v35  ;;  %v8451_v43 = vld [vmem:[#allocation3 + $0x218] sm:$0xff]  ;;  %v8457_v23 = vld [vmem:[#allocation3 + $0x1d0] sm:$0xff] }
 0x3af   :  { %2685 = vmatpush.msra.mxu2 %v8443_v50  ;;  %2663 = vmatpush.msra.mxu1 %v11757_v32  ;;  %11758 = vst [vmem:[#allocation107_spill] sm:$0xff] %v8451_v43  ;;  %v8454_v52 = vld [vmem:[#allocation3 + $0x6d8] sm:$0xff]  ;;  %v8467_v32 = vld [vmem:[#allocation3 + $0x190] sm:$0xff] }
 0x3b0   :  { %2646 = vmatpush.msra.mxu0 %v11756_v11  ;;  %11759 = vst [vmem:[#allocation94_spill] sm:$0xff] %v8454_v52  ;;  %2703 = vmatpush.msra.mxu3 %v8454_v52  ;;  %v11761_v56 = vld [vmem:[#allocation120_spill] sm:$0xff] }
 0x3b1   :  { %2686 = vmatpush.msra.mxu2 %v8451_v43  ;;  %11760 = vst [vmem:[#allocation20_spill] sm:$0xff] %v8457_v23  ;;  %2664 = vmatpush.msra.mxu1 %v11761_v56  ;;  %v8461_v50 = vld [vmem:[#allocation3 + $0x1d8] sm:$0xff]  ;;  %v8477_v56 = vld [vmem:[#allocation3 + $0x150] sm:$0xff] }
 0x3b2   :  { %2647 = vmatpush.msra.mxu0 %v8457_v23  ;;  %11762 = vst [vmem:[#allocation95_spill] sm:$0xff] %v8461_v50  ;;  %v8464_v11 = vld [vmem:[#allocation3 + $0x698] sm:$0xff] }
 0x3b3   :  { %2687 = vmatpush.msra.mxu2 %v8461_v50  ;;  %11763 = vst [vmem:[#allocation109_spill] sm:$0xff] %v8464_v11  ;;  %2704 = vmatpush.msra.mxu3 %v8464_v11  ;;  %v11765_v43 = vld [vmem:[#allocation36_spill] sm:$0xff]  ;;  %v11769_v50 = vld [vmem:[#allocation122_spill] sm:$0xff] }
 0x3b4   :  { %11764 = vst [vmem:[#allocation96_spill] sm:$0xff] %v8467_v32  ;;  %2648 = vmatpush.msra.mxu0 %v8467_v32  ;;  %2665 = vmatpush.msra.mxu1 %v11765_v43  ;;  %v8471_v52 = vld [vmem:[#allocation3 + $0x198] sm:$0xff]  ;;  %v8487_v43 = vld [vmem:[#allocation3 + $0x110] sm:$0xff] }
 0x3b5   :  { %11766 = vst [vmem:[#allocation22_spill] sm:$0xff] %v8471_v52  ;;  %2688 = vmatpush.msra.mxu2 %v8471_v52  ;;  %v8474_v23 = vld [vmem:[#allocation3 + $0x658] sm:$0xff] }
 0x3b6   :  { %11767 = vst [vmem:[#allocation97_spill] sm:$0xff] %v8474_v23  ;;  %2705 = vmatpush.msra.mxu3 %v8474_v23  ;;  %2649 = vmatpush.msra.mxu0 %v8477_v56  ;;  %v8481_v11 = vld [vmem:[#allocation3 + $0x158] sm:$0xff] }
 0x3b7   :  { %11768 = vst [vmem:[#allocation111_spill] sm:$0xff] %v8477_v56  ;;  %2666 = vmatpush.msra.mxu1 %v11769_v50  ;;  %2689 = vmatpush.msra.mxu2 %v8481_v11  ;;  %v8484_v32 = vld [vmem:[#allocation3 + $0x618] sm:$0xff]  ;;  %v8497_v50 = vld [vmem:[#allocation3 + $0xd0] sm:$0xff] }
 0x3b8   :  { %11770 = vst [vmem:[#allocation98_spill] sm:$0xff] %v8481_v11  ;;  %2706 = vmatpush.msra.mxu3 %v8484_v32  ;;  %2650 = vmatpush.msra.mxu0 %v8487_v43  ;;  %v11773_v52 = vld [vmem:[#allocation55_spill] sm:$0xff] }
 0x3b9   :  { %11771 = vst [vmem:[#allocation23_spill] sm:$0xff] %v8484_v32  ;;  %2667 = vmatpush.msra.mxu1 %v11773_v52  ;;  %v8491_v23 = vld [vmem:[#allocation3 + $0x118] sm:$0xff]  ;;  %v8500_v11 = vld [vmem:[#allocation3 + $0x590] sm:$0xff] }
 0x3ba   :  { %11772 = vst [vmem:[#allocation113_spill] sm:$0xff] %v8487_v43  ;;  %2690 = vmatpush.msra.mxu2 %v8491_v23  ;;  %v8494_v56 = vld [vmem:[#allocation3 + $0x5d8] sm:$0xff]  ;;  %2651 = vmatpush.msra.mxu0 %v8497_v50  ;;  %v2038_v43 = vpop.f32.mrf.mxu0  ;;  %v2098_v35 = vpop.f32.mrf.mxu3 }
 0x3bb   :  { %11774 = vst [vmem:[#allocation16_spill] sm:$0xff] %v8491_v23  ;;  %2707 = vmatpush.msra.mxu3 %v8494_v56  ;;  %2668 = vmatpush.msra.mxu1 %v8500_v11  ;;  %v8503_v32 = vld [vmem:[#allocation3 + $0xd8] sm:$0xff]  ;;  %v8509_v23 = vld [vmem:[#allocation3 + $0x90] sm:$0xff] }
 0x3bc   :  { %11775 = vst [vmem:[#allocation24_spill] sm:$0xff] %v8494_v56  ;;  %2691 = vmatpush.msra.mxu2 %v8503_v32  ;;  %v8506_v52 = vld [vmem:[#allocation3 + $0x598] sm:$0xff]  ;;  %2652 = vmatpush.msra.mxu0 %v8509_v23  ;;  %v8512_v56 = vld [vmem:[#allocation3 + $0x550] sm:$0xff] }
 0x3bd   :  { %11776 = vst [vmem:[#allocation115_spill] sm:$0xff] %v8497_v50  ;;  %2708 = vmatpush.msra.mxu3 %v8506_v52  ;;  %2669 = vmatpush.msra.mxu1 %v8512_v56  ;;  %v8515_v50 = vld [vmem:[#allocation3 + $0x98] sm:$0xff] }
 0x3be   :  { %11777 = vst [vmem:[#allocation99_spill] sm:$0xff] %v8500_v11  ;;  %2692 = vmatpush.msra.mxu2 %v8515_v50  ;;  %v8518_v11 = vld [vmem:[#allocation3 + $0x558] sm:$0xff] }
 0x3bf   :  { %11778 = vst [vmem:[#allocation26_spill] sm:$0xff] %v8503_v32  ;;  %2709 = vmatpush.msra.mxu3 %v8518_v11  ;;  %v8521_v32 = vld [vmem:[#allocation3 + $0x50] sm:$0xff] }
 0x3c0   :  { %11779 = vst [vmem:[#allocation117_spill] sm:$0xff] %v8506_v52  ;;  %2653 = vmatpush.msra.mxu0 %v8521_v32  ;;  %v8524_v52 = vld [vmem:[#allocation3 + $0x510] sm:$0xff] }
 0x3c1   :  { %11780 = vst [vmem:[#allocation100_spill] sm:$0xff] %v8509_v23  ;;  %2670 = vmatpush.msra.mxu1 %v8524_v52  ;;  %v8527_v23 = vld [vmem:[#allocation3 + $0x58] sm:$0xff] }
 0x3c2   :  { %11781 = vst [vmem:[#allocation119_spill] sm:$0xff] %v8512_v56  ;;  %2693 = vmatpush.msra.mxu2 %v8527_v23  ;;  %v8530_v56 = vld [vmem:[#allocation3 + $0x518] sm:$0xff]  ;;  %v2164_v29 = vpop.f32.mrf.mxu0 }
 0x3c3   :  { %11782 = vst [vmem:[#allocation29_spill] sm:$0xff] %v8515_v50  ;;  %2710 = vmatpush.msra.mxu3 %v8530_v56  ;;  %v8533_v50 = vld [vmem:[#allocation3 + $0x10] sm:$0xff] }
 0x3c4   :  { %11783 = vst [vmem:[#allocation103_spill] sm:$0xff] %v8518_v11  ;;  %2654 = vmatpush.msra.mxu0 %v8533_v50  ;;  %v8536_v11 = vld [vmem:[#allocation3 + $0x4d0] sm:$0xff]  ;;  %v2224_v2 = vpop.f32.mrf.mxu3 }
 0x3c5   :  { %11784 = vst [vmem:[#allocation121_spill] sm:$0xff] %v8521_v32  ;;  %2671 = vmatpush.msra.mxu1 %v8536_v11  ;;  %v8539_v32 = vld [vmem:[#allocation3 + $0x18] sm:$0xff] }
 0x3c6   :  { %11785 = vst [vmem:[#allocation32_spill] sm:$0xff] %v8524_v52  ;;  %2694 = vmatpush.msra.mxu2 %v8539_v32  ;;  %v8542_v52 = vld [vmem:[#allocation3 + $0x4d8] sm:$0xff] }
 0x3c7   :  { %11786 = vst [vmem:[#allocation106_spill] sm:$0xff] %v8527_v23  ;;  %2711 = vmatpush.msra.mxu3 %v8542_v52  ;;  %v8545_v23 = vld [vmem:[#allocation3 + $0x490] sm:$0xff] }
 0x3c8   :  { %11787 = vst [vmem:[#allocation123_spill] sm:$0xff] %v8530_v56  ;;  %2672 = vmatpush.msra.mxu1 %v8545_v23  ;;  %v8548_v56 = vld [vmem:[#allocation3 + $0x498] sm:$0xff] }
 0x3c9   :  { %11788 = vst [vmem:[#allocation124_spill] sm:$0xff] %v8533_v50  ;;  %2712 = vmatpush.msra.mxu3 %v8548_v56  ;;  %v8551_v50 = vld [vmem:[#allocation3 + $0x450] sm:$0xff] }
 0x3ca   :  { %11789 = vst [vmem:[#allocation108_spill] sm:$0xff] %v8536_v11  ;;  %2673 = vmatpush.msra.mxu1 %v8551_v50  ;;  %v8554_v11 = vld [vmem:[#allocation3 + $0x458] sm:$0xff] }
 0x3cb   :  { %11790 = vst [vmem:[#allocation126_spill] sm:$0xff] %v8539_v32  ;;  %2713 = vmatpush.msra.mxu3 %v8554_v11  ;;  %v8557_v32 = vld [vmem:[#allocation3 + $0x410] sm:$0xff] }
 0x3cc   :  { %11791 = vst [vmem:[#allocation127_spill] sm:$0xff] %v8542_v52  ;;  %2674 = vmatpush.msra.mxu1 %v8557_v32  ;;  %v8560_v52 = vld [vmem:[#allocation3 + $0x418] sm:$0xff] }
 0x3cd   :  { %11792 = vst [vmem:[#allocation110_spill] sm:$0xff] %v8545_v23  ;;  %2714 = vmatpush.msra.mxu3 %v8560_v52  ;;  %v2058_v23 = vpop.f32.mrf.mxu1 }
 0x3ce   :  { %11793 = vst [vmem:[#allocation21_spill] sm:$0xff] %v8548_v56  ;;  %v2078_v56 = vpop.f32.mrf.mxu2  ;;  %v2059_v4 = vadd.f32 %v2058_v23, %v2038_v43 }
 0x3cf   :  { %11794 = vst [vmem:[#allocation128_spill] sm:$0xff] %v8551_v50 }
 0x3d0   :  { %11795 = vst [vmem:[#allocation112_spill] sm:$0xff] %v8554_v11  ;;  %v2103_v46 = vrot.slane %v2059_v4, 2  ;;  %v2099_v11 = vadd.f32 %v2098_v35, %v2078_v56 }
 0x3d1   :  { %11796 = vst [vmem:[#allocation129_spill] sm:$0xff] %v8557_v32 }
 0x3d2   :  { %11797 = vst [vmem:[#allocation130_spill] sm:$0xff] %v8560_v52  ;;  %v2107_v32 = vadd.f32 %v2103_v46, %v2007_v37  ;;  %v2104_v57 = vrot.slane %v2099_v11, 2 }
 0x3d4   :  { %v4626_v16 = vmul.f32 -1.442695, %v2107_v32  ;;  %v2108_v3 = vadd.f32 %v2104_v57, %v2008_v14 }
 0x3d5   :  { %v2184_v28 = vpop.f32.mrf.mxu1 }
 0x3d6   :  { %v2185_v50 = vadd.f32 %v2184_v28, %v2164_v29  ;;  %v2204_v10 = vpop.f32.mrf.mxu2  ;;  %4758 = vpow2.f32 %v4626_v16  ;;  %v4627_v29 = vmul.f32 -1.442695, %v2108_v3 }
 0x3d7   :  { %v2225_v17 = vadd.f32 %v2224_v2, %v2204_v10 }
 0x3d8   :  { %v2229_v39 = vrot.slane %v2185_v50, 2 }
 0x3d9   :  { %v2230_v52 = vrot.slane %v2225_v17, 2 }
 0x3da   :  { %v2233_v58 = vadd.f32 %v2229_v39, %v2009_v7 }
 0x3db   :  { %v2234_v23 = vadd.f32 %v2230_v52, %v2010_v13  ;;  %v2290_v13 = vpop.f32.mrf.mxu0 }
 0x3dc   :  { %v4628_v5 = vmul.f32 -1.442695, %v2233_v58  ;;  %v4759_v28 = vpop.eup %4758 }
 0x3dd   :  { %v4629_v4 = vmul.f32 -1.442695, %v2234_v23  ;;  %v8563_v10 = vadd.f32 1.0, %v4759_v28 }
 0x3de   :  { %4760 = vpow2.f32 %v4628_v5  ;;  %v2330_v58 = vpop.f32.mrf.mxu2 }
 0x3df   :  { %4762 = vpow2.f32 %v4627_v29  ;;  %v2128_v30 = vand.u32 2147483648, %v8563_v10  ;;  %vm2122_vm11 = vweird.f32 %v8563_v10 }
 0x3e0   :  { %4764 = vpow2.f32 %v4629_v4  ;;  %v2310_v5 = vpop.f32.mrf.mxu1 }
 0x3e1   :  { %4766 = vrcp.f32 %v8563_v10  ;;  %v2311_v2 = vadd.f32 %v2310_v5, %v2290_v13 }
 0x3e3   :  { %v2355_v23 = vrot.slane %v2311_v2, 2 }
 0x3e4   :  { %v4761_v35 = vpop.eup %4760 }
 0x3e5   :  { %v8565_v37 = vadd.f32 1.0, %v4761_v35  ;;  %v4763_v7 = vpop.eup %4762  ;;  %v2013_v35 = vld [vmem:[#allocation2 + $0x8] sm:$0xc0] }
 0x3e6   :  { %v4765_v17 = vpop.eup %4764  ;;  %v8569_v14 = vadd.f32 1.0, %v4763_v7 }
 0x3e7   :  { %4768 = vrcp.f32 %v8565_v37  ;;  %v8571_v3 = vadd.f32 1.0, %v4765_v17  ;;  %v8573_v16 = vpop.eup %4766  ;;  %v2350_v39 = vpop.f32.mrf.mxu3  ;;  %vm2248_vm12 = vweird.f32 %v8565_v37 }
 0x3e8   :  { %4770 = vrcp.f32 %v8569_v14  ;;  %v2118_v46 = vmul.f32 %v8573_v16, %v8563_v10  ;;  %v2351_v7 = vadd.f32 %v2350_v39, %v2330_v58  ;;  %vm2123_vm9 = vweird.f32 %v8573_v16 }
 0x3e9   :  { %4772 = vrcp.f32 %v8571_v3  ;;  %vm8606_vm13 = vmor %vm2122_vm11, %vm2123_vm9  ;;  %vm2137_vm0 = vweird.f32 %v8569_v14  ;;  %vm2263_vm4 = vweird.f32 %v8571_v3 }
 0x3ea   :  { %v2119_v4 = vsub.f32 1.0, %v2118_v46 }
 0x3ec   :  { %v2120_v46 = vmul.f32 %v8573_v16, %v2119_v4  ;;  %v2252_v4 = vand.u32 2147483647, %v8565_v37 }
 0x3ed   :  { %v8576_v57 = vpop.eup %4768 }
 0x3ee   :  { %v2244_v11 = vmul.f32 %v8576_v57, %v8565_v37  ;;  %v8583_v50 = vpop.eup %4770  ;;  %vm2249_vm10 = vweird.f32 %v8576_v57  ;;  %vm2253_vm1 = vcmp.eq.f32.partialorder %v2252_v4, 8.507059e+37 }
 0x3ef   :  { %v8585_v52 = vpop.eup %4772  ;;  %v2133_v13 = vmul.f32 %v8583_v50, %v8569_v14  ;;  %vm8614_vm14 = vmor %vm2248_vm12, %vm2249_vm10  ;;  %vm2138_vm2 = vweird.f32 %v8583_v50 }
 0x3f0   :  { %v2245_v28 = vsub.f32 1.0, %v2244_v11  ;;  %v2259_v5 = vmul.f32 %v8585_v52, %v8571_v3  ;;  %v2356_v11 = vrot.slane %v2351_v7, 2  ;;  %vm2264_vm3 = vweird.f32 %v8585_v52  ;;  %vm8640_vm5 = vmor %vm2137_vm0, %vm2138_vm2 }
 0x3f1   :  { %v2134_v39 = vsub.f32 1.0, %v2133_v13  ;;  %vm2265_vm6 = vmor %vm2263_vm4, %vm2264_vm3 }
 0x3f2   :  { %v2246_v2 = vmul.f32 %v8576_v57, %v2245_v28 }
 0x3fc   :  { %v2392_v32 = vpop.f32.mrf.mxu0 }
 0x403   :  { %v2412_v56 = vpop.f32.mrf.mxu1  ;;  %v2432_v49 = vpop.f32.mrf.mxu2 }
 0x404   :  { %v2413_v43 = vadd.f32 %v2412_v56, %v2392_v32  ;;  %v2359_v56 = vadd.f32 %v2355_v23, %v2011_v26  ;;  %v2254_v23 = vand.u32 2147483648, %v8565_v37 }
 0x406   :  { %v2457_v29 = vrot.slane %v2413_v43, 2  ;;  %v2260_v43 = vsub.f32 1.0, %v2259_v5 }
 0x408   :  { %v2461_v17 = vadd.f32 %v2457_v29, %v2013_v35  ;;  %v2452_v32 = vpop.f32.mrf.mxu3  ;;  %v2126_v29 = vand.u32 2147483647, %v8563_v10  ;;  %v2014_v35 = vld [vmem:[#allocation2 + $0x48] sm:$0xc0]  ;;  %v2135_v10 = vmul.f32 %v8583_v50, %v2134_v39  ;;  %v2255_v39 = vor.u32 1.1754944e-38, %v2254_v23 }
 0x409   :  { %v2453_v47 = vadd.f32 %v2452_v32, %v2432_v49  ;;  %v2121_v49 = vadd.f32 %v8573_v16, %v2120_v46  ;;  %v2365_v32 = vrot.slane %v7964_v9, 6 }
 0x40a   :  { %v4630_v60 = vmul.f32 -1.442695, %v2461_v17  ;;  %v2261_v17 = vmul.f32 %v8585_v52, %v2260_v43  ;;  %vm8618_vm15 = vcmp.eq.f32.partialorder %v2126_v29, 8.507059e+37 }
 0x40b   :  { %v2458_v58 = vrot.slane %v2453_v47, 2  ;;  %v2012_v47 = vld [vmem:[#allocation2 + $0x68] sm:$0xc0]  ;;  %v2125_v46 = vsel %vm8606_vm13, %v8573_v16, %v2121_v49  ;;  %v2269_v16 = vand.u32 2147483648, %v8571_v3 }
 0x40c   :  { %4774 = vpow2.f32 %v4630_v60  ;;  %v2247_v60 = vadd.f32 %v8576_v57, %v2246_v2  ;;  %v2360_v28 = vadd.f32 %v2356_v11, %v2012_v47  ;;  %v2129_v2 = vor.u32 1.1754944e-38, %v2128_v30 }
 0x40d   :  { %4776 = vtanh.f32 %v2359_v56  ;;  %v2462_v26 = vadd.f32 %v2458_v58, %v2014_v35  ;;  %v2136_v30 = vadd.f32 %v8583_v50, %v2135_v10  ;;  %v2262_v43 = vadd.f32 %v8585_v52, %v2261_v17 }
 0x40e   :  { %v2251_v9 = vsel %vm8614_vm14, %v8576_v57, %v2247_v60  ;;  %v2130_v57 = vsel %vm8618_vm15, %v2129_v2, %v2125_v46  ;;  %v2143_v35 = vand.u32 2147483648, %v8569_v14  ;;  %v2141_v60 = vand.u32 2147483647, %v8569_v14 }
 0x40f   :  { %v4631_v7 = vmul.f32 -1.442695, %v2462_v26  ;;  %v2256_v29 = vsel %vm2253_vm1, %v2255_v39, %v2251_v9  ;;  %v2267_v47 = vand.u32 2147483647, %v8571_v3  ;;  %v2270_v10 = vor.u32 1.1754944e-38, %v2269_v16 }
 0x410   :  { %v2369_v4 = vmul.f32 %v2365_v32, %v2256_v29  ;;  %vm2142_vm7 = vcmp.eq.f32.partialorder %v2141_v60, 8.507059e+37  ;;  %v2366_v32 = vrot.slane %v7968_v25, 6 }
 0x411   :  { %4778 = vpow2.f32 %v4631_v7  ;;  %v2266_v7 = vsel %vm2265_vm6, %v8585_v52, %v2262_v43  ;;  %vm2268_vm8 = vcmp.eq.f32.partialorder %v2267_v47, 8.507059e+37 }
 0x412   :  { %v4775_v5 = vpop.eup %4774  ;;  %4780 = vtanh.f32 %v2360_v28  ;;  %v2140_v28 = vsel %vm8640_vm5, %v8583_v50, %v2136_v30  ;;  %v2271_v3 = vsel %vm2268_vm8, %v2270_v10, %v2266_v7 }
 0x413   :  { %v2469_v11 = vadd.f32 1.0, %v4775_v5  ;;  %v4777_v58 = vpop.eup %4776  ;;  %v2144_v5 = vor.u32 1.1754944e-38, %v2143_v35  ;;  %v2370_v50 = vmul.f32 %v2366_v32, %v2271_v3  ;;  %v11829_v3 = vld [vmem:[#allocation72_spill] sm:$0xff] }
 0x414   :  { %v2371_v26 = vmul.f32 %v4777_v58, %v2130_v57  ;;  %v11831_v32 = vld [vmem:[#allocation76_spill] sm:$0xff] }
 0x415   :  { %4782 = vrcp.f32 %v2469_v11  ;;  %v2145_v14 = vsel %vm2142_vm7, %v2144_v5, %v2140_v28  ;;  %v2482_v52 = vand.u32 2147483648, %v2469_v11  ;;  %v2480_v39 = vand.u32 2147483647, %v2469_v11 }
 0x416   :  { %v8650_v37 = vadd.f32 %v2371_v26, %v2369_v4  ;;  %vm2476_vm10 = vweird.f32 %v2469_v11 }
 0x417   :  { %v4779_v23 = vpop.eup %4778  ;;  %v2483_v29 = vor.u32 1.1754944e-38, %v2482_v52  ;;  %vm2481_vm12 = vcmp.eq.f32.partialorder %v2480_v39, 8.507059e+37  ;;  %v11835_v52 = vld [vmem:[#allocation60_spill] sm:$0xff]  ;;  %v11837_v39 = vld [vmem:[#allocation81_spill] sm:$0xff] }
 0x418   :  { %v2470_v17 = vadd.f32 1.0, %v4779_v23  ;;  %v4781_v13 = vpop.eup %4780 }
 0x419   :  { %v2372_v46 = vmul.f32 %v4781_v13, %v2145_v14  ;;  %v11828_v14 = vld [vmem:[#allocation52_spill] sm:$0xff] }
 0x41a   :  { %4784 = vrcp.f32 %v2470_v17  ;;  %v2497_v60 = vand.u32 2147483648, %v2470_v17  ;;  %v2495_v4 = vand.u32 2147483647, %v2470_v17  ;;  %vm2491_vm14 = vweird.f32 %v2470_v17 }
 0x41b   :  { %v4783_v56 = vpop.eup %4782  ;;  %4786 = vtanh.f32 %v8650_v37  ;;  %v8654_v43 = vadd.f32 %v2372_v46, %v2370_v50  ;;  %v11832_v46 = vld [vmem:[#allocation47_spill] sm:$0xff]  ;;  %v11834_v50 = vld [vmem:[#allocation77_spill] sm:$0xff] }
 0x41c   :  { %v2472_v2 = vmul.f32 %v4783_v56, %v2469_v11  ;;  %vm2477_vm9 = vweird.f32 %v4783_v56  ;;  %v2498_v11 = vor.u32 1.1754944e-38, %v2497_v60  ;;  %vm2496_vm0 = vcmp.eq.f32.partialorder %v2495_v4, 8.507059e+37  ;;  %v8742_v60 = vld [vmem:[#allocation3 + $0x378] sm:$0xff]  ;;  %v11848_v4 = vld [vmem:[#allocation45_spill] sm:$0xff] }
 0x41d   :  { %vm2478_vm11 = vmor %vm2476_vm10, %vm2477_vm9  ;;  %4788 = vtanh.f32 %v8654_v43 }
 0x41e   :  { %v2473_v9 = vsub.f32 1.0, %v2472_v2  ;;  %v11830_v2 = vld [vmem:[#allocation79_spill] sm:$0xff] }
 0x420   :  { %v2474_v58 = vmul.f32 %v4783_v56, %v2473_v9  ;;  %v4785_v30 = vpop.eup %4784  ;;  %v11833_v9 = vld [vmem:[#allocation56_spill] sm:$0xff] }
 0x421   :  { %v2487_v57 = vmul.f32 %v4785_v30, %v2470_v17  ;;  %v4787_v26 = vpop.eup %4786  ;;  %vm2492_vm13 = vweird.f32 %v4785_v30 }
 0x422   :  { %v2475_v16 = vadd.f32 %v4783_v56, %v2474_v58  ;;  %vm2493_vm15 = vmor %vm2491_vm14, %vm2492_vm13  ;;  %v11836_v58 = vld [vmem:[#allocation53_spill] sm:$0xff] }
 0x423   :  { %v2488_v25 = vsub.f32 1.0, %v2487_v57  ;;  %v4789_v10 = vpop.eup %4788  ;;  %v11840_v57 = vld [vmem:[#allocation54_spill] sm:$0xff] }
 0x424   :  { %v2479_v35 = vsel %vm2478_vm11, %v4783_v56, %v2475_v16  ;;  %v11839_v16 = vld [vmem:[#allocation57_spill] sm:$0xff] }
 0x425   :  { %v2484_v49 = vsel %vm2481_vm12, %v2483_v29, %v2479_v35  ;;  %v2489_v23 = vmul.f32 %v4785_v30, %v2488_v25  ;;  %v11841_v29 = vld [vmem:[#allocation40_spill] sm:$0xff]  ;;  %v11843_v25 = vld [vmem:[#allocation82_spill] sm:$0xff] }
 0x426   :  { %v2503_v47 = vmul.f32 %v4787_v26, %v2484_v49  ;;  %v8730_v35 = vld [vmem:[#allocation3 + $0x3f8] sm:$0xff] }
 0x427   :  { %v2490_v7 = vadd.f32 %v4785_v30, %v2489_v23  ;;  %v8736_v26 = vld [vmem:[#allocation3 + $0x3b8] sm:$0xff]  ;;  %v11847_v23 = vld [vmem:[#allocation85_spill] sm:$0xff] }
 0x428   :  { %v8657_v28 = vrot.slane %v2503_v47, 6  ;;  %v11844_v49 = vld [vmem:[#allocation43_spill] sm:$0xff]  ;;  %v11845_v47 = vld [vmem:[#allocation58_spill] sm:$0xff] }
 0x429   :  { %v2494_v13 = vsel %vm2493_vm15, %v4785_v30, %v2490_v7  ;;  %v11838_v30 = vld [vmem:[#allocation37_spill] sm:$0xff] }
 0x42a   :  { %2535 = vmatmul.f32.vlgmr.msrb.gmra.mxu0 %v8657_v28  ;;  %2575 = vmatmul.f32.vlgmr.msrb.gmra.mxu2 %v8657_v28  ;;  %v2499_v5 = vsel %vm2496_vm0, %v2498_v11, %v2494_v13  ;;  %v11850_v7 = vld [vmem:[#allocation69_spill] sm:$0xff]  ;;  %v8757_v11 = vld [vmem:[#allocation3 + $0x2f8] sm:$0xff]  ;;  %v11851_v13 = vld [vmem:[#allocation66_spill] sm:$0xff] }
 0x42b   :  { %2759 = vmatpush.msrb.mxu0 %v7975_v31  ;;  %2799 = vmatpush.msrb.mxu2 %v7978_v33  ;;  %v2504_v56 = vmul.f32 %v4789_v10, %v2499_v5  ;;  %v11806_v31 = vld [vmem:[#allocation125_spill] sm:$0xff]  ;;  %v11852_v10 = vld [vmem:[#allocation48_spill] sm:$0xff] }
 0x42c   :  { %v11807_v33 = vld [vmem:[#allocation25_spill] sm:$0xff]  ;;  %v8763_v5 = vld [vmem:[#allocation3 + $0x2b8] sm:$0xff] }
 0x42d   :  { %2760 = vmatpush.msrb.mxu0 %v7981_v1  ;;  %2800 = vmatpush.msrb.mxu2 %v7984_v21  ;;  %v8665_v17 = vrot.slane %v2504_v56, 6  ;;  %v11808_v1 = vld [vmem:[#allocation39_spill] sm:$0xff]  ;;  %v11854_v56 = vld [vmem:[#allocation73_spill] sm:$0xff] }
 0x42e   :  { %v11809_v21 = vld [vmem:[#allocation59_spill] sm:$0xff] }
 0x42f   :  { %2761 = vmatpush.msrb.mxu0 %v7989_v59  ;;  %2801 = vmatpush.msrb.mxu2 %v7992_v34  ;;  %v11810_v59 = vld [vmem:[#allocation27_spill] sm:$0xff]  ;;  %v11811_v34 = vld [vmem:[#allocation42_spill] sm:$0xff] }
 0x430   :  { %2555 = vmatmul.f32.vlgmr.msrb.gmra.mxu1 %v8665_v17  ;;  %2595 = vmatmul.f32.vlgmr.msrb.gmra.mxu3 %v8665_v17 }
 0x431   :  { %2762 = vmatpush.msrb.mxu0 %v7997_v53  ;;  %2779 = vmatpush.msrb.mxu1 %v8000_v44  ;;  %v11812_v53 = vld [vmem:[#allocation63_spill] sm:$0xff]  ;;  %v11813_v44 = vld [vmem:[#allocation30_spill] sm:$0xff] }
 0x432   :  { %2802 = vmatpush.msrb.mxu2 %v8003_v8  ;;  %2819 = vmatpush.msrb.mxu3 %v8006_v55  ;;  %v11814_v8 = vld [vmem:[#allocation44_spill] sm:$0xff]  ;;  %v11815_v55 = vld [vmem:[#allocation67_spill] sm:$0xff] }
 0x433   :  { %2655 = vmatmul.f32.vlgmr.msra.gmra.mxu0 %v8657_v28  ;;  %2695 = vmatmul.f32.vlgmr.msra.gmra.mxu2 %v8657_v28 }
 0x434   :  { %2763 = vmatpush.msrb.mxu0 %v8011_v40  ;;  %2780 = vmatpush.msrb.mxu1 %v8014_v12  ;;  %v11816_v40 = vld [vmem:[#allocation33_spill] sm:$0xff]  ;;  %v11817_v12 = vld [vmem:[#allocation46_spill] sm:$0xff] }
 0x435   :  { %2803 = vmatpush.msrb.mxu2 %v8017_v61  ;;  %2820 = vmatpush.msrb.mxu3 %v8020_v15  ;;  %v11818_v61 = vld [vmem:[#allocation71_spill] sm:$0xff]  ;;  %v11819_v15 = vld [vmem:[#allocation41_spill] sm:$0xff] }
 0x436   :  { %2764 = vmatpush.msrb.mxu0 %v8023_v24  ;;  %2781 = vmatpush.msrb.mxu1 %v8026_v41  ;;  %v11820_v24 = vld [vmem:[#allocation35_spill] sm:$0xff] }
 0x437   :  { %2804 = vmatpush.msrb.mxu2 %v8029_v42  ;;  %2821 = vmatpush.msrb.mxu3 %v8032_v20  ;;  %v11821_v41 = vld [vmem:[#allocation83_spill] sm:$0xff]  ;;  %v11822_v42 = vld [vmem:[#allocation49_spill] sm:$0xff]  ;;  %v11823_v20 = vld [vmem:[#allocation50_spill] sm:$0xff] }
 0x438   :  { %2765 = vmatpush.msrb.mxu0 %v8035_v48  ;;  %2782 = vmatpush.msrb.mxu1 %v8038_v54  ;;  %v11824_v48 = vld [vmem:[#allocation75_spill] sm:$0xff]  ;;  %v11825_v54 = vld [vmem:[#allocation64_spill] sm:$0xff] }
 0x439   :  { %2805 = vmatpush.msrb.mxu2 %v8041_v27  ;;  %2822 = vmatpush.msrb.mxu3 %v8044_v19  ;;  %v11826_v27 = vld [vmem:[#allocation38_spill] sm:$0xff]  ;;  %v11827_v19 = vld [vmem:[#allocation68_spill] sm:$0xff] }
 0x43a   :  { %2675 = vmatmul.f32.vlgmr.msra.gmra.mxu1 %v8665_v17  ;;  %2715 = vmatmul.f32.vlgmr.msra.gmra.mxu3 %v8665_v17 }
 0x43b   :  { %2766 = vmatpush.msrb.mxu0 %v11806_v31  ;;  %2783 = vmatpush.msrb.mxu1 %v11807_v33  ;;  %v8769_v31 = vld [vmem:[#allocation3 + $0x278] sm:$0xff] }
 0x43c   :  { %2806 = vmatpush.msrb.mxu2 %v11808_v1  ;;  %2823 = vmatpush.msrb.mxu3 %v11809_v21  ;;  %v11856_v33 = vld [vmem:[#allocation51_spill] sm:$0xff]  ;;  %v11858_v21 = vld [vmem:[#allocation78_spill] sm:$0xff] }
 0x43d   :  { %2767 = vmatpush.msrb.mxu0 %v11810_v59  ;;  %2784 = vmatpush.msrb.mxu1 %v11811_v34  ;;  %v8775_v1 = vld [vmem:[#allocation3 + $0x238] sm:$0xff] }
 0x43e   :  { %2807 = vmatpush.msrb.mxu2 %v11812_v53  ;;  %2824 = vmatpush.msrb.mxu3 %v11813_v44  ;;  %v8781_v59 = vld [vmem:[#allocation3 + $0x1f8] sm:$0xff] }
 0x43f   :  { %2768 = vmatpush.msrb.mxu0 %v11814_v8  ;;  %2785 = vmatpush.msrb.mxu1 %v11815_v55  ;;  %v11860_v34 = vld [vmem:[#allocation80_spill] sm:$0xff]  ;;  %v11863_v8 = vld [vmem:[#allocation87_spill] sm:$0xff] }
 0x440   :  { %2808 = vmatpush.msrb.mxu2 %v11816_v40  ;;  %2825 = vmatpush.msrb.mxu3 %v11817_v12  ;;  %v8787_v53 = vld [vmem:[#allocation3 + $0x1b8] sm:$0xff]  ;;  %v11864_v40 = vld [vmem:[#allocation89_spill] sm:$0xff] }
 0x441   :  { %2769 = vmatpush.msrb.mxu0 %v11818_v61  ;;  %2786 = vmatpush.msrb.mxu1 %v11819_v15  ;;  %v11861_v44 = vld [vmem:[#allocation84_spill] sm:$0xff]  ;;  %v11866_v12 = vld [vmem:[#allocation135_spill] sm:$0xff] }
 0x442   :  { %2809 = vmatpush.msrb.mxu2 %v11820_v24  ;;  %2826 = vmatpush.msrb.mxu3 %v11821_v41  ;;  %v8793_v55 = vld [vmem:[#allocation3 + $0x178] sm:$0xff]  ;;  %v11868_v24 = vld [vmem:[#allocation137_spill] sm:$0xff]  ;;  %v11869_v41 = vld [vmem:[#allocation138_spill] sm:$0xff] }
 0x443   :  { %2770 = vmatpush.msrb.mxu0 %v11822_v42  ;;  %2787 = vmatpush.msrb.mxu1 %v11823_v20  ;;  %v8799_v61 = vld [vmem:[#allocation3 + $0x138] sm:$0xff] }
 0x444   :  { %2810 = vmatpush.msrb.mxu2 %v11824_v48  ;;  %2827 = vmatpush.msrb.mxu3 %v11825_v54  ;;  %v11867_v15 = vld [vmem:[#allocation136_spill] sm:$0xff]  ;;  %v11870_v48 = vld [vmem:[#allocation139_spill] sm:$0xff] }
 0x445   :  { %2771 = vmatpush.msrb.mxu0 %v11826_v27  ;;  %2788 = vmatpush.msrb.mxu1 %v11827_v19  ;;  %v8805_v42 = vld [vmem:[#allocation3 + $0xf8] sm:$0xff] }
 0x446   :  { %2811 = vmatpush.msrb.mxu2 %v11828_v14  ;;  %2828 = vmatpush.msrb.mxu3 %v11829_v3  ;;  %v8808_v20 = vld [vmem:[#allocation3 + $0x5b8] sm:$0xff]  ;;  %v11872_v14 = vld [vmem:[#allocation141_spill] sm:$0xff]  ;;  %v11873_v3 = vld [vmem:[#allocation142_spill] sm:$0xff] }
 0x447   :  { %2772 = vmatpush.msrb.mxu0 %v11830_v2  ;;  %2789 = vmatpush.msrb.mxu1 %v11831_v32  ;;  %v11871_v54 = vld [vmem:[#allocation140_spill] sm:$0xff] }
 0x448   :  { %2812 = vmatpush.msrb.mxu2 %v11832_v46  ;;  %2829 = vmatpush.msrb.mxu3 %v11833_v9  ;;  %v8813_v27 = vld [vmem:[#allocation3 + $0xb8] sm:$0xff]  ;;  %v8827_v46 = vld [vmem:[#allocation3 + $0x30] sm:$0xff] }
 0x449   :  { %2773 = vmatpush.msrb.mxu0 %v11834_v50  ;;  %2790 = vmatpush.msrb.mxu1 %v11835_v52  ;;  %v8816_v19 = vld [vmem:[#allocation3 + $0x578] sm:$0xff] }
 0x44a   :  { %2813 = vmatpush.msrb.mxu2 %v8139_v63  ;;  %2830 = vmatpush.msrb.mxu3 %v11836_v58  ;;  %v11842_v63 = vld [vmem:[#allocation61_spill] sm:$0xff]  ;;  %v8821_v2 = vld [vmem:[#allocation3 + $0x78] sm:$0xff] }
 0x44b   :  { %2774 = vmatpush.msrb.mxu0 %v11837_v39  ;;  %2791 = vmatpush.msrb.mxu1 %v11838_v30  ;;  %v8824_v32 = vld [vmem:[#allocation3 + $0x538] sm:$0xff]  ;;  %v8843_v30 = vld [vmem:[#allocation3 + $0x3c0] sm:$0xff] }
 0x44c   :  { %2814 = vmatpush.msrb.mxu2 %v11839_v16  ;;  %2831 = vmatpush.msrb.mxu3 %v11840_v57  ;;  %v11874_v9 = vld [vmem:[#allocation143_spill] sm:$0xff]  ;;  %v11875_v58 = vld [vmem:[#allocation144_spill] sm:$0xff]  ;;  %v8846_v16 = vld [vmem:[#allocation3 + $0x3c8] sm:$0xff] }
 0x44d   :  { %2775 = vmatmul.f32.vlgmr.msrb.gmra.mxu0 %v8657_v28  ;;  %2815 = vmatmul.f32.vlgmr.msrb.gmra.mxu2 %v8657_v28  ;;  %v8831_v50 = vld [vmem:[#allocation3 + $0x38] sm:$0xff]  ;;  %v11876_v57 = vld [vmem:[#allocation145_spill] sm:$0xff] }
 0x44e   :  { %2855 = vmatpush.msra.mxu0 %v11841_v29  ;;  %2895 = vmatpush.msra.mxu2 %v8730_v35  ;;  %v8834_v52 = vld [vmem:[#allocation3 + $0x4f8] sm:$0xff] }
 0x44f   :  { %2792 = vmatpush.msrb.mxu1 %v8163_v0  ;;  %2832 = vmatpush.msrb.mxu3 %v11842_v63  ;;  %v11846_v0 = vld [vmem:[#allocation65_spill] sm:$0xff]  ;;  %v8840_v39 = vld [vmem:[#allocation3 + $0x4b8] sm:$0xff] }
 0x450   :  { %2856 = vmatpush.msra.mxu0 %v11843_v25  ;;  %2896 = vmatpush.msra.mxu2 %v8736_v26  ;;  %v8850_v29 = vld [vmem:[#allocation3 + $0x478] sm:$0xff]  ;;  %v8856_v63 = vld [vmem:[#allocation3 + $0x388] sm:$0xff] }
 0x451   :  { %2793 = vmatpush.msrb.mxu1 %v8173_v38  ;;  %2833 = vmatpush.msrb.mxu3 %v11844_v49  ;;  %v8751_v38 = vld [vmem:[#allocation3 + $0x338] sm:$0xff]  ;;  %v11877_v25 = vld [vmem:[#allocation146_spill] sm:$0xff] }
 0x452   :  { %2857 = vmatpush.msra.mxu0 %v8179_v18  ;;  %2897 = vmatpush.msra.mxu2 %v8742_v60  ;;  %v11849_v18 = vld [vmem:[#allocation62_spill] sm:$0xff]  ;;  %v8860_v49 = vld [vmem:[#allocation3 + $0x438] sm:$0xff] }
 0x453   :  { %2794 = vmatpush.msrb.mxu1 %v11845_v47  ;;  %2834 = vmatpush.msrb.mxu3 %v11846_v0  ;;  %v8865_v47 = vld [vmem:[#allocation3 + $0x340] sm:$0xff]  ;;  %v8868_v0 = vld [vmem:[#allocation3 + $0x348] sm:$0xff] }
 0x454   :  { %2795 = vmatmul.f32.vlgmr.msrb.gmra.mxu1 %v8665_v17  ;;  %2835 = vmatmul.f32.vlgmr.msrb.gmra.mxu3 %v8665_v17 }
 0x455   :  { %2858 = vmatpush.msra.mxu0 %v11847_v23  ;;  %2875 = vmatpush.msra.mxu1 %v11848_v4  ;;  %v11878_v23 = vld [vmem:[#allocation147_spill] sm:$0xff]  ;;  %v8872_v4 = vld [vmem:[#allocation3 + $0x7c8] sm:$0xff] }
 0x456   :  { %2898 = vmatpush.msra.mxu2 %v8751_v38  ;;  %2915 = vmatpush.msra.mxu3 %v8198_v22  ;;  %v11853_v22 = vld [vmem:[#allocation88_spill] sm:$0xff] }
 0x457   :  { %2859 = vmatpush.msra.mxu0 %v11849_v18  ;;  %2876 = vmatpush.msra.mxu1 %v11850_v7  ;;  %v8875_v18 = vld [vmem:[#allocation3 + $0x300] sm:$0xff]  ;;  %v8878_v7 = vld [vmem:[#allocation3 + $0x308] sm:$0xff] }
 0x458   :  { %2899 = vmatpush.msra.mxu2 %v8757_v11  ;;  %2916 = vmatpush.msra.mxu3 %v8208_v36  ;;  %v11855_v36 = vld [vmem:[#allocation70_spill] sm:$0xff]  ;;  %11879 = vst [vmem:[#allocation114_spill] sm:$0xff] %v8878_v7 }
 0x459   :  { %2860 = vmatpush.msra.mxu0 %v11851_v13  ;;  %2877 = vmatpush.msra.mxu1 %v11852_v10  ;;  %v8882_v13 = vld [vmem:[#allocation3 + $0x788] sm:$0xff]  ;;  %v8885_v10 = vld [vmem:[#allocation3 + $0x2c0] sm:$0xff] }
 0x45a   :  { %2900 = vmatpush.msra.mxu2 %v8763_v5  ;;  %2917 = vmatpush.msra.mxu3 %v8218_v6  ;;  %v11857_v6 = vld [vmem:[#allocation90_spill] sm:$0xff]  ;;  %11881 = vst [vmem:[#allocation28_spill] sm:$0xff] %v8882_v13 }
 0x45b   :  { %2861 = vmatpush.msra.mxu0 %v11853_v22  ;;  %2878 = vmatpush.msra.mxu1 %v11854_v56  ;;  %11882 = vst [vmem:[#allocation131_spill] sm:$0xff] %v8885_v10  ;;  %v8888_v22 = vld [vmem:[#allocation3 + $0x2c8] sm:$0xff] }
 0x45c   :  { %2901 = vmatpush.msra.mxu2 %v8769_v31  ;;  %2918 = vmatpush.msra.mxu3 %v8228_v62  ;;  %v11859_v62 = vld [vmem:[#allocation74_spill] sm:$0xff]  ;;  %11883 = vst [vmem:[#allocation116_spill] sm:$0xff] %v8888_v22  ;;  %v11884_v56 = vld [vmem:[#allocation9_spill] sm:$0xff] }
 0x45d   :  { %2862 = vmatpush.msra.mxu0 %v11855_v36  ;;  %2879 = vmatpush.msra.mxu1 %v11856_v33  ;;  %v8892_v36 = vld [vmem:[#allocation3 + $0x748] sm:$0xff]  ;;  %v8895_v33 = vld [vmem:[#allocation3 + $0x280] sm:$0xff] }
 0x45e   :  { %2902 = vmatpush.msra.mxu2 %v8775_v1  ;;  %2919 = vmatpush.msra.mxu3 %v8238_v51  ;;  %v11862_v51 = vld [vmem:[#allocation86_spill] sm:$0xff]  ;;  %11885 = vst [vmem:[#allocation31_spill] sm:$0xff] %v8892_v36 }
 0x45f   :  { %2863 = vmatpush.msra.mxu0 %v11857_v6  ;;  %2880 = vmatpush.msra.mxu1 %v11858_v21  ;;  %11886 = vst [vmem:[#allocation132_spill] sm:$0xff] %v8895_v33  ;;  %v8898_v6 = vld [vmem:[#allocation3 + $0x288] sm:$0xff]  ;;  %v8901_v21 = vld [vmem:[#allocation3 + $0x700] sm:$0xff] }
 0x460   :  { %2903 = vmatpush.msra.mxu2 %v8781_v59  ;;  %2920 = vmatpush.msra.mxu3 %v8248_v45  ;;  %v11865_v45 = vld [vmem:[#allocation134_spill] sm:$0xff]  ;;  %11887 = vst [vmem:[#allocation118_spill] sm:$0xff] %v8898_v6 }
 0x461   :  { %2864 = vmatpush.msra.mxu0 %v11859_v62  ;;  %2881 = vmatpush.msra.mxu1 %v11860_v34  ;;  %11888 = vst [vmem:[#allocation34_spill] sm:$0xff] %v8901_v21  ;;  %v8904_v62 = vld [vmem:[#allocation3 + $0x708] sm:$0xff]  ;;  %v8907_v34 = vld [vmem:[#allocation3 + $0x240] sm:$0xff] }
 0x462   :  { %2904 = vmatpush.msra.mxu2 %v8787_v53  ;;  %2921 = vmatpush.msra.mxu3 %v11861_v44  ;;  %11889 = vst [vmem:[#allocation133_spill] sm:$0xff] %v8904_v62  ;;  %v8910_v44 = vld [vmem:[#allocation3 + $0x248] sm:$0xff] }
 0x463   :  { %2865 = vmatpush.msra.mxu0 %v11862_v51  ;;  %2882 = vmatpush.msra.mxu1 %v11863_v8  ;;  %11890 = vst [vmem:[#allocation120_spill] sm:$0xff] %v8907_v34  ;;  %v8913_v51 = vld [vmem:[#allocation3 + $0x6c0] sm:$0xff]  ;;  %v8916_v8 = vld [vmem:[#allocation3 + $0x6c8] sm:$0xff] }
 0x464   :  { %2905 = vmatpush.msra.mxu2 %v8793_v55  ;;  %2922 = vmatpush.msra.mxu3 %v11864_v40  ;;  %11891 = vst [vmem:[#allocation36_spill] sm:$0xff] %v8910_v44  ;;  %v8919_v40 = vld [vmem:[#allocation3 + $0x200] sm:$0xff] }
 0x465   :  { %2866 = vmatpush.msra.mxu0 %v11865_v45  ;;  %2883 = vmatpush.msra.mxu1 %v11866_v12  ;;  %11892 = vst [vmem:[#allocation122_spill] sm:$0xff] %v8913_v51  ;;  %v8922_v45 = vld [vmem:[#allocation3 + $0x208] sm:$0xff]  ;;  %v8925_v12 = vld [vmem:[#allocation3 + $0x680] sm:$0xff] }
 0x466   :  { %2906 = vmatpush.msra.mxu2 %v8799_v61  ;;  %2923 = vmatpush.msra.mxu3 %v11867_v15  ;;  %11893 = vst [vmem:[#allocation55_spill] sm:$0xff] %v8916_v8  ;;  %v8928_v15 = vld [vmem:[#allocation3 + $0x688] sm:$0xff] }
 0x467   :  { %2867 = vmatpush.msra.mxu0 %v11868_v24  ;;  %2884 = vmatpush.msra.mxu1 %v11869_v41  ;;  %11894 = vst [vmem:[#allocation125_spill] sm:$0xff] %v8919_v40  ;;  %v8931_v24 = vld [vmem:[#allocation3 + $0x1c0] sm:$0xff]  ;;  %v8934_v41 = vld [vmem:[#allocation3 + $0x1c8] sm:$0xff] }
 0x468   :  { %2907 = vmatpush.msra.mxu2 %v8805_v42  ;;  %2924 = vmatpush.msra.mxu3 %v8808_v20  ;;  %11895 = vst [vmem:[#allocation25_spill] sm:$0xff] %v8922_v45 }
 0x469   :  { %2868 = vmatpush.msra.mxu0 %v11870_v48  ;;  %2885 = vmatpush.msra.mxu1 %v11871_v54  ;;  %11896 = vst [vmem:[#allocation39_spill] sm:$0xff] %v8925_v12  ;;  %v8937_v48 = vld [vmem:[#allocation3 + $0x640] sm:$0xff]  ;;  %v8940_v54 = vld [vmem:[#allocation3 + $0x648] sm:$0xff] }
 0x46a   :  { %2908 = vmatpush.msra.mxu2 %v8813_v27  ;;  %2925 = vmatpush.msra.mxu3 %v8816_v19  ;;  %11897 = vst [vmem:[#allocation59_spill] sm:$0xff] %v8928_v15 }
 0x46b   :  { %2869 = vmatpush.msra.mxu0 %v11872_v14  ;;  %2886 = vmatpush.msra.mxu1 %v11873_v3  ;;  %11898 = vst [vmem:[#allocation27_spill] sm:$0xff] %v8931_v24  ;;  %v8943_v14 = vld [vmem:[#allocation3 + $0x180] sm:$0xff]  ;;  %v8946_v3 = vld [vmem:[#allocation3 + $0x188] sm:$0xff] }
 0x46c   :  { %2909 = vmatpush.msra.mxu2 %v8821_v2  ;;  %2926 = vmatpush.msra.mxu3 %v8824_v32  ;;  %11899 = vst [vmem:[#allocation42_spill] sm:$0xff] %v8934_v41 }
 0x46d   :  { %2870 = vmatpush.msra.mxu0 %v8827_v46  ;;  %2887 = vmatpush.msra.mxu1 %v11874_v9  ;;  %11900 = vst [vmem:[#allocation63_spill] sm:$0xff] %v8937_v48  ;;  %v8949_v9 = vld [vmem:[#allocation3 + $0x600] sm:$0xff] }
 0x46e   :  { %2910 = vmatpush.msra.mxu2 %v8831_v50  ;;  %2927 = vmatpush.msra.mxu3 %v8834_v52  ;;  %11901 = vst [vmem:[#allocation30_spill] sm:$0xff] %v8940_v54 }
 0x46f   :  { %2871 = vmatmul.f32.vlgmr.msra.gmra.mxu0 %v8657_v28  ;;  %2911 = vmatmul.f32.vlgmr.msra.gmra.mxu2 %v8657_v28  ;;  %v8853_v28 = vld [vmem:[#allocation3 + $0x380] sm:$0xff]  ;;  %11902 = vst [vmem:[#allocation44_spill] sm:$0xff] %v8943_v14 }
 0x470   :  { %2888 = vmatpush.msra.mxu1 %v11875_v58  ;;  %2928 = vmatpush.msra.mxu3 %v8840_v39  ;;  %11903 = vst [vmem:[#allocation67_spill] sm:$0xff] %v8946_v3  ;;  %v8952_v58 = vld [vmem:[#allocation3 + $0x608] sm:$0xff] }
 0x471   :  { %2987 = vmatpush.msrb.mxu0 %v8843_v30  ;;  %3027 = vmatpush.msrb.mxu2 %v8846_v16  ;;  %11904 = vst [vmem:[#allocation33_spill] sm:$0xff] %v8949_v9 }
 0x472   :  { %2889 = vmatpush.msra.mxu1 %v11876_v57  ;;  %2929 = vmatpush.msra.mxu3 %v8850_v29  ;;  %11905 = vst [vmem:[#allocation46_spill] sm:$0xff] %v8952_v58  ;;  %v8955_v57 = vld [vmem:[#allocation3 + $0x140] sm:$0xff] }
 0x473   :  { %2988 = vmatpush.msrb.mxu0 %v8853_v28  ;;  %3028 = vmatpush.msrb.mxu2 %v8856_v63  ;;  %11906 = vst [vmem:[#allocation71_spill] sm:$0xff] %v8955_v57 }
 0x474   :  { %2890 = vmatpush.msra.mxu1 %v11877_v25  ;;  %2930 = vmatpush.msra.mxu3 %v8860_v49  ;;  %v8958_v25 = vld [vmem:[#allocation3 + $0x148] sm:$0xff] }
 0x475   :  { %2891 = vmatmul.f32.vlgmr.msra.gmra.mxu1 %v8665_v17  ;;  %2931 = vmatmul.f32.vlgmr.msra.gmra.mxu3 %v8665_v17  ;;  %v11880_v17 = vld [vmem:[#allocation10_spill] sm:$0xff]  ;;  %11907 = vst [vmem:[#allocation41_spill] sm:$0xff] %v8958_v25 }
 0x476   :  { %2989 = vmatpush.msrb.mxu0 %v8865_v47  ;;  %3029 = vmatpush.msrb.mxu2 %v8868_v0 }
 0x477   :  { %3007 = vmatpush.msrb.mxu1 %v11878_v23  ;;  %3047 = vmatpush.msrb.mxu3 %v8872_v4  ;;  %v8961_v23 = vld [vmem:[#allocation3 + $0x5c0] sm:$0xff] }
 0x478   :  { %2990 = vmatpush.msrb.mxu0 %v8875_v18  ;;  %3030 = vmatpush.msrb.mxu2 %v8878_v7  ;;  %11908 = vst [vmem:[#allocation35_spill] sm:$0xff] %v8961_v23 }
 0x479   :  { %3008 = vmatpush.msrb.mxu1 %v11880_v17  ;;  %3048 = vmatpush.msrb.mxu3 %v8882_v13  ;;  %v8964_v17 = vld [vmem:[#allocation3 + $0x5c8] sm:$0xff] }
 0x47a   :  { %2991 = vmatpush.msrb.mxu0 %v8885_v10  ;;  %3031 = vmatpush.msrb.mxu2 %v8888_v22  ;;  %11909 = vst [vmem:[#allocation83_spill] sm:$0xff] %v8964_v17 }
 0x47b   :  { %3009 = vmatpush.msrb.mxu1 %v11884_v56  ;;  %3049 = vmatpush.msrb.mxu3 %v8892_v36  ;;  %v8967_v56 = vld [vmem:[#allocation3 + $0x100] sm:$0xff] }
 0x47c   :  { %2992 = vmatpush.msrb.mxu0 %v8895_v33  ;;  %3032 = vmatpush.msrb.mxu2 %v8898_v6  ;;  %11910 = vst [vmem:[#allocation49_spill] sm:$0xff] %v8967_v56  ;;  %v2509_v33 = vld [vmem:[#allocation2 + $0x60] sm:$0x3] }
 0x47d   :  { %3010 = vmatpush.msrb.mxu1 %v8901_v21  ;;  %3050 = vmatpush.msrb.mxu3 %v8904_v62 }
 0x47e   :  { %2993 = vmatpush.msrb.mxu0 %v8907_v34  ;;  %3033 = vmatpush.msrb.mxu2 %v8910_v44  ;;  %v2508_v34 = vld [vmem:[#allocation2 + $0x38] sm:$0x3] }
 0x47f   :  { %3011 = vmatpush.msrb.mxu1 %v8913_v51  ;;  %3051 = vmatpush.msrb.mxu3 %v8916_v8 }
 0x480   :  { %2994 = vmatpush.msrb.mxu0 %v8919_v40  ;;  %3034 = vmatpush.msrb.mxu2 %v8922_v45  ;;  %v2507_v45 = vld [vmem:[#allocation2 + $0x10] sm:$0x3] }
 0x481   :  { %3012 = vmatpush.msrb.mxu1 %v8925_v12  ;;  %3052 = vmatpush.msrb.mxu3 %v8928_v15  ;;  %v2505_v12 = vld [vmem:[#allocation2 + $0x40] sm:$0x3] }
 0x482   :  { %2995 = vmatpush.msrb.mxu0 %v8931_v24  ;;  %3035 = vmatpush.msrb.mxu2 %v8934_v41 }
 0x483   :  { %3013 = vmatpush.msrb.mxu1 %v8937_v48  ;;  %3053 = vmatpush.msrb.mxu3 %v8940_v54  ;;  %v11978_v54 = vld [vmem:[#allocation26_spill] sm:$0xff]  ;;  %v11983_v48 = vld [vmem:[#allocation103_spill] sm:$0xff] }
 0x484   :  { %2996 = vmatpush.msrb.mxu0 %v8943_v14  ;;  %3036 = vmatpush.msrb.mxu2 %v8946_v3  ;;  %v9039_v3 = vld [vmem:[#allocation3 + $0x400] sm:$0xff]  ;;  %v9084_v14 = vld [vmem:[#allocation3 + $0x690] sm:$0xff] }
 0x485   :  { %3014 = vmatpush.msrb.mxu1 %v8949_v9  ;;  %3054 = vmatpush.msrb.mxu3 %v8952_v58  ;;  %v8970_v58 = vld [vmem:[#allocation3 + $0x108] sm:$0xff]  ;;  %v9007_v9 = vld [vmem:[#allocation3 + $0x4c0] sm:$0xff]  ;;  %11938 = vst [vmem:[#allocation43_spill] sm:$0xff] %v9039_v3 }
 0x486   :  { %2997 = vmatpush.msrb.mxu0 %v8955_v57  ;;  %3037 = vmatpush.msrb.mxu2 %v8958_v25  ;;  %11911 = vst [vmem:[#allocation50_spill] sm:$0xff] %v8970_v58  ;;  %v8973_v57 = vld [vmem:[#allocation3 + $0x580] sm:$0xff]  ;;  %v8976_v25 = vld [vmem:[#allocation3 + $0x588] sm:$0xff] }
 0x487   :  { %3015 = vmatpush.msrb.mxu1 %v8961_v23  ;;  %3055 = vmatpush.msrb.mxu3 %v8964_v17  ;;  %11912 = vst [vmem:[#allocation75_spill] sm:$0xff] %v8973_v57  ;;  %v8979_v23 = vld [vmem:[#allocation3 + $0xc0] sm:$0xff]  ;;  %v8982_v17 = vld [vmem:[#allocation3 + $0xc8] sm:$0xff] }
 0x488   :  { %2998 = vmatpush.msrb.mxu0 %v8967_v56  ;;  %3038 = vmatpush.msrb.mxu2 %v8970_v58  ;;  %11913 = vst [vmem:[#allocation64_spill] sm:$0xff] %v8976_v25  ;;  %v8985_v56 = vld [vmem:[#allocation3 + $0x540] sm:$0xff]  ;;  %v8988_v58 = vld [vmem:[#allocation3 + $0x548] sm:$0xff] }
 0x489   :  { %3016 = vmatpush.msrb.mxu1 %v8973_v57  ;;  %3056 = vmatpush.msrb.mxu3 %v8976_v25  ;;  %11914 = vst [vmem:[#allocation38_spill] sm:$0xff] %v8979_v23  ;;  %v8991_v57 = vld [vmem:[#allocation3 + $0x80] sm:$0xff]  ;;  %v8994_v25 = vld [vmem:[#allocation3 + $0x88] sm:$0xff] }
 0x48a   :  { %2999 = vmatpush.msrb.mxu0 %v8979_v23  ;;  %11915 = vst [vmem:[#allocation68_spill] sm:$0xff] %v8982_v17  ;;  %3039 = vmatpush.msrb.mxu2 %v8982_v17  ;;  %v8997_v23 = vld [vmem:[#allocation3 + $0x500] sm:$0xff]  ;;  %v9000_v17 = vld [vmem:[#allocation3 + $0x508] sm:$0xff] }
 0x48b   :  { %11916 = vst [vmem:[#allocation52_spill] sm:$0xff] %v8985_v56  ;;  %3017 = vmatpush.msrb.mxu1 %v8985_v56  ;;  %3057 = vmatpush.msrb.mxu3 %v8988_v58  ;;  %v9003_v56 = vld [vmem:[#allocation3 + $0x40] sm:$0xff] }
 0x48c   :  { %11917 = vst [vmem:[#allocation72_spill] sm:$0xff] %v8988_v58  ;;  %3000 = vmatpush.msrb.mxu0 %v8991_v57  ;;  %3040 = vmatpush.msrb.mxu2 %v8994_v25  ;;  %v11923_v58 = vld [vmem:[#allocation17_spill] sm:$0xff] }
 0x48d   :  { %11918 = vst [vmem:[#allocation79_spill] sm:$0xff] %v8991_v57  ;;  %3018 = vmatpush.msrb.mxu1 %v8997_v23  ;;  %3058 = vmatpush.msrb.mxu3 %v9000_v17  ;;  %v9010_v57 = vld [vmem:[#allocation3 + $0x4c8] sm:$0xff] }
 0x48e   :  { %11919 = vst [vmem:[#allocation76_spill] sm:$0xff] %v8994_v25  ;;  %3001 = vmatpush.msrb.mxu0 %v9003_v56  ;;  %3041 = vmatpush.msrb.mxu2 %v11923_v58  ;;  %v9013_v25 = vld [vmem:[#allocation3] sm:$0xff] }
 0x48f   :  { %11920 = vst [vmem:[#allocation47_spill] sm:$0xff] %v8997_v23  ;;  %3019 = vmatpush.msrb.mxu1 %v9007_v9  ;;  %3059 = vmatpush.msrb.mxu3 %v9010_v57  ;;  %v11927_v23 = vld [vmem:[#allocation12_spill] sm:$0xff] }
 0x490   :  { %11921 = vst [vmem:[#allocation56_spill] sm:$0xff] %v9000_v17  ;;  %3002 = vmatpush.msrb.mxu0 %v9013_v25  ;;  %3042 = vmatpush.msrb.mxu2 %v11927_v23  ;;  %v9017_v17 = vld [vmem:[#allocation3 + $0x3d0] sm:$0xff]  ;;  %v9021_v58 = vld [vmem:[#allocation3 + $0x480] sm:$0xff] }
 0x491   :  { %11922 = vst [vmem:[#allocation77_spill] sm:$0xff] %v9003_v56  ;;  %v11929_v56 = vld [vmem:[#allocation11_spill] sm:$0xff]  ;;  %3020 = vmatpush.msrb.mxu1 %v9021_v58  ;;  %v9031_v23 = vld [vmem:[#allocation3 + $0x440] sm:$0xff] }
 0x492   :  { %11924 = vst [vmem:[#allocation60_spill] sm:$0xff] %v9007_v9  ;;  %3113 = vmatpush.msra.mxu0 %v9017_v17  ;;  %3153 = vmatpush.msra.mxu2 %v11929_v56  ;;  %v9024_v9 = vld [vmem:[#allocation3 + $0x488] sm:$0xff]  ;;  %v9035_v56 = vld [vmem:[#allocation3 + $0x350] sm:$0xff] }
 0x493   :  { %11925 = vst [vmem:[#allocation53_spill] sm:$0xff] %v9010_v57  ;;  %3060 = vmatpush.msrb.mxu3 %v9024_v9  ;;  %v9027_v57 = vld [vmem:[#allocation3 + $0x390] sm:$0xff]  ;;  %3021 = vmatpush.msrb.mxu1 %v9031_v23 }
 0x494   :  { %11926 = vst [vmem:[#allocation81_spill] sm:$0xff] %v9013_v25  ;;  %3114 = vmatpush.msra.mxu0 %v9027_v57  ;;  %v11933_v25 = vld [vmem:[#allocation18_spill] sm:$0xff] }
 0x495   :  { %11928 = vst [vmem:[#allocation37_spill] sm:$0xff] %v9017_v17  ;;  %3154 = vmatpush.msra.mxu2 %v11933_v25  ;;  %v11935_v17 = vld [vmem:[#allocation14_spill] sm:$0xff]  ;;  %3022 = vmatpush.msrb.mxu1 %v9039_v3  ;;  %v11947_v3 = vld [vmem:[#allocation91_spill] sm:$0xff] }
 0x496   :  { %11930 = vst [vmem:[#allocation57_spill] sm:$0xff] %v9021_v58  ;;  %3061 = vmatpush.msrb.mxu3 %v11935_v17  ;;  %3115 = vmatpush.msra.mxu0 %v9035_v56  ;;  %v11937_v58 = vld [vmem:[#allocation101_spill] sm:$0xff]  ;;  %v9046_v25 = vld [vmem:[#allocation3 + $0x7d0] sm:$0xff] }
 0x497   :  { %11931 = vst [vmem:[#allocation54_spill] sm:$0xff] %v9024_v9  ;;  %3155 = vmatpush.msra.mxu2 %v11937_v58  ;;  %v11939_v9 = vld [vmem:[#allocation13_spill] sm:$0xff]  ;;  %3133 = vmatpush.msra.mxu1 %v9046_v25  ;;  %v11942_v17 = vld [vmem:[#allocation102_spill] sm:$0xff] }
 0x498   :  { %11932 = vst [vmem:[#allocation40_spill] sm:$0xff] %v9027_v57  ;;  %3062 = vmatpush.msrb.mxu3 %v11939_v9  ;;  %v9043_v57 = vld [vmem:[#allocation3 + $0x310] sm:$0xff]  ;;  %v11946_v9 = vld [vmem:[#allocation104_spill] sm:$0xff] }
 0x499   :  { %11934 = vst [vmem:[#allocation61_spill] sm:$0xff] %v9031_v23  ;;  %3116 = vmatpush.msra.mxu0 %v9043_v57  ;;  %3156 = vmatpush.msra.mxu2 %v11942_v17  ;;  %v11943_v23 = vld [vmem:[#allocation15_spill] sm:$0xff]  ;;  %v11951_v17 = vld [vmem:[#allocation92_spill] sm:$0xff] }
 0x49a   :  { %11936 = vst [vmem:[#allocation82_spill] sm:$0xff] %v9035_v56  ;;  %3173 = vmatpush.msra.mxu3 %v11943_v23  ;;  %v9051_v56 = vld [vmem:[#allocation3 + $0x2d0] sm:$0xff]  ;;  %v11950_v23 = vld [vmem:[#allocation105_spill] sm:$0xff] }
 0x49b   :  { %11940 = vst [vmem:[#allocation58_spill] sm:$0xff] %v9043_v57  ;;  %3117 = vmatpush.msra.mxu0 %v9051_v56  ;;  %v9054_v58 = vld [vmem:[#allocation3 + $0x790] sm:$0xff]  ;;  %3157 = vmatpush.msra.mxu2 %v11946_v9  ;;  %v11955_v9 = vld [vmem:[#allocation93_spill] sm:$0xff] }
 0x49c   :  { %11941 = vst [vmem:[#allocation65_spill] sm:$0xff] %v9046_v25  ;;  %3134 = vmatpush.msra.mxu1 %v9054_v58  ;;  %3174 = vmatpush.msra.mxu3 %v11947_v3  ;;  %v9059_v57 = vld [vmem:[#allocation3 + $0x290] sm:$0xff] }
 0x49d   :  { %11944 = vst [vmem:[#allocation85_spill] sm:$0xff] %v9051_v56  ;;  %3118 = vmatpush.msra.mxu0 %v9059_v57  ;;  %v9062_v25 = vld [vmem:[#allocation3 + $0x750] sm:$0xff]  ;;  %3158 = vmatpush.msra.mxu2 %v11950_v23 }
 0x49e   :  { %11945 = vst [vmem:[#allocation45_spill] sm:$0xff] %v9054_v58  ;;  %3135 = vmatpush.msra.mxu1 %v9062_v25  ;;  %3175 = vmatpush.msra.mxu3 %v11951_v17  ;;  %v9067_v56 = vld [vmem:[#allocation3 + $0x250] sm:$0xff] }
 0x49f   :  { %11948 = vst [vmem:[#allocation62_spill] sm:$0xff] %v9059_v57  ;;  %3119 = vmatpush.msra.mxu0 %v9067_v56  ;;  %v9070_v58 = vld [vmem:[#allocation3 + $0x710] sm:$0xff] }
 0x4a0   :  { %11949 = vst [vmem:[#allocation69_spill] sm:$0xff] %v9062_v25  ;;  %3136 = vmatpush.msra.mxu1 %v9070_v58  ;;  %v11954_v3 = vld [vmem:[#allocation19_spill] sm:$0xff]  ;;  %3176 = vmatpush.msra.mxu3 %v11955_v9  ;;  %v11959_v17 = vld [vmem:[#allocation94_spill] sm:$0xff]  ;;  %v11963_v9 = vld [vmem:[#allocation109_spill] sm:$0xff] }
 0x4a1   :  { %11952 = vst [vmem:[#allocation66_spill] sm:$0xff] %v9067_v56  ;;  %3159 = vmatpush.msra.mxu2 %v11954_v3  ;;  %v9075_v57 = vld [vmem:[#allocation3 + $0x210] sm:$0xff]  ;;  %v11960_v56 = vld [vmem:[#allocation20_spill] sm:$0xff] }
 0x4a2   :  { %11953 = vst [vmem:[#allocation48_spill] sm:$0xff] %v9070_v58  ;;  %3120 = vmatpush.msra.mxu0 %v9075_v57  ;;  %v9078_v25 = vld [vmem:[#allocation3 + $0x6d0] sm:$0xff]  ;;  %3177 = vmatpush.msra.mxu3 %v11959_v17  ;;  %v11964_v58 = vld [vmem:[#allocation96_spill] sm:$0xff] }
 0x4a3   :  { %11956 = vst [vmem:[#allocation88_spill] sm:$0xff] %v9075_v57  ;;  %3137 = vmatpush.msra.mxu1 %v9078_v25  ;;  %v11958_v23 = vld [vmem:[#allocation107_spill] sm:$0xff] }
 0x4a4   :  { %11957 = vst [vmem:[#allocation73_spill] sm:$0xff] %v9078_v25  ;;  %3160 = vmatpush.msra.mxu2 %v11958_v23  ;;  %3121 = vmatpush.msra.mxu0 %v11960_v56  ;;  %v11962_v3 = vld [vmem:[#allocation95_spill] sm:$0xff]  ;;  %v11966_v25 = vld [vmem:[#allocation22_spill] sm:$0xff]  ;;  %v11967_v23 = vld [vmem:[#allocation97_spill] sm:$0xff] }
 0x4a5   :  { %11961 = vst [vmem:[#allocation70_spill] sm:$0xff] %v9084_v14  ;;  %3138 = vmatpush.msra.mxu1 %v9084_v14  ;;  %3178 = vmatpush.msra.mxu3 %v11963_v9  ;;  %v9090_v57 = vld [vmem:[#allocation3 + $0x650] sm:$0xff]  ;;  %v11972_v9 = vld [vmem:[#allocation113_spill] sm:$0xff] }
 0x4a6   :  { %3161 = vmatpush.msra.mxu2 %v11962_v3  ;;  %3122 = vmatpush.msra.mxu0 %v11964_v58  ;;  %11965 = vst [vmem:[#allocation51_spill] sm:$0xff] %v9090_v57  ;;  %v11968_v17 = vld [vmem:[#allocation111_spill] sm:$0xff]  ;;  %v11970_v14 = vld [vmem:[#allocation98_spill] sm:$0xff] }
 0x4a7   :  { %3139 = vmatpush.msra.mxu1 %v9090_v57  ;;  %3179 = vmatpush.msra.mxu3 %v11967_v23  ;;  %v9096_v56 = vld [vmem:[#allocation3 + $0x610] sm:$0xff]  ;;  %v11974_v57 = vld [vmem:[#allocation16_spill] sm:$0xff] }
 0x4a8   :  { %3162 = vmatpush.msra.mxu2 %v11966_v25  ;;  %3123 = vmatpush.msra.mxu0 %v11968_v17  ;;  %11969 = vst [vmem:[#allocation90_spill] sm:$0xff] %v9096_v56  ;;  %v11971_v3 = vld [vmem:[#allocation23_spill] sm:$0xff]  ;;  %v11975_v25 = vld [vmem:[#allocation24_spill] sm:$0xff] }
 0x4a9   :  { %3140 = vmatpush.msra.mxu1 %v9096_v56  ;;  %3180 = vmatpush.msra.mxu3 %v11971_v3  ;;  %v9102_v58 = vld [vmem:[#allocation3 + $0x5d0] sm:$0xff]  ;;  %v11979_v56 = vld [vmem:[#allocation117_spill] sm:$0xff] }
 0x4aa   :  { %3163 = vmatpush.msra.mxu2 %v11970_v14  ;;  %3124 = vmatpush.msra.mxu0 %v11972_v9  ;;  %11973 = vst [vmem:[#allocation78_spill] sm:$0xff] %v9102_v58  ;;  %v11976_v23 = vld [vmem:[#allocation115_spill] sm:$0xff]  ;;  %v11980_v14 = vld [vmem:[#allocation100_spill] sm:$0xff]  ;;  %v11982_v9 = vld [vmem:[#allocation29_spill] sm:$0xff] }
 0x4ab   :  { %3141 = vmatpush.msra.mxu1 %v9102_v58  ;;  %3181 = vmatpush.msra.mxu3 %v11975_v25  ;;  %v11977_v17 = vld [vmem:[#allocation99_spill] sm:$0xff]  ;;  %v11984_v58 = vld [vmem:[#allocation121_spill] sm:$0xff]  ;;  %v11986_v25 = vld [vmem:[#allocation106_spill] sm:$0xff] }
 0x4ac   :  { %3164 = vmatpush.msra.mxu2 %v11974_v57  ;;  %3125 = vmatpush.msra.mxu0 %v11976_v23  ;;  %v11981_v3 = vld [vmem:[#allocation119_spill] sm:$0xff]  ;;  %v11985_v57 = vld [vmem:[#allocation32_spill] sm:$0xff] }
 0x4ad   :  { %3142 = vmatpush.msra.mxu1 %v11977_v17  ;;  %3182 = vmatpush.msra.mxu3 %v11979_v56  ;;  %v11987_v23 = vld [vmem:[#allocation123_spill] sm:$0xff]  ;;  %v11988_v17 = vld [vmem:[#allocation124_spill] sm:$0xff]  ;;  %v11990_v56 = vld [vmem:[#allocation126_spill] sm:$0xff] }
 0x4ae   :  { %3165 = vmatpush.msra.mxu2 %v11978_v54  ;;  %3126 = vmatpush.msra.mxu0 %v11980_v14  ;;  %v11989_v54 = vld [vmem:[#allocation108_spill] sm:$0xff]  ;;  %v11991_v14 = vld [vmem:[#allocation127_spill] sm:$0xff] }
 0x4af   :  { %3143 = vmatpush.msra.mxu1 %v11981_v3  ;;  %3183 = vmatpush.msra.mxu3 %v11983_v48  ;;  %v11992_v3 = vld [vmem:[#allocation110_spill] sm:$0xff]  ;;  %v11994_v48 = vld [vmem:[#allocation128_spill] sm:$0xff] }
 0x4b0   :  { %3166 = vmatpush.msra.mxu2 %v11982_v9  ;;  %3127 = vmatpush.msra.mxu0 %v11984_v58  ;;  %v11993_v9 = vld [vmem:[#allocation21_spill] sm:$0xff]  ;;  %v11995_v58 = vld [vmem:[#allocation112_spill] sm:$0xff] }
 0x4b1   :  { %3144 = vmatpush.msra.mxu1 %v11985_v57  ;;  %3184 = vmatpush.msra.mxu3 %v11987_v23  ;;  %v11996_v57 = vld [vmem:[#allocation129_spill] sm:$0xff]  ;;  %v2556_v23 = vpop.f32.mrf.mxu1 }
 0x4b2   :  { %3167 = vmatpush.msra.mxu2 %v11986_v25  ;;  %3128 = vmatpush.msra.mxu0 %v11988_v17  ;;  %v11997_v25 = vld [vmem:[#allocation130_spill] sm:$0xff]  ;;  %v2536_v17 = vpop.f32.mrf.mxu0 }
 0x4b3   :  { %3145 = vmatpush.msra.mxu1 %v11989_v54  ;;  %3185 = vmatpush.msra.mxu3 %v11991_v14  ;;  %v2596_v41 = vpop.f32.mrf.mxu3  ;;  %v2576_v54 = vpop.f32.mrf.mxu2 }
 0x4b4   :  { %3168 = vmatpush.msra.mxu2 %v11990_v56  ;;  %v2557_v56 = vadd.f32 %v2556_v23, %v2536_v17 }
 0x4b5   :  { %3146 = vmatpush.msra.mxu1 %v11992_v3  ;;  %3186 = vmatpush.msra.mxu3 %v11993_v9 }
 0x4b6   :  { %v2599_v3 = vadd.f32 %v2557_v56, %v2505_v12 }
 0x4b7   :  { %3147 = vmatpush.msra.mxu1 %v11994_v48  ;;  %3187 = vmatpush.msra.mxu3 %v11995_v58  ;;  %v2597_v48 = vadd.f32 %v2596_v41, %v2576_v54 }
 0x4b8   :  { %v4632_v51 = vmul.f32 -1.442695, %v2599_v3 }
 0x4b9   :  { %3148 = vmatpush.msra.mxu1 %v11996_v57  ;;  %3188 = vmatpush.msra.mxu3 %v11997_v25  ;;  %v2676_v24 = vpop.f32.mrf.mxu1  ;;  %v2506_v57 = vld [vmem:[#allocation2 + $0x20] sm:$0x3] }
 0x4ba   :  { %v2656_v15 = vpop.f32.mrf.mxu0  ;;  %v2600_v25 = vadd.f32 %v2597_v48, %v2506_v57  ;;  %4790 = vpow2.f32 %v4632_v51 }
 0x4bb   :  { %v2677_v14 = vadd.f32 %v2676_v24, %v2656_v15  ;;  %v2696_v8 = vpop.f32.mrf.mxu2 }
 0x4bc   :  { %v4633_v21 = vmul.f32 -1.442695, %v2600_v25 }
 0x4bd   :  { %v2716_v9 = vpop.f32.mrf.mxu3  ;;  %v2719_v40 = vadd.f32 %v2677_v14, %v2507_v45 }
 0x4be   :  { %v2717_v58 = vadd.f32 %v2716_v9, %v2696_v8 }
 0x4bf   :  { %v4634_v44 = vmul.f32 -1.442695, %v2719_v40 }
 0x4c0   :  { %v2720_v62 = vadd.f32 %v2717_v58, %v2508_v34  ;;  %v4791_v17 = vpop.eup %4790 }
 0x4c1   :  { %4792 = vpow2.f32 %v4634_v44  ;;  %v9129_v12 = vadd.f32 1.0, %v4791_v17 }
 0x4c2   :  { %v4635_v23 = vmul.f32 -1.442695, %v2720_v62  ;;  %4794 = vpow2.f32 %v4633_v21 }
 0x4c3   :  { %vm2614_vm3 = vweird.f32 %v9129_v12 }
 0x4c4   :  { %4796 = vpow2.f32 %v4635_v23 }
 0x4c5   :  { %4798 = vrcp.f32 %v9129_v12 }
 0x4c7   :  { %v4793_v15 = vpop.eup %4792 }
 0x4c8   :  { %v9131_v45 = vadd.f32 1.0, %v4793_v15  ;;  %v4795_v24 = vpop.eup %4794  ;;  %v2511_v15 = vld [vmem:[#allocation2 + $0x78] sm:$0x3] }
 0x4c9   :  { %v9135_v40 = vadd.f32 1.0, %v4795_v24 }
 0x4ca   :  { %v4797_v8 = vpop.eup %4796  ;;  %4800 = vrcp.f32 %v9131_v45  ;;  %v2776_v44 = vpop.f32.mrf.mxu0  ;;  %vm2734_vm4 = vweird.f32 %v9131_v45 }
 0x4cb   :  { %v9137_v34 = vadd.f32 1.0, %v4797_v8  ;;  %v9139_v51 = vpop.eup %4798  ;;  %4802 = vrcp.f32 %v9135_v40  ;;  %vm2629_vm8 = vweird.f32 %v9135_v40 }
 0x4cc   :  { %v2610_v41 = vmul.f32 %v9139_v51, %v9129_v12  ;;  %vm2615_vm1 = vweird.f32 %v9139_v51 }
 0x4cd   :  { %4804 = vrcp.f32 %v9137_v34  ;;  %vm9172_vm5 = vmor %vm2614_vm3, %vm2615_vm1  ;;  %vm2749_vm12 = vweird.f32 %v9137_v34 }
 0x4ce   :  { %v2611_v23 = vsub.f32 1.0, %v2610_v41 }
 0x4d0   :  { %v9142_v21 = vpop.eup %4800  ;;  %v2816_v56 = vpop.f32.mrf.mxu2  ;;  %v2612_v13 = vmul.f32 %v9139_v51, %v2611_v23 }
 0x4d1   :  { %v2796_v62 = vpop.f32.mrf.mxu1  ;;  %v2730_v54 = vmul.f32 %v9142_v21, %v9131_v45  ;;  %v9149_v3 = vpop.eup %4802  ;;  %vm2735_vm2 = vweird.f32 %v9142_v21 }
 0x4d2   :  { %v2797_v57 = vadd.f32 %v2796_v62, %v2776_v44  ;;  %v2625_v8 = vmul.f32 %v9149_v3, %v9135_v40  ;;  %vm9180_vm6 = vmor %vm2734_vm4, %vm2735_vm2  ;;  %vm2630_vm10 = vweird.f32 %v9149_v3 }
 0x4d3   :  { %v9151_v58 = vpop.eup %4804  ;;  %v2731_v17 = vsub.f32 1.0, %v2730_v54  ;;  %vm9206_vm13 = vmor %vm2629_vm8, %vm2630_vm10 }
 0x4d4   :  { %v2745_v6 = vmul.f32 %v9151_v58, %v9137_v34  ;;  %v2839_v36 = vadd.f32 %v2797_v57, %v2509_v33  ;;  %v2626_v54 = vsub.f32 1.0, %v2625_v8  ;;  %v2613_v57 = vadd.f32 %v9139_v51, %v2612_v13 }
 0x4d5   :  { %v2732_v10 = vmul.f32 %v9142_v21, %v2731_v17  ;;  %vm2750_vm11 = vweird.f32 %v9151_v58 }
 0x4d6   :  { %v2627_v13 = vmul.f32 %v9149_v3, %v2626_v54  ;;  %vm2751_vm14 = vmor %vm2749_vm12, %vm2750_vm11 }
 0x4d7   :  { %v2836_v14 = vpop.f32.mrf.mxu3 }
 0x4d8   :  { %v2837_v62 = vadd.f32 %v2836_v14, %v2816_v56  ;;  %v2738_v56 = vand.u32 2147483647, %v9131_v45 }
 0x4da   :  { %vm2739_vm9 = vcmp.eq.f32.partialorder %v2738_v56, 8.507059e+37 }
 0x4ec   :  { %v2872_v9 = vpop.f32.mrf.mxu0 }
 0x4f2   :  { %v2892_v48 = vpop.f32.mrf.mxu1  ;;  %v2912_v7 = vpop.f32.mrf.mxu2 }
 0x4f3   :  { %v2893_v25 = vadd.f32 %v2892_v48, %v2872_v9  ;;  %v2746_v9 = vsub.f32 1.0, %v2745_v6  ;;  %v2618_v48 = vand.u32 2147483647, %v9129_v12  ;;  %v2740_v6 = vand.u32 2147483648, %v9131_v45 }
 0x4f5   :  { %v2935_v24 = vadd.f32 %v2893_v25, %v2511_v15  ;;  %v2512_v25 = vld [vmem:[#allocation2 + $0x28] sm:$0x3]  ;;  %v2620_v15 = vand.u32 2147483648, %v9129_v12  ;;  %v2845_v12 = vrot.slane %v8650_v37, 6  ;;  %vm9184_vm7 = vcmp.eq.f32.partialorder %v2618_v48, 8.507059e+37 }
 0x4f6   :  { %v2741_v54 = vor.u32 1.1754944e-38, %v2740_v6 }
 0x4f7   :  { %v4636_v22 = vmul.f32 -1.442695, %v2935_v24  ;;  %v2621_v8 = vor.u32 1.1754944e-38, %v2620_v15  ;;  %v2635_v15 = vand.u32 2147483648, %v9135_v40 }
 0x4f8   :  { %v2932_v44 = vpop.f32.mrf.mxu3 }
 0x4f9   :  { %4806 = vpow2.f32 %v4636_v22  ;;  %v2933_v41 = vadd.f32 %v2932_v44, %v2912_v7  ;;  %v2733_v22 = vadd.f32 %v9142_v21, %v2732_v10  ;;  %v2510_v7 = vld [vmem:[#allocation2 + $0x70] sm:$0x3]  ;;  %v2617_v44 = vsel %vm9172_vm5, %v9139_v51, %v2613_v57 }
 0x4fa   :  { %4808 = vtanh.f32 %v2839_v36  ;;  %v2840_v14 = vadd.f32 %v2837_v62, %v2510_v7  ;;  %v2747_v36 = vmul.f32 %v9151_v58, %v2746_v9  ;;  %v2628_v9 = vadd.f32 %v9149_v3, %v2627_v13 }
 0x4fb   :  { %v2936_v33 = vadd.f32 %v2933_v41, %v2512_v25  ;;  %v2737_v37 = vsel %vm9180_vm6, %v9142_v21, %v2733_v22  ;;  %v2755_v51 = vand.u32 2147483648, %v9137_v34  ;;  %v2622_v21 = vsel %vm9184_vm7, %v2621_v8, %v2617_v44 }
 0x4fc   :  { %v2748_v48 = vadd.f32 %v9151_v58, %v2747_v36  ;;  %v2742_v25 = vsel %vm2739_vm9, %v2741_v54, %v2737_v37  ;;  %v2633_v22 = vand.u32 2147483647, %v9135_v40  ;;  %v2753_v7 = vand.u32 2147483647, %v9137_v34 }
 0x4fd   :  { %v4637_v23 = vmul.f32 -1.442695, %v2936_v33  ;;  %v2849_v56 = vmul.f32 %v2845_v12, %v2742_v25  ;;  %v2756_v13 = vor.u32 1.1754944e-38, %v2755_v51  ;;  %v2846_v12 = vrot.slane %v8654_v43, 6 }
 0x4fe   :  { %vm2634_vm15 = vcmp.eq.f32.partialorder %v2633_v22, 8.507059e+37  ;;  %vm2754_vm0 = vcmp.eq.f32.partialorder %v2753_v7, 8.507059e+37 }
 0x4ff   :  { %v4807_v10 = vpop.eup %4806  ;;  %4810 = vpow2.f32 %v4637_v23  ;;  %v2752_v23 = vsel %vm2751_vm14, %v9151_v58, %v2748_v48 }
 0x500   :  { %v2943_v62 = vadd.f32 1.0, %v4807_v10  ;;  %v4809_v41 = vpop.eup %4808  ;;  %4812 = vtanh.f32 %v2840_v14  ;;  %v2632_v14 = vsel %vm9206_vm13, %v9149_v3, %v2628_v9  ;;  %v2636_v10 = vor.u32 1.1754944e-38, %v2635_v15 }
 0x501   :  { %v2851_v33 = vmul.f32 %v4809_v41, %v2622_v21  ;;  %v2757_v34 = vsel %vm2754_vm0, %v2756_v13, %v2752_v23  ;;  %v9227_v23 = vld [vmem:[#allocation3 + $0x3e0] sm:$0xff] }
 0x502   :  { %4814 = vrcp.f32 %v2943_v62  ;;  %v2637_v40 = vsel %vm2634_vm15, %v2636_v10, %v2632_v14  ;;  %v2850_v3 = vmul.f32 %v2846_v12, %v2757_v34  ;;  %v2956_v58 = vand.u32 2147483648, %v2943_v62  ;;  %v9244_v12 = vld [vmem:[#allocation3 + $0x368] sm:$0xff] }
 0x503   :  { %v9216_v45 = vadd.f32 %v2851_v33, %v2849_v56  ;;  %v2954_v54 = vand.u32 2147483647, %v2943_v62  ;;  %vm2950_vm2 = vweird.f32 %v2943_v62 }
 0x504   :  { %v2957_v25 = vor.u32 1.1754944e-38, %v2956_v58  ;;  %v9258_v58 = vld [vmem:[#allocation3 + $0x7e8] sm:$0xff] }
 0x505   :  { %v4811_v6 = vpop.eup %4810  ;;  %vm2955_vm4 = vcmp.eq.f32.partialorder %v2954_v54, 8.507059e+37  ;;  %v9266_v54 = vld [vmem:[#allocation3 + $0x7a0] sm:$0xff] }
 0x506   :  { %v2944_v36 = vadd.f32 1.0, %v4811_v6  ;;  %v4813_v17 = vpop.eup %4812 }
 0x507   :  { %v2852_v44 = vmul.f32 %v4813_v17, %v2637_v40  ;;  %v9230_v17 = vld [vmem:[#allocation3 + $0x3e8] sm:$0xff]  ;;  %v9233_v40 = vld [vmem:[#allocation3 + $0x3a0] sm:$0xff] }
 0x508   :  { %v4815_v24 = vpop.eup %4814  ;;  %4816 = vrcp.f32 %v2944_v36  ;;  %v2971_v22 = vand.u32 2147483648, %v2944_v36  ;;  %v2969_v56 = vand.u32 2147483647, %v2944_v36  ;;  %vm2965_vm6 = vweird.f32 %v2944_v36 }
 0x509   :  { %v2946_v8 = vmul.f32 %v4815_v24, %v2943_v62  ;;  %4818 = vtanh.f32 %v9216_v45  ;;  %vm2951_vm1 = vweird.f32 %v4815_v24  ;;  %v9220_v48 = vadd.f32 %v2852_v44, %v2850_v3  ;;  %v9249_v44 = vld [vmem:[#allocation3 + $0x320] sm:$0xff]  ;;  %v9255_v3 = vld [vmem:[#allocation3 + $0x328] sm:$0xff] }
 0x50a   :  { %vm2952_vm3 = vmor %vm2950_vm2, %vm2951_vm1  ;;  %v2972_v62 = vor.u32 1.1754944e-38, %v2971_v22  ;;  %vm2970_vm8 = vcmp.eq.f32.partialorder %v2969_v56, 8.507059e+37  ;;  %v9293_v22 = vld [vmem:[#allocation3 + $0x268] sm:$0xff]  ;;  %v9301_v56 = vld [vmem:[#allocation3 + $0x220] sm:$0xff] }
 0x50b   :  { %v2947_v37 = vsub.f32 1.0, %v2946_v8  ;;  %4820 = vtanh.f32 %v9220_v48  ;;  %v9241_v8 = vld [vmem:[#allocation3 + $0x360] sm:$0xff]  ;;  %12006 = vst [vmem:[#allocation74_spill] sm:$0xff] %v9301_v56 }
 0x50d   :  { %v2948_v41 = vmul.f32 %v4815_v24, %v2947_v37  ;;  %v9252_v37 = vld [vmem:[#allocation3 + $0x7e0] sm:$0xff] }
 0x50e   :  { %v4817_v9 = vpop.eup %4816 }
 0x50f   :  { %v2949_v51 = vadd.f32 %v4815_v24, %v2948_v41  ;;  %v2961_v21 = vmul.f32 %v4817_v9, %v2944_v36  ;;  %v4819_v33 = vpop.eup %4818  ;;  %vm2966_vm5 = vweird.f32 %v4817_v9  ;;  %v9236_v36 = vld [vmem:[#allocation3 + $0x3a8] sm:$0xff]  ;;  %v9263_v41 = vld [vmem:[#allocation3 + $0x2e0] sm:$0xff] }
 0x510   :  { %vm2967_vm7 = vmor %vm2965_vm6, %vm2966_vm5 }
 0x511   :  { %v2953_v15 = vsel %vm2952_vm3, %v4815_v24, %v2949_v51  ;;  %v2962_v43 = vsub.f32 1.0, %v2961_v21  ;;  %v4821_v10 = vpop.eup %4820  ;;  %v9272_v51 = vld [vmem:[#allocation3 + $0x7a8] sm:$0xff]  ;;  %v9275_v21 = vld [vmem:[#allocation3 + $0x2a0] sm:$0xff] }
 0x512   :  { %v2958_v57 = vsel %vm2955_vm4, %v2957_v25, %v2953_v15  ;;  %v9278_v25 = vld [vmem:[#allocation3 + $0x760] sm:$0xff]  ;;  %v9281_v15 = vld [vmem:[#allocation3 + $0x2a8] sm:$0xff] }
 0x513   :  { %v9223_v7 = vmul.f32 %v4819_v33, %v2958_v57  ;;  %v2963_v6 = vmul.f32 %v4817_v9, %v2962_v43  ;;  %v9284_v43 = vld [vmem:[#allocation3 + $0x768] sm:$0xff]  ;;  %v9287_v33 = vld [vmem:[#allocation3 + $0x260] sm:$0xff] }
 0x514   :  { %v9290_v57 = vld [vmem:[#allocation3 + $0x720] sm:$0xff] }
 0x515   :  { %v2964_v14 = vadd.f32 %v4817_v9, %v2963_v6  ;;  %3003 = vmatmul.f32.vlgmr.msrb.gmra.mxu0 %v9223_v7  ;;  %3043 = vmatmul.f32.vlgmr.msrb.gmra.mxu2 %v9223_v7  ;;  %v9296_v6 = vld [vmem:[#allocation3 + $0x728] sm:$0xff] }
 0x516   :  { %3239 = vmatpush.msrb.mxu0 %v9227_v23  ;;  %3279 = vmatpush.msrb.mxu2 %v9230_v17 }
 0x517   :  { %v2968_v13 = vsel %vm2967_vm7, %v4817_v9, %v2964_v14  ;;  %v9269_v9 = vld [vmem:[#allocation3 + $0x2e8] sm:$0xff]  ;;  %v9304_v14 = vld [vmem:[#allocation3 + $0x6e0] sm:$0xff] }
 0x518   :  { %v2973_v24 = vsel %vm2970_vm8, %v2972_v62, %v2968_v13  ;;  %3240 = vmatpush.msrb.mxu0 %v9233_v40  ;;  %3280 = vmatpush.msrb.mxu2 %v9236_v36  ;;  %12007 = vst [vmem:[#allocation80_spill] sm:$0xff] %v9304_v14  ;;  %v9307_v62 = vld [vmem:[#allocation3 + $0x228] sm:$0xff] }
 0x519   :  { %v9239_v34 = vmul.f32 %v4821_v10, %v2973_v24  ;;  %12008 = vst [vmem:[#allocation84_spill] sm:$0xff] %v9307_v62  ;;  %v9310_v13 = vld [vmem:[#allocation3 + $0x6e8] sm:$0xff]  ;;  %v9313_v10 = vld [vmem:[#allocation3 + $0x1e0] sm:$0xff] }
 0x51a   :  { %3241 = vmatpush.msrb.mxu0 %v9241_v8  ;;  %3281 = vmatpush.msrb.mxu2 %v9244_v12  ;;  %12009 = vst [vmem:[#allocation86_spill] sm:$0xff] %v9310_v13  ;;  %v9316_v24 = vld [vmem:[#allocation3 + $0x6a0] sm:$0xff] }
 0x51b   :  { %3023 = vmatmul.f32.vlgmr.msrb.gmra.mxu1 %v9239_v34  ;;  %3063 = vmatmul.f32.vlgmr.msrb.gmra.mxu3 %v9239_v34  ;;  %12010 = vst [vmem:[#allocation87_spill] sm:$0xff] %v9313_v10 }
 0x51c   :  { %3242 = vmatpush.msrb.mxu0 %v9249_v44  ;;  %3259 = vmatpush.msrb.mxu1 %v9252_v37  ;;  %12011 = vst [vmem:[#allocation89_spill] sm:$0xff] %v9316_v24 }
 0x51d   :  { %3282 = vmatpush.msrb.mxu2 %v9255_v3  ;;  %3299 = vmatpush.msrb.mxu3 %v9258_v58 }
 0x51e   :  { %3129 = vmatmul.f32.vlgmr.msra.gmra.mxu0 %v9223_v7  ;;  %3169 = vmatmul.f32.vlgmr.msra.gmra.mxu2 %v9223_v7 }
 0x51f   :  { %3243 = vmatpush.msrb.mxu0 %v9263_v41  ;;  %3260 = vmatpush.msrb.mxu1 %v9266_v54 }
 0x520   :  { %3283 = vmatpush.msrb.mxu2 %v9269_v9  ;;  %3300 = vmatpush.msrb.mxu3 %v9272_v51 }
 0x521   :  { %3244 = vmatpush.msrb.mxu0 %v9275_v21  ;;  %3261 = vmatpush.msrb.mxu1 %v9278_v25 }
 0x522   :  { %3284 = vmatpush.msrb.mxu2 %v9281_v15  ;;  %3301 = vmatpush.msrb.mxu3 %v9284_v43 }
 0x523   :  { %3245 = vmatpush.msrb.mxu0 %v9287_v33  ;;  %3262 = vmatpush.msrb.mxu1 %v9290_v57 }
 0x524   :  { %3285 = vmatpush.msrb.mxu2 %v9293_v22  ;;  %3302 = vmatpush.msrb.mxu3 %v9296_v6 }
 0x525   :  { %3149 = vmatmul.f32.vlgmr.msra.gmra.mxu1 %v9239_v34  ;;  %3189 = vmatmul.f32.vlgmr.msra.gmra.mxu3 %v9239_v34 }
 0x526   :  { %3246 = vmatpush.msrb.mxu0 %v9301_v56  ;;  %3263 = vmatpush.msrb.mxu1 %v9304_v14  ;;  %v9319_v56 = vld [vmem:[#allocation3 + $0x1e8] sm:$0xff] }
 0x527   :  { %3286 = vmatpush.msrb.mxu2 %v9307_v62  ;;  %3303 = vmatpush.msrb.mxu3 %v9310_v13  ;;  %12012 = vst [vmem:[#allocation134_spill] sm:$0xff] %v9319_v56  ;;  %v9322_v14 = vld [vmem:[#allocation3 + $0x6a8] sm:$0xff]  ;;  %v9325_v62 = vld [vmem:[#allocation3 + $0x1a0] sm:$0xff] }
 0x528   :  { %3247 = vmatpush.msrb.mxu0 %v9313_v10  ;;  %3264 = vmatpush.msrb.mxu1 %v9316_v24  ;;  %12013 = vst [vmem:[#allocation135_spill] sm:$0xff] %v9322_v14  ;;  %v9328_v13 = vld [vmem:[#allocation3 + $0x660] sm:$0xff]  ;;  %v9331_v10 = vld [vmem:[#allocation3 + $0x1a8] sm:$0xff] }
 0x529   :  { %3287 = vmatpush.msrb.mxu2 %v9319_v56  ;;  %3304 = vmatpush.msrb.mxu3 %v9322_v14  ;;  %12014 = vst [vmem:[#allocation136_spill] sm:$0xff] %v9325_v62  ;;  %v9334_v24 = vld [vmem:[#allocation3 + $0x668] sm:$0xff]  ;;  %v9337_v56 = vld [vmem:[#allocation3 + $0x160] sm:$0xff] }
 0x52a   :  { %3248 = vmatpush.msrb.mxu0 %v9325_v62  ;;  %12015 = vst [vmem:[#allocation137_spill] sm:$0xff] %v9328_v13  ;;  %3265 = vmatpush.msrb.mxu1 %v9328_v13  ;;  %v9340_v14 = vld [vmem:[#allocation3 + $0x620] sm:$0xff]  ;;  %v9343_v62 = vld [vmem:[#allocation3 + $0x168] sm:$0xff] }
 0x52b   :  { %12016 = vst [vmem:[#allocation138_spill] sm:$0xff] %v9331_v10  ;;  %3288 = vmatpush.msrb.mxu2 %v9331_v10  ;;  %3305 = vmatpush.msrb.mxu3 %v9334_v24  ;;  %v9346_v13 = vld [vmem:[#allocation3 + $0x628] sm:$0xff]  ;;  %v9349_v10 = vld [vmem:[#allocation3 + $0x120] sm:$0xff] }
 0x52c   :  { %12017 = vst [vmem:[#allocation139_spill] sm:$0xff] %v9334_v24  ;;  %3249 = vmatpush.msrb.mxu0 %v9337_v56  ;;  %3266 = vmatpush.msrb.mxu1 %v9340_v14  ;;  %v9352_v24 = vld [vmem:[#allocation3 + $0x5e0] sm:$0xff] }
 0x52d   :  { %12018 = vst [vmem:[#allocation140_spill] sm:$0xff] %v9337_v56  ;;  %3289 = vmatpush.msrb.mxu2 %v9343_v62  ;;  %3306 = vmatpush.msrb.mxu3 %v9346_v13  ;;  %v9355_v56 = vld [vmem:[#allocation3 + $0x128] sm:$0xff] }
 0x52e   :  { %12019 = vst [vmem:[#allocation141_spill] sm:$0xff] %v9340_v14  ;;  %3250 = vmatpush.msrb.mxu0 %v9349_v10  ;;  %3267 = vmatpush.msrb.mxu1 %v9352_v24  ;;  %v9358_v14 = vld [vmem:[#allocation3 + $0x5e8] sm:$0xff] }
 0x52f   :  { %12020 = vst [vmem:[#allocation142_spill] sm:$0xff] %v9343_v62  ;;  %3290 = vmatpush.msrb.mxu2 %v9355_v56  ;;  %3307 = vmatpush.msrb.mxu3 %v9358_v14  ;;  %v9361_v62 = vld [vmem:[#allocation3 + $0xe0] sm:$0xff] }
 0x530   :  { %12021 = vst [vmem:[#allocation143_spill] sm:$0xff] %v9346_v13  ;;  %3251 = vmatpush.msrb.mxu0 %v9361_v62  ;;  %v9364_v13 = vld [vmem:[#allocation3 + $0x5a0] sm:$0xff] }
 0x531   :  { %12022 = vst [vmem:[#allocation144_spill] sm:$0xff] %v9349_v10  ;;  %3268 = vmatpush.msrb.mxu1 %v9364_v13  ;;  %v9367_v10 = vld [vmem:[#allocation3 + $0xe8] sm:$0xff] }
 0x532   :  { %12023 = vst [vmem:[#allocation145_spill] sm:$0xff] %v9352_v24  ;;  %3291 = vmatpush.msrb.mxu2 %v9367_v10  ;;  %v9370_v24 = vld [vmem:[#allocation3 + $0x5a8] sm:$0xff] }
 0x533   :  { %12024 = vst [vmem:[#allocation146_spill] sm:$0xff] %v9355_v56  ;;  %3308 = vmatpush.msrb.mxu3 %v9370_v24  ;;  %v9373_v56 = vld [vmem:[#allocation3 + $0xa0] sm:$0xff] }
 0x534   :  { %12025 = vst [vmem:[#allocation147_spill] sm:$0xff] %v9358_v14  ;;  %3252 = vmatpush.msrb.mxu0 %v9373_v56  ;;  %v9376_v14 = vld [vmem:[#allocation3 + $0x560] sm:$0xff] }
 0x535   :  { %12026 = vst [vmem:[#allocation10_spill] sm:$0xff] %v9361_v62  ;;  %3269 = vmatpush.msrb.mxu1 %v9376_v14  ;;  %v9379_v62 = vld [vmem:[#allocation3 + $0xa8] sm:$0xff] }
 0x536   :  { %12027 = vst [vmem:[#allocation9_spill] sm:$0xff] %v9364_v13  ;;  %3292 = vmatpush.msrb.mxu2 %v9379_v62  ;;  %v9382_v13 = vld [vmem:[#allocation3 + $0x568] sm:$0xff] }
 0x537   :  { %12028 = vst [vmem:[#allocation17_spill] sm:$0xff] %v9367_v10  ;;  %3309 = vmatpush.msrb.mxu3 %v9382_v13  ;;  %v9385_v10 = vld [vmem:[#allocation3 + $0x60] sm:$0xff] }
 0x538   :  { %12029 = vst [vmem:[#allocation12_spill] sm:$0xff] %v9370_v24  ;;  %3253 = vmatpush.msrb.mxu0 %v9385_v10  ;;  %v9388_v24 = vld [vmem:[#allocation3 + $0x520] sm:$0xff] }
 0x539   :  { %12030 = vst [vmem:[#allocation11_spill] sm:$0xff] %v9373_v56  ;;  %3270 = vmatpush.msrb.mxu1 %v9388_v24  ;;  %v9391_v56 = vld [vmem:[#allocation3 + $0x68] sm:$0xff] }
 0x53a   :  { %12031 = vst [vmem:[#allocation18_spill] sm:$0xff] %v9376_v14  ;;  %3293 = vmatpush.msrb.mxu2 %v9391_v56  ;;  %v9394_v14 = vld [vmem:[#allocation3 + $0x528] sm:$0xff] }
 0x53b   :  { %12032 = vst [vmem:[#allocation14_spill] sm:$0xff] %v9379_v62  ;;  %3310 = vmatpush.msrb.mxu3 %v9394_v14  ;;  %v9397_v62 = vld [vmem:[#allocation3 + $0x20] sm:$0xff] }
 0x53c   :  { %12033 = vst [vmem:[#allocation101_spill] sm:$0xff] %v9382_v13  ;;  %3254 = vmatpush.msrb.mxu0 %v9397_v62  ;;  %v9400_v13 = vld [vmem:[#allocation3 + $0x4e0] sm:$0xff] }
 0x53d   :  { %12034 = vst [vmem:[#allocation13_spill] sm:$0xff] %v9385_v10  ;;  %3271 = vmatpush.msrb.mxu1 %v9400_v13  ;;  %v9403_v10 = vld [vmem:[#allocation3 + $0x28] sm:$0xff]  ;;  %3255 = vmatmul.f32.vlgmr.msrb.gmra.mxu0 %v9223_v7 }
 0x53e   :  { %12035 = vst [vmem:[#allocation102_spill] sm:$0xff] %v9388_v24  ;;  %3294 = vmatpush.msrb.mxu2 %v9403_v10  ;;  %v9406_v24 = vld [vmem:[#allocation3 + $0x4e8] sm:$0xff] }
 0x53f   :  { %12036 = vst [vmem:[#allocation15_spill] sm:$0xff] %v9394_v14  ;;  %3311 = vmatpush.msrb.mxu3 %v9406_v24  ;;  %3295 = vmatmul.f32.vlgmr.msrb.gmra.mxu2 %v9223_v7  ;;  %v9411_v14 = vld [vmem:[#allocation3 + $0x3f0] sm:$0xff] }
 0x540   :  { %12037 = vst [vmem:[#allocation104_spill] sm:$0xff] %v9397_v62  ;;  %3341 = vmatpush.msra.mxu0 %v9411_v14  ;;  %3381 = vmatpush.msra.mxu2 %v8730_v35  ;;  %v9415_v62 = vld [vmem:[#allocation3 + $0x4a0] sm:$0xff]  ;;  %v9431_v35 = vld [vmem:[#allocation3 + $0x370] sm:$0xff] }
 0x541   :  { %12038 = vst [vmem:[#allocation91_spill] sm:$0xff] %v9400_v13  ;;  %3272 = vmatpush.msrb.mxu1 %v9415_v62  ;;  %v9418_v13 = vld [vmem:[#allocation3 + $0x4a8] sm:$0xff] }
 0x542   :  { %12039 = vst [vmem:[#allocation105_spill] sm:$0xff] %v9403_v10  ;;  %3312 = vmatpush.msrb.mxu3 %v9418_v13  ;;  %v9421_v10 = vld [vmem:[#allocation3 + $0x3b0] sm:$0xff]  ;;  %3382 = vmatpush.msra.mxu2 %v8736_v26 }
 0x543   :  { %12040 = vst [vmem:[#allocation92_spill] sm:$0xff] %v9406_v24  ;;  %3342 = vmatpush.msra.mxu0 %v9421_v10  ;;  %v9425_v24 = vld [vmem:[#allocation3 + $0x460] sm:$0xff]  ;;  %v9443_v26 = vld [vmem:[#allocation3 + $0x330] sm:$0xff] }
 0x544   :  { %12041 = vst [vmem:[#allocation19_spill] sm:$0xff] %v9411_v14  ;;  %3273 = vmatpush.msrb.mxu1 %v9425_v24  ;;  %v9428_v14 = vld [vmem:[#allocation3 + $0x468] sm:$0xff]  ;;  %3383 = vmatpush.msra.mxu2 %v8742_v60  ;;  %v9450_v60 = vld [vmem:[#allocation3 + $0x7f8] sm:$0xff] }
 0x545   :  { %12042 = vst [vmem:[#allocation93_spill] sm:$0xff] %v9418_v13  ;;  %3313 = vmatpush.msrb.mxu3 %v9428_v14  ;;  %3343 = vmatpush.msra.mxu0 %v9431_v35  ;;  %v9435_v13 = vld [vmem:[#allocation3 + $0x420] sm:$0xff] }
 0x546   :  { %12043 = vst [vmem:[#allocation107_spill] sm:$0xff] %v9421_v10  ;;  %3274 = vmatpush.msrb.mxu1 %v9435_v13  ;;  %v9438_v10 = vld [vmem:[#allocation3 + $0x428] sm:$0xff]  ;;  %3384 = vmatpush.msra.mxu2 %v8751_v38  ;;  %v9466_v38 = vld [vmem:[#allocation3 + $0x770] sm:$0xff] }
 0x547   :  { %12044 = vst [vmem:[#allocation94_spill] sm:$0xff] %v9428_v14  ;;  %3314 = vmatpush.msrb.mxu3 %v9438_v10  ;;  %3275 = vmatmul.f32.vlgmr.msrb.gmra.mxu1 %v9239_v34  ;;  %v9446_v14 = vld [vmem:[#allocation3 + $0x7f0] sm:$0xff] }
 0x548   :  { %12045 = vst [vmem:[#allocation20_spill] sm:$0xff] %v9435_v13  ;;  %3315 = vmatmul.f32.vlgmr.msrb.gmra.mxu3 %v9239_v34  ;;  %3344 = vmatpush.msra.mxu0 %v9443_v26  ;;  %v9453_v13 = vld [vmem:[#allocation3 + $0x2f0] sm:$0xff] }
 0x549   :  { %12046 = vst [vmem:[#allocation95_spill] sm:$0xff] %v9438_v10  ;;  %3361 = vmatpush.msra.mxu1 %v9446_v14  ;;  %3401 = vmatpush.msra.mxu3 %v9450_v60  ;;  %v9456_v10 = vld [vmem:[#allocation3 + $0x7b0] sm:$0xff] }
 0x54a   :  { %12047 = vst [vmem:[#allocation109_spill] sm:$0xff] %v9443_v26  ;;  %3345 = vmatpush.msra.mxu0 %v9453_v13  ;;  %3385 = vmatpush.msra.mxu2 %v8757_v11  ;;  %v9460_v26 = vld [vmem:[#allocation3 + $0x7b8] sm:$0xff]  ;;  %v9476_v11 = vld [vmem:[#allocation3 + $0x730] sm:$0xff] }
 0x54b   :  { %12048 = vst [vmem:[#allocation96_spill] sm:$0xff] %v9446_v14  ;;  %3362 = vmatpush.msra.mxu1 %v9456_v10  ;;  %3402 = vmatpush.msra.mxu3 %v9460_v26  ;;  %v9463_v14 = vld [vmem:[#allocation3 + $0x2b0] sm:$0xff] }
 0x54c   :  { %12049 = vst [vmem:[#allocation22_spill] sm:$0xff] %v9453_v13  ;;  %3346 = vmatpush.msra.mxu0 %v9463_v14  ;;  %3386 = vmatpush.msra.mxu2 %v8763_v5  ;;  %v9470_v13 = vld [vmem:[#allocation3 + $0x778] sm:$0xff]  ;;  %v9486_v5 = vld [vmem:[#allocation3 + $0x6f0] sm:$0xff] }
 0x54d   :  { %12050 = vst [vmem:[#allocation97_spill] sm:$0xff] %v9456_v10  ;;  %3363 = vmatpush.msra.mxu1 %v9466_v38  ;;  %3403 = vmatpush.msra.mxu3 %v9470_v13  ;;  %v9473_v10 = vld [vmem:[#allocation3 + $0x270] sm:$0xff] }
 0x54e   :  { %12051 = vst [vmem:[#allocation111_spill] sm:$0xff] %v9463_v14  ;;  %3347 = vmatpush.msra.mxu0 %v9473_v10  ;;  %3387 = vmatpush.msra.mxu2 %v8769_v31  ;;  %v9480_v14 = vld [vmem:[#allocation3 + $0x738] sm:$0xff]  ;;  %v9496_v31 = vld [vmem:[#allocation3 + $0x6b0] sm:$0xff] }
 0x54f   :  { %12052 = vst [vmem:[#allocation98_spill] sm:$0xff] %v9466_v38  ;;  %3364 = vmatpush.msra.mxu1 %v9476_v11  ;;  %3404 = vmatpush.msra.mxu3 %v9480_v14  ;;  %v9483_v38 = vld [vmem:[#allocation3 + $0x230] sm:$0xff] }
 0x550   :  { %12053 = vst [vmem:[#allocation23_spill] sm:$0xff] %v9473_v10  ;;  %3348 = vmatpush.msra.mxu0 %v9483_v38  ;;  %3388 = vmatpush.msra.mxu2 %v8775_v1  ;;  %v9490_v10 = vld [vmem:[#allocation3 + $0x6f8] sm:$0xff]  ;;  %v9506_v1 = vld [vmem:[#allocation3 + $0x670] sm:$0xff] }
 0x551   :  { %12054 = vst [vmem:[#allocation113_spill] sm:$0xff] %v9476_v11  ;;  %3365 = vmatpush.msra.mxu1 %v9486_v5  ;;  %3405 = vmatpush.msra.mxu3 %v9490_v10  ;;  %v9493_v11 = vld [vmem:[#allocation3 + $0x1f0] sm:$0xff] }
 0x552   :  { %12055 = vst [vmem:[#allocation16_spill] sm:$0xff] %v9483_v38  ;;  %3349 = vmatpush.msra.mxu0 %v9493_v11  ;;  %3389 = vmatpush.msra.mxu2 %v8781_v59  ;;  %v9500_v38 = vld [vmem:[#allocation3 + $0x6b8] sm:$0xff]  ;;  %v9516_v59 = vld [vmem:[#allocation3 + $0x630] sm:$0xff] }
 0x553   :  { %12056 = vst [vmem:[#allocation24_spill] sm:$0xff] %v9486_v5  ;;  %3366 = vmatpush.msra.mxu1 %v9496_v31  ;;  %3406 = vmatpush.msra.mxu3 %v9500_v38  ;;  %v9503_v5 = vld [vmem:[#allocation3 + $0x1b0] sm:$0xff] }
 0x554   :  { %12057 = vst [vmem:[#allocation115_spill] sm:$0xff] %v9493_v11  ;;  %3350 = vmatpush.msra.mxu0 %v9503_v5  ;;  %3390 = vmatpush.msra.mxu2 %v8787_v53  ;;  %v9510_v11 = vld [vmem:[#allocation3 + $0x678] sm:$0xff]  ;;  %v9526_v53 = vld [vmem:[#allocation3 + $0x5f0] sm:$0xff] }
 0x555   :  { %12058 = vst [vmem:[#allocation99_spill] sm:$0xff] %v9496_v31  ;;  %3367 = vmatpush.msra.mxu1 %v9506_v1  ;;  %3407 = vmatpush.msra.mxu3 %v9510_v11  ;;  %v9513_v31 = vld [vmem:[#allocation3 + $0x170] sm:$0xff] }
 0x556   :  { %12059 = vst [vmem:[#allocation26_spill] sm:$0xff] %v9503_v5  ;;  %3351 = vmatpush.msra.mxu0 %v9513_v31  ;;  %3391 = vmatpush.msra.mxu2 %v8793_v55  ;;  %v9520_v5 = vld [vmem:[#allocation3 + $0x638] sm:$0xff]  ;;  %v9536_v55 = vld [vmem:[#allocation3 + $0x5b0] sm:$0xff] }
 0x557   :  { %12060 = vst [vmem:[#allocation117_spill] sm:$0xff] %v9506_v1  ;;  %3368 = vmatpush.msra.mxu1 %v9516_v59  ;;  %3408 = vmatpush.msra.mxu3 %v9520_v5  ;;  %v9523_v1 = vld [vmem:[#allocation3 + $0x130] sm:$0xff] }
 0x558   :  { %12061 = vst [vmem:[#allocation100_spill] sm:$0xff] %v9510_v11  ;;  %3352 = vmatpush.msra.mxu0 %v9523_v1  ;;  %3392 = vmatpush.msra.mxu2 %v8799_v61  ;;  %v9544_v61 = vld [vmem:[#allocation3 + $0x570] sm:$0xff] }
 0x559   :  { %12062 = vst [vmem:[#allocation119_spill] sm:$0xff] %v9513_v31  ;;  %3369 = vmatpush.msra.mxu1 %v9526_v53  ;;  %v9530_v31 = vld [vmem:[#allocation3 + $0x5f8] sm:$0xff] }
 0x55a   :  { %12063 = vst [vmem:[#allocation29_spill] sm:$0xff] %v9516_v59  ;;  %3409 = vmatpush.msra.mxu3 %v9530_v31  ;;  %v9533_v59 = vld [vmem:[#allocation3 + $0xf0] sm:$0xff]  ;;  %3393 = vmatpush.msra.mxu2 %v8805_v42 }
 0x55b   :  { %12064 = vst [vmem:[#allocation103_spill] sm:$0xff] %v9520_v5  ;;  %3353 = vmatpush.msra.mxu0 %v9533_v59  ;;  %3370 = vmatpush.msra.mxu1 %v9536_v55  ;;  %v9558_v42 = vld [vmem:[#allocation3 + $0x4f0] sm:$0xff] }
 0x55c   :  { %12065 = vst [vmem:[#allocation121_spill] sm:$0xff] %v9523_v1  ;;  %3410 = vmatpush.msra.mxu3 %v8808_v20  ;;  %v9541_v1 = vld [vmem:[#allocation3 + $0xb0] sm:$0xff]  ;;  %3394 = vmatpush.msra.mxu2 %v8813_v27 }
 0x55d   :  { %12066 = vst [vmem:[#allocation32_spill] sm:$0xff] %v9526_v53  ;;  %3354 = vmatpush.msra.mxu0 %v9541_v1  ;;  %3371 = vmatpush.msra.mxu1 %v9544_v61  ;;  %v9565_v20 = vld [vmem:[#allocation3 + $0x4b0] sm:$0xff] }
 0x55e   :  { %12067 = vst [vmem:[#allocation106_spill] sm:$0xff] %v9530_v31  ;;  %3411 = vmatpush.msra.mxu3 %v8816_v19  ;;  %3395 = vmatpush.msra.mxu2 %v8821_v2  ;;  %v9571_v27 = vld [vmem:[#allocation3 + $0x470] sm:$0xff]  ;;  %v9585_v2 = vld [vmem:[#allocation3 + $0x7c0] sm:$0xff] }
 0x55f   :  { %12068 = vst [vmem:[#allocation123_spill] sm:$0xff] %v9533_v59  ;;  %v9549_v59 = vld [vmem:[#allocation3 + $0x70] sm:$0xff] }
 0x560   :  { %12069 = vst [vmem:[#allocation124_spill] sm:$0xff] %v9536_v55  ;;  %3355 = vmatpush.msra.mxu0 %v9549_v59  ;;  %v9552_v55 = vld [vmem:[#allocation3 + $0x530] sm:$0xff]  ;;  %3412 = vmatpush.msra.mxu3 %v8824_v32 }
 0x561   :  { %12070 = vst [vmem:[#allocation108_spill] sm:$0xff] %v9541_v1  ;;  %3372 = vmatpush.msra.mxu1 %v9552_v55  ;;  %3396 = vmatpush.msra.mxu2 %v8831_v50  ;;  %v9577_v19 = vld [vmem:[#allocation3 + $0x430] sm:$0xff]  ;;  %v12081_v50 = vld [vmem:[#allocation28_spill] sm:$0xff]  ;;  %v2983_v1 = vld [vmem:[#allocation2 + $0x60] sm:$0xc] }
 0x562   :  { %12071 = vst [vmem:[#allocation126_spill] sm:$0xff] %v9544_v61  ;;  %3356 = vmatpush.msra.mxu0 %v8827_v46  ;;  %3413 = vmatpush.msra.mxu3 %v8834_v52  ;;  %v12079_v32 = vld [vmem:[#allocation114_spill] sm:$0xff]  ;;  %v9591_v46 = vld [vmem:[#allocation3 + $0x780] sm:$0xff]  ;;  %v12082_v52 = vld [vmem:[#allocation131_spill] sm:$0xff] }
 0x563   :  { %12072 = vst [vmem:[#allocation127_spill] sm:$0xff] %v9549_v59  ;;  %3373 = vmatpush.msra.mxu1 %v9558_v42  ;;  %3357 = vmatmul.f32.vlgmr.msra.gmra.mxu0 %v9223_v7  ;;  %v2982_v61 = vld [vmem:[#allocation2 + $0x38] sm:$0xc] }
 0x564   :  { %12073 = vst [vmem:[#allocation110_spill] sm:$0xff] %v9552_v55  ;;  %3397 = vmatmul.f32.vlgmr.msra.gmra.mxu2 %v9223_v7  ;;  %3414 = vmatpush.msra.mxu3 %v8840_v39  ;;  %v12083_v39 = vld [vmem:[#allocation116_spill] sm:$0xff]  ;;  %v12094_v7 = vld [vmem:[#allocation125_spill] sm:$0xff] }
 0x565   :  { %12074 = vst [vmem:[#allocation21_spill] sm:$0xff] %v9558_v42  ;;  %3374 = vmatpush.msra.mxu1 %v9565_v20  ;;  %3485 = vmatpush.msrb.mxu0 %v8843_v30  ;;  %v9597_v30 = vld [vmem:[#allocation3 + $0x740] sm:$0xff] }
 0x566   :  { %12075 = vst [vmem:[#allocation128_spill] sm:$0xff] %v9565_v20  ;;  %3525 = vmatpush.msrb.mxu2 %v8846_v16  ;;  %3415 = vmatpush.msra.mxu3 %v8850_v29  ;;  %v12085_v16 = vld [vmem:[#allocation31_spill] sm:$0xff]  ;;  %v12086_v29 = vld [vmem:[#allocation132_spill] sm:$0xff]  ;;  %v2980_v42 = vld [vmem:[#allocation2 + $0x20] sm:$0xc] }
 0x567   :  { %12076 = vst [vmem:[#allocation112_spill] sm:$0xff] %v9571_v27  ;;  %3375 = vmatpush.msra.mxu1 %v9571_v27  ;;  %3486 = vmatpush.msrb.mxu0 %v8853_v28  ;;  %v12087_v28 = vld [vmem:[#allocation118_spill] sm:$0xff] }
 0x568   :  { %3526 = vmatpush.msrb.mxu2 %v8856_v63  ;;  %12077 = vst [vmem:[#allocation129_spill] sm:$0xff] %v9577_v19  ;;  %3416 = vmatpush.msra.mxu3 %v8860_v49  ;;  %v12088_v63 = vld [vmem:[#allocation34_spill] sm:$0xff]  ;;  %v12089_v49 = vld [vmem:[#allocation133_spill] sm:$0xff] }
 0x569   :  { %3376 = vmatpush.msra.mxu1 %v9577_v19  ;;  %3417 = vmatmul.f32.vlgmr.msra.gmra.mxu3 %v9239_v34  ;;  %12078 = vst [vmem:[#allocation130_spill] sm:$0xff] %v9585_v2 }
 0x56a   :  { %3377 = vmatmul.f32.vlgmr.msra.gmra.mxu1 %v9239_v34  ;;  %3487 = vmatpush.msrb.mxu0 %v8865_v47  ;;  %12080 = vst [vmem:[#allocation114_spill] sm:$0xff] %v9591_v46  ;;  %v12090_v47 = vld [vmem:[#allocation120_spill] sm:$0xff]  ;;  %v12095_v34 = vld [vmem:[#allocation25_spill] sm:$0xff] }
 0x56b   :  { %3527 = vmatpush.msrb.mxu2 %v8868_v0  ;;  %3505 = vmatpush.msrb.mxu1 %v9585_v2  ;;  %12084 = vst [vmem:[#allocation28_spill] sm:$0xff] %v9597_v30  ;;  %v12091_v0 = vld [vmem:[#allocation36_spill] sm:$0xff]  ;;  %v2981_v2 = vld [vmem:[#allocation2 + $0x10] sm:$0xc] }
 0x56c   :  { %3545 = vmatpush.msrb.mxu3 %v8872_v4  ;;  %3488 = vmatpush.msrb.mxu0 %v8875_v18  ;;  %v12092_v4 = vld [vmem:[#allocation122_spill] sm:$0xff]  ;;  %v12093_v18 = vld [vmem:[#allocation55_spill] sm:$0xff] }
 0x56d   :  { %3528 = vmatpush.msrb.mxu2 %v12079_v32  ;;  %3506 = vmatpush.msrb.mxu1 %v9591_v46  ;;  %v12096_v32 = vld [vmem:[#allocation39_spill] sm:$0xff] }
 0x56e   :  { %3546 = vmatpush.msrb.mxu3 %v12081_v50  ;;  %3489 = vmatpush.msrb.mxu0 %v12082_v52  ;;  %v12097_v50 = vld [vmem:[#allocation59_spill] sm:$0xff] }
 0x56f   :  { %3529 = vmatpush.msrb.mxu2 %v12083_v39  ;;  %3507 = vmatpush.msrb.mxu1 %v9597_v30  ;;  %v12098_v52 = vld [vmem:[#allocation27_spill] sm:$0xff]  ;;  %v12099_v39 = vld [vmem:[#allocation42_spill] sm:$0xff]  ;;  %v2979_v30 = vld [vmem:[#allocation2 + $0x40] sm:$0xc] }
 0x570   :  { %3547 = vmatpush.msrb.mxu3 %v12085_v16  ;;  %3490 = vmatpush.msrb.mxu0 %v12086_v29  ;;  %v12100_v16 = vld [vmem:[#allocation63_spill] sm:$0xff]  ;;  %v12101_v29 = vld [vmem:[#allocation30_spill] sm:$0xff] }
 0x571   :  { %3530 = vmatpush.msrb.mxu2 %v12087_v28  ;;  %3508 = vmatpush.msrb.mxu1 %v12088_v63  ;;  %v12102_v28 = vld [vmem:[#allocation44_spill] sm:$0xff]  ;;  %v12103_v63 = vld [vmem:[#allocation67_spill] sm:$0xff] }
 0x572   :  { %3548 = vmatpush.msrb.mxu3 %v12089_v49  ;;  %3491 = vmatpush.msrb.mxu0 %v12090_v47  ;;  %v12104_v49 = vld [vmem:[#allocation33_spill] sm:$0xff]  ;;  %v12105_v47 = vld [vmem:[#allocation46_spill] sm:$0xff] }
 0x573   :  { %3531 = vmatpush.msrb.mxu2 %v12091_v0  ;;  %3509 = vmatpush.msrb.mxu1 %v12092_v4  ;;  %v12106_v0 = vld [vmem:[#allocation71_spill] sm:$0xff]  ;;  %v12107_v4 = vld [vmem:[#allocation41_spill] sm:$0xff] }
 0x574   :  { %3549 = vmatpush.msrb.mxu3 %v12093_v18  ;;  %3492 = vmatpush.msrb.mxu0 %v12094_v7  ;;  %v12108_v18 = vld [vmem:[#allocation35_spill] sm:$0xff] }
 0x575   :  { %3532 = vmatpush.msrb.mxu2 %v12095_v34  ;;  %3510 = vmatpush.msrb.mxu1 %v12096_v32  ;;  %v12109_v7 = vld [vmem:[#allocation83_spill] sm:$0xff]  ;;  %v12110_v34 = vld [vmem:[#allocation49_spill] sm:$0xff]  ;;  %v12111_v32 = vld [vmem:[#allocation50_spill] sm:$0xff] }
 0x576   :  { %3550 = vmatpush.msrb.mxu3 %v12097_v50  ;;  %3493 = vmatpush.msrb.mxu0 %v12098_v52  ;;  %v12112_v50 = vld [vmem:[#allocation75_spill] sm:$0xff]  ;;  %v12113_v52 = vld [vmem:[#allocation64_spill] sm:$0xff] }
 0x577   :  { %3533 = vmatpush.msrb.mxu2 %v12099_v39  ;;  %3511 = vmatpush.msrb.mxu1 %v12100_v16  ;;  %v12114_v39 = vld [vmem:[#allocation38_spill] sm:$0xff]  ;;  %v12115_v16 = vld [vmem:[#allocation68_spill] sm:$0xff] }
 0x578   :  { %3551 = vmatpush.msrb.mxu3 %v12101_v29  ;;  %3494 = vmatpush.msrb.mxu0 %v12102_v28  ;;  %v12116_v29 = vld [vmem:[#allocation52_spill] sm:$0xff] }
 0x579   :  { %3534 = vmatpush.msrb.mxu2 %v12103_v63  ;;  %3512 = vmatpush.msrb.mxu1 %v12104_v49  ;;  %v12117_v28 = vld [vmem:[#allocation72_spill] sm:$0xff]  ;;  %v12118_v63 = vld [vmem:[#allocation79_spill] sm:$0xff] }
 0x57a   :  { %3552 = vmatpush.msrb.mxu3 %v12105_v47  ;;  %3495 = vmatpush.msrb.mxu0 %v12106_v0  ;;  %v12119_v49 = vld [vmem:[#allocation76_spill] sm:$0xff]  ;;  %v12120_v47 = vld [vmem:[#allocation47_spill] sm:$0xff] }
 0x57b   :  { %3535 = vmatpush.msrb.mxu2 %v12107_v4  ;;  %3513 = vmatpush.msrb.mxu1 %v12108_v18  ;;  %v12121_v0 = vld [vmem:[#allocation56_spill] sm:$0xff]  ;;  %v12122_v4 = vld [vmem:[#allocation77_spill] sm:$0xff] }
 0x57c   :  { %3553 = vmatpush.msrb.mxu3 %v12109_v7  ;;  %3496 = vmatpush.msrb.mxu0 %v12110_v34  ;;  %v9638_v18 = vld [vmem:[#allocation3 + $0x48] sm:$0xff]  ;;  %v12124_v7 = vld [vmem:[#allocation60_spill] sm:$0xff] }
 0x57d   :  { %3536 = vmatpush.msrb.mxu2 %v12111_v32  ;;  %3514 = vmatpush.msrb.mxu1 %v12112_v50  ;;  %12123 = vst [vmem:[#allocation131_spill] sm:$0xff] %v9638_v18  ;;  %v12125_v34 = vld [vmem:[#allocation53_spill] sm:$0xff] }
 0x57e   :  { %3554 = vmatpush.msrb.mxu3 %v12113_v52  ;;  %3497 = vmatpush.msrb.mxu0 %v12114_v39  ;;  %v12126_v32 = vld [vmem:[#allocation81_spill] sm:$0xff]  ;;  %v9648_v39 = vld [vmem:[#allocation3 + $0x3d8] sm:$0xff] }
 0x57f   :  { %3537 = vmatpush.msrb.mxu2 %v12115_v16  ;;  %3515 = vmatpush.msrb.mxu1 %v12116_v29  ;;  %v9644_v50 = vld [vmem:[#allocation3 + $0x8] sm:$0xff]  ;;  %12129 = vst [vmem:[#allocation31_spill] sm:$0xff] %v9648_v39 }
 0x580   :  { %3555 = vmatpush.msrb.mxu3 %v12117_v28  ;;  %3498 = vmatpush.msrb.mxu0 %v12118_v63  ;;  %12127 = vst [vmem:[#allocation116_spill] sm:$0xff] %v9644_v50  ;;  %v12128_v52 = vld [vmem:[#allocation37_spill] sm:$0xff]  ;;  %v12131_v29 = vld [vmem:[#allocation54_spill] sm:$0xff]  ;;  %v12132_v28 = vld [vmem:[#allocation40_spill] sm:$0xff] }
 0x581   :  { %3538 = vmatpush.msrb.mxu2 %v12119_v49  ;;  %3516 = vmatpush.msrb.mxu1 %v12120_v47  ;;  %v12130_v16 = vld [vmem:[#allocation57_spill] sm:$0xff]  ;;  %v9654_v63 = vld [vmem:[#allocation3 + $0x398] sm:$0xff] }
 0x582   :  { %3556 = vmatpush.msrb.mxu3 %v12121_v0  ;;  %3499 = vmatpush.msrb.mxu0 %v12122_v4  ;;  %12133 = vst [vmem:[#allocation132_spill] sm:$0xff] %v9654_v63  ;;  %v12134_v49 = vld [vmem:[#allocation61_spill] sm:$0xff]  ;;  %v12136_v0 = vld [vmem:[#allocation82_spill] sm:$0xff]  ;;  %v9662_v4 = vld [vmem:[#allocation3 + $0x358] sm:$0xff] }
 0x583   :  { %3539 = vmatpush.msrb.mxu2 %v9638_v18  ;;  %3517 = vmatpush.msrb.mxu1 %v12124_v7  ;;  %v9658_v47 = vld [vmem:[#allocation3 + $0x448] sm:$0xff]  ;;  %12137 = vst [vmem:[#allocation34_spill] sm:$0xff] %v9662_v4  ;;  %v12138_v7 = vld [vmem:[#allocation43_spill] sm:$0xff] }
 0x584   :  { %3557 = vmatpush.msrb.mxu3 %v12125_v34  ;;  %3500 = vmatpush.msrb.mxu0 %v12126_v32  ;;  %12135 = vst [vmem:[#allocation118_spill] sm:$0xff] %v9658_v47  ;;  %v9666_v34 = vld [vmem:[#allocation3 + $0x408] sm:$0xff] }
 0x585   :  { %3540 = vmatpush.msrb.mxu2 %v9644_v50  ;;  %3518 = vmatpush.msrb.mxu1 %v12130_v16  ;;  %12139 = vst [vmem:[#allocation133_spill] sm:$0xff] %v9666_v34  ;;  %v12140_v32 = vld [vmem:[#allocation58_spill] sm:$0xff]  ;;  %v9671_v16 = vld [vmem:[#allocation3 + $0x318] sm:$0xff] }
 0x586   :  { %3611 = vmatpush.msra.mxu0 %v12128_v52  ;;  %3558 = vmatpush.msrb.mxu3 %v12131_v29  ;;  %v12141_v52 = vld [vmem:[#allocation65_spill] sm:$0xff]  ;;  %12142 = vst [vmem:[#allocation120_spill] sm:$0xff] %v9671_v16  ;;  %v9674_v29 = vld [vmem:[#allocation3 + $0x7d8] sm:$0xff] }
 0x587   :  { %3651 = vmatpush.msra.mxu2 %v9648_v39  ;;  %3519 = vmatpush.msrb.mxu1 %v12134_v49  ;;  %12143 = vst [vmem:[#allocation36_spill] sm:$0xff] %v9674_v29  ;;  %v12145_v49 = vld [vmem:[#allocation45_spill] sm:$0xff] }
 0x588   :  { %3612 = vmatpush.msra.mxu0 %v12132_v28  ;;  %3559 = vmatpush.msrb.mxu3 %v9658_v47  ;;  %v12144_v28 = vld [vmem:[#allocation85_spill] sm:$0xff] }
 0x589   :  { %3652 = vmatpush.msra.mxu2 %v9654_v63  ;;  %3520 = vmatpush.msrb.mxu1 %v12138_v7  ;;  %v9682_v7 = vld [vmem:[#allocation3 + $0x798] sm:$0xff] }
 0x58a   :  { %3613 = vmatpush.msra.mxu0 %v12136_v0  ;;  %3560 = vmatpush.msrb.mxu3 %v9666_v34  ;;  %v9679_v0 = vld [vmem:[#allocation3 + $0x2d8] sm:$0xff]  ;;  %12147 = vst [vmem:[#allocation55_spill] sm:$0xff] %v9682_v7 }
 0x58b   :  { %3653 = vmatpush.msra.mxu2 %v9662_v4  ;;  %3631 = vmatpush.msra.mxu1 %v12141_v52  ;;  %12146 = vst [vmem:[#allocation122_spill] sm:$0xff] %v9679_v0  ;;  %v12149_v52 = vld [vmem:[#allocation69_spill] sm:$0xff] }
 0x58c   :  { %3614 = vmatpush.msra.mxu0 %v12140_v32  ;;  %3671 = vmatpush.msra.mxu3 %v9674_v29  ;;  %v12148_v32 = vld [vmem:[#allocation62_spill] sm:$0xff]  ;;  %v9690_v29 = vld [vmem:[#allocation3 + $0x758] sm:$0xff] }
 0x58d   :  { %3654 = vmatpush.msra.mxu2 %v9671_v16  ;;  %3632 = vmatpush.msra.mxu1 %v12145_v49  ;;  %v9687_v16 = vld [vmem:[#allocation3 + $0x298] sm:$0xff]  ;;  %12151 = vst [vmem:[#allocation25_spill] sm:$0xff] %v9690_v29 }
 0x58e   :  { %3615 = vmatpush.msra.mxu0 %v12144_v28  ;;  %3672 = vmatpush.msra.mxu3 %v9682_v7  ;;  %12150 = vst [vmem:[#allocation125_spill] sm:$0xff] %v9687_v16  ;;  %v12152_v28 = vld [vmem:[#allocation66_spill] sm:$0xff]  ;;  %v12153_v49 = vld [vmem:[#allocation48_spill] sm:$0xff] }
 0x58f   :  { %3655 = vmatpush.msra.mxu2 %v9679_v0  ;;  %3633 = vmatpush.msra.mxu1 %v12149_v52  ;;  %v9695_v0 = vld [vmem:[#allocation3 + $0x258] sm:$0xff]  ;;  %v12157_v52 = vld [vmem:[#allocation73_spill] sm:$0xff] }
 0x590   :  { %3616 = vmatpush.msra.mxu0 %v12148_v32  ;;  %3673 = vmatpush.msra.mxu3 %v9690_v29  ;;  %12154 = vst [vmem:[#allocation39_spill] sm:$0xff] %v9695_v0  ;;  %v9698_v7 = vld [vmem:[#allocation3 + $0x718] sm:$0xff] }
 0x591   :  { %3656 = vmatpush.msra.mxu2 %v9687_v16  ;;  %3634 = vmatpush.msra.mxu1 %v12153_v49  ;;  %12155 = vst [vmem:[#allocation59_spill] sm:$0xff] %v9698_v7  ;;  %v12156_v32 = vld [vmem:[#allocation88_spill] sm:$0xff]  ;;  %v12161_v49 = vld [vmem:[#allocation70_spill] sm:$0xff] }
 0x592   :  { %3617 = vmatpush.msra.mxu0 %v12152_v28  ;;  %3674 = vmatpush.msra.mxu3 %v9698_v7  ;;  %v9703_v16 = vld [vmem:[#allocation3 + $0x218] sm:$0xff]  ;;  %v9709_v28 = vld [vmem:[#allocation3 + $0x1d0] sm:$0xff] }
 0x593   :  { %3657 = vmatpush.msra.mxu2 %v9695_v0  ;;  %3635 = vmatpush.msra.mxu1 %v12157_v52  ;;  %12158 = vst [vmem:[#allocation27_spill] sm:$0xff] %v9703_v16  ;;  %v9706_v29 = vld [vmem:[#allocation3 + $0x6d8] sm:$0xff]  ;;  %v9719_v52 = vld [vmem:[#allocation3 + $0x190] sm:$0xff] }
 0x594   :  { %3618 = vmatpush.msra.mxu0 %v12156_v32  ;;  %12159 = vst [vmem:[#allocation42_spill] sm:$0xff] %v9706_v29  ;;  %3675 = vmatpush.msra.mxu3 %v9706_v29  ;;  %v9713_v0 = vld [vmem:[#allocation3 + $0x1d8] sm:$0xff] }
 0x595   :  { %3658 = vmatpush.msra.mxu2 %v9703_v16  ;;  %12160 = vst [vmem:[#allocation63_spill] sm:$0xff] %v9709_v28  ;;  %3636 = vmatpush.msra.mxu1 %v12161_v49  ;;  %v9716_v32 = vld [vmem:[#allocation3 + $0x698] sm:$0xff]  ;;  %v9729_v49 = vld [vmem:[#allocation3 + $0x150] sm:$0xff] }
 0x596   :  { %3619 = vmatpush.msra.mxu0 %v9709_v28  ;;  %12162 = vst [vmem:[#allocation30_spill] sm:$0xff] %v9713_v0  ;;  %3676 = vmatpush.msra.mxu3 %v9716_v32  ;;  %v12165_v16 = vld [vmem:[#allocation51_spill] sm:$0xff] }
 0x597   :  { %3659 = vmatpush.msra.mxu2 %v9713_v0  ;;  %12163 = vst [vmem:[#allocation44_spill] sm:$0xff] %v9716_v32  ;;  %3637 = vmatpush.msra.mxu1 %v12165_v16  ;;  %v9723_v29 = vld [vmem:[#allocation3 + $0x198] sm:$0xff]  ;;  %v12169_v0 = vld [vmem:[#allocation90_spill] sm:$0xff] }
 0x598   :  { %12164 = vst [vmem:[#allocation67_spill] sm:$0xff] %v9719_v52  ;;  %3620 = vmatpush.msra.mxu0 %v9719_v52  ;;  %v9726_v28 = vld [vmem:[#allocation3 + $0x658] sm:$0xff]  ;;  %v9739_v16 = vld [vmem:[#allocation3 + $0x110] sm:$0xff] }
 0x599   :  { %12166 = vst [vmem:[#allocation33_spill] sm:$0xff] %v9723_v29  ;;  %3660 = vmatpush.msra.mxu2 %v9723_v29  ;;  %3677 = vmatpush.msra.mxu3 %v9726_v28  ;;  %v9733_v32 = vld [vmem:[#allocation3 + $0x158] sm:$0xff]  ;;  %v12173_v29 = vld [vmem:[#allocation78_spill] sm:$0xff] }
 0x59a   :  { %12167 = vst [vmem:[#allocation46_spill] sm:$0xff] %v9726_v28  ;;  %3621 = vmatpush.msra.mxu0 %v9729_v49  ;;  %3638 = vmatpush.msra.mxu1 %v12169_v0  ;;  %v9736_v52 = vld [vmem:[#allocation3 + $0x618] sm:$0xff]  ;;  %v9749_v0 = vld [vmem:[#allocation3 + $0xd0] sm:$0xff] }
 0x59b   :  { %12168 = vst [vmem:[#allocation71_spill] sm:$0xff] %v9729_v49  ;;  %3661 = vmatpush.msra.mxu2 %v9733_v32  ;;  %3678 = vmatpush.msra.mxu3 %v9736_v52  ;;  %v9743_v28 = vld [vmem:[#allocation3 + $0x118] sm:$0xff] }
 0x59c   :  { %12170 = vst [vmem:[#allocation41_spill] sm:$0xff] %v9733_v32  ;;  %3622 = vmatpush.msra.mxu0 %v9739_v16  ;;  %3639 = vmatpush.msra.mxu1 %v12173_v29  ;;  %v9746_v49 = vld [vmem:[#allocation3 + $0x5d8] sm:$0xff]  ;;  %v9752_v32 = vld [vmem:[#allocation3 + $0x590] sm:$0xff] }
 0x59d   :  { %12171 = vst [vmem:[#allocation35_spill] sm:$0xff] %v9736_v52  ;;  %3662 = vmatpush.msra.mxu2 %v9743_v28  ;;  %3679 = vmatpush.msra.mxu3 %v9746_v49  ;;  %v9755_v52 = vld [vmem:[#allocation3 + $0xd8] sm:$0xff] }
 0x59e   :  { %12172 = vst [vmem:[#allocation83_spill] sm:$0xff] %v9739_v16  ;;  %3623 = vmatpush.msra.mxu0 %v9749_v0  ;;  %3640 = vmatpush.msra.mxu1 %v9752_v32  ;;  %v9758_v29 = vld [vmem:[#allocation3 + $0x598] sm:$0xff]  ;;  %v3004_v16 = vpop.f32.mrf.mxu0  ;;  %v3064_v7 = vpop.f32.mrf.mxu3 }
 0x59f   :  { %12174 = vst [vmem:[#allocation49_spill] sm:$0xff] %v9743_v28  ;;  %3663 = vmatpush.msra.mxu2 %v9755_v52  ;;  %3680 = vmatpush.msra.mxu3 %v9758_v29  ;;  %v9761_v28 = vld [vmem:[#allocation3 + $0x90] sm:$0xff] }
 0x5a0   :  { %12175 = vst [vmem:[#allocation50_spill] sm:$0xff] %v9746_v49  ;;  %3624 = vmatpush.msra.mxu0 %v9761_v28  ;;  %v9764_v49 = vld [vmem:[#allocation3 + $0x550] sm:$0xff] }
 0x5a1   :  { %12176 = vst [vmem:[#allocation75_spill] sm:$0xff] %v9749_v0  ;;  %3641 = vmatpush.msra.mxu1 %v9764_v49  ;;  %v9767_v0 = vld [vmem:[#allocation3 + $0x98] sm:$0xff] }
 0x5a2   :  { %12177 = vst [vmem:[#allocation64_spill] sm:$0xff] %v9752_v32  ;;  %3664 = vmatpush.msra.mxu2 %v9767_v0  ;;  %v9770_v32 = vld [vmem:[#allocation3 + $0x558] sm:$0xff] }
 0x5a3   :  { %12178 = vst [vmem:[#allocation38_spill] sm:$0xff] %v9755_v52  ;;  %3681 = vmatpush.msra.mxu3 %v9770_v32  ;;  %v9773_v52 = vld [vmem:[#allocation3 + $0x50] sm:$0xff] }
 0x5a4   :  { %12179 = vst [vmem:[#allocation68_spill] sm:$0xff] %v9758_v29  ;;  %3625 = vmatpush.msra.mxu0 %v9773_v52  ;;  %v9776_v29 = vld [vmem:[#allocation3 + $0x510] sm:$0xff] }
 0x5a5   :  { %12180 = vst [vmem:[#allocation52_spill] sm:$0xff] %v9761_v28  ;;  %3642 = vmatpush.msra.mxu1 %v9776_v29  ;;  %v9779_v28 = vld [vmem:[#allocation3 + $0x58] sm:$0xff] }
 0x5a6   :  { %12181 = vst [vmem:[#allocation72_spill] sm:$0xff] %v9764_v49  ;;  %3665 = vmatpush.msra.mxu2 %v9779_v28  ;;  %v9782_v49 = vld [vmem:[#allocation3 + $0x518] sm:$0xff]  ;;  %v3130_v47 = vpop.f32.mrf.mxu0 }
 0x5a7   :  { %12182 = vst [vmem:[#allocation79_spill] sm:$0xff] %v9767_v0  ;;  %3682 = vmatpush.msra.mxu3 %v9782_v49  ;;  %v9785_v0 = vld [vmem:[#allocation3 + $0x10] sm:$0xff] }
 0x5a8   :  { %12183 = vst [vmem:[#allocation76_spill] sm:$0xff] %v9770_v32  ;;  %3626 = vmatpush.msra.mxu0 %v9785_v0  ;;  %v9788_v32 = vld [vmem:[#allocation3 + $0x4d0] sm:$0xff]  ;;  %v3190_v39 = vpop.f32.mrf.mxu3 }
 0x5a9   :  { %12184 = vst [vmem:[#allocation47_spill] sm:$0xff] %v9773_v52  ;;  %3643 = vmatpush.msra.mxu1 %v9788_v32  ;;  %v9791_v52 = vld [vmem:[#allocation3 + $0x18] sm:$0xff] }
 0x5aa   :  { %12185 = vst [vmem:[#allocation56_spill] sm:$0xff] %v9776_v29  ;;  %3666 = vmatpush.msra.mxu2 %v9791_v52  ;;  %v9794_v29 = vld [vmem:[#allocation3 + $0x4d8] sm:$0xff] }
 0x5ab   :  { %12186 = vst [vmem:[#allocation77_spill] sm:$0xff] %v9779_v28  ;;  %3683 = vmatpush.msra.mxu3 %v9794_v29  ;;  %v9797_v28 = vld [vmem:[#allocation3 + $0x490] sm:$0xff] }
 0x5ac   :  { %12187 = vst [vmem:[#allocation60_spill] sm:$0xff] %v9782_v49  ;;  %3644 = vmatpush.msra.mxu1 %v9797_v28  ;;  %v9800_v49 = vld [vmem:[#allocation3 + $0x498] sm:$0xff] }
 0x5ad   :  { %12188 = vst [vmem:[#allocation53_spill] sm:$0xff] %v9785_v0  ;;  %3684 = vmatpush.msra.mxu3 %v9800_v49  ;;  %v9803_v0 = vld [vmem:[#allocation3 + $0x450] sm:$0xff] }
 0x5ae   :  { %12189 = vst [vmem:[#allocation81_spill] sm:$0xff] %v9788_v32  ;;  %3645 = vmatpush.msra.mxu1 %v9803_v0  ;;  %v9806_v32 = vld [vmem:[#allocation3 + $0x458] sm:$0xff] }
 0x5af   :  { %12190 = vst [vmem:[#allocation37_spill] sm:$0xff] %v9791_v52  ;;  %3685 = vmatpush.msra.mxu3 %v9806_v32  ;;  %v9809_v52 = vld [vmem:[#allocation3 + $0x410] sm:$0xff] }
 0x5b0   :  { %12191 = vst [vmem:[#allocation57_spill] sm:$0xff] %v9794_v29  ;;  %3646 = vmatpush.msra.mxu1 %v9809_v52  ;;  %v9812_v29 = vld [vmem:[#allocation3 + $0x418] sm:$0xff] }
 0x5b1   :  { %12192 = vst [vmem:[#allocation54_spill] sm:$0xff] %v9797_v28  ;;  %3686 = vmatpush.msra.mxu3 %v9812_v29  ;;  %v3024_v28 = vpop.f32.mrf.mxu1 }
 0x5b2   :  { %12193 = vst [vmem:[#allocation40_spill] sm:$0xff] %v9800_v49  ;;  %v3044_v49 = vpop.f32.mrf.mxu2  ;;  %v3025_v4 = vadd.f32 %v3024_v28, %v3004_v16 }
 0x5b3   :  { %12194 = vst [vmem:[#allocation61_spill] sm:$0xff] %v9803_v0 }
 0x5b4   :  { %12195 = vst [vmem:[#allocation82_spill] sm:$0xff] %v9806_v32  ;;  %v3069_v63 = vrot.slane %v3025_v4, 6  ;;  %v3065_v32 = vadd.f32 %v3064_v7, %v3044_v49 }
 0x5b5   :  { %12196 = vst [vmem:[#allocation43_spill] sm:$0xff] %v9809_v52 }
 0x5b6   :  { %12197 = vst [vmem:[#allocation58_spill] sm:$0xff] %v9812_v29  ;;  %v3073_v52 = vadd.f32 %v3069_v63, %v2979_v30  ;;  %v3070_v27 = vrot.slane %v3065_v32, 6 }
 0x5b8   :  { %v4638_v20 = vmul.f32 -1.442695, %v3073_v52  ;;  %v3074_v59 = vadd.f32 %v3070_v27, %v2980_v42 }
 0x5b9   :  { %v3150_v34 = vpop.f32.mrf.mxu1 }
 0x5ba   :  { %v3151_v0 = vadd.f32 %v3150_v34, %v3130_v47  ;;  %v3170_v18 = vpop.f32.mrf.mxu2  ;;  %4822 = vpow2.f32 %v4638_v20  ;;  %v4639_v47 = vmul.f32 -1.442695, %v3074_v59 }
 0x5bb   :  { %v3191_v46 = vadd.f32 %v3190_v39, %v3170_v18 }
 0x5bc   :  { %v3195_v50 = vrot.slane %v3151_v0, 6 }
 0x5bd   :  { %v3196_v29 = vrot.slane %v3191_v46, 6 }
 0x5be   :  { %v3199_v19 = vadd.f32 %v3195_v50, %v2981_v2 }
 0x5bf   :  { %v3200_v28 = vadd.f32 %v3196_v29, %v2982_v61  ;;  %v3256_v61 = vpop.f32.mrf.mxu0 }
 0x5c0   :  { %v4640_v55 = vmul.f32 -1.442695, %v3199_v19  ;;  %v4823_v34 = vpop.eup %4822 }
 0x5c1   :  { %v4641_v4 = vmul.f32 -1.442695, %v3200_v28  ;;  %v9815_v18 = vadd.f32 1.0, %v4823_v34 }
 0x5c2   :  { %4824 = vpow2.f32 %v4640_v55  ;;  %v3296_v19 = vpop.f32.mrf.mxu2 }
 0x5c3   :  { %4826 = vpow2.f32 %v4639_v47  ;;  %v3094_v11 = vand.u32 2147483648, %v9815_v18  ;;  %vm3088_vm11 = vweird.f32 %v9815_v18 }
 0x5c4   :  { %4828 = vpow2.f32 %v4641_v4  ;;  %v3276_v55 = vpop.f32.mrf.mxu1 }
 0x5c5   :  { %4830 = vrcp.f32 %v9815_v18  ;;  %v3277_v39 = vadd.f32 %v3276_v55, %v3256_v61 }
 0x5c7   :  { %v3321_v28 = vrot.slane %v3277_v39, 6 }
 0x5c8   :  { %v4825_v7 = vpop.eup %4824 }
 0x5c9   :  { %v9817_v30 = vadd.f32 1.0, %v4825_v7  ;;  %v4827_v2 = vpop.eup %4826  ;;  %v2985_v7 = vld [vmem:[#allocation2 + $0x78] sm:$0xc] }
 0x5ca   :  { %v4829_v46 = vpop.eup %4828  ;;  %v9821_v42 = vadd.f32 1.0, %v4827_v2 }
 0x5cb   :  { %4832 = vrcp.f32 %v9817_v30  ;;  %v9823_v59 = vadd.f32 1.0, %v4829_v46  ;;  %v9825_v20 = vpop.eup %4830  ;;  %v3316_v50 = vpop.f32.mrf.mxu3  ;;  %vm3214_vm12 = vweird.f32 %v9817_v30 }
 0x5cc   :  { %4834 = vrcp.f32 %v9821_v42  ;;  %v3084_v63 = vmul.f32 %v9825_v20, %v9815_v18  ;;  %v3317_v2 = vadd.f32 %v3316_v50, %v3296_v19  ;;  %vm3089_vm9 = vweird.f32 %v9825_v20 }
 0x5cd   :  { %4836 = vrcp.f32 %v9823_v59  ;;  %vm9858_vm13 = vmor %vm3088_vm11, %vm3089_vm9  ;;  %vm3103_vm0 = vweird.f32 %v9821_v42  ;;  %vm3229_vm4 = vweird.f32 %v9823_v59 }
 0x5ce   :  { %v3085_v4 = vsub.f32 1.0, %v3084_v63 }
 0x5d0   :  { %v3086_v63 = vmul.f32 %v9825_v20, %v3085_v4  ;;  %v3218_v4 = vand.u32 2147483647, %v9817_v30 }
 0x5d1   :  { %v9828_v27 = vpop.eup %4832 }
 0x5d2   :  { %v3210_v32 = vmul.f32 %v9828_v27, %v9817_v30  ;;  %v9835_v0 = vpop.eup %4834  ;;  %vm3215_vm10 = vweird.f32 %v9828_v27  ;;  %vm3219_vm1 = vcmp.eq.f32.partialorder %v3218_v4, 8.507059e+37 }
 0x5d3   :  { %v9837_v29 = vpop.eup %4836  ;;  %v3099_v61 = vmul.f32 %v9835_v0, %v9821_v42  ;;  %vm9866_vm14 = vmor %vm3214_vm12, %vm3215_vm10  ;;  %vm3104_vm2 = vweird.f32 %v9835_v0 }
 0x5d4   :  { %v3211_v34 = vsub.f32 1.0, %v3210_v32  ;;  %v3225_v55 = vmul.f32 %v9837_v29, %v9823_v59  ;;  %v3322_v32 = vrot.slane %v3317_v2, 6  ;;  %vm3230_vm3 = vweird.f32 %v9837_v29  ;;  %vm9892_vm5 = vmor %vm3103_vm0, %vm3104_vm2 }
 0x5d5   :  { %v3100_v50 = vsub.f32 1.0, %v3099_v61  ;;  %vm3231_vm6 = vmor %vm3229_vm4, %vm3230_vm3 }
 0x5d6   :  { %v3212_v39 = vmul.f32 %v9828_v27, %v3211_v34 }
 0x5e0   :  { %v3358_v52 = vpop.f32.mrf.mxu0 }
 0x5e7   :  { %v3378_v49 = vpop.f32.mrf.mxu1  ;;  %v3398_v31 = vpop.f32.mrf.mxu2 }
 0x5e8   :  { %v3379_v16 = vadd.f32 %v3378_v49, %v3358_v52  ;;  %v3325_v49 = vadd.f32 %v3321_v28, %v2983_v1  ;;  %v3220_v28 = vand.u32 2147483648, %v9817_v30 }
 0x5ea   :  { %v3423_v47 = vrot.slane %v3379_v16, 6  ;;  %v3226_v16 = vsub.f32 1.0, %v3225_v55 }
 0x5ec   :  { %v3427_v46 = vadd.f32 %v3423_v47, %v2985_v7  ;;  %v3418_v52 = vpop.f32.mrf.mxu3  ;;  %v3092_v47 = vand.u32 2147483647, %v9815_v18  ;;  %v2986_v7 = vld [vmem:[#allocation2 + $0x28] sm:$0xc]  ;;  %v3101_v18 = vmul.f32 %v9835_v0, %v3100_v50  ;;  %v3221_v50 = vor.u32 1.1754944e-38, %v3220_v28 }
 0x5ed   :  { %v3419_v5 = vadd.f32 %v3418_v52, %v3398_v31  ;;  %v3087_v31 = vadd.f32 %v9825_v20, %v3086_v63  ;;  %v3331_v52 = vrot.slane %v9216_v45, 6 }
 0x5ee   :  { %v4642_v53 = vmul.f32 -1.442695, %v3427_v46  ;;  %v3227_v46 = vmul.f32 %v9837_v29, %v3226_v16  ;;  %vm9870_vm15 = vcmp.eq.f32.partialorder %v3092_v47, 8.507059e+37 }
 0x5ef   :  { %v3424_v19 = vrot.slane %v3419_v5, 6  ;;  %v2984_v5 = vld [vmem:[#allocation2 + $0x70] sm:$0xc]  ;;  %v3091_v63 = vsel %vm9858_vm13, %v9825_v20, %v3087_v31  ;;  %v3235_v20 = vand.u32 2147483648, %v9823_v59 }
 0x5f0   :  { %4838 = vpow2.f32 %v4642_v53  ;;  %v3213_v53 = vadd.f32 %v9828_v27, %v3212_v39  ;;  %v3326_v34 = vadd.f32 %v3322_v32, %v2984_v5  ;;  %v3095_v39 = vor.u32 1.1754944e-38, %v3094_v11 }
 0x5f1   :  { %4840 = vtanh.f32 %v3325_v49  ;;  %v3428_v1 = vadd.f32 %v3424_v19, %v2986_v7  ;;  %v3102_v11 = vadd.f32 %v9835_v0, %v3101_v18  ;;  %v3228_v16 = vadd.f32 %v9837_v29, %v3227_v46 }
 0x5f2   :  { %v3217_v45 = vsel %vm9866_vm14, %v9828_v27, %v3213_v53  ;;  %v3096_v27 = vsel %vm9870_vm15, %v3095_v39, %v3091_v63  ;;  %v3109_v7 = vand.u32 2147483648, %v9821_v42  ;;  %v3107_v53 = vand.u32 2147483647, %v9821_v42 }
 0x5f3   :  { %v4643_v2 = vmul.f32 -1.442695, %v3428_v1  ;;  %v3222_v47 = vsel %vm3219_vm1, %v3221_v50, %v3217_v45  ;;  %v3233_v5 = vand.u32 2147483647, %v9823_v59  ;;  %v3236_v18 = vor.u32 1.1754944e-38, %v3235_v20 }
 0x5f4   :  { %v3335_v4 = vmul.f32 %v3331_v52, %v3222_v47  ;;  %vm3108_vm7 = vcmp.eq.f32.partialorder %v3107_v53, 8.507059e+37  ;;  %v3332_v52 = vrot.slane %v9220_v48, 6 }
 0x5f5   :  { %4842 = vpow2.f32 %v4643_v2  ;;  %v3232_v2 = vsel %vm3231_vm6, %v9837_v29, %v3228_v16  ;;  %vm3234_vm8 = vcmp.eq.f32.partialorder %v3233_v5, 8.507059e+37 }
 0x5f6   :  { %v4839_v55 = vpop.eup %4838  ;;  %4844 = vtanh.f32 %v3326_v34  ;;  %v3106_v34 = vsel %vm9892_vm5, %v9835_v0, %v3102_v11  ;;  %v3237_v59 = vsel %vm3234_vm8, %v3236_v18, %v3232_v2 }
 0x5f7   :  { %v3435_v32 = vadd.f32 1.0, %v4839_v55  ;;  %v4841_v19 = vpop.eup %4840  ;;  %v3110_v55 = vor.u32 1.1754944e-38, %v3109_v7  ;;  %v3336_v0 = vmul.f32 %v3332_v52, %v3237_v59  ;;  %v12229_v59 = vld [vmem:[#allocation12_spill] sm:$0xff]  ;;  %v12231_v52 = vld [vmem:[#allocation18_spill] sm:$0xff] }
 0x5f8   :  { %v3337_v1 = vmul.f32 %v4841_v19, %v3096_v27 }
 0x5f9   :  { %4846 = vrcp.f32 %v3435_v32  ;;  %v3111_v42 = vsel %vm3108_vm7, %v3110_v55, %v3106_v34  ;;  %v3448_v29 = vand.u32 2147483648, %v3435_v32  ;;  %v3446_v50 = vand.u32 2147483647, %v3435_v32 }
 0x5fa   :  { %v9902_v30 = vadd.f32 %v3337_v1, %v3335_v4  ;;  %vm3442_vm10 = vweird.f32 %v3435_v32 }
 0x5fb   :  { %v4843_v28 = vpop.eup %4842  ;;  %v3449_v47 = vor.u32 1.1754944e-38, %v3448_v29  ;;  %vm3447_vm12 = vcmp.eq.f32.partialorder %v3446_v50, 8.507059e+37  ;;  %v12235_v29 = vld [vmem:[#allocation102_spill] sm:$0xff]  ;;  %v12237_v50 = vld [vmem:[#allocation104_spill] sm:$0xff] }
 0x5fc   :  { %v3436_v46 = vadd.f32 1.0, %v4843_v28  ;;  %v4845_v61 = vpop.eup %4844 }
 0x5fd   :  { %v3338_v63 = vmul.f32 %v4845_v61, %v3111_v42  ;;  %v12228_v42 = vld [vmem:[#allocation17_spill] sm:$0xff] }
 0x5fe   :  { %4848 = vrcp.f32 %v3436_v46  ;;  %v3463_v53 = vand.u32 2147483648, %v3436_v46  ;;  %v3461_v4 = vand.u32 2147483647, %v3436_v46  ;;  %vm3457_vm14 = vweird.f32 %v3436_v46 }
 0x5ff   :  { %v4847_v49 = vpop.eup %4846  ;;  %4850 = vtanh.f32 %v9902_v30  ;;  %v9906_v16 = vadd.f32 %v3338_v63, %v3336_v0  ;;  %v12232_v63 = vld [vmem:[#allocation14_spill] sm:$0xff]  ;;  %v12234_v0 = vld [vmem:[#allocation13_spill] sm:$0xff] }
 0x600   :  { %v3438_v39 = vmul.f32 %v4847_v49, %v3435_v32  ;;  %vm3443_vm9 = vweird.f32 %v4847_v49  ;;  %v3464_v32 = vor.u32 1.1754944e-38, %v3463_v53  ;;  %vm3462_vm0 = vcmp.eq.f32.partialorder %v3461_v4, 8.507059e+37  ;;  %v9994_v53 = vld [vmem:[#allocation3 + $0x378] sm:$0xff] }
 0x601   :  { %vm3444_vm11 = vmor %vm3442_vm10, %vm3443_vm9  ;;  %4852 = vtanh.f32 %v9906_v16  ;;  %v12248_v4 = vld [vmem:[#allocation96_spill] sm:$0xff] }
 0x602   :  { %v3439_v45 = vsub.f32 1.0, %v3438_v39  ;;  %v12230_v39 = vld [vmem:[#allocation11_spill] sm:$0xff] }
 0x604   :  { %v3440_v19 = vmul.f32 %v4847_v49, %v3439_v45  ;;  %v4849_v11 = vpop.eup %4848  ;;  %v12233_v45 = vld [vmem:[#allocation101_spill] sm:$0xff] }
 0x605   :  { %v3453_v27 = vmul.f32 %v4849_v11, %v3436_v46  ;;  %v4851_v1 = vpop.eup %4850  ;;  %vm3458_vm13 = vweird.f32 %v4849_v11 }
 0x606   :  { %v3441_v20 = vadd.f32 %v4847_v49, %v3440_v19  ;;  %vm3459_vm15 = vmor %vm3457_vm14, %vm3458_vm13  ;;  %v12236_v19 = vld [vmem:[#allocation15_spill] sm:$0xff] }
 0x607   :  { %v3454_v48 = vsub.f32 1.0, %v3453_v27  ;;  %v4853_v18 = vpop.eup %4852  ;;  %v12240_v27 = vld [vmem:[#allocation92_spill] sm:$0xff] }
 0x608   :  { %v3445_v7 = vsel %vm3444_vm11, %v4847_v49, %v3441_v20  ;;  %v12239_v20 = vld [vmem:[#allocation105_spill] sm:$0xff] }
 0x609   :  { %v3450_v31 = vsel %vm3447_vm12, %v3449_v47, %v3445_v7  ;;  %v3455_v28 = vmul.f32 %v4849_v11, %v3454_v48  ;;  %v12241_v47 = vld [vmem:[#allocation19_spill] sm:$0xff] }
 0x60a   :  { %v3469_v5 = vmul.f32 %v4851_v1, %v3450_v31  ;;  %v9982_v7 = vld [vmem:[#allocation3 + $0x3f8] sm:$0xff]  ;;  %v12244_v31 = vld [vmem:[#allocation94_spill] sm:$0xff] }
 0x60b   :  { %v3456_v2 = vadd.f32 %v4849_v11, %v3455_v28  ;;  %v12243_v48 = vld [vmem:[#allocation107_spill] sm:$0xff]  ;;  %v12247_v28 = vld [vmem:[#allocation109_spill] sm:$0xff] }
 0x60c   :  { %v9909_v34 = vrot.slane %v3469_v5, 2  ;;  %v9988_v1 = vld [vmem:[#allocation3 + $0x3b8] sm:$0xff] }
 0x60d   :  { %v3460_v61 = vsel %vm3459_vm15, %v4849_v11, %v3456_v2  ;;  %v12238_v11 = vld [vmem:[#allocation91_spill] sm:$0xff]  ;;  %v12245_v5 = vld [vmem:[#allocation20_spill] sm:$0xff]  ;;  %v12250_v2 = vld [vmem:[#allocation97_spill] sm:$0xff] }
 0x60e   :  { %3501 = vmatmul.f32.vlgmr.msrb.gmra.mxu0 %v9909_v34  ;;  %3541 = vmatmul.f32.vlgmr.msrb.gmra.mxu2 %v9909_v34  ;;  %v3465_v55 = vsel %vm3462_vm0, %v3464_v32, %v3460_v61  ;;  %v10009_v32 = vld [vmem:[#allocation3 + $0x2f8] sm:$0xff] }
 0x60f   :  { %3737 = vmatpush.msrb.mxu0 %v9227_v23  ;;  %3777 = vmatpush.msrb.mxu2 %v9230_v17  ;;  %v3470_v49 = vmul.f32 %v4853_v18, %v3465_v55  ;;  %v12206_v23 = vld [vmem:[#allocation74_spill] sm:$0xff]  ;;  %v12207_v17 = vld [vmem:[#allocation80_spill] sm:$0xff]  ;;  %v12251_v61 = vld [vmem:[#allocation111_spill] sm:$0xff] }
 0x610   :  { %v12252_v18 = vld [vmem:[#allocation98_spill] sm:$0xff]  ;;  %v10015_v55 = vld [vmem:[#allocation3 + $0x2b8] sm:$0xff] }
 0x611   :  { %3738 = vmatpush.msrb.mxu0 %v9233_v40  ;;  %3778 = vmatpush.msrb.mxu2 %v9236_v36  ;;  %v9917_v46 = vrot.slane %v3470_v49, 2  ;;  %v12208_v40 = vld [vmem:[#allocation84_spill] sm:$0xff]  ;;  %v12209_v36 = vld [vmem:[#allocation86_spill] sm:$0xff]  ;;  %v12254_v49 = vld [vmem:[#allocation113_spill] sm:$0xff] }
 0x613   :  { %3739 = vmatpush.msrb.mxu0 %v9241_v8  ;;  %3779 = vmatpush.msrb.mxu2 %v9244_v12  ;;  %v12210_v8 = vld [vmem:[#allocation87_spill] sm:$0xff]  ;;  %v12211_v12 = vld [vmem:[#allocation89_spill] sm:$0xff] }
 0x614   :  { %3521 = vmatmul.f32.vlgmr.msrb.gmra.mxu1 %v9917_v46  ;;  %3561 = vmatmul.f32.vlgmr.msrb.gmra.mxu3 %v9917_v46 }
 0x615   :  { %3740 = vmatpush.msrb.mxu0 %v9249_v44  ;;  %3757 = vmatpush.msrb.mxu1 %v9252_v37  ;;  %v12212_v44 = vld [vmem:[#allocation134_spill] sm:$0xff]  ;;  %v12213_v37 = vld [vmem:[#allocation135_spill] sm:$0xff] }
 0x616   :  { %3780 = vmatpush.msrb.mxu2 %v9255_v3  ;;  %3797 = vmatpush.msrb.mxu3 %v9258_v58  ;;  %v12214_v3 = vld [vmem:[#allocation136_spill] sm:$0xff]  ;;  %v12215_v58 = vld [vmem:[#allocation137_spill] sm:$0xff] }
 0x617   :  { %3627 = vmatmul.f32.vlgmr.msra.gmra.mxu0 %v9909_v34  ;;  %3667 = vmatmul.f32.vlgmr.msra.gmra.mxu2 %v9909_v34 }
 0x618   :  { %3741 = vmatpush.msrb.mxu0 %v9263_v41  ;;  %3758 = vmatpush.msrb.mxu1 %v9266_v54  ;;  %v12216_v41 = vld [vmem:[#allocation138_spill] sm:$0xff]  ;;  %v12217_v54 = vld [vmem:[#allocation139_spill] sm:$0xff] }
 0x619   :  { %3781 = vmatpush.msrb.mxu2 %v9269_v9  ;;  %3798 = vmatpush.msrb.mxu3 %v9272_v51  ;;  %v12218_v9 = vld [vmem:[#allocation140_spill] sm:$0xff]  ;;  %v12219_v51 = vld [vmem:[#allocation141_spill] sm:$0xff] }
 0x61a   :  { %3742 = vmatpush.msrb.mxu0 %v9275_v21  ;;  %3759 = vmatpush.msrb.mxu1 %v9278_v25  ;;  %v12220_v21 = vld [vmem:[#allocation142_spill] sm:$0xff]  ;;  %v12221_v25 = vld [vmem:[#allocation143_spill] sm:$0xff] }
 0x61b   :  { %3782 = vmatpush.msrb.mxu2 %v9281_v15  ;;  %3799 = vmatpush.msrb.mxu3 %v9284_v43  ;;  %v12222_v15 = vld [vmem:[#allocation144_spill] sm:$0xff]  ;;  %v12223_v43 = vld [vmem:[#allocation145_spill] sm:$0xff] }
 0x61c   :  { %3743 = vmatpush.msrb.mxu0 %v9287_v33  ;;  %3760 = vmatpush.msrb.mxu1 %v9290_v57  ;;  %v12224_v33 = vld [vmem:[#allocation146_spill] sm:$0xff]  ;;  %v12225_v57 = vld [vmem:[#allocation147_spill] sm:$0xff] }
 0x61d   :  { %3783 = vmatpush.msrb.mxu2 %v9293_v22  ;;  %3800 = vmatpush.msrb.mxu3 %v9296_v6  ;;  %v12226_v22 = vld [vmem:[#allocation10_spill] sm:$0xff]  ;;  %v12227_v6 = vld [vmem:[#allocation9_spill] sm:$0xff] }
 0x61e   :  { %3647 = vmatmul.f32.vlgmr.msra.gmra.mxu1 %v9917_v46  ;;  %3687 = vmatmul.f32.vlgmr.msra.gmra.mxu3 %v9917_v46 }
 0x61f   :  { %3744 = vmatpush.msrb.mxu0 %v12206_v23  ;;  %3761 = vmatpush.msrb.mxu1 %v12207_v17  ;;  %v10021_v23 = vld [vmem:[#allocation3 + $0x278] sm:$0xff] }
 0x620   :  { %3784 = vmatpush.msrb.mxu2 %v12208_v40  ;;  %3801 = vmatpush.msrb.mxu3 %v12209_v36  ;;  %v12256_v17 = vld [vmem:[#allocation24_spill] sm:$0xff]  ;;  %v12258_v36 = vld [vmem:[#allocation99_spill] sm:$0xff] }
 0x621   :  { %3745 = vmatpush.msrb.mxu0 %v12210_v8  ;;  %3762 = vmatpush.msrb.mxu1 %v12211_v12  ;;  %v10027_v40 = vld [vmem:[#allocation3 + $0x238] sm:$0xff]  ;;  %v12260_v12 = vld [vmem:[#allocation117_spill] sm:$0xff] }
 0x622   :  { %3785 = vmatpush.msrb.mxu2 %v12212_v44  ;;  %3802 = vmatpush.msrb.mxu3 %v12213_v37  ;;  %v10033_v8 = vld [vmem:[#allocation3 + $0x1f8] sm:$0xff] }
 0x623   :  { %3746 = vmatpush.msrb.mxu0 %v12214_v3  ;;  %3763 = vmatpush.msrb.mxu1 %v12215_v58  ;;  %v10039_v44 = vld [vmem:[#allocation3 + $0x1b8] sm:$0xff]  ;;  %v12263_v3 = vld [vmem:[#allocation29_spill] sm:$0xff] }
 0x624   :  { %3786 = vmatpush.msrb.mxu2 %v12216_v41  ;;  %3803 = vmatpush.msrb.mxu3 %v12217_v54  ;;  %v12261_v37 = vld [vmem:[#allocation100_spill] sm:$0xff]  ;;  %v12264_v41 = vld [vmem:[#allocation103_spill] sm:$0xff] }
 0x625   :  { %3747 = vmatpush.msrb.mxu0 %v12218_v9  ;;  %3764 = vmatpush.msrb.mxu1 %v12219_v51  ;;  %v10045_v58 = vld [vmem:[#allocation3 + $0x178] sm:$0xff]  ;;  %v12267_v51 = vld [vmem:[#allocation106_spill] sm:$0xff] }
 0x626   :  { %3787 = vmatpush.msrb.mxu2 %v12220_v21  ;;  %3804 = vmatpush.msrb.mxu3 %v12221_v25  ;;  %v12266_v54 = vld [vmem:[#allocation32_spill] sm:$0xff]  ;;  %v12268_v21 = vld [vmem:[#allocation123_spill] sm:$0xff] }
 0x627   :  { %3748 = vmatpush.msrb.mxu0 %v12222_v15  ;;  %3765 = vmatpush.msrb.mxu1 %v12223_v43  ;;  %v10051_v9 = vld [vmem:[#allocation3 + $0x138] sm:$0xff] }
 0x628   :  { %3788 = vmatpush.msrb.mxu2 %v12224_v33  ;;  %3805 = vmatpush.msrb.mxu3 %v12225_v57  ;;  %v12269_v25 = vld [vmem:[#allocation124_spill] sm:$0xff]  ;;  %v12271_v57 = vld [vmem:[#allocation126_spill] sm:$0xff] }
 0x629   :  { %3749 = vmatpush.msrb.mxu0 %v12226_v22  ;;  %3766 = vmatpush.msrb.mxu1 %v12227_v6  ;;  %v10057_v15 = vld [vmem:[#allocation3 + $0xf8] sm:$0xff] }
 0x62a   :  { %3789 = vmatpush.msrb.mxu2 %v12228_v42  ;;  %3806 = vmatpush.msrb.mxu3 %v12229_v59  ;;  %v10060_v43 = vld [vmem:[#allocation3 + $0x5b8] sm:$0xff]  ;;  %v12273_v59 = vld [vmem:[#allocation110_spill] sm:$0xff] }
 0x62b   :  { %3750 = vmatpush.msrb.mxu0 %v12230_v39  ;;  %3767 = vmatpush.msrb.mxu1 %v12231_v52  ;;  %v12270_v33 = vld [vmem:[#allocation108_spill] sm:$0xff]  ;;  %v12272_v42 = vld [vmem:[#allocation127_spill] sm:$0xff] }
 0x62c   :  { %3790 = vmatpush.msrb.mxu2 %v12232_v63  ;;  %3807 = vmatpush.msrb.mxu3 %v12233_v45  ;;  %v10065_v22 = vld [vmem:[#allocation3 + $0xb8] sm:$0xff]  ;;  %v10079_v63 = vld [vmem:[#allocation3 + $0x30] sm:$0xff]  ;;  %v12274_v45 = vld [vmem:[#allocation21_spill] sm:$0xff] }
 0x62d   :  { %3751 = vmatpush.msrb.mxu0 %v12234_v0  ;;  %3768 = vmatpush.msrb.mxu1 %v12235_v29  ;;  %v10068_v6 = vld [vmem:[#allocation3 + $0x578] sm:$0xff] }
 0x62e   :  { %3791 = vmatpush.msrb.mxu2 %v9391_v56  ;;  %3808 = vmatpush.msrb.mxu3 %v12236_v19  ;;  %v12242_v56 = vld [vmem:[#allocation93_spill] sm:$0xff]  ;;  %v10073_v39 = vld [vmem:[#allocation3 + $0x78] sm:$0xff] }
 0x62f   :  { %3752 = vmatpush.msrb.mxu0 %v12237_v50  ;;  %3769 = vmatpush.msrb.mxu1 %v12238_v11  ;;  %v10076_v52 = vld [vmem:[#allocation3 + $0x538] sm:$0xff]  ;;  %v5691_v11 = vld [vmem:[#allocation3 + $0x3c0] sm:$0xff] }
 0x630   :  { %3792 = vmatpush.msrb.mxu2 %v12239_v20  ;;  %3809 = vmatpush.msrb.mxu3 %v12240_v27  ;;  %v10083_v0 = vld [vmem:[#allocation3 + $0x38] sm:$0xff]  ;;  %v5692_v20 = vld [vmem:[#allocation3 + $0x3c8] sm:$0xff] }
 0x631   :  { %3753 = vmatmul.f32.vlgmr.msrb.gmra.mxu0 %v9909_v34  ;;  %3793 = vmatmul.f32.vlgmr.msrb.gmra.mxu2 %v9909_v34  ;;  %v10086_v29 = vld [vmem:[#allocation3 + $0x4f8] sm:$0xff] }
 0x632   :  { %3839 = vmatpush.msra.mxu0 %v12241_v47  ;;  %3879 = vmatpush.msra.mxu2 %v9982_v7  ;;  %v12275_v19 = vld [vmem:[#allocation128_spill] sm:$0xff] }
 0x633   :  { %3770 = vmatpush.msrb.mxu1 %v9415_v62  ;;  %3810 = vmatpush.msrb.mxu3 %v12242_v56  ;;  %v12246_v62 = vld [vmem:[#allocation95_spill] sm:$0xff]  ;;  %v12276_v27 = vld [vmem:[#allocation112_spill] sm:$0xff] }
 0x634   :  { %3840 = vmatpush.msra.mxu0 %v12243_v48  ;;  %3880 = vmatpush.msra.mxu2 %v9988_v1  ;;  %v10092_v50 = vld [vmem:[#allocation3 + $0x4b8] sm:$0xff]  ;;  %v5694_v56 = vld [vmem:[#allocation3 + $0x380] sm:$0xff]  ;;  %v5695_v48 = vld [vmem:[#allocation3 + $0x388] sm:$0xff] }
 0x635   :  { %3771 = vmatpush.msrb.mxu1 %v9425_v24  ;;  %3811 = vmatpush.msrb.mxu3 %v12244_v31  ;;  %v10003_v24 = vld [vmem:[#allocation3 + $0x338] sm:$0xff] }
 0x636   :  { %3841 = vmatpush.msra.mxu0 %v9431_v35  ;;  %3881 = vmatpush.msra.mxu2 %v9994_v53  ;;  %v12249_v35 = vld [vmem:[#allocation22_spill] sm:$0xff]  ;;  %v10096_v47 = vld [vmem:[#allocation3 + $0x478] sm:$0xff] }
 0x637   :  { %3772 = vmatpush.msrb.mxu1 %v12245_v5  ;;  %3812 = vmatpush.msrb.mxu3 %v12246_v62  ;;  %v10100_v31 = vld [vmem:[#allocation3 + $0x438] sm:$0xff]  ;;  %v5697_v5 = vld [vmem:[#allocation3 + $0x340] sm:$0xff]  ;;  %v5698_v62 = vld [vmem:[#allocation3 + $0x348] sm:$0xff] }
 0x638   :  { %3773 = vmatmul.f32.vlgmr.msrb.gmra.mxu1 %v9917_v46  ;;  %3813 = vmatmul.f32.vlgmr.msrb.gmra.mxu3 %v9917_v46 }
 0x639   :  { %3842 = vmatpush.msra.mxu0 %v12247_v28  ;;  %3859 = vmatpush.msra.mxu1 %v12248_v4  ;;  %v12278_v28 = vld [vmem:[#allocation130_spill] sm:$0xff] }
 0x63a   :  { %3882 = vmatpush.msra.mxu2 %v10003_v24  ;;  %3899 = vmatpush.msra.mxu3 %v9450_v60  ;;  %v12253_v60 = vld [vmem:[#allocation23_spill] sm:$0xff]  ;;  %v5699_v4 = vld [vmem:[#allocation3 + $0x7c8] sm:$0xff] }
 0x63b   :  { %3843 = vmatpush.msra.mxu0 %v12249_v35  ;;  %3860 = vmatpush.msra.mxu1 %v12250_v2  ;;  %v5700_v35 = vld [vmem:[#allocation3 + $0x300] sm:$0xff]  ;;  %v5701_v2 = vld [vmem:[#allocation3 + $0x308] sm:$0xff] }
 0x63c   :  { %3883 = vmatpush.msra.mxu2 %v10009_v32  ;;  %3900 = vmatpush.msra.mxu3 %v9460_v26  ;;  %v12255_v26 = vld [vmem:[#allocation16_spill] sm:$0xff] }
 0x63d   :  { %3844 = vmatpush.msra.mxu0 %v12251_v61  ;;  %3861 = vmatpush.msra.mxu1 %v12252_v18  ;;  %v12279_v61 = vld [vmem:[#allocation114_spill] sm:$0xff] }
 0x63e   :  { %3884 = vmatpush.msra.mxu2 %v10015_v55  ;;  %3901 = vmatpush.msra.mxu3 %v9470_v13  ;;  %v12257_v13 = vld [vmem:[#allocation115_spill] sm:$0xff]  ;;  %v5702_v18 = vld [vmem:[#allocation3 + $0x788] sm:$0xff] }
 0x63f   :  { %3845 = vmatpush.msra.mxu0 %v12253_v60  ;;  %3862 = vmatpush.msra.mxu1 %v12254_v49  ;;  %v5703_v60 = vld [vmem:[#allocation3 + $0x2c0] sm:$0xff]  ;;  %v5704_v49 = vld [vmem:[#allocation3 + $0x2c8] sm:$0xff] }
 0x640   :  { %3885 = vmatpush.msra.mxu2 %v10021_v23  ;;  %3902 = vmatpush.msra.mxu3 %v9480_v14  ;;  %v12259_v14 = vld [vmem:[#allocation26_spill] sm:$0xff] }
 0x641   :  { %3846 = vmatpush.msra.mxu0 %v12255_v26  ;;  %3863 = vmatpush.msra.mxu1 %v12256_v17  ;;  %v5705_v26 = vld [vmem:[#allocation3 + $0x748] sm:$0xff]  ;;  %v5706_v17 = vld [vmem:[#allocation3 + $0x280] sm:$0xff] }
 0x642   :  { %3886 = vmatpush.msra.mxu2 %v10027_v40  ;;  %3903 = vmatpush.msra.mxu3 %v9490_v10  ;;  %v12262_v10 = vld [vmem:[#allocation119_spill] sm:$0xff] }
 0x643   :  { %3847 = vmatpush.msra.mxu0 %v12257_v13  ;;  %3864 = vmatpush.msra.mxu1 %v12258_v36  ;;  %v5707_v13 = vld [vmem:[#allocation3 + $0x288] sm:$0xff]  ;;  %v5708_v36 = vld [vmem:[#allocation3 + $0x700] sm:$0xff] }
 0x644   :  { %3887 = vmatpush.msra.mxu2 %v10033_v8  ;;  %3904 = vmatpush.msra.mxu3 %v9500_v38  ;;  %v12265_v38 = vld [vmem:[#allocation121_spill] sm:$0xff] }
 0x645   :  { %3848 = vmatpush.msra.mxu0 %v12259_v14  ;;  %3865 = vmatpush.msra.mxu1 %v12260_v12  ;;  %v5709_v14 = vld [vmem:[#allocation3 + $0x708] sm:$0xff]  ;;  %v5710_v12 = vld [vmem:[#allocation3 + $0x240] sm:$0xff] }
 0x646   :  { %3888 = vmatpush.msra.mxu2 %v10039_v44  ;;  %3905 = vmatpush.msra.mxu3 %v12261_v37  ;;  %v5711_v37 = vld [vmem:[#allocation3 + $0x248] sm:$0xff] }
 0x647   :  { %3849 = vmatpush.msra.mxu0 %v12262_v10  ;;  %3866 = vmatpush.msra.mxu1 %v12263_v3  ;;  %v5712_v10 = vld [vmem:[#allocation3 + $0x6c0] sm:$0xff]  ;;  %v5713_v3 = vld [vmem:[#allocation3 + $0x6c8] sm:$0xff] }
 0x648   :  { %3889 = vmatpush.msra.mxu2 %v10045_v58  ;;  %3906 = vmatpush.msra.mxu3 %v12264_v41  ;;  %v5714_v41 = vld [vmem:[#allocation3 + $0x200] sm:$0xff] }
 0x649   :  { %3850 = vmatpush.msra.mxu0 %v12265_v38  ;;  %3867 = vmatpush.msra.mxu1 %v12266_v54  ;;  %v5715_v38 = vld [vmem:[#allocation3 + $0x208] sm:$0xff]  ;;  %v5716_v54 = vld [vmem:[#allocation3 + $0x680] sm:$0xff] }
 0x64a   :  { %3890 = vmatpush.msra.mxu2 %v10051_v9  ;;  %3907 = vmatpush.msra.mxu3 %v12267_v51  ;;  %v5717_v51 = vld [vmem:[#allocation3 + $0x688] sm:$0xff] }
 0x64b   :  { %3851 = vmatpush.msra.mxu0 %v12268_v21  ;;  %3868 = vmatpush.msra.mxu1 %v12269_v25  ;;  %v5718_v21 = vld [vmem:[#allocation3 + $0x1c0] sm:$0xff]  ;;  %v5719_v25 = vld [vmem:[#allocation3 + $0x1c8] sm:$0xff] }
 0x64c   :  { %3891 = vmatpush.msra.mxu2 %v10057_v15  ;;  %3908 = vmatpush.msra.mxu3 %v10060_v43 }
 0x64d   :  { %3852 = vmatpush.msra.mxu0 %v12270_v33  ;;  %3869 = vmatpush.msra.mxu1 %v12271_v57  ;;  %v5720_v33 = vld [vmem:[#allocation3 + $0x640] sm:$0xff]  ;;  %v5721_v57 = vld [vmem:[#allocation3 + $0x648] sm:$0xff] }
 0x64e   :  { %3892 = vmatpush.msra.mxu2 %v10065_v22  ;;  %3909 = vmatpush.msra.mxu3 %v10068_v6 }
 0x64f   :  { %3853 = vmatpush.msra.mxu0 %v12272_v42  ;;  %3870 = vmatpush.msra.mxu1 %v12273_v59  ;;  %v5722_v42 = vld [vmem:[#allocation3 + $0x180] sm:$0xff]  ;;  %v5723_v59 = vld [vmem:[#allocation3 + $0x188] sm:$0xff] }
 0x650   :  { %3893 = vmatpush.msra.mxu2 %v10073_v39  ;;  %3910 = vmatpush.msra.mxu3 %v10076_v52 }
 0x651   :  { %3854 = vmatpush.msra.mxu0 %v10079_v63  ;;  %3871 = vmatpush.msra.mxu1 %v12274_v45  ;;  %v5724_v45 = vld [vmem:[#allocation3 + $0x600] sm:$0xff] }
 0x652   :  { %3894 = vmatpush.msra.mxu2 %v10083_v0  ;;  %3911 = vmatpush.msra.mxu3 %v10086_v29 }
 0x653   :  { %3855 = vmatmul.f32.vlgmr.msra.gmra.mxu0 %v9909_v34  ;;  %3895 = vmatmul.f32.vlgmr.msra.gmra.mxu2 %v9909_v34  ;;  %v12277_v34 = vld [vmem:[#allocation129_spill] sm:$0xff] }
 0x654   :  { %3872 = vmatpush.msra.mxu1 %v12275_v19  ;;  %3912 = vmatpush.msra.mxu3 %v10092_v50  ;;  %v5725_v19 = vld [vmem:[#allocation3 + $0x608] sm:$0xff] }
 0x655   :  { %3983 = vmatpush.msrb.mxu0 %v5691_v11  ;;  %4023 = vmatpush.msrb.mxu2 %v5692_v20  ;;  %v5726_v11 = vld [vmem:[#allocation3 + $0x140] sm:$0xff]  ;;  %v5727_v20 = vld [vmem:[#allocation3 + $0x148] sm:$0xff] }
 0x656   :  { %3873 = vmatpush.msra.mxu1 %v12276_v27  ;;  %3913 = vmatpush.msra.mxu3 %v10096_v47  ;;  %v5728_v27 = vld [vmem:[#allocation3 + $0x5c0] sm:$0xff] }
 0x657   :  { %3984 = vmatpush.msrb.mxu0 %v5694_v56  ;;  %4024 = vmatpush.msrb.mxu2 %v5695_v48  ;;  %v5729_v56 = vld [vmem:[#allocation3 + $0x5c8] sm:$0xff]  ;;  %v5730_v48 = vld [vmem:[#allocation3 + $0x100] sm:$0xff] }
 0x658   :  { %3874 = vmatpush.msra.mxu1 %v12277_v34  ;;  %3914 = vmatpush.msra.mxu3 %v10100_v31  ;;  %v5731_v34 = vld [vmem:[#allocation3 + $0x108] sm:$0xff] }
 0x659   :  { %3875 = vmatmul.f32.vlgmr.msra.gmra.mxu1 %v9917_v46  ;;  %3915 = vmatmul.f32.vlgmr.msra.gmra.mxu3 %v9917_v46  ;;  %v12280_v46 = vld [vmem:[#allocation28_spill] sm:$0xff] }
 0x65a   :  { %3985 = vmatpush.msrb.mxu0 %v5697_v5  ;;  %4025 = vmatpush.msrb.mxu2 %v5698_v62  ;;  %v5732_v5 = vld [vmem:[#allocation3 + $0x580] sm:$0xff]  ;;  %v5733_v62 = vld [vmem:[#allocation3 + $0x588] sm:$0xff] }
 0x65b   :  { %4003 = vmatpush.msrb.mxu1 %v12278_v28  ;;  %4043 = vmatpush.msrb.mxu3 %v5699_v4  ;;  %v5734_v28 = vld [vmem:[#allocation3 + $0xc0] sm:$0xff]  ;;  %v5735_v4 = vld [vmem:[#allocation3 + $0xc8] sm:$0xff] }
 0x65c   :  { %3986 = vmatpush.msrb.mxu0 %v5700_v35  ;;  %4026 = vmatpush.msrb.mxu2 %v5701_v2  ;;  %v5736_v35 = vld [vmem:[#allocation3 + $0x540] sm:$0xff]  ;;  %v5737_v2 = vld [vmem:[#allocation3 + $0x548] sm:$0xff] }
 0x65d   :  { %4004 = vmatpush.msrb.mxu1 %v12279_v61  ;;  %4044 = vmatpush.msrb.mxu3 %v5702_v18  ;;  %v5738_v61 = vld [vmem:[#allocation3 + $0x80] sm:$0xff]  ;;  %v5739_v18 = vld [vmem:[#allocation3 + $0x88] sm:$0xff] }
 0x65e   :  { %3987 = vmatpush.msrb.mxu0 %v5703_v60  ;;  %4027 = vmatpush.msrb.mxu2 %v5704_v49  ;;  %v5740_v60 = vld [vmem:[#allocation3 + $0x500] sm:$0xff]  ;;  %v5741_v49 = vld [vmem:[#allocation3 + $0x508] sm:$0xff] }
 0x65f   :  { %4005 = vmatpush.msrb.mxu1 %v12280_v46  ;;  %4045 = vmatpush.msrb.mxu3 %v5705_v26  ;;  %v5742_v46 = vld [vmem:[#allocation3 + $0x40] sm:$0xff]  ;;  %v12281_v26 = vld [vmem:[#allocation131_spill] sm:$0xff] }
 0x660   :  { %3988 = vmatpush.msrb.mxu0 %v5706_v17  ;;  %4028 = vmatpush.msrb.mxu2 %v5707_v13  ;;  %v5743_v17 = vld [vmem:[#allocation3 + $0x4c0] sm:$0xff]  ;;  %v5744_v13 = vld [vmem:[#allocation3 + $0x4c8] sm:$0xff] }
 0x661   :  { %4006 = vmatpush.msrb.mxu1 %v5708_v36  ;;  %4046 = vmatpush.msrb.mxu3 %v5709_v14  ;;  %v5745_v36 = vld [vmem:[#allocation3] sm:$0xff] }
 0x662   :  { %3989 = vmatpush.msrb.mxu0 %v5710_v12  ;;  %4029 = vmatpush.msrb.mxu2 %v5711_v37  ;;  %v12282_v14 = vld [vmem:[#allocation116_spill] sm:$0xff]  ;;  %v5746_v12 = vld [vmem:[#allocation3 + $0x3d0] sm:$0xff] }
 0x663   :  { %4007 = vmatpush.msrb.mxu1 %v5712_v10  ;;  %4047 = vmatpush.msrb.mxu3 %v5713_v3  ;;  %v12283_v37 = vld [vmem:[#allocation31_spill] sm:$0xff]  ;;  %v5747_v10 = vld [vmem:[#allocation3 + $0x480] sm:$0xff]  ;;  %v5748_v3 = vld [vmem:[#allocation3 + $0x488] sm:$0xff] }
 0x664   :  { %3990 = vmatpush.msrb.mxu0 %v5714_v41  ;;  %4030 = vmatpush.msrb.mxu2 %v5715_v38  ;;  %v5749_v41 = vld [vmem:[#allocation3 + $0x390] sm:$0xff]  ;;  %v12284_v38 = vld [vmem:[#allocation132_spill] sm:$0xff] }
 0x665   :  { %4008 = vmatpush.msrb.mxu1 %v5716_v54  ;;  %4048 = vmatpush.msrb.mxu3 %v5717_v51  ;;  %v5750_v54 = vld [vmem:[#allocation3 + $0x440] sm:$0xff]  ;;  %v12285_v51 = vld [vmem:[#allocation118_spill] sm:$0xff] }
 0x666   :  { %3991 = vmatpush.msrb.mxu0 %v5718_v21  ;;  %4031 = vmatpush.msrb.mxu2 %v5719_v25  ;;  %v5751_v21 = vld [vmem:[#allocation3 + $0x350] sm:$0xff] }
 0x667   :  { %4009 = vmatpush.msrb.mxu1 %v5720_v33  ;;  %4049 = vmatpush.msrb.mxu3 %v5721_v57  ;;  %v12286_v25 = vld [vmem:[#allocation34_spill] sm:$0xff]  ;;  %v5752_v33 = vld [vmem:[#allocation3 + $0x400] sm:$0xff] }
 0x668   :  { %3992 = vmatpush.msrb.mxu0 %v5722_v42  ;;  %4032 = vmatpush.msrb.mxu2 %v5723_v59  ;;  %v12287_v57 = vld [vmem:[#allocation133_spill] sm:$0xff]  ;;  %v5753_v42 = vld [vmem:[#allocation3 + $0x310] sm:$0xff] }
 0x669   :  { %4010 = vmatpush.msrb.mxu1 %v5724_v45  ;;  %4050 = vmatpush.msrb.mxu3 %v5725_v19  ;;  %v5754_v59 = vld [vmem:[#allocation3 + $0x7d0] sm:$0xff]  ;;  %v12288_v45 = vld [vmem:[#allocation120_spill] sm:$0xff] }
 0x66a   :  { %3993 = vmatpush.msrb.mxu0 %v5726_v11  ;;  %4033 = vmatpush.msrb.mxu2 %v5727_v20  ;;  %v12289_v19 = vld [vmem:[#allocation36_spill] sm:$0xff]  ;;  %v5755_v11 = vld [vmem:[#allocation3 + $0x2d0] sm:$0xff] }
 0x66b   :  { %4011 = vmatpush.msrb.mxu1 %v5728_v27  ;;  %4051 = vmatpush.msrb.mxu3 %v5729_v56  ;;  %v5756_v20 = vld [vmem:[#allocation3 + $0x790] sm:$0xff] }
 0x66c   :  { %3994 = vmatpush.msrb.mxu0 %v5730_v48  ;;  %4034 = vmatpush.msrb.mxu2 %v5731_v34  ;;  %v12290_v27 = vld [vmem:[#allocation122_spill] sm:$0xff]  ;;  %v12291_v56 = vld [vmem:[#allocation55_spill] sm:$0xff] }
 0x66d   :  { %4012 = vmatpush.msrb.mxu1 %v5732_v5  ;;  %4052 = vmatpush.msrb.mxu3 %v5733_v62  ;;  %v5757_v48 = vld [vmem:[#allocation3 + $0x290] sm:$0xff]  ;;  %v12292_v5 = vld [vmem:[#allocation125_spill] sm:$0xff] }
 0x66e   :  { %3995 = vmatpush.msrb.mxu0 %v5734_v28  ;;  %4035 = vmatpush.msrb.mxu2 %v5735_v4  ;;  %v5758_v34 = vld [vmem:[#allocation3 + $0x750] sm:$0xff]  ;;  %v12293_v62 = vld [vmem:[#allocation25_spill] sm:$0xff] }
 0x66f   :  { %4013 = vmatpush.msrb.mxu1 %v5736_v35  ;;  %4053 = vmatpush.msrb.mxu3 %v5737_v2  ;;  %v5759_v28 = vld [vmem:[#allocation3 + $0x250] sm:$0xff] }
 0x670   :  { %3996 = vmatpush.msrb.mxu0 %v5738_v61  ;;  %4036 = vmatpush.msrb.mxu2 %v5739_v18  ;;  %v5760_v4 = vld [vmem:[#allocation3 + $0x710] sm:$0xff] }
 0x671   :  { %4014 = vmatpush.msrb.mxu1 %v5740_v60  ;;  %4054 = vmatpush.msrb.mxu3 %v5741_v49  ;;  %v12294_v35 = vld [vmem:[#allocation39_spill] sm:$0xff]  ;;  %v12297_v49 = vld [vmem:[#allocation42_spill] sm:$0xff] }
 0x672   :  { %3997 = vmatpush.msrb.mxu0 %v5742_v46  ;;  %4037 = vmatpush.msrb.mxu2 %v12281_v26  ;;  %v12295_v2 = vld [vmem:[#allocation59_spill] sm:$0xff] }
 0x673   :  { %4015 = vmatpush.msrb.mxu1 %v5743_v17  ;;  %4055 = vmatpush.msrb.mxu3 %v5744_v13  ;;  %v5761_v61 = vld [vmem:[#allocation3 + $0x210] sm:$0xff]  ;;  %v12300_v13 = vld [vmem:[#allocation44_spill] sm:$0xff] }
 0x674   :  { %3998 = vmatpush.msrb.mxu0 %v5745_v36  ;;  %4038 = vmatpush.msrb.mxu2 %v12282_v14  ;;  %v5762_v18 = vld [vmem:[#allocation3 + $0x6d0] sm:$0xff] }
 0x675   :  { %4016 = vmatpush.msrb.mxu1 %v5747_v10  ;;  %4056 = vmatpush.msrb.mxu3 %v5748_v3  ;;  %v12296_v60 = vld [vmem:[#allocation27_spill] sm:$0xff]  ;;  %v12299_v17 = vld [vmem:[#allocation30_spill] sm:$0xff] }
 0x676   :  { %4109 = vmatpush.msra.mxu0 %v5746_v12  ;;  %4149 = vmatpush.msra.mxu2 %v12283_v37  ;;  %v12298_v46 = vld [vmem:[#allocation63_spill] sm:$0xff]  ;;  %v12302_v12 = vld [vmem:[#allocation33_spill] sm:$0xff]  ;;  %v12303_v37 = vld [vmem:[#allocation46_spill] sm:$0xff] }
 0x677   :  { %4017 = vmatpush.msrb.mxu1 %v5750_v54  ;;  %4057 = vmatpush.msrb.mxu3 %v12285_v51  ;;  %v5763_v26 = vld [vmem:[#allocation3 + $0x690] sm:$0xff] }
 0x678   :  { %4110 = vmatpush.msra.mxu0 %v5749_v41  ;;  %4150 = vmatpush.msra.mxu2 %v12284_v38  ;;  %v12301_v36 = vld [vmem:[#allocation67_spill] sm:$0xff]  ;;  %v12305_v41 = vld [vmem:[#allocation41_spill] sm:$0xff] }
 0x679   :  { %4018 = vmatpush.msrb.mxu1 %v5752_v33  ;;  %4058 = vmatpush.msrb.mxu3 %v12287_v57  ;;  %v5764_v14 = vld [vmem:[#allocation3 + $0x650] sm:$0xff]  ;;  %v12311_v57 = vld [vmem:[#allocation64_spill] sm:$0xff] }
 0x67a   :  { %4111 = vmatpush.msra.mxu0 %v5751_v21  ;;  %4151 = vmatpush.msra.mxu2 %v12286_v25  ;;  %v12304_v10 = vld [vmem:[#allocation71_spill] sm:$0xff]  ;;  %v12308_v21 = vld [vmem:[#allocation49_spill] sm:$0xff]  ;;  %v12309_v25 = vld [vmem:[#allocation50_spill] sm:$0xff] }
 0x67b   :  { %4129 = vmatpush.msra.mxu1 %v5754_v59  ;;  %4169 = vmatpush.msra.mxu3 %v12289_v19  ;;  %v5765_v3 = vld [vmem:[#allocation3 + $0x610] sm:$0xff]  ;;  %v12313_v59 = vld [vmem:[#allocation68_spill] sm:$0xff] }
 0x67c   :  { %4112 = vmatpush.msra.mxu0 %v5753_v42  ;;  %4152 = vmatpush.msra.mxu2 %v12288_v45  ;;  %v12306_v38 = vld [vmem:[#allocation35_spill] sm:$0xff]  ;;  %v12312_v42 = vld [vmem:[#allocation38_spill] sm:$0xff]  ;;  %v12314_v45 = vld [vmem:[#allocation52_spill] sm:$0xff] }
 0x67d   :  { %4130 = vmatpush.msra.mxu1 %v5756_v20  ;;  %4170 = vmatpush.msra.mxu3 %v12291_v56  ;;  %v12307_v54 = vld [vmem:[#allocation83_spill] sm:$0xff]  ;;  %v12315_v19 = vld [vmem:[#allocation72_spill] sm:$0xff] }
 0x67e   :  { %4113 = vmatpush.msra.mxu0 %v5755_v11  ;;  %4153 = vmatpush.msra.mxu2 %v12290_v27  ;;  %v5766_v51 = vld [vmem:[#allocation3 + $0x5d0] sm:$0xff]  ;;  %v12317_v20 = vld [vmem:[#allocation76_spill] sm:$0xff] }
 0x67f   :  { %4131 = vmatpush.msra.mxu1 %v5758_v34  ;;  %4171 = vmatpush.msra.mxu3 %v12293_v62  ;;  %v12310_v33 = vld [vmem:[#allocation75_spill] sm:$0xff]  ;;  %v12319_v56 = vld [vmem:[#allocation56_spill] sm:$0xff]  ;;  %v12323_v62 = vld [vmem:[#allocation81_spill] sm:$0xff] }
 0x680   :  { %4114 = vmatpush.msra.mxu0 %v5757_v48  ;;  %4154 = vmatpush.msra.mxu2 %v12292_v5  ;;  %v12316_v11 = vld [vmem:[#allocation79_spill] sm:$0xff]  ;;  %v12320_v48 = vld [vmem:[#allocation77_spill] sm:$0xff]  ;;  %v12321_v34 = vld [vmem:[#allocation60_spill] sm:$0xff] }
 0x681   :  { %4132 = vmatpush.msra.mxu1 %v5760_v4  ;;  %4172 = vmatpush.msra.mxu3 %v12295_v2  ;;  %v12318_v27 = vld [vmem:[#allocation47_spill] sm:$0xff]  ;;  %v12322_v5 = vld [vmem:[#allocation53_spill] sm:$0xff]  ;;  %v12327_v2 = vld [vmem:[#allocation40_spill] sm:$0xff] }
 0x682   :  { %4115 = vmatpush.msra.mxu0 %v5759_v28  ;;  %4155 = vmatpush.msra.mxu2 %v12294_v35  ;;  %v12324_v28 = vld [vmem:[#allocation37_spill] sm:$0xff]  ;;  %v12326_v35 = vld [vmem:[#allocation54_spill] sm:$0xff] }
 0x683   :  { %4133 = vmatpush.msra.mxu1 %v5762_v18  ;;  %4173 = vmatpush.msra.mxu3 %v12297_v49  ;;  %v12325_v4 = vld [vmem:[#allocation57_spill] sm:$0xff]  ;;  %v12329_v18 = vld [vmem:[#allocation82_spill] sm:$0xff] }
 0x684   :  { %4116 = vmatpush.msra.mxu0 %v5761_v61  ;;  %4156 = vmatpush.msra.mxu2 %v12296_v60  ;;  %v12328_v61 = vld [vmem:[#allocation61_spill] sm:$0xff]  ;;  %v12330_v60 = vld [vmem:[#allocation43_spill] sm:$0xff]  ;;  %v12331_v49 = vld [vmem:[#allocation58_spill] sm:$0xff] }
 0x685   :  { %4134 = vmatpush.msra.mxu1 %v5763_v26  ;;  %4174 = vmatpush.msra.mxu3 %v12300_v13 }
 0x686   :  { %4117 = vmatpush.msra.mxu0 %v12298_v46  ;;  %4157 = vmatpush.msra.mxu2 %v12299_v17 }
 0x687   :  { %4135 = vmatpush.msra.mxu1 %v5764_v14  ;;  %4175 = vmatpush.msra.mxu3 %v12303_v37 }
 0x688   :  { %4118 = vmatpush.msra.mxu0 %v12301_v36  ;;  %4158 = vmatpush.msra.mxu2 %v12302_v12 }
 0x689   :  { %4136 = vmatpush.msra.mxu1 %v5765_v3  ;;  %4176 = vmatpush.msra.mxu3 %v12306_v38 }
 0x68a   :  { %4119 = vmatpush.msra.mxu0 %v12304_v10  ;;  %4159 = vmatpush.msra.mxu2 %v12305_v41 }
 0x68b   :  { %4137 = vmatpush.msra.mxu1 %v5766_v51  ;;  %4177 = vmatpush.msra.mxu3 %v12309_v25  ;;  %v3502_v26 = vpop.f32.mrf.mxu0  ;;  %v3471_v51 = vld [vmem:[#allocation2 + $0x40] sm:$0x30] }
 0x68c   :  { %4120 = vmatpush.msra.mxu0 %v12307_v54  ;;  %4160 = vmatpush.msra.mxu2 %v12308_v21 }
 0x68d   :  { %4138 = vmatpush.msra.mxu1 %v12311_v57  ;;  %4178 = vmatpush.msra.mxu3 %v12313_v59 }
 0x68e   :  { %4121 = vmatpush.msra.mxu0 %v12310_v33  ;;  %4161 = vmatpush.msra.mxu2 %v12312_v42  ;;  %v3473_v33 = vld [vmem:[#allocation2 + $0x10] sm:$0x30] }
 0x68f   :  { %4139 = vmatpush.msra.mxu1 %v12315_v19  ;;  %4179 = vmatpush.msra.mxu3 %v12317_v20  ;;  %v3472_v19 = vld [vmem:[#allocation2 + $0x20] sm:$0x30] }
 0x690   :  { %4122 = vmatpush.msra.mxu0 %v12314_v45  ;;  %4162 = vmatpush.msra.mxu2 %v12316_v11 }
 0x691   :  { %4140 = vmatpush.msra.mxu1 %v12319_v56  ;;  %4180 = vmatpush.msra.mxu3 %v12321_v34  ;;  %v3522_v46 = vpop.f32.mrf.mxu1  ;;  %v3542_v13 = vpop.f32.mrf.mxu2 }
 0x692   :  { %4123 = vmatpush.msra.mxu0 %v12318_v27  ;;  %4163 = vmatpush.msra.mxu2 %v12320_v48  ;;  %v3523_v14 = vadd.f32 %v3522_v46, %v3502_v26  ;;  %v3474_v27 = vld [vmem:[#allocation2 + $0x38] sm:$0x30] }
 0x693   :  { %4141 = vmatpush.msra.mxu1 %v12323_v62  ;;  %4181 = vmatpush.msra.mxu3 %v12325_v4 }
 0x694   :  { %4124 = vmatpush.msra.mxu0 %v12322_v5  ;;  %4164 = vmatpush.msra.mxu2 %v12324_v28  ;;  %v3628_v12 = vpop.f32.mrf.mxu0  ;;  %v3567_v10 = vrot.slane %v3523_v14, 4 }
 0x695   :  { %4142 = vmatpush.msra.mxu1 %v12326_v35  ;;  %4182 = vmatpush.msra.mxu3 %v12327_v2 }
 0x696   :  { %v3571_v25 = vadd.f32 %v3567_v10, %v3471_v51 }
 0x697   :  { %4143 = vmatpush.msra.mxu1 %v12328_v61  ;;  %4183 = vmatpush.msra.mxu3 %v12329_v18  ;;  %v3562_v17 = vpop.f32.mrf.mxu3 }
 0x698   :  { %v3563_v38 = vadd.f32 %v3562_v17, %v3542_v13  ;;  %v4644_v45 = vmul.f32 -1.442695, %v3571_v25 }
 0x699   :  { %4144 = vmatpush.msra.mxu1 %v12330_v60  ;;  %4184 = vmatpush.msra.mxu3 %v12331_v49 }
 0x69a   :  { %v3668_v54 = vpop.f32.mrf.mxu2  ;;  %v3568_v42 = vrot.slane %v3563_v38, 4  ;;  %4854 = vpow2.f32 %v4644_v45 }
 0x69b   :  { %v3648_v36 = vpop.f32.mrf.mxu1 }
 0x69c   :  { %v3649_v37 = vadd.f32 %v3648_v36, %v3628_v12  ;;  %v3572_v20 = vadd.f32 %v3568_v42, %v3472_v19  ;;  %v3475_v19 = vld [vmem:[#allocation2 + $0x60] sm:$0x30] }
 0x69e   :  { %v3693_v41 = vrot.slane %v3649_v37, 4  ;;  %v4645_v48 = vmul.f32 -1.442695, %v3572_v20 }
 0x6a0   :  { %v3697_v57 = vadd.f32 %v3693_v41, %v3473_v33  ;;  %v4855_v5 = vpop.eup %4854  ;;  %v3477_v33 = vld [vmem:[#allocation2 + $0x78] sm:$0x30] }
 0x6a1   :  { %v3688_v3 = vpop.f32.mrf.mxu3  ;;  %v10159_v28 = vadd.f32 1.0, %v4855_v5 }
 0x6a2   :  { %v3689_v21 = vadd.f32 %v3688_v3, %v3668_v54  ;;  %v4646_v11 = vmul.f32 -1.442695, %v3697_v57 }
 0x6a3   :  { %vm3586_vm3 = vweird.f32 %v10159_v28 }
 0x6a4   :  { %v3694_v59 = vrot.slane %v3689_v21, 4  ;;  %4856 = vpow2.f32 %v4646_v11 }
 0x6a5   :  { %4858 = vpow2.f32 %v4645_v48 }
 0x6a6   :  { %v3698_v56 = vadd.f32 %v3694_v59, %v3474_v27 }
 0x6a8   :  { %v4647_v34 = vmul.f32 -1.442695, %v3698_v56 }
 0x6aa   :  { %v4857_v62 = vpop.eup %4856  ;;  %4860 = vpow2.f32 %v4647_v34 }
 0x6ab   :  { %v10161_v4 = vadd.f32 1.0, %v4857_v62  ;;  %v4859_v35 = vpop.eup %4858  ;;  %4862 = vrcp.f32 %v10159_v28 }
 0x6ac   :  { %v10165_v61 = vadd.f32 1.0, %v4859_v35 }
 0x6ad   :  { %4864 = vrcp.f32 %v10161_v4  ;;  %vm3712_vm4 = vweird.f32 %v10161_v4 }
 0x6ae   :  { %v3754_v18 = vpop.f32.mrf.mxu0  ;;  %4866 = vrcp.f32 %v10165_v61  ;;  %vm3601_vm8 = vweird.f32 %v10165_v61 }
 0x6b0   :  { %v4861_v2 = vpop.eup %4860 }
 0x6b1   :  { %v10167_v49 = vadd.f32 1.0, %v4861_v2  ;;  %v10169_v46 = vpop.eup %4862 }
 0x6b2   :  { %v3582_v14 = vmul.f32 %v10169_v46, %v10159_v28  ;;  %vm3587_vm1 = vweird.f32 %v10169_v46 }
 0x6b3   :  { %v10172_v26 = vpop.eup %4864  ;;  %4868 = vrcp.f32 %v10167_v49  ;;  %vm10202_vm5 = vmor %vm3586_vm3, %vm3587_vm1  ;;  %vm3727_vm12 = vweird.f32 %v10167_v49 }
 0x6b4   :  { %v3794_v17 = vpop.f32.mrf.mxu2  ;;  %v3708_v12 = vmul.f32 %v10172_v26, %v10161_v4  ;;  %v10179_v41 = vpop.eup %4866  ;;  %v3583_v21 = vsub.f32 1.0, %v3582_v14  ;;  %vm3713_vm2 = vweird.f32 %v10172_v26 }
 0x6b5   :  { %v3774_v60 = vpop.f32.mrf.mxu1  ;;  %v3597_v59 = vmul.f32 %v10179_v41, %v10165_v61  ;;  %vm10210_vm6 = vmor %vm3712_vm4, %vm3713_vm2  ;;  %vm3602_vm10 = vweird.f32 %v10179_v41 }
 0x6b6   :  { %v3775_v36 = vadd.f32 %v3774_v60, %v3754_v18  ;;  %v3709_v25 = vsub.f32 1.0, %v3708_v12  ;;  %v3584_v5 = vmul.f32 %v10169_v46, %v3583_v21  ;;  %v3590_v60 = vand.u32 2147483647, %v10159_v28  ;;  %vm10236_vm13 = vmor %vm3601_vm8, %vm3602_vm10 }
 0x6b7   :  { %v3598_v2 = vsub.f32 1.0, %v3597_v59 }
 0x6b8   :  { %v3819_v54 = vrot.slane %v3775_v36, 4  ;;  %v3710_v34 = vmul.f32 %v10172_v26, %v3709_v25  ;;  %v3585_v14 = vadd.f32 %v10169_v46, %v3584_v5  ;;  %vm10214_vm7 = vcmp.eq.f32.partialorder %v3590_v60, 8.507059e+37 }
 0x6b9   :  { %v10181_v38 = vpop.eup %4868 }
 0x6ba   :  { %v3723_v45 = vmul.f32 %v10181_v38, %v10167_v49  ;;  %v3823_v27 = vadd.f32 %v3819_v54, %v3475_v19  ;;  %v3711_v12 = vadd.f32 %v10172_v26, %v3710_v34  ;;  %vm3728_vm11 = vweird.f32 %v10181_v38 }
 0x6bb   :  { %v3814_v13 = vpop.f32.mrf.mxu3  ;;  %v3607_v34 = vand.u32 2147483648, %v10165_v61  ;;  %vm3729_vm14 = vmor %vm3727_vm12, %vm3728_vm11 }
 0x6bc   :  { %v3815_v57 = vadd.f32 %v3814_v13, %v3794_v17  ;;  %v3724_v18 = vsub.f32 1.0, %v3723_v45  ;;  %v3478_v17 = vld [vmem:[#allocation2 + $0x28] sm:$0x30]  ;;  %v3592_v13 = vand.u32 2147483648, %v10159_v28  ;;  %v3599_v28 = vmul.f32 %v10179_v41, %v3598_v2 }
 0x6bd   :  { %v3589_v45 = vsel %vm10202_vm5, %v10169_v46, %v3585_v14  ;;  %v3733_v46 = vand.u32 2147483648, %v10167_v49  ;;  %v3731_v2 = vand.u32 2147483647, %v10167_v49 }
 0x6be   :  { %v3820_v62 = vrot.slane %v3815_v57, 4  ;;  %v3725_v21 = vmul.f32 %v10181_v38, %v3724_v18  ;;  %v3829_v57 = vrot.slane %v9902_v30, 6  ;;  %v3593_v59 = vor.u32 1.1754944e-38, %v3592_v13 }
 0x6bf   :  { %v3715_v30 = vsel %vm10210_vm6, %v10172_v26, %v3711_v12  ;;  %v3734_v12 = vor.u32 1.1754944e-38, %v3733_v46  ;;  %vm3732_vm0 = vcmp.eq.f32.partialorder %v3731_v2, 8.507059e+37  ;;  %v5767_v2 = vld [vmem:[#allocation3 + $0x3e0] sm:$0xff] }
 0x6c0   :  { %v3594_v26 = vsel %vm10214_vm7, %v3593_v59, %v3589_v45 }
 0x6d0   :  { %v3856_v37 = vpop.f32.mrf.mxu0 }
 0x6d6   :  { %v3876_v10 = vpop.f32.mrf.mxu1  ;;  %v3896_v11 = vpop.f32.mrf.mxu2 }
 0x6d7   :  { %v3877_v3 = vadd.f32 %v3876_v10, %v3856_v37  ;;  %v3476_v37 = vld [vmem:[#allocation2 + $0x70] sm:$0x30]  ;;  %v3718_v10 = vand.u32 2147483648, %v10161_v4 }
 0x6d8   :  { %v3824_v54 = vadd.f32 %v3820_v62, %v3476_v37  ;;  %v3608_v37 = vor.u32 1.1754944e-38, %v3607_v34 }
 0x6d9   :  { %v3921_v51 = vrot.slane %v3877_v3, 4  ;;  %v3716_v3 = vand.u32 2147483647, %v10161_v4 }
 0x6db   :  { %v3925_v42 = vadd.f32 %v3921_v51, %v3477_v33  ;;  %vm3717_vm9 = vcmp.eq.f32.partialorder %v3716_v3, 8.507059e+37 }
 0x6dc   :  { %v3916_v20 = vpop.f32.mrf.mxu3 }
 0x6dd   :  { %v4648_v56 = vmul.f32 -1.442695, %v3925_v42  ;;  %v3917_v48 = vadd.f32 %v3916_v20, %v3896_v11  ;;  %v3719_v20 = vor.u32 1.1754944e-38, %v3718_v10 }
 0x6df   :  { %4870 = vpow2.f32 %v4648_v56  ;;  %v3922_v35 = vrot.slane %v3917_v48, 4  ;;  %v3726_v56 = vadd.f32 %v10181_v38, %v3725_v21  ;;  %v3720_v48 = vsel %vm3717_vm9, %v3719_v20, %v3715_v30 }
 0x6e0   :  { %4872 = vtanh.f32 %v3823_v27  ;;  %v3600_v27 = vadd.f32 %v10179_v41, %v3599_v28  ;;  %v3833_v60 = vmul.f32 %v3829_v57, %v3720_v48 }
 0x6e1   :  { %v3926_v36 = vadd.f32 %v3922_v35, %v3478_v17  ;;  %v3605_v35 = vand.u32 2147483647, %v10165_v61  ;;  %v3730_v13 = vsel %vm3729_vm14, %v10181_v38, %v3726_v56 }
 0x6e2   :  { %v3604_v17 = vsel %vm10236_vm13, %v10179_v41, %v3600_v27  ;;  %v3735_v49 = vsel %vm3732_vm0, %v3734_v12, %v3730_v13  ;;  %v5770_v13 = vld [vmem:[#allocation3 + $0x3a8] sm:$0xff] }
 0x6e3   :  { %v4649_v51 = vmul.f32 -1.442695, %v3926_v36  ;;  %vm3606_vm15 = vcmp.eq.f32.partialorder %v3605_v35, 8.507059e+37  ;;  %v5772_v12 = vld [vmem:[#allocation3 + $0x368] sm:$0xff] }
 0x6e4   :  { %v3609_v61 = vsel %vm3606_vm15, %v3608_v37, %v3604_v17  ;;  %v5769_v17 = vld [vmem:[#allocation3 + $0x3a0] sm:$0xff] }
 0x6e5   :  { %v4871_v33 = vpop.eup %4870  ;;  %4874 = vpow2.f32 %v4649_v51  ;;  %v3830_v51 = vrot.slane %v9906_v16, 6  ;;  %v5773_v37 = vld [vmem:[#allocation3 + $0x320] sm:$0xff] }
 0x6e6   :  { %v3933_v19 = vadd.f32 1.0, %v4871_v33  ;;  %v4873_v11 = vpop.eup %4872  ;;  %4876 = vtanh.f32 %v3824_v54 }
 0x6e7   :  { %v3835_v5 = vmul.f32 %v4873_v11, %v3594_v26  ;;  %v3834_v41 = vmul.f32 %v3830_v51, %v3735_v49  ;;  %v5776_v49 = vld [vmem:[#allocation3 + $0x7e8] sm:$0xff]  ;;  %v5778_v51 = vld [vmem:[#allocation3 + $0x7a0] sm:$0xff] }
 0x6e8   :  { %4878 = vrcp.f32 %v3933_v19  ;;  %v3946_v38 = vand.u32 2147483648, %v3933_v19  ;;  %v3944_v33 = vand.u32 2147483647, %v3933_v19  ;;  %vm3940_vm2 = vweird.f32 %v3933_v19 }
 0x6e9   :  { %v10246_v3 = vadd.f32 %v3835_v5, %v3833_v60 }
 0x6ea   :  { %v3947_v45 = vor.u32 1.1754944e-38, %v3946_v38  ;;  %vm3945_vm4 = vcmp.eq.f32.partialorder %v3944_v33, 8.507059e+37  ;;  %v5782_v38 = vld [vmem:[#allocation3 + $0x760] sm:$0xff]  ;;  %v5784_v33 = vld [vmem:[#allocation3 + $0x768] sm:$0xff] }
 0x6eb   :  { %v4875_v18 = vpop.eup %4874 }
 0x6ec   :  { %v3934_v36 = vadd.f32 1.0, %v4875_v18  ;;  %v4877_v14 = vpop.eup %4876  ;;  %v5768_v18 = vld [vmem:[#allocation3 + $0x3e8] sm:$0xff] }
 0x6ed   :  { %v3836_v21 = vmul.f32 %v4877_v14, %v3609_v61  ;;  %v5771_v14 = vld [vmem:[#allocation3 + $0x360] sm:$0xff]  ;;  %v5775_v61 = vld [vmem:[#allocation3 + $0x328] sm:$0xff] }
 0x6ee   :  { %v4879_v10 = vpop.eup %4878  ;;  %4880 = vrcp.f32 %v3934_v36  ;;  %v3961_v27 = vand.u32 2147483648, %v3934_v36  ;;  %v3959_v26 = vand.u32 2147483647, %v3934_v36  ;;  %vm3955_vm6 = vweird.f32 %v3934_v36 }
 0x6ef   :  { %v3936_v54 = vmul.f32 %v4879_v10, %v3933_v19  ;;  %4882 = vtanh.f32 %v10246_v3  ;;  %vm3941_vm1 = vweird.f32 %v4879_v10  ;;  %v10250_v42 = vadd.f32 %v3836_v21, %v3834_v41  ;;  %v5779_v21 = vld [vmem:[#allocation3 + $0x2e8] sm:$0xff]  ;;  %v5781_v41 = vld [vmem:[#allocation3 + $0x2a0] sm:$0xff] }
 0x6f0   :  { %vm3942_vm3 = vmor %vm3940_vm2, %vm3941_vm1  ;;  %v3962_v19 = vor.u32 1.1754944e-38, %v3961_v27  ;;  %vm3960_vm8 = vcmp.eq.f32.partialorder %v3959_v26, 8.507059e+37  ;;  %v5793_v27 = vld [vmem:[#allocation3 + $0x1e0] sm:$0xff]  ;;  %v5796_v26 = vld [vmem:[#allocation3 + $0x6a8] sm:$0xff] }
 0x6f1   :  { %v3937_v25 = vsub.f32 1.0, %v3936_v54  ;;  %4884 = vtanh.f32 %v10250_v42  ;;  %v5777_v54 = vld [vmem:[#allocation3 + $0x2e0] sm:$0xff] }
 0x6f3   :  { %v3938_v28 = vmul.f32 %v4879_v10, %v3937_v25  ;;  %v5780_v25 = vld [vmem:[#allocation3 + $0x7a8] sm:$0xff] }
 0x6f4   :  { %v4881_v57 = vpop.eup %4880 }
 0x6f5   :  { %v3939_v4 = vadd.f32 %v4879_v10, %v3938_v28  ;;  %v3951_v59 = vmul.f32 %v4881_v57, %v3934_v36  ;;  %v4883_v11 = vpop.eup %4882  ;;  %vm3956_vm5 = vweird.f32 %v4881_v57  ;;  %v5783_v28 = vld [vmem:[#allocation3 + $0x2a8] sm:$0xff] }
 0x6f6   :  { %vm3957_vm7 = vmor %vm3955_vm6, %vm3956_vm5 }
 0x6f7   :  { %v3943_v30 = vsel %vm3942_vm3, %v4879_v10, %v3939_v4  ;;  %v3952_v16 = vsub.f32 1.0, %v3951_v59  ;;  %v4885_v62 = vpop.eup %4884  ;;  %v5774_v10 = vld [vmem:[#allocation3 + $0x7e0] sm:$0xff]  ;;  %v5787_v59 = vld [vmem:[#allocation3 + $0x268] sm:$0xff] }
 0x6f8   :  { %v3948_v20 = vsel %vm3945_vm4, %v3947_v45, %v3943_v30  ;;  %v5786_v4 = vld [vmem:[#allocation3 + $0x720] sm:$0xff]  ;;  %v5788_v45 = vld [vmem:[#allocation3 + $0x728] sm:$0xff] }
 0x6f9   :  { %v3967_v56 = vmul.f32 %v4883_v11, %v3948_v20  ;;  %v3953_v46 = vmul.f32 %v4881_v57, %v3952_v16  ;;  %v5789_v30 = vld [vmem:[#allocation3 + $0x220] sm:$0xff]  ;;  %v5791_v11 = vld [vmem:[#allocation3 + $0x228] sm:$0xff] }
 0x6fa   :  { %v5790_v16 = vld [vmem:[#allocation3 + $0x6e0] sm:$0xff]  ;;  %v5792_v20 = vld [vmem:[#allocation3 + $0x6e8] sm:$0xff] }
 0x6fb   :  { %v10253_v48 = vrot.slane %v3967_v56, 4  ;;  %v3954_v34 = vadd.f32 %v4881_v57, %v3953_v46  ;;  %v5794_v56 = vld [vmem:[#allocation3 + $0x6a0] sm:$0xff]  ;;  %v5795_v46 = vld [vmem:[#allocation3 + $0x1e8] sm:$0xff] }
 0x6fd   :  { %v3958_v5 = vsel %vm3957_vm7, %v4881_v57, %v3954_v34  ;;  %3999 = vmatmul.f32.vlgmr.msrb.gmra.mxu0 %v10253_v48  ;;  %4039 = vmatmul.f32.vlgmr.msrb.gmra.mxu2 %v10253_v48  ;;  %v5785_v57 = vld [vmem:[#allocation3 + $0x260] sm:$0xff] }
 0x6fe   :  { %v3963_v35 = vsel %vm3960_vm8, %v3962_v19, %v3958_v5  ;;  %4235 = vmatpush.msrb.mxu0 %v5767_v2  ;;  %4275 = vmatpush.msrb.mxu2 %v5768_v18  ;;  %v5797_v34 = vld [vmem:[#allocation3 + $0x1a0] sm:$0xff]  ;;  %v5799_v5 = vld [vmem:[#allocation3 + $0x1a8] sm:$0xff] }
 0x6ff   :  { %v3968_v60 = vmul.f32 %v4885_v62, %v3963_v35  ;;  %v5798_v19 = vld [vmem:[#allocation3 + $0x660] sm:$0xff]  ;;  %v5800_v62 = vld [vmem:[#allocation3 + $0x668] sm:$0xff] }
 0x700   :  { %4236 = vmatpush.msrb.mxu0 %v5769_v17  ;;  %4276 = vmatpush.msrb.mxu2 %v5770_v13  ;;  %v5801_v35 = vld [vmem:[#allocation3 + $0x160] sm:$0xff]  ;;  %v5803_v18 = vld [vmem:[#allocation3 + $0x168] sm:$0xff] }
 0x701   :  { %v10257_v36 = vrot.slane %v3968_v60, 4  ;;  %v5802_v2 = vld [vmem:[#allocation3 + $0x620] sm:$0xff]  ;;  %v5804_v60 = vld [vmem:[#allocation3 + $0x628] sm:$0xff] }
 0x702   :  { %4237 = vmatpush.msrb.mxu0 %v5771_v14  ;;  %4277 = vmatpush.msrb.mxu2 %v5772_v12  ;;  %v5805_v17 = vld [vmem:[#allocation3 + $0x120] sm:$0xff]  ;;  %v5807_v14 = vld [vmem:[#allocation3 + $0x128] sm:$0xff] }
 0x703   :  { %4019 = vmatmul.f32.vlgmr.msrb.gmra.mxu1 %v10257_v36  ;;  %4059 = vmatmul.f32.vlgmr.msrb.gmra.mxu3 %v10257_v36  ;;  %v5806_v13 = vld [vmem:[#allocation3 + $0x5e0] sm:$0xff]  ;;  %v5808_v12 = vld [vmem:[#allocation3 + $0x5e8] sm:$0xff] }
 0x704   :  { %4238 = vmatpush.msrb.mxu0 %v5773_v37  ;;  %4255 = vmatpush.msrb.mxu1 %v5774_v10  ;;  %v5809_v37 = vld [vmem:[#allocation3 + $0xe0] sm:$0xff] }
 0x705   :  { %4278 = vmatpush.msrb.mxu2 %v5775_v61  ;;  %4295 = vmatpush.msrb.mxu3 %v5776_v49  ;;  %v5810_v10 = vld [vmem:[#allocation3 + $0x5a0] sm:$0xff]  ;;  %v5811_v61 = vld [vmem:[#allocation3 + $0xe8] sm:$0xff] }
 0x706   :  { %4125 = vmatmul.f32.vlgmr.msra.gmra.mxu0 %v10253_v48  ;;  %4165 = vmatmul.f32.vlgmr.msra.gmra.mxu2 %v10253_v48  ;;  %v5812_v49 = vld [vmem:[#allocation3 + $0x5a8] sm:$0xff] }
 0x707   :  { %4239 = vmatpush.msrb.mxu0 %v5777_v54  ;;  %4256 = vmatpush.msrb.mxu1 %v5778_v51  ;;  %v5813_v54 = vld [vmem:[#allocation3 + $0xa0] sm:$0xff] }
 0x708   :  { %4279 = vmatpush.msrb.mxu2 %v5779_v21  ;;  %4296 = vmatpush.msrb.mxu3 %v5780_v25  ;;  %v5814_v51 = vld [vmem:[#allocation3 + $0x560] sm:$0xff]  ;;  %v5815_v21 = vld [vmem:[#allocation3 + $0xa8] sm:$0xff] }
 0x709   :  { %4240 = vmatpush.msrb.mxu0 %v5781_v41  ;;  %4257 = vmatpush.msrb.mxu1 %v5782_v38  ;;  %v5816_v25 = vld [vmem:[#allocation3 + $0x568] sm:$0xff]  ;;  %v5817_v41 = vld [vmem:[#allocation3 + $0x60] sm:$0xff] }
 0x70a   :  { %4280 = vmatpush.msrb.mxu2 %v5783_v28  ;;  %4297 = vmatpush.msrb.mxu3 %v5784_v33  ;;  %v5818_v38 = vld [vmem:[#allocation3 + $0x520] sm:$0xff]  ;;  %v5819_v28 = vld [vmem:[#allocation3 + $0x68] sm:$0xff] }
 0x70b   :  { %4241 = vmatpush.msrb.mxu0 %v5785_v57  ;;  %4258 = vmatpush.msrb.mxu1 %v5786_v4  ;;  %v5820_v33 = vld [vmem:[#allocation3 + $0x528] sm:$0xff]  ;;  %v5821_v57 = vld [vmem:[#allocation3 + $0x20] sm:$0xff] }
 0x70c   :  { %4281 = vmatpush.msrb.mxu2 %v5787_v59  ;;  %4298 = vmatpush.msrb.mxu3 %v5788_v45  ;;  %v5822_v4 = vld [vmem:[#allocation3 + $0x4e0] sm:$0xff]  ;;  %v5823_v59 = vld [vmem:[#allocation3 + $0x28] sm:$0xff] }
 0x70d   :  { %4145 = vmatmul.f32.vlgmr.msra.gmra.mxu1 %v10257_v36  ;;  %4185 = vmatmul.f32.vlgmr.msra.gmra.mxu3 %v10257_v36  ;;  %v5824_v45 = vld [vmem:[#allocation3 + $0x4e8] sm:$0xff] }
 0x70e   :  { %4242 = vmatpush.msrb.mxu0 %v5789_v30  ;;  %4259 = vmatpush.msrb.mxu1 %v5790_v16  ;;  %v5825_v30 = vld [vmem:[#allocation3 + $0x3f0] sm:$0xff]  ;;  %v5826_v16 = vld [vmem:[#allocation3 + $0x4a0] sm:$0xff] }
 0x70f   :  { %4282 = vmatpush.msrb.mxu2 %v5791_v11  ;;  %4299 = vmatpush.msrb.mxu3 %v5792_v20  ;;  %v5827_v11 = vld [vmem:[#allocation3 + $0x4a8] sm:$0xff]  ;;  %v5828_v20 = vld [vmem:[#allocation3 + $0x3b0] sm:$0xff] }
 0x710   :  { %4243 = vmatpush.msrb.mxu0 %v5793_v27  ;;  %4260 = vmatpush.msrb.mxu1 %v5794_v56  ;;  %v5829_v27 = vld [vmem:[#allocation3 + $0x460] sm:$0xff]  ;;  %v5830_v56 = vld [vmem:[#allocation3 + $0x468] sm:$0xff] }
 0x711   :  { %4283 = vmatpush.msrb.mxu2 %v5795_v46  ;;  %4300 = vmatpush.msrb.mxu3 %v5796_v26  ;;  %v5831_v46 = vld [vmem:[#allocation3 + $0x370] sm:$0xff]  ;;  %v5832_v26 = vld [vmem:[#allocation3 + $0x420] sm:$0xff] }
 0x712   :  { %4244 = vmatpush.msrb.mxu0 %v5797_v34  ;;  %4261 = vmatpush.msrb.mxu1 %v5798_v19  ;;  %v5833_v34 = vld [vmem:[#allocation3 + $0x428] sm:$0xff]  ;;  %v5835_v19 = vld [vmem:[#allocation3 + $0x7f0] sm:$0xff] }
 0x713   :  { %4284 = vmatpush.msrb.mxu2 %v5799_v5  ;;  %4301 = vmatpush.msrb.mxu3 %v5800_v62  ;;  %v5837_v5 = vld [vmem:[#allocation3 + $0x2f0] sm:$0xff] }
 0x714   :  { %4245 = vmatpush.msrb.mxu0 %v5801_v35  ;;  %4262 = vmatpush.msrb.mxu1 %v5802_v2  ;;  %v5838_v62 = vld [vmem:[#allocation3 + $0x7b0] sm:$0xff] }
 0x715   :  { %4285 = vmatpush.msrb.mxu2 %v5803_v18  ;;  %4302 = vmatpush.msrb.mxu3 %v5804_v60  ;;  %v5840_v35 = vld [vmem:[#allocation3 + $0x2b0] sm:$0xff]  ;;  %v5842_v18 = vld [vmem:[#allocation3 + $0x778] sm:$0xff] }
 0x716   :  { %4246 = vmatpush.msrb.mxu0 %v5805_v17  ;;  %4263 = vmatpush.msrb.mxu1 %v5806_v13  ;;  %v5841_v2 = vld [vmem:[#allocation3 + $0x770] sm:$0xff]  ;;  %v5845_v17 = vld [vmem:[#allocation3 + $0x738] sm:$0xff] }
 0x717   :  { %4286 = vmatpush.msrb.mxu2 %v5807_v14  ;;  %4303 = vmatpush.msrb.mxu3 %v5808_v12  ;;  %v5843_v60 = vld [vmem:[#allocation3 + $0x270] sm:$0xff]  ;;  %v5848_v14 = vld [vmem:[#allocation3 + $0x6f8] sm:$0xff] }
 0x718   :  { %4247 = vmatpush.msrb.mxu0 %v5809_v37  ;;  %4264 = vmatpush.msrb.mxu1 %v5810_v10  ;;  %v5846_v13 = vld [vmem:[#allocation3 + $0x230] sm:$0xff]  ;;  %v5851_v37 = vld [vmem:[#allocation3 + $0x6b8] sm:$0xff] }
 0x719   :  { %4287 = vmatpush.msrb.mxu2 %v5811_v61  ;;  %4304 = vmatpush.msrb.mxu3 %v5812_v49  ;;  %v5849_v12 = vld [vmem:[#allocation3 + $0x1f0] sm:$0xff]  ;;  %v5854_v61 = vld [vmem:[#allocation3 + $0x678] sm:$0xff] }
 0x71a   :  { %4248 = vmatpush.msrb.mxu0 %v5813_v54  ;;  %4265 = vmatpush.msrb.mxu1 %v5814_v51  ;;  %v5852_v10 = vld [vmem:[#allocation3 + $0x1b0] sm:$0xff]  ;;  %v5857_v54 = vld [vmem:[#allocation3 + $0x638] sm:$0xff] }
 0x71b   :  { %4288 = vmatpush.msrb.mxu2 %v5815_v21  ;;  %4305 = vmatpush.msrb.mxu3 %v5816_v25  ;;  %v5855_v49 = vld [vmem:[#allocation3 + $0x170] sm:$0xff]  ;;  %v5860_v21 = vld [vmem:[#allocation3 + $0x5f8] sm:$0xff] }
 0x71c   :  { %4249 = vmatpush.msrb.mxu0 %v5817_v41  ;;  %4266 = vmatpush.msrb.mxu1 %v5818_v38  ;;  %v5858_v51 = vld [vmem:[#allocation3 + $0x130] sm:$0xff] }
 0x71d   :  { %4289 = vmatpush.msrb.mxu2 %v5819_v28  ;;  %4306 = vmatpush.msrb.mxu3 %v5820_v33  ;;  %v5861_v25 = vld [vmem:[#allocation3 + $0xf0] sm:$0xff] }
 0x71e   :  { %4250 = vmatpush.msrb.mxu0 %v5821_v57  ;;  %4267 = vmatpush.msrb.mxu1 %v5822_v4  ;;  %v5863_v41 = vld [vmem:[#allocation3 + $0xb0] sm:$0xff] }
 0x71f   :  { %4290 = vmatpush.msrb.mxu2 %v5823_v59  ;;  %4307 = vmatpush.msrb.mxu3 %v5824_v45  ;;  %v5865_v38 = vld [vmem:[#allocation3 + $0x70] sm:$0xff]  ;;  %v3969_v45 = vld [vmem:[#allocation2 + $0x40] sm:$0xc0] }
 0x720   :  { %4251 = vmatmul.f32.vlgmr.msrb.gmra.mxu0 %v10253_v48  ;;  %4291 = vmatmul.f32.vlgmr.msrb.gmra.mxu2 %v10253_v48 }
 0x721   :  { %4337 = vmatpush.msra.mxu0 %v5825_v30  ;;  %4377 = vmatpush.msra.mxu2 %v9982_v7  ;;  %v5834_v7 = vld [vmem:[#allocation3 + $0x330] sm:$0xff] }
 0x722   :  { %4268 = vmatpush.msrb.mxu1 %v5826_v16  ;;  %4308 = vmatpush.msrb.mxu3 %v5827_v11  ;;  %v3971_v16 = vld [vmem:[#allocation2 + $0x10] sm:$0xc0] }
 0x723   :  { %4338 = vmatpush.msra.mxu0 %v5828_v20  ;;  %4378 = vmatpush.msra.mxu2 %v9988_v1  ;;  %v5836_v1 = vld [vmem:[#allocation3 + $0x7f8] sm:$0xff] }
 0x724   :  { %4269 = vmatpush.msrb.mxu1 %v5829_v27  ;;  %4309 = vmatpush.msrb.mxu3 %v5830_v56  ;;  %v3970_v56 = vld [vmem:[#allocation2 + $0x20] sm:$0xc0] }
 0x725   :  { %4339 = vmatpush.msra.mxu0 %v5831_v46  ;;  %4379 = vmatpush.msra.mxu2 %v9994_v53  ;;  %v5839_v53 = vld [vmem:[#allocation3 + $0x7b8] sm:$0xff] }
 0x726   :  { %4270 = vmatpush.msrb.mxu1 %v5832_v26  ;;  %4310 = vmatpush.msrb.mxu3 %v5833_v34  ;;  %v3972_v34 = vld [vmem:[#allocation2 + $0x38] sm:$0xc0] }
 0x727   :  { %4271 = vmatmul.f32.vlgmr.msrb.gmra.mxu1 %v10257_v36  ;;  %4311 = vmatmul.f32.vlgmr.msrb.gmra.mxu3 %v10257_v36 }
 0x728   :  { %4340 = vmatpush.msra.mxu0 %v5834_v7  ;;  %4357 = vmatpush.msra.mxu1 %v5835_v19  ;;  %v4482_v7 = vld [vmem:[%s10494_s4 + $0x78] sm:$0xff] }
 0x729   :  { %4380 = vmatpush.msra.mxu2 %v10003_v24  ;;  %4397 = vmatpush.msra.mxu3 %v5836_v1  ;;  %v5844_v24 = vld [vmem:[#allocation3 + $0x730] sm:$0xff] }
 0x72a   :  { %4341 = vmatpush.msra.mxu0 %v5837_v5  ;;  %4358 = vmatpush.msra.mxu1 %v5838_v62  ;;  %v4481_v1 = vld [vmem:[%s10494_s4 + $0x70] sm:$0xff]  ;;  %v4480_v62 = vld [vmem:[%s10494_s4 + $0x68] sm:$0xff] }
 0x72b   :  { %4381 = vmatpush.msra.mxu2 %v10009_v32  ;;  %4398 = vmatpush.msra.mxu3 %v5839_v53  ;;  %v5847_v32 = vld [vmem:[#allocation3 + $0x6f0] sm:$0xff] }
 0x72c   :  { %4342 = vmatpush.msra.mxu0 %v5840_v35  ;;  %4359 = vmatpush.msra.mxu1 %v5841_v2  ;;  %v4479_v35 = vld [vmem:[%s10494_s4 + $0x60] sm:$0xff]  ;;  %v4498_v2 = vld [vmem:[%s10494_s4 + $0xf8] sm:$0xff] }
 0x72d   :  { %4382 = vmatpush.msra.mxu2 %v10015_v55  ;;  %4399 = vmatpush.msra.mxu3 %v5842_v18  ;;  %v5850_v55 = vld [vmem:[#allocation3 + $0x6b0] sm:$0xff] }
 0x72e   :  { %4343 = vmatpush.msra.mxu0 %v5843_v60  ;;  %4360 = vmatpush.msra.mxu1 %v5844_v24  ;;  %v4478_v60 = vld [vmem:[%s10494_s4 + $0x58] sm:$0xff]  ;;  %v4497_v24 = vld [vmem:[%s10494_s4 + $0xf0] sm:$0xff] }
 0x72f   :  { %4383 = vmatpush.msra.mxu2 %v10021_v23  ;;  %4400 = vmatpush.msra.mxu3 %v5845_v17  ;;  %v5853_v23 = vld [vmem:[#allocation3 + $0x670] sm:$0xff] }
 0x730   :  { %4344 = vmatpush.msra.mxu0 %v5846_v13  ;;  %4361 = vmatpush.msra.mxu1 %v5847_v32  ;;  %v4477_v13 = vld [vmem:[%s10494_s4 + $0x50] sm:$0xff]  ;;  %v4496_v32 = vld [vmem:[%s10494_s4 + $0xe8] sm:$0xff] }
 0x731   :  { %4384 = vmatpush.msra.mxu2 %v10027_v40  ;;  %4401 = vmatpush.msra.mxu3 %v5848_v14  ;;  %v5856_v40 = vld [vmem:[#allocation3 + $0x630] sm:$0xff] }
 0x732   :  { %4345 = vmatpush.msra.mxu0 %v5849_v12  ;;  %4362 = vmatpush.msra.mxu1 %v5850_v55  ;;  %v4476_v55 = vld [vmem:[%s10494_s4 + $0x48] sm:$0xff] }
 0x733   :  { %4385 = vmatpush.msra.mxu2 %v10033_v8  ;;  %4402 = vmatpush.msra.mxu3 %v5851_v37  ;;  %v5859_v8 = vld [vmem:[#allocation3 + $0x5f0] sm:$0xff]  ;;  %v4495_v37 = vld [vmem:[%s10494_s4 + $0xe0] sm:$0xff] }
 0x734   :  { %4346 = vmatpush.msra.mxu0 %v5852_v10  ;;  %4363 = vmatpush.msra.mxu1 %v5853_v23  ;;  %v4475_v23 = vld [vmem:[%s10494_s4 + $0x40] sm:$0xff] }
 0x735   :  { %4386 = vmatpush.msra.mxu2 %v10039_v44  ;;  %4403 = vmatpush.msra.mxu3 %v5854_v61  ;;  %v5862_v44 = vld [vmem:[#allocation3 + $0x5b0] sm:$0xff]  ;;  %v4494_v61 = vld [vmem:[%s10494_s4 + $0xd8] sm:$0xff] }
 0x736   :  { %4347 = vmatpush.msra.mxu0 %v5855_v49  ;;  %4364 = vmatpush.msra.mxu1 %v5856_v40  ;;  %v4474_v40 = vld [vmem:[%s10494_s4 + $0x38] sm:$0xff] }
 0x737   :  { %4387 = vmatpush.msra.mxu2 %v10045_v58  ;;  %4404 = vmatpush.msra.mxu3 %v5857_v54  ;;  %v5864_v58 = vld [vmem:[#allocation3 + $0x570] sm:$0xff] }
 0x738   :  { %4348 = vmatpush.msra.mxu0 %v5858_v51  ;;  %4365 = vmatpush.msra.mxu1 %v5859_v8  ;;  %v4493_v54 = vld [vmem:[%s10494_s4 + $0xd0] sm:$0xff] }
 0x739   :  { %4388 = vmatpush.msra.mxu2 %v10051_v9  ;;  %4405 = vmatpush.msra.mxu3 %v5860_v21  ;;  %v5866_v9 = vld [vmem:[#allocation3 + $0x530] sm:$0xff] }
 0x73a   :  { %4349 = vmatpush.msra.mxu0 %v5861_v25  ;;  %4366 = vmatpush.msra.mxu1 %v5862_v44  ;;  %v4473_v44 = vld [vmem:[%s10494_s4 + $0x30] sm:$0xff] }
 0x73b   :  { %4389 = vmatpush.msra.mxu2 %v10057_v15  ;;  %4406 = vmatpush.msra.mxu3 %v10060_v43  ;;  %v5867_v15 = vld [vmem:[#allocation3 + $0x4f0] sm:$0xff] }
 0x73c   :  { %4350 = vmatpush.msra.mxu0 %v5863_v41  ;;  %4367 = vmatpush.msra.mxu1 %v5864_v58  ;;  %v5868_v43 = vld [vmem:[#allocation3 + $0x4b0] sm:$0xff]  ;;  %v4492_v41 = vld [vmem:[%s10494_s4 + $0xc8] sm:$0xff] }
 0x73d   :  { %4390 = vmatpush.msra.mxu2 %v10065_v22  ;;  %4407 = vmatpush.msra.mxu3 %v10068_v6  ;;  %v5869_v22 = vld [vmem:[#allocation3 + $0x470] sm:$0xff]  ;;  %v4472_v58 = vld [vmem:[%s10494_s4 + $0x28] sm:$0xff] }
 0x73e   :  { %4351 = vmatpush.msra.mxu0 %v5865_v38  ;;  %4368 = vmatpush.msra.mxu1 %v5866_v9  ;;  %v5870_v6 = vld [vmem:[#allocation3 + $0x430] sm:$0xff]  ;;  %v4491_v38 = vld [vmem:[%s10494_s4 + $0xc0] sm:$0xff] }
 0x73f   :  { %4391 = vmatpush.msra.mxu2 %v10073_v39  ;;  %4408 = vmatpush.msra.mxu3 %v10076_v52 }
 0x740   :  { %4352 = vmatpush.msra.mxu0 %v10079_v63  ;;  %4369 = vmatpush.msra.mxu1 %v5867_v15 }
 0x741   :  { %4392 = vmatpush.msra.mxu2 %v10083_v0  ;;  %4409 = vmatpush.msra.mxu3 %v10086_v29 }
 0x742   :  { %4353 = vmatmul.f32.vlgmr.msra.gmra.mxu0 %v10253_v48  ;;  %4393 = vmatmul.f32.vlgmr.msra.gmra.mxu2 %v10253_v48 }
 0x743   :  { %4370 = vmatpush.msra.mxu1 %v5868_v43  ;;  %4410 = vmatpush.msra.mxu3 %v10092_v50  ;;  %v4471_v43 = vld [vmem:[%s10494_s4 + $0x20] sm:$0xff] }
 0x744   :  { %4509 = vmatpush.msrb.mxu0 %v4482_v7 }
 0x745   :  { %4371 = vmatpush.msra.mxu1 %v5869_v22  ;;  %4411 = vmatpush.msra.mxu3 %v10096_v47  ;;  %v4490_v22 = vld [vmem:[%s10494_s4 + $0xb8] sm:$0xff] }
 0x746   :  { %4510 = vmatpush.msrb.mxu0 %v4481_v1 }
 0x747   :  { %4372 = vmatpush.msra.mxu1 %v5870_v6  ;;  %4412 = vmatpush.msra.mxu3 %v10100_v31 }
 0x748   :  { %4373 = vmatmul.f32.vlgmr.msra.gmra.mxu1 %v10257_v36  ;;  %4413 = vmatmul.f32.vlgmr.msra.gmra.mxu3 %v10257_v36 }
 0x749   :  { %4511 = vmatpush.msrb.mxu0 %v4480_v62  ;;  %4529 = vmatpush.msrb.mxu1 %v4498_v2  ;;  %v4485_v2 = vld [vmem:[%s10494_s4 + $0x90] sm:$0xff] }
 0x74b   :  { %4512 = vmatpush.msrb.mxu0 %v4479_v35  ;;  %4530 = vmatpush.msrb.mxu1 %v4497_v24 }
 0x74d   :  { %4513 = vmatpush.msrb.mxu0 %v4478_v60  ;;  %4531 = vmatpush.msrb.mxu1 %v4496_v32  ;;  %v4483_v32 = vld [vmem:[%s10494_s4 + $0x80] sm:$0xff] }
 0x74f   :  { %4514 = vmatpush.msrb.mxu0 %v4477_v13  ;;  %4532 = vmatpush.msrb.mxu1 %v4495_v37 }
 0x751   :  { %4515 = vmatpush.msrb.mxu0 %v4476_v55  ;;  %4533 = vmatpush.msrb.mxu1 %v4494_v61 }
 0x753   :  { %4516 = vmatpush.msrb.mxu0 %v4475_v23  ;;  %4534 = vmatpush.msrb.mxu1 %v4493_v54  ;;  %v3976_v23 = vld [vmem:[#allocation2 + $0x28] sm:$0xc0] }
 0x755   :  { %4517 = vmatpush.msrb.mxu0 %v4474_v40  ;;  %4535 = vmatpush.msrb.mxu1 %v4492_v41 }
 0x757   :  { %4518 = vmatpush.msrb.mxu0 %v4473_v44  ;;  %4536 = vmatpush.msrb.mxu1 %v4491_v38 }
 0x759   :  { %4519 = vmatpush.msrb.mxu0 %v4472_v58  ;;  %4537 = vmatpush.msrb.mxu1 %v4490_v22 }
 0x75b   :  { %4520 = vmatpush.msrb.mxu0 %v4471_v43 }
 0x77a   :  { %v4000_v52 = vpop.f32.mrf.mxu0 }
 0x780   :  { %v4020_v39 = vpop.f32.mrf.mxu1  ;;  %v4040_v0 = vpop.f32.mrf.mxu2 }
 0x781   :  { %v4021_v48 = vadd.f32 %v4020_v39, %v4000_v52 }
 0x783   :  { %v4126_v28 = vpop.f32.mrf.mxu0  ;;  %v4065_v33 = vrot.slane %v4021_v48, 2 }
 0x785   :  { %v4069_v31 = vadd.f32 %v4065_v33, %v3969_v45 }
 0x786   :  { %v4060_v63 = vpop.f32.mrf.mxu3 }
 0x787   :  { %v4061_v47 = vadd.f32 %v4060_v63, %v4040_v0  ;;  %v4650_v27 = vmul.f32 -1.442695, %v4069_v31  ;;  %v4470_v63 = vld [vmem:[%s10494_s4 + $0x18] sm:$0xff]  ;;  %v4489_v0 = vld [vmem:[%s10494_s4 + $0xb0] sm:$0xff]  ;;  %v4468_v31 = vld [vmem:[%s10494_s4 + $0x8] sm:$0xff] }
 0x788   :  { %4521 = vmatpush.msrb.mxu0 %v4470_v63  ;;  %4538 = vmatpush.msrb.mxu1 %v4489_v0 }
 0x789   :  { %v4166_v59 = vpop.f32.mrf.mxu2  ;;  %v4066_v20 = vrot.slane %v4061_v47, 2  ;;  %4886 = vpow2.f32 %v4650_v27  ;;  %v3975_v27 = vld [vmem:[#allocation2 + $0x78] sm:$0xc0] }
 0x78a   :  { %v4146_v29 = vpop.f32.mrf.mxu1 }
 0x78b   :  { %v4147_v50 = vadd.f32 %v4146_v29, %v4126_v28  ;;  %v4070_v26 = vadd.f32 %v4066_v20, %v3970_v56  ;;  %v4486_v56 = vld [vmem:[%s10494_s4 + $0x98] sm:$0xff] }
 0x78d   :  { %v4191_v4 = vrot.slane %v4147_v50, 2  ;;  %v4651_v5 = vmul.f32 -1.442695, %v4070_v26 }
 0x78f   :  { %v4195_v11 = vadd.f32 %v4191_v4, %v3971_v16  ;;  %v4887_v18 = vpop.eup %4886  ;;  %v4488_v4 = vld [vmem:[%s10494_s4 + $0xa8] sm:$0xff]  ;;  %v4487_v16 = vld [vmem:[%s10494_s4 + $0xa0] sm:$0xff] }
 0x790   :  { %v4186_v57 = vpop.f32.mrf.mxu3  ;;  %v10324_v14 = vadd.f32 1.0, %v4887_v18  ;;  %4539 = vmatpush.msrb.mxu1 %v4488_v4  ;;  %v4484_v18 = vld [vmem:[%s10494_s4 + $0x88] sm:$0xff] }
 0x791   :  { %v4187_v30 = vadd.f32 %v4186_v57, %v4166_v59  ;;  %v4652_v46 = vmul.f32 -1.442695, %v4195_v11  ;;  %v4469_v57 = vld [vmem:[%s10494_s4 + $0x10] sm:$0xff]  ;;  %v4467_v11 = vld [vmem:[%s10494_s4] sm:$0xff] }
 0x792   :  { %4522 = vmatpush.msrb.mxu0 %v4469_v57  ;;  %4540 = vmatpush.msrb.mxu1 %v4487_v16  ;;  %v4090_v61 = vand.u32 2147483648, %v10324_v14  ;;  %vm4084_vm11 = vweird.f32 %v10324_v14 }
 0x793   :  { %v4192_v36 = vrot.slane %v4187_v30, 2  ;;  %4888 = vpow2.f32 %v4652_v46 }
 0x794   :  { %4890 = vpow2.f32 %v4651_v5  ;;  %4523 = vmatpush.msrb.mxu0 %v4468_v31  ;;  %4541 = vmatpush.msrb.mxu1 %v4486_v56 }
 0x795   :  { %v4196_v19 = vadd.f32 %v4192_v36, %v3972_v34 }
 0x796   :  { %4524 = vmatpush.msrb.mxu0 %v4467_v11  ;;  %4542 = vmatpush.msrb.mxu1 %v4485_v2 }
 0x797   :  { %v4653_v53 = vmul.f32 -1.442695, %v4196_v19  ;;  %v3973_v19 = vld [vmem:[#allocation2 + $0x60] sm:$0xc0] }
 0x798   :  { %4543 = vmatpush.msrb.mxu1 %v4484_v18 }
 0x799   :  { %v4889_v17 = vpop.eup %4888  ;;  %4892 = vpow2.f32 %v4653_v53 }
 0x79a   :  { %v10326_v12 = vadd.f32 1.0, %v4889_v17  ;;  %v4891_v10 = vpop.eup %4890  ;;  %4894 = vrcp.f32 %v10324_v14  ;;  %4544 = vmatpush.msrb.mxu1 %v4483_v32 }
 0x79b   :  { %v10348_v51 = vadd.f32 1.0, %v4891_v10  ;;  %v4088_v10 = vand.u32 2147483647, %v10324_v14 }
 0x79c   :  { %4896 = vrcp.f32 %v10326_v12  ;;  %v4214_v44 = vand.u32 2147483647, %v10326_v12  ;;  %vm4210_vm12 = vweird.f32 %v10326_v12 }
 0x79d   :  { %v4252_v8 = vpop.f32.mrf.mxu0  ;;  %4898 = vrcp.f32 %v10348_v51  ;;  %vm10448_vm15 = vcmp.eq.f32.partialorder %v4088_v10, 8.507059e+37  ;;  %vm4099_vm0 = vweird.f32 %v10348_v51  ;;  %v4105_v57 = vand.u32 2147483648, %v10348_v51 }
 0x79e   :  { %vm4215_vm1 = vcmp.eq.f32.partialorder %v4214_v44, 8.507059e+37 }
 0x79f   :  { %v4893_v49 = vpop.eup %4892 }
 0x7a0   :  { %v10350_v25 = vadd.f32 1.0, %v4893_v49  ;;  %v10364_v9 = vpop.eup %4894 }
 0x7a1   :  { %v4080_v29 = vmul.f32 %v10364_v9, %v10324_v14  ;;  %vm4085_vm9 = vweird.f32 %v10364_v9 }
 0x7a2   :  { %v10367_v15 = vpop.eup %4896  ;;  %4900 = vrcp.f32 %v10350_v25  ;;  %vm10436_vm13 = vmor %vm4084_vm11, %vm4085_vm9  ;;  %vm4225_vm4 = vweird.f32 %v10350_v25  ;;  %v4229_v31 = vand.u32 2147483647, %v10350_v25 }
 0x7a3   :  { %v4292_v6 = vpop.f32.mrf.mxu2  ;;  %v4206_v48 = vmul.f32 %v10367_v15, %v10326_v12  ;;  %v10392_v47 = vpop.eup %4898  ;;  %v4081_v20 = vsub.f32 1.0, %v4080_v29  ;;  %vm4211_vm10 = vweird.f32 %v10367_v15 }
 0x7a4   :  { %v4272_v21 = vpop.f32.mrf.mxu1  ;;  %v4095_v34 = vmul.f32 %v10392_v47, %v10348_v51  ;;  %vm10444_vm14 = vmor %vm4210_vm12, %vm4211_vm10  ;;  %vm4100_vm2 = vweird.f32 %v10392_v47  ;;  %vm4230_vm8 = vcmp.eq.f32.partialorder %v4229_v31, 8.507059e+37 }
 0x7a5   :  { %v4273_v52 = vadd.f32 %v4272_v21, %v4252_v8  ;;  %v4207_v36 = vsub.f32 1.0, %v4206_v48  ;;  %v4082_v24 = vmul.f32 %v10364_v9, %v4081_v20  ;;  %v3974_v8 = vld [vmem:[#allocation2 + $0x70] sm:$0xc0]  ;;  %v4216_v21 = vand.u32 2147483648, %v10326_v12  ;;  %vm10470_vm5 = vmor %vm4099_vm0, %vm4100_vm2 }
 0x7a6   :  { %v4096_v55 = vsub.f32 1.0, %v4095_v34 }
 0x7a7   :  { %v4317_v45 = vrot.slane %v4273_v52, 2  ;;  %v4208_v60 = vmul.f32 %v10367_v15, %v4207_v36  ;;  %v4083_v40 = vadd.f32 %v10364_v9, %v4082_v24  ;;  %v4091_v52 = vor.u32 1.1754944e-38, %v4090_v61 }
 0x7a8   :  { %v10394_v59 = vpop.eup %4900  ;;  %v4097_v14 = vmul.f32 %v10392_v47, %v4096_v55  ;;  %v4217_v48 = vor.u32 1.1754944e-38, %v4216_v21 }
 0x7a9   :  { %v4221_v7 = vmul.f32 %v10394_v59, %v10350_v25  ;;  %v4321_v62 = vadd.f32 %v4317_v45, %v3973_v19  ;;  %v4209_v54 = vadd.f32 %v10367_v15, %v4208_v60  ;;  %v4087_v63 = vsel %vm10436_vm13, %v10364_v9, %v4083_v40 }
 0x7aa   :  { %v4312_v39 = vpop.f32.mrf.mxu3  ;;  %vm4226_vm3 = vweird.f32 %v10394_v59  ;;  %v4231_v9 = vand.u32 2147483648, %v10350_v25 }
 0x7ab   :  { %v4313_v46 = vadd.f32 %v4312_v39, %v4292_v6  ;;  %v4222_v37 = vsub.f32 1.0, %v4221_v7  ;;  %v4327_v6 = vrot.slane %v10246_v3, 6  ;;  %v4213_v3 = vsel %vm10444_vm14, %v10367_v15, %v4209_v54  ;;  %vm4227_vm6 = vmor %vm4225_vm4, %vm4226_vm3 }
 0x7ac   :  { %v4092_v15 = vsel %vm10448_vm15, %v4091_v52, %v4087_v63 }
 0x7ad   :  { %v4318_v17 = vrot.slane %v4313_v46, 2  ;;  %v4223_v38 = vmul.f32 %v10394_v59, %v4222_v37  ;;  %v4232_v46 = vor.u32 1.1754944e-38, %v4231_v9 }
 0x7af   :  { %v4322_v41 = vadd.f32 %v4318_v17, %v3974_v8 }
 0x7bf   :  { %v4354_v28 = vpop.f32.mrf.mxu0 }
 0x7c5   :  { %v4374_v50 = vpop.f32.mrf.mxu1  ;;  %v4394_v1 = vpop.f32.mrf.mxu2 }
 0x7c6   :  { %v4375_v33 = vadd.f32 %v4374_v50, %v4354_v28  ;;  %v4098_v28 = vadd.f32 %v10392_v47, %v4097_v14  ;;  %v4224_v50 = vadd.f32 %v10394_v59, %v4223_v38  ;;  %v4661_v38 = vld [vmem:[%s10495_s5] ss:$0 sm:$0xff]  ;;  %s5927_s5 = smov [#allocation6]  }
 0x7c7   :  { %s4580_s29 = sshll.u32 %s5927_s5, 4  ;;  %s4581_s29 = int_to_ptr.vmem [resolvable:$true] %s4580_s29 }
 0x7c8   :  { %v4419_v30 = vrot.slane %v4375_v33, 2  ;;  %v4218_v33 = vsel %vm4215_vm1, %v4217_v48, %v4213_v3  ;;  %v4102_v20 = vsel %vm10470_vm5, %v10392_v47, %v4098_v28  ;;  %v4228_v36 = vsel %vm4227_vm6, %v10394_v59, %v4224_v50 }
 0x7c9   :  { %v4331_v11 = vmul.f32 %v4327_v6, %v4218_v33  ;;  %v4233_v25 = vsel %vm4230_vm8, %v4232_v46, %v4228_v36  ;;  %vm4549_vm1 = vcmask 17408  }
 0x7ca   :  { %v4423_v26 = vadd.f32 %v4419_v30, %v3975_v27  ;;  %v4103_v30 = vand.u32 2147483647, %v10348_v51 }
 0x7cb   :  { %v4414_v5 = vpop.f32.mrf.mxu3 }
 0x7cc   :  { %v4654_v53 = vmul.f32 -1.442695, %v4423_v26  ;;  %v4415_v35 = vadd.f32 %v4414_v5, %v4394_v1  ;;  %v4106_v26 = vor.u32 1.1754944e-38, %v4105_v57  ;;  %vm4104_vm7 = vcmp.eq.f32.partialorder %v4103_v30, 8.507059e+37 }
 0x7cd   :  { %v4328_v1 = vrot.slane %v10250_v42, 6 }
 0x7ce   :  { %4902 = vpow2.f32 %v4654_v53  ;;  %v4420_v13 = vrot.slane %v4415_v35, 2  ;;  %v4107_v51 = vsel %vm4104_vm7, %v4106_v26, %v4102_v20 }
 0x7cf   :  { %4904 = vtanh.f32 %v4321_v62  ;;  %v4332_v47 = vmul.f32 %v4328_v1, %v4233_v25 }
 0x7d0   :  { %v4424_v49 = vadd.f32 %v4420_v13, %v3976_v23 }
 0x7d2   :  { %v4655_v58 = vmul.f32 -1.442695, %v4424_v49 }
 0x7d4   :  { %v4903_v22 = vpop.eup %4902  ;;  %4906 = vpow2.f32 %v4655_v58 }
 0x7d5   :  { %v4431_v0 = vadd.f32 1.0, %v4903_v22  ;;  %v4905_v29 = vpop.eup %4904  ;;  %4908 = vtanh.f32 %v4322_v41 }
 0x7d6   :  { %v4333_v4 = vmul.f32 %v4905_v29, %v4092_v15 }
 0x7d7   :  { %4910 = vrcp.f32 %v4431_v0  ;;  %v4444_v53 = vand.u32 2147483648, %v4431_v0  ;;  %v4442_v35 = vand.u32 2147483647, %v4431_v0  ;;  %vm4438_vm10 = vweird.f32 %v4431_v0 }
 0x7d8   :  { %v4335_v7 = vadd.f32 %v4333_v4, %v4331_v11 }
 0x7d9   :  { %v4445_v17 = vor.u32 1.1754944e-38, %v4444_v53  ;;  %vm4443_vm12 = vcmp.eq.f32.partialorder %v4442_v35, 8.507059e+37 }
 0x7da   :  { %v4907_v16 = vpop.eup %4906 }
 0x7db   :  { %v4432_v27 = vadd.f32 1.0, %v4907_v16  ;;  %v4909_v56 = vpop.eup %4908 }
 0x7dc   :  { %v4334_v5 = vmul.f32 %v4909_v56, %v4107_v51 }
 0x7dd   :  { %v4911_v34 = vpop.eup %4910  ;;  %4912 = vrcp.f32 %v4432_v27  ;;  %v4459_v42 = vand.u32 2147483648, %v4432_v27  ;;  %v4457_v61 = vand.u32 2147483647, %v4432_v27  ;;  %vm4453_vm14 = vweird.f32 %v4432_v27 }
 0x7de   :  { %v4434_v19 = vmul.f32 %v4911_v34, %v4431_v0  ;;  %4914 = vtanh.f32 %v4335_v7  ;;  %vm4439_vm9 = vweird.f32 %v4911_v34  ;;  %v4336_v18 = vadd.f32 %v4334_v5, %v4332_v47 }
 0x7df   :  { %vm4440_vm11 = vmor %vm4438_vm10, %vm4439_vm9  ;;  %v4460_v54 = vor.u32 1.1754944e-38, %v4459_v42  ;;  %vm4458_vm0 = vcmp.eq.f32.partialorder %v4457_v61, 8.507059e+37 }
 0x7e0   :  { %v4435_v62 = vsub.f32 1.0, %v4434_v19  ;;  %4916 = vtanh.f32 %v4336_v18 }
 0x7e2   :  { %v4436_v59 = vmul.f32 %v4911_v34, %v4435_v62 }
 0x7e3   :  { %v4913_v2 = vpop.eup %4912 }
 0x7e4   :  { %v4449_v60 = vmul.f32 %v4913_v2, %v4432_v27  ;;  %v4437_v24 = vadd.f32 %v4911_v34, %v4436_v59  ;;  %v4915_v55 = vpop.eup %4914  ;;  %vm4454_vm13 = vweird.f32 %v4913_v2 }
 0x7e5   :  { %vm4455_vm15 = vmor %vm4453_vm14, %vm4454_vm13 }
 0x7e6   :  { %v4450_v13 = vsub.f32 1.0, %v4449_v60  ;;  %v4441_v32 = vsel %vm4440_vm11, %v4911_v34, %v4437_v24  ;;  %v4917_v21 = vpop.eup %4916 }
 0x7e7   :  { %v4446_v37 = vsel %vm4443_vm12, %v4445_v17, %v4441_v32 }
 0x7e8   :  { %v4451_v10 = vmul.f32 %v4913_v2, %v4450_v13  ;;  %v4465_v23 = vmul.f32 %v4915_v55, %v4446_v37 }
 0x7ea   :  { %v4505_v49 = vrot.slane %v4465_v23, 6  ;;  %v4452_v40 = vadd.f32 %v4913_v2, %v4451_v10 }
 0x7ec   :  { %4525 = vmatmul.f32.vlgmr.msrb.gmra.mxu0 %v4505_v49  ;;  %v4456_v8 = vsel %vm4455_vm15, %v4913_v2, %v4452_v40 }
 0x7ed   :  { %v4461_v44 = vsel %vm4458_vm0, %v4460_v54, %v4456_v8 }
 0x7ee   :  { %v4466_v41 = vmul.f32 %v4917_v21, %v4461_v44 }
 0x7f0   :  { %v4506_v58 = vrot.slane %v4466_v41, 6 }
 0x7f2   :  { %4545 = vmatmul.f32.vlgmr.msrb.gmra.mxu1 %v4506_v58 }
 0x869   :  { %v4526_v43 = vpop.f32.mrf.mxu0 }
 0x86a   :  { %v4527_v14 = vadd.f32 %v4661_v38, %v4526_v43 }
 0x86f   :  { %v4546_v22 = vpop.f32.mrf.mxu1 }
 0x870   :  { %v4547_v6 = vadd.f32 %v4546_v22, %v4527_v14 }
 0x872   :  { %v4550_v39 = vsel %vm4549_vm1, %v4547_v6, -inf }
 0x873   :  { %4551 = vmax.xlane.f32.xlu0 %v4550_v39 }
 0x8e6   :  { %v4552_v12 = vpop.xlane.xlu0 %4551 }
 0x8e7   :  { %v4553_v52 = vsub.f32 %v4547_v6, %v4552_v12 }
 0x8e9   :  { %v4554_v63 = vmul.f32 1.442695, %v4553_v52 }
 0x8eb   :  { %4918 = vpow2.f32 %v4554_v63 }
 0x8f1   :  { %v4919_v3 = vpop.eup %4918 }
 0x8f2   :  { %v4556_v0 = vsel %vm4549_vm1, %v4919_v3, 0.0 }
 0x8f3   :  { %4557 = vadd.xlane.f32.xlu0 %v4556_v0 }
 0x966   :  { %v4558_v29 = vpop.xlane.xlu0 %4557 }
 0x967   :  { %4920 = vrcp.f32 %v4558_v29  ;;  %v4570_v9 = vand.u32 2147483648, %v4558_v29  ;;  %v4568_v33 = vand.u32 2147483647, %v4558_v29  ;;  %vm4564_vm3 = vweird.f32 %v4558_v29 }
 0x969   :  { %v4571_v4 = vor.u32 1.1754944e-38, %v4570_v9  ;;  %vm4569_vm5 = vcmp.eq.f32.partialorder %v4568_v33, 8.507059e+37 }
 0x96d   :  { %v4921_v48 = vpop.eup %4920 }
 0x96e   :  { %v4560_v28 = vmul.f32 %v4921_v48, %v4558_v29  ;;  %vm4565_vm2 = vweird.f32 %v4921_v48 }
 0x96f   :  { %vm4566_vm4 = vmor %vm4564_vm3, %vm4565_vm2 }
 0x970   :  { %v4561_v50 = vsub.f32 1.0, %v4560_v28 }
 0x972   :  { %v4562_v15 = vmul.f32 %v4921_v48, %v4561_v50 }
 0x974   :  { %v4563_v57 = vadd.f32 %v4921_v48, %v4562_v15 }
 0x976   :  { %v4567_v45 = vsel %vm4566_vm4, %v4921_v48, %v4563_v57 }
 0x977   :  { %v4572_v30 = vsel %vm4569_vm5, %v4571_v4, %v4567_v45 }
 0x978   :  { %v4573_v31 = vmul.f32 %v4919_v3, %v4572_v30 }
 0x97a   :  { %4574 = vst.msk [vmem:[#allocation6] sm:$0x3] %vm4549_vm1, %v4573_v31 }
 0x97b   :  { %4585 = dma.vmem_to_hbm [thread:$0]  %s4581_s29, 32, %s4583_s7, [#allocation5]  }
 0x97c   :  { %5921 = dma.done.wait [#allocation5], 32  }
 0x97d   :  { %5922 = vsyncadd [#allocation5], 4294967264 }
 0x97e   :  { %4590 = vsyncpa [#allocation4], 1 }
 0x97f   :  { %4591 = vsyncpa [#allocation5], 1 }

</bundles_post_ra>
